<compile_context>
chip_gen: v7x
topology: tpu7x:2x2x1
jax: 0.10.0
libtpu: 0.0.40
codegen_flags: <defaults>
</compile_context>

<pallas_src>
import functools

import numpy as np
import jax
import jax.numpy as jnp
from jax.experimental import pallas as pl
from jax.experimental.pallas import tpu as pltpu


GENOME = dict(
    filters=[8, 16], kernels=[3, 3], norms=["none"], activations=["relu"],
    dropouts=["none"], adaptive_size=(4, 4), adaptive_type="avg",
    lstm_in=32, lstm_hidden=32, lstm_out=8,
)
NC = 3


# ----------------------------------------------------------------------------
# Fused Pallas kernel: conv stack + pool + transfer + LSTM + output Linear
# ----------------------------------------------------------------------------
def _fused_kernel(xT_ref, w1_ref, b1_ref, w2_ref, b2_ref, pool_ref, wtpT_ref,
                  tb_ref, wih_ref, whh_ref, lb_ref, ow_ref, ob_ref,
                  pred_ref, *,
                  n_img, wimg, c_in, f1, f2, k1, k2, r1, r2, p_pool, lin, hid):
    f32 = jnp.float32

    # ---- conv1 + ReLU -------------------------------------------------------
    # activations are (channels, N*H*W): spatial on lanes (lane-dense).
    x_full = xT_ref[...]                                   # (c_in, N*H*W)
    acc1 = jnp.zeros((f1, r1), f32)
    for kh in range(k1):
        for kw in range(k1):
            off = kh * wimg + kw
            acc1 = acc1 + jnp.dot(w1_ref[kh * k1 + kw],     # (f1, c_in)
                                  x_full[:, off:off + r1],  # (c_in, r1)
                                  preferred_element_type=f32)
    y1 = jnp.maximum(acc1 + b1_ref[...], 0.0)               # (f1, r1)

    # ---- conv2 + ReLU -------------------------------------------------------
    acc2 = jnp.zeros((f2, r2), f32)
    for kh in range(k2):
        for kw in range(k2):
            off = kh * wimg + kw
            acc2 = acc2 + jnp.dot(w2_ref[kh * k2 + kw],     # (f2, f1)
                                  y1[:, off:off + r2],      # (f1, r2)
                                  preferred_element_type=f32)
    y2 = jnp.maximum(acc2 + b2_ref[...], 0.0)               # (f2, r2)

    # ---- AdaptiveAvgPool2d folded into a single matmul ---------------------
    # pool_ref selects/averages the valid 3x3 blocks; garbage margin rows of
    # y2 are multiplied by zero.  pooled[c, p*N + n] = avg over block p, img n.
    pooled = jnp.dot(y2, pool_ref[...], preferred_element_type=f32)  # (f2, P*N)

    # ---- transfer Linear (computed transposed: tT[j, n]) -------------------
    tT = jnp.zeros((lin, n_img), f32)
    for p in range(p_pool):
        tT = tT + jnp.dot(wtpT_ref[p * lin:(p + 1) * lin, :],      # (lin, f2)
                          pooled[:, p * n_img:(p + 1) * n_img],    # (f2, N)
                          preferred_element_type=f32)
    tT = tT + tb_ref[...]                                   # (lin, N)

    # ---- LSTM over batch-as-sequence; input projection hoisted -------------
    gxT = jnp.dot(wih_ref[...], tT, preferred_element_type=f32) + lb_ref[...]
    # gxT: (4H, S)   PyTorch gate order along rows: i, f, g, o

    h = jnp.zeros((hid, 1), f32)
    c = jnp.zeros((hid, 1), f32)
    for s in range(n_img):                                  # S = batch = 8, unrolled
        gates = gxT[:, s:s + 1] + jnp.dot(whh_ref[...], h,
                                          preferred_element_type=f32)
        i_g = jax.nn.sigmoid(gates[0 * hid:1 * hid, :])
        f_g = jax.nn.sigmoid(gates[1 * hid:2 * hid, :])
        g_g = jnp.tanh(gates[2 * hid:3 * hid, :])
        o_g = jax.nn.sigmoid(gates[3 * hid:4 * hid, :])
        c = f_g * c + i_g * g_g
        h = o_g * jnp.tanh(c)

    # ---- final Linear on last hidden state (module returns predictions[-1])
    pred_ref[...] = jnp.dot(ow_ref[...], h,
                            preferred_element_type=f32) + ob_ref[...]


# ----------------------------------------------------------------------------
# Forward pass wrapper (host-side constant prep + single pallas_call)
# ----------------------------------------------------------------------------
def genetic_convlstm_forward(params, x):
    N, C, Himg, Wimg = x.shape
    f1, f2 = GENOME["filters"]
    k1, k2 = GENOME["kernels"]
    ph_out, pw_out = GENOME["adaptive_size"]
    P = ph_out * pw_out
    LIN, HID, OUT = GENOME["lstm_in"], GENOME["lstm_hidden"], GENOME["lstm_out"]

    Ho2 = Himg - k1 - k2 + 2
    Wo2 = Wimg - k1 - k2 + 2
    HW = Himg * Wimg
    R0 = N * HW
    R1 = R0 - ((k1 - 1) * Wimg + (k1 - 1))       # conv1 offset-trick rows
    R2 = R1 - ((k2 - 1) * Wimg + (k2 - 1))       # conv2 offset-trick rows

    # AdaptiveAvgPool2d matches this matmul formulation for evenly divisible
    # output sizes (here 12x12 -> 4x4).
    assert Ho2 % ph_out == 0 and Wo2 % pw_out == 0
    bh, bw = Ho2 // ph_out, Wo2 // pw_out

    # pooling/selection matrix (built on host, becomes a compile-time constant)
    pool_np = np.zeros((R2, P * N), np.float32)
    inv = 1.0 / (bh * bw)
    for n in range(N):
        for ph in range(ph_out):
            for pw in range(pw_out):
                p = ph * pw_out + pw
                for dh in range(bh):
                    for dw in range(bw):
                        r = n * HW + (ph * bh + dh) * Wimg + (pw * bw + dw)
                        pool_np[r, p * N + n] = inv
    pool_mat = jnp.asarray(pool_np)

    # ---- weight reorganisation (tiny, host/XLA side) ------------------------
    # input as (C, N*H*W): spatial on lanes
    xT = x.transpose(1, 0, 2, 3).reshape(C, R0)
    # per-tap conv weights: [kh*K+kw, out_ch, in_ch]
    w1_taps = params["conv1_w"].transpose(2, 3, 0, 1).reshape(k1 * k1, f1, C)
    w2_taps = params["conv2_w"].transpose(2, 3, 0, 1).reshape(k2 * k2, f2, f1)
    b1_col = params["conv1_b"].reshape(f1, 1)
    b2_col = params["conv2_b"].reshape(f2, 1)

    # pad the tiny input-channel contraction dim up to 8 (zero rows/cols)
    C_pad = max(C, 8)
    if C_pad != C:
        xT = jnp.pad(xT, ((0, C_pad - C), (0, 0)))
        w1_taps = jnp.pad(w1_taps, ((0, 0), (0, 0), (0, C_pad - C)))

    # transfer weight permuted to [p*LIN + j, c]  (PyTorch in-index = c*P + p)
    wtpT = (params["transfer_w"].reshape(LIN, f2, P)
            .transpose(2, 0, 1).reshape(P * LIN, f2))
    tb_col = params["transfer_b"].reshape(LIN, 1)

    wih = params["w_ih"]                              # (4H, LIN), PyTorch layout
    whh = params["w_hh"]                              # (4H, H)
    lb_col = (params["b_ih"] + params["b_hh"]).reshape(4 * HID, 1)
    ow = params["out_w"]                              # (OUT, H), PyTorch layout
    ob_col = params["out_b"].reshape(OUT, 1)

    kern = functools.partial(
        _fused_kernel,
        n_img=N, wimg=Wimg, c_in=C_pad, f1=f1, f2=f2, k1=k1, k2=k2,
        r1=R1, r2=R2, p_pool=P, lin=LIN, hid=HID)

    pred = pl.pallas_call(
        kern,
        out_shape=jax.ShapeDtypeStruct((OUT, 1), jnp.float32),
        grid=(1,),
        in_specs=[
            pl.BlockSpec((C_pad, R0), lambda i: (0, 0)),
            pl.BlockSpec((k1 * k1, f1, C_pad), lambda i: (0, 0, 0)),
            pl.BlockSpec((f1, 1), lambda i: (0, 0)),
            pl.BlockSpec((k2 * k2, f2, f1), lambda i: (0, 0, 0)),
            pl.BlockSpec((f2, 1), lambda i: (0, 0)),
            pl.BlockSpec((R2, P * N), lambda i: (0, 0)),
            pl.BlockSpec((P * LIN, f2), lambda i: (0, 0)),
            pl.BlockSpec((LIN, 1), lambda i: (0, 0)),
            pl.BlockSpec((4 * HID, LIN), lambda i: (0, 0)),
            pl.BlockSpec((4 * HID, HID), lambda i: (0, 0)),
            pl.BlockSpec((4 * HID, 1), lambda i: (0, 0)),
            pl.BlockSpec((OUT, HID), lambda i: (0, 0)),
            pl.BlockSpec((OUT, 1), lambda i: (0, 0)),
        ],
        out_specs=pl.BlockSpec((OUT, 1), lambda i: (0, 0)),
        compiler_params=pltpu.CompilerParams(dimension_semantics=("arbitrary",)),
    )(xT, w1_taps, b1_col, w2_taps, b2_col, pool_mat, wtpT, tb_col,
      wih, whh, lb_col, ow, ob_col)

    return pred[:, 0]                                  # == predictions[-1]


# ----------------------------------------------------------------------------
# Pure-JAX reference (no Pallas) for a loose numerical sanity check
# ----------------------------------------------------------------------------
def _reference_forward(params, x):
    ph_out, pw_out = GENOME["adaptive_size"]
    LIN, HID = GENOME["lstm_in"], GENOME["lstm_hidden"]

    y = jax.lax.conv_general_dilated(x, params["conv1_w"], (1, 1), "VALID",
                                     dimension_numbers=("NCHW", "OIHW", "NCHW"))
    y = jnp.maximum(y + params["conv1_b"][None, :, None, None], 0.0)
    y = jax.lax.conv_general_dilated(y, params["conv2_w"], (1, 1), "VALID",
                                     dimension_numbers=("NCHW", "OIHW", "NCHW"))
    y = jnp.maximum(y + params["conv2_b"][None, :, None, None], 0.0)

    N, C2, H2, W2 = y.shape
    bh, bw = H2 // ph_out, W2 // pw_out
    pooled = y.reshape(N, C2, ph_out, bh, pw_out, bw).mean(axis=(3, 5))
    conv_map = pooled.reshape(N, -1)
    t = conv_map @ params["transfer_w"].T + params["transfer_b"]

    def step(carry, xt):
        h, c = carry
        gates = (params["w_ih"] @ xt + params["b_ih"]
                 + params["w_hh"] @ h + params["b_hh"])
        i, f, g, o = jnp.split(gates, 4)
        i, f, o = jax.nn.sigmoid(i), jax.nn.sigmoid(f), jax.nn.sigmoid(o)
        g = jnp.tanh(g)
        c = f * c + i * g
        h = o * jnp.tanh(c)
        return (h, c), h

    (_, _), hs = jax.lax.scan(step, (jnp.zeros(HID), jnp.zeros(HID)), t)
    preds = hs @ params["out_w"].T + params["out_b"]
    return preds[-1]


# ----------------------------------------------------------------------------
# Params (PyTorch layouts) + entry point
# ----------------------------------------------------------------------------
def init_params(key):
    f1, f2 = GENOME["filters"]
    k1, k2 = GENOME["kernels"]
    ph, pw = GENOME["adaptive_size"]
    LIN, HID, OUT = GENOME["lstm_in"], GENOME["lstm_hidden"], GENOME["lstm_out"]
    transfer_features = f2 * ph * pw

    ks = jax.random.split(key, 12)
    g = lambda k, shape, s=0.1: s * jax.random.normal(k, shape, jnp.float32)

    return dict(
        conv1_w=g(ks[0], (f1, NC, k1, k1)),
        conv1_b=g(ks[1], (f1,)),
        conv2_w=g(ks[2], (f2, f1, k2, k2)),
        conv2_b=g(ks[3], (f2,)),
        transfer_w=g(ks[4], (LIN, transfer_features)),   # nn.Linear (out, in)
        transfer_b=g(ks[5], (LIN,)),
        w_ih=g(ks[6], (4 * HID, LIN)),
        w_hh=g(ks[7], (4 * HID, HID)),
        b_ih=g(ks[8], (4 * HID,)),
        b_hh=g(ks[9], (4 * HID,)),
        out_w=g(ks[10], (OUT, HID)),                     # nn.Linear (out, in)
        out_b=g(ks[11], (OUT,)),
    )


if __name__ == "__main__":
    key = jax.random.PRNGKey(0)
    k_params, k_x = jax.random.split(key)

    params = init_params(k_params)
    # batch of 8 images (batch becomes the LSTM sequence length), NCHW
    x = jax.random.normal(k_x, (8, NC, 16, 16), jnp.float32)

    fwd = jax.jit(genetic_convlstm_forward)
    out = fwd(params, x)
    jax.block_until_ready(out)

    assert out.shape == (GENOME["lstm_out"],)
    assert bool(jnp.all(jnp.isfinite(out)))

    ref = _reference_forward(params, x)
    err = float(jnp.max(jnp.abs(out - ref)))
    assert err < 5e-2, f"mismatch vs pure-JAX reference: max abs err {err}"

    print("KERNEL_OK")
</pallas_src>

<mosaic_0001>
module attributes {stable_mosaic.version = 11 : i64} {
  func.func @_fused_kernel(%arg0: i32, %arg1: memref<8x2048xf32, #tpu.memory_space<vmem>>, %arg2: memref<9x8x8xf32, #tpu.memory_space<vmem>>, %arg3: memref<8x1xf32, #tpu.memory_space<vmem>>, %arg4: memref<9x16x8xf32, #tpu.memory_space<vmem>>, %arg5: memref<16x1xf32, #tpu.memory_space<vmem>>, %arg6: memref<1980x128xf32, #tpu.memory_space<vmem>>, %arg7: memref<512x16xf32, #tpu.memory_space<vmem>>, %arg8: memref<32x1xf32, #tpu.memory_space<vmem>>, %arg9: memref<128x32xf32, #tpu.memory_space<vmem>>, %arg10: memref<128x32xf32, #tpu.memory_space<vmem>>, %arg11: memref<128x1xf32, #tpu.memory_space<vmem>>, %arg12: memref<8x32xf32, #tpu.memory_space<vmem>>, %arg13: memref<8x1xf32, #tpu.memory_space<vmem>>, %arg14: memref<8x1xf32, #tpu.memory_space<vmem>>) attributes {dimension_semantics = [#tpu.dimension_semantics<arbitrary>], iteration_bounds = array<i64: 1>, scalar_prefetch = 0 : i64, scratch_operands = 0 : i64, tpu.core_type = #tpu.core_type<tc>, window_params = [{pipeline_mode = #tpu.pipeline_mode<synchronous>, transform_indices = @transform_0, window_bounds = array<i64: 8, 2048>}, {pipeline_mode = #tpu.pipeline_mode<synchronous>, transform_indices = @transform_1, window_bounds = array<i64: 9, 8, 8>}, {pipeline_mode = #tpu.pipeline_mode<synchronous>, transform_indices = @transform_2, window_bounds = array<i64: 8, 1>}, {pipeline_mode = #tpu.pipeline_mode<synchronous>, transform_indices = @transform_3, window_bounds = array<i64: 9, 16, 8>}, {pipeline_mode = #tpu.pipeline_mode<synchronous>, transform_indices = @transform_4, window_bounds = array<i64: 16, 1>}, {pipeline_mode = #tpu.pipeline_mode<synchronous>, transform_indices = @transform_5, window_bounds = array<i64: 1980, 128>}, {pipeline_mode = #tpu.pipeline_mode<synchronous>, transform_indices = @transform_6, window_bounds = array<i64: 512, 16>}, {pipeline_mode = #tpu.pipeline_mode<synchronous>, transform_indices = @transform_7, window_bounds = array<i64: 32, 1>}, {pipeline_mode = #tpu.pipeline_mode<synchronous>, transform_indices = @transform_8, window_bounds = array<i64: 128, 32>}, {pipeline_mode = #tpu.pipeline_mode<synchronous>, transform_indices = @transform_9, window_bounds = array<i64: 128, 32>}, {pipeline_mode = #tpu.pipeline_mode<synchronous>, transform_indices = @transform_10, window_bounds = array<i64: 128, 1>}, {pipeline_mode = #tpu.pipeline_mode<synchronous>, transform_indices = @transform_11, window_bounds = array<i64: 8, 32>}, {pipeline_mode = #tpu.pipeline_mode<synchronous>, transform_indices = @transform_12, window_bounds = array<i64: 8, 1>}, {pipeline_mode = #tpu.pipeline_mode<synchronous>, transform_indices = @transform_13, window_bounds = array<i64: 8, 1>}]} {
    %c0 = arith.constant 0 : index
    %c0_0 = arith.constant 0 : index
    %0 = vector.load %arg1[%c0, %c0_0] : memref<8x2048xf32, #tpu.memory_space<vmem>>, vector<8x2048xf32>
    %cst = arith.constant 0.000000e+00 : f32
    %1 = vector.broadcast %cst : f32 to vector<8x2014xf32>
    %c0_1 = arith.constant 0 : index
    %c0_2 = arith.constant 0 : index
    %c0_3 = arith.constant 0 : index
    %2 = vector.load %arg2[%c0_1, %c0_2, %c0_3] : memref<9x8x8xf32, #tpu.memory_space<vmem>>, vector<1x8x8xf32>
    %3 = vector.shape_cast %2 : vector<1x8x8xf32> to vector<8x8xf32>
    %4 = vector.extract_strided_slice %0 {offsets = [0, 0], sizes = [8, 2014], strides = [1, 1]} : vector<8x2048xf32> to vector<8x2014xf32>
    %cst_4 = arith.constant dense<0.000000e+00> : vector<8x2014xf32>
    %5 = tpu.matmul %3, %4, %cst_4 {dimension_numbers = #tpu.dot_dimension_numbers<[1], [0], [0], [1], [0, 0, 1, 1], [], []>} : vector<8x8xf32>, vector<8x2014xf32>, vector<8x2014xf32> -> vector<8x2014xf32>
    %6 = arith.addf %1, %5 : vector<8x2014xf32>
    %c1 = arith.constant 1 : index
    %c0_5 = arith.constant 0 : index
    %c0_6 = arith.constant 0 : index
    %7 = vector.load %arg2[%c1, %c0_5, %c0_6] : memref<9x8x8xf32, #tpu.memory_space<vmem>>, vector<1x8x8xf32>
    %8 = vector.shape_cast %7 : vector<1x8x8xf32> to vector<8x8xf32>
    %9 = vector.extract_strided_slice %0 {offsets = [0, 1], sizes = [8, 2014], strides = [1, 1]} : vector<8x2048xf32> to vector<8x2014xf32>
    %cst_7 = arith.constant dense<0.000000e+00> : vector<8x2014xf32>
    %10 = tpu.matmul %8, %9, %cst_7 {dimension_numbers = #tpu.dot_dimension_numbers<[1], [0], [0], [1], [0, 0, 1, 1], [], []>} : vector<8x8xf32>, vector<8x2014xf32>, vector<8x2014xf32> -> vector<8x2014xf32>
    %11 = arith.addf %6, %10 : vector<8x2014xf32>
    %c2 = arith.constant 2 : index
    %c0_8 = arith.constant 0 : index
    %c0_9 = arith.constant 0 : index
    %12 = vector.load %arg2[%c2, %c0_8, %c0_9] : memref<9x8x8xf32, #tpu.memory_space<vmem>>, vector<1x8x8xf32>
    %13 = vector.shape_cast %12 : vector<1x8x8xf32> to vector<8x8xf32>
    %14 = vector.extract_strided_slice %0 {offsets = [0, 2], sizes = [8, 2014], strides = [1, 1]} : vector<8x2048xf32> to vector<8x2014xf32>
    %cst_10 = arith.constant dense<0.000000e+00> : vector<8x2014xf32>
    %15 = tpu.matmul %13, %14, %cst_10 {dimension_numbers = #tpu.dot_dimension_numbers<[1], [0], [0], [1], [0, 0, 1, 1], [], []>} : vector<8x8xf32>, vector<8x2014xf32>, vector<8x2014xf32> -> vector<8x2014xf32>
    %16 = arith.addf %11, %15 : vector<8x2014xf32>
    %c3 = arith.constant 3 : index
    %c0_11 = arith.constant 0 : index
    %c0_12 = arith.constant 0 : index
    %17 = vector.load %arg2[%c3, %c0_11, %c0_12] : memref<9x8x8xf32, #tpu.memory_space<vmem>>, vector<1x8x8xf32>
    %18 = vector.shape_cast %17 : vector<1x8x8xf32> to vector<8x8xf32>
    %19 = vector.extract_strided_slice %0 {offsets = [0, 16], sizes = [8, 2014], strides = [1, 1]} : vector<8x2048xf32> to vector<8x2014xf32>
    %cst_13 = arith.constant dense<0.000000e+00> : vector<8x2014xf32>
    %20 = tpu.matmul %18, %19, %cst_13 {dimension_numbers = #tpu.dot_dimension_numbers<[1], [0], [0], [1], [0, 0, 1, 1], [], []>} : vector<8x8xf32>, vector<8x2014xf32>, vector<8x2014xf32> -> vector<8x2014xf32>
    %21 = arith.addf %16, %20 : vector<8x2014xf32>
    %c4 = arith.constant 4 : index
    %c0_14 = arith.constant 0 : index
    %c0_15 = arith.constant 0 : index
    %22 = vector.load %arg2[%c4, %c0_14, %c0_15] : memref<9x8x8xf32, #tpu.memory_space<vmem>>, vector<1x8x8xf32>
    %23 = vector.shape_cast %22 : vector<1x8x8xf32> to vector<8x8xf32>
    %24 = vector.extract_strided_slice %0 {offsets = [0, 17], sizes = [8, 2014], strides = [1, 1]} : vector<8x2048xf32> to vector<8x2014xf32>
    %cst_16 = arith.constant dense<0.000000e+00> : vector<8x2014xf32>
    %25 = tpu.matmul %23, %24, %cst_16 {dimension_numbers = #tpu.dot_dimension_numbers<[1], [0], [0], [1], [0, 0, 1, 1], [], []>} : vector<8x8xf32>, vector<8x2014xf32>, vector<8x2014xf32> -> vector<8x2014xf32>
    %26 = arith.addf %21, %25 : vector<8x2014xf32>
    %c5 = arith.constant 5 : index
    %c0_17 = arith.constant 0 : index
    %c0_18 = arith.constant 0 : index
    %27 = vector.load %arg2[%c5, %c0_17, %c0_18] : memref<9x8x8xf32, #tpu.memory_space<vmem>>, vector<1x8x8xf32>
    %28 = vector.shape_cast %27 : vector<1x8x8xf32> to vector<8x8xf32>
    %29 = vector.extract_strided_slice %0 {offsets = [0, 18], sizes = [8, 2014], strides = [1, 1]} : vector<8x2048xf32> to vector<8x2014xf32>
    %cst_19 = arith.constant dense<0.000000e+00> : vector<8x2014xf32>
    %30 = tpu.matmul %28, %29, %cst_19 {dimension_numbers = #tpu.dot_dimension_numbers<[1], [0], [0], [1], [0, 0, 1, 1], [], []>} : vector<8x8xf32>, vector<8x2014xf32>, vector<8x2014xf32> -> vector<8x2014xf32>
    %31 = arith.addf %26, %30 : vector<8x2014xf32>
    %c6 = arith.constant 6 : index
    %c0_20 = arith.constant 0 : index
    %c0_21 = arith.constant 0 : index
    %32 = vector.load %arg2[%c6, %c0_20, %c0_21] : memref<9x8x8xf32, #tpu.memory_space<vmem>>, vector<1x8x8xf32>
    %33 = vector.shape_cast %32 : vector<1x8x8xf32> to vector<8x8xf32>
    %34 = vector.extract_strided_slice %0 {offsets = [0, 32], sizes = [8, 2014], strides = [1, 1]} : vector<8x2048xf32> to vector<8x2014xf32>
    %cst_22 = arith.constant dense<0.000000e+00> : vector<8x2014xf32>
    %35 = tpu.matmul %33, %34, %cst_22 {dimension_numbers = #tpu.dot_dimension_numbers<[1], [0], [0], [1], [0, 0, 1, 1], [], []>} : vector<8x8xf32>, vector<8x2014xf32>, vector<8x2014xf32> -> vector<8x2014xf32>
    %36 = arith.addf %31, %35 : vector<8x2014xf32>
    %c7 = arith.constant 7 : index
    %c0_23 = arith.constant 0 : index
    %c0_24 = arith.constant 0 : index
    %37 = vector.load %arg2[%c7, %c0_23, %c0_24] : memref<9x8x8xf32, #tpu.memory_space<vmem>>, vector<1x8x8xf32>
    %38 = vector.shape_cast %37 : vector<1x8x8xf32> to vector<8x8xf32>
    %39 = vector.extract_strided_slice %0 {offsets = [0, 33], sizes = [8, 2014], strides = [1, 1]} : vector<8x2048xf32> to vector<8x2014xf32>
    %cst_25 = arith.constant dense<0.000000e+00> : vector<8x2014xf32>
    %40 = tpu.matmul %38, %39, %cst_25 {dimension_numbers = #tpu.dot_dimension_numbers<[1], [0], [0], [1], [0, 0, 1, 1], [], []>} : vector<8x8xf32>, vector<8x2014xf32>, vector<8x2014xf32> -> vector<8x2014xf32>
    %41 = arith.addf %36, %40 : vector<8x2014xf32>
    %c8 = arith.constant 8 : index
    %c0_26 = arith.constant 0 : index
    %c0_27 = arith.constant 0 : index
    %42 = vector.load %arg2[%c8, %c0_26, %c0_27] : memref<9x8x8xf32, #tpu.memory_space<vmem>>, vector<1x8x8xf32>
    %43 = vector.shape_cast %42 : vector<1x8x8xf32> to vector<8x8xf32>
    %44 = vector.extract_strided_slice %0 {offsets = [0, 34], sizes = [8, 2014], strides = [1, 1]} : vector<8x2048xf32> to vector<8x2014xf32>
    %cst_28 = arith.constant dense<0.000000e+00> : vector<8x2014xf32>
    %45 = tpu.matmul %43, %44, %cst_28 {dimension_numbers = #tpu.dot_dimension_numbers<[1], [0], [0], [1], [0, 0, 1, 1], [], []>} : vector<8x8xf32>, vector<8x2014xf32>, vector<8x2014xf32> -> vector<8x2014xf32>
    %46 = arith.addf %41, %45 : vector<8x2014xf32>
    %c0_29 = arith.constant 0 : index
    %c0_30 = arith.constant 0 : index
    %47 = vector.load %arg3[%c0_29, %c0_30] : memref<8x1xf32, #tpu.memory_space<vmem>>, vector<8x1xf32>
    %48 = vector.broadcast %47 : vector<8x1xf32> to vector<8x2014xf32>
    %49 = arith.addf %46, %48 : vector<8x2014xf32>
    %cst_31 = arith.constant 0.000000e+00 : f32
    %50 = vector.broadcast %cst_31 : f32 to vector<8x2014xf32>
    %51 = arith.maximumf %49, %50 : vector<8x2014xf32>
    %cst_32 = arith.constant 0.000000e+00 : f32
    %52 = vector.broadcast %cst_32 : f32 to vector<16x1980xf32>
    %c0_33 = arith.constant 0 : index
    %c0_34 = arith.constant 0 : index
    %c0_35 = arith.constant 0 : index
    %53 = vector.load %arg4[%c0_33, %c0_34, %c0_35] : memref<9x16x8xf32, #tpu.memory_space<vmem>>, vector<1x16x8xf32>
    %54 = vector.shape_cast %53 : vector<1x16x8xf32> to vector<16x8xf32>
    %55 = vector.extract_strided_slice %51 {offsets = [0, 0], sizes = [8, 1980], strides = [1, 1]} : vector<8x2014xf32> to vector<8x1980xf32>
    %cst_36 = arith.constant dense<0.000000e+00> : vector<16x1980xf32>
    %56 = tpu.matmul %54, %55, %cst_36 {dimension_numbers = #tpu.dot_dimension_numbers<[1], [0], [0], [1], [0, 0, 1, 1], [], []>} : vector<16x8xf32>, vector<8x1980xf32>, vector<16x1980xf32> -> vector<16x1980xf32>
    %57 = arith.addf %52, %56 : vector<16x1980xf32>
    %c1_37 = arith.constant 1 : index
    %c0_38 = arith.constant 0 : index
    %c0_39 = arith.constant 0 : index
    %58 = vector.load %arg4[%c1_37, %c0_38, %c0_39] : memref<9x16x8xf32, #tpu.memory_space<vmem>>, vector<1x16x8xf32>
    %59 = vector.shape_cast %58 : vector<1x16x8xf32> to vector<16x8xf32>
    %60 = vector.extract_strided_slice %51 {offsets = [0, 1], sizes = [8, 1980], strides = [1, 1]} : vector<8x2014xf32> to vector<8x1980xf32>
    %cst_40 = arith.constant dense<0.000000e+00> : vector<16x1980xf32>
    %61 = tpu.matmul %59, %60, %cst_40 {dimension_numbers = #tpu.dot_dimension_numbers<[1], [0], [0], [1], [0, 0, 1, 1], [], []>} : vector<16x8xf32>, vector<8x1980xf32>, vector<16x1980xf32> -> vector<16x1980xf32>
    %62 = arith.addf %57, %61 : vector<16x1980xf32>
    %c2_41 = arith.constant 2 : index
    %c0_42 = arith.constant 0 : index
    %c0_43 = arith.constant 0 : index
    %63 = vector.load %arg4[%c2_41, %c0_42, %c0_43] : memref<9x16x8xf32, #tpu.memory_space<vmem>>, vector<1x16x8xf32>
    %64 = vector.shape_cast %63 : vector<1x16x8xf32> to vector<16x8xf32>
    %65 = vector.extract_strided_slice %51 {offsets = [0, 2], sizes = [8, 1980], strides = [1, 1]} : vector<8x2014xf32> to vector<8x1980xf32>
    %cst_44 = arith.constant dense<0.000000e+00> : vector<16x1980xf32>
    %66 = tpu.matmul %64, %65, %cst_44 {dimension_numbers = #tpu.dot_dimension_numbers<[1], [0], [0], [1], [0, 0, 1, 1], [], []>} : vector<16x8xf32>, vector<8x1980xf32>, vector<16x1980xf32> -> vector<16x1980xf32>
    %67 = arith.addf %62, %66 : vector<16x1980xf32>
    %c3_45 = arith.constant 3 : index
    %c0_46 = arith.constant 0 : index
    %c0_47 = arith.constant 0 : index
    %68 = vector.load %arg4[%c3_45, %c0_46, %c0_47] : memref<9x16x8xf32, #tpu.memory_space<vmem>>, vector<1x16x8xf32>
    %69 = vector.shape_cast %68 : vector<1x16x8xf32> to vector<16x8xf32>
    %70 = vector.extract_strided_slice %51 {offsets = [0, 16], sizes = [8, 1980], strides = [1, 1]} : vector<8x2014xf32> to vector<8x1980xf32>
    %cst_48 = arith.constant dense<0.000000e+00> : vector<16x1980xf32>
    %71 = tpu.matmul %69, %70, %cst_48 {dimension_numbers = #tpu.dot_dimension_numbers<[1], [0], [0], [1], [0, 0, 1, 1], [], []>} : vector<16x8xf32>, vector<8x1980xf32>, vector<16x1980xf32> -> vector<16x1980xf32>
    %72 = arith.addf %67, %71 : vector<16x1980xf32>
    %c4_49 = arith.constant 4 : index
    %c0_50 = arith.constant 0 : index
    %c0_51 = arith.constant 0 : index
    %73 = vector.load %arg4[%c4_49, %c0_50, %c0_51] : memref<9x16x8xf32, #tpu.memory_space<vmem>>, vector<1x16x8xf32>
    %74 = vector.shape_cast %73 : vector<1x16x8xf32> to vector<16x8xf32>
    %75 = vector.extract_strided_slice %51 {offsets = [0, 17], sizes = [8, 1980], strides = [1, 1]} : vector<8x2014xf32> to vector<8x1980xf32>
    %cst_52 = arith.constant dense<0.000000e+00> : vector<16x1980xf32>
    %76 = tpu.matmul %74, %75, %cst_52 {dimension_numbers = #tpu.dot_dimension_numbers<[1], [0], [0], [1], [0, 0, 1, 1], [], []>} : vector<16x8xf32>, vector<8x1980xf32>, vector<16x1980xf32> -> vector<16x1980xf32>
    %77 = arith.addf %72, %76 : vector<16x1980xf32>
    %c5_53 = arith.constant 5 : index
    %c0_54 = arith.constant 0 : index
    %c0_55 = arith.constant 0 : index
    %78 = vector.load %arg4[%c5_53, %c0_54, %c0_55] : memref<9x16x8xf32, #tpu.memory_space<vmem>>, vector<1x16x8xf32>
    %79 = vector.shape_cast %78 : vector<1x16x8xf32> to vector<16x8xf32>
    %80 = vector.extract_strided_slice %51 {offsets = [0, 18], sizes = [8, 1980], strides = [1, 1]} : vector<8x2014xf32> to vector<8x1980xf32>
    %cst_56 = arith.constant dense<0.000000e+00> : vector<16x1980xf32>
    %81 = tpu.matmul %79, %80, %cst_56 {dimension_numbers = #tpu.dot_dimension_numbers<[1], [0], [0], [1], [0, 0, 1, 1], [], []>} : vector<16x8xf32>, vector<8x1980xf32>, vector<16x1980xf32> -> vector<16x1980xf32>
    %82 = arith.addf %77, %81 : vector<16x1980xf32>
    %c6_57 = arith.constant 6 : index
    %c0_58 = arith.constant 0 : index
    %c0_59 = arith.constant 0 : index
    %83 = vector.load %arg4[%c6_57, %c0_58, %c0_59] : memref<9x16x8xf32, #tpu.memory_space<vmem>>, vector<1x16x8xf32>
    %84 = vector.shape_cast %83 : vector<1x16x8xf32> to vector<16x8xf32>
    %85 = vector.extract_strided_slice %51 {offsets = [0, 32], sizes = [8, 1980], strides = [1, 1]} : vector<8x2014xf32> to vector<8x1980xf32>
    %cst_60 = arith.constant dense<0.000000e+00> : vector<16x1980xf32>
    %86 = tpu.matmul %84, %85, %cst_60 {dimension_numbers = #tpu.dot_dimension_numbers<[1], [0], [0], [1], [0, 0, 1, 1], [], []>} : vector<16x8xf32>, vector<8x1980xf32>, vector<16x1980xf32> -> vector<16x1980xf32>
    %87 = arith.addf %82, %86 : vector<16x1980xf32>
    %c7_61 = arith.constant 7 : index
    %c0_62 = arith.constant 0 : index
    %c0_63 = arith.constant 0 : index
    %88 = vector.load %arg4[%c7_61, %c0_62, %c0_63] : memref<9x16x8xf32, #tpu.memory_space<vmem>>, vector<1x16x8xf32>
    %89 = vector.shape_cast %88 : vector<1x16x8xf32> to vector<16x8xf32>
    %90 = vector.extract_strided_slice %51 {offsets = [0, 33], sizes = [8, 1980], strides = [1, 1]} : vector<8x2014xf32> to vector<8x1980xf32>
    %cst_64 = arith.constant dense<0.000000e+00> : vector<16x1980xf32>
    %91 = tpu.matmul %89, %90, %cst_64 {dimension_numbers = #tpu.dot_dimension_numbers<[1], [0], [0], [1], [0, 0, 1, 1], [], []>} : vector<16x8xf32>, vector<8x1980xf32>, vector<16x1980xf32> -> vector<16x1980xf32>
    %92 = arith.addf %87, %91 : vector<16x1980xf32>
    %c8_65 = arith.constant 8 : index
    %c0_66 = arith.constant 0 : index
    %c0_67 = arith.constant 0 : index
    %93 = vector.load %arg4[%c8_65, %c0_66, %c0_67] : memref<9x16x8xf32, #tpu.memory_space<vmem>>, vector<1x16x8xf32>
    %94 = vector.shape_cast %93 : vector<1x16x8xf32> to vector<16x8xf32>
    %95 = vector.extract_strided_slice %51 {offsets = [0, 34], sizes = [8, 1980], strides = [1, 1]} : vector<8x2014xf32> to vector<8x1980xf32>
    %cst_68 = arith.constant dense<0.000000e+00> : vector<16x1980xf32>
    %96 = tpu.matmul %94, %95, %cst_68 {dimension_numbers = #tpu.dot_dimension_numbers<[1], [0], [0], [1], [0, 0, 1, 1], [], []>} : vector<16x8xf32>, vector<8x1980xf32>, vector<16x1980xf32> -> vector<16x1980xf32>
    %97 = arith.addf %92, %96 : vector<16x1980xf32>
    %c0_69 = arith.constant 0 : index
    %c0_70 = arith.constant 0 : index
    %98 = vector.load %arg5[%c0_69, %c0_70] : memref<16x1xf32, #tpu.memory_space<vmem>>, vector<16x1xf32>
    %99 = vector.broadcast %98 : vector<16x1xf32> to vector<16x1980xf32>
    %100 = arith.addf %97, %99 : vector<16x1980xf32>
    %cst_71 = arith.constant 0.000000e+00 : f32
    %101 = vector.broadcast %cst_71 : f32 to vector<16x1980xf32>
    %102 = arith.maximumf %100, %101 : vector<16x1980xf32>
    %c0_72 = arith.constant 0 : index
    %c0_73 = arith.constant 0 : index
    %103 = vector.load %arg6[%c0_72, %c0_73] : memref<1980x128xf32, #tpu.memory_space<vmem>>, vector<1980x128xf32>
    %cst_74 = arith.constant dense<0.000000e+00> : vector<16x128xf32>
    %104 = tpu.matmul %102, %103, %cst_74 {dimension_numbers = #tpu.dot_dimension_numbers<[1], [0], [0], [1], [0, 0, 1, 1], [], []>} : vector<16x1980xf32>, vector<1980x128xf32>, vector<16x128xf32> -> vector<16x128xf32>
    %cst_75 = arith.constant 0.000000e+00 : f32
    %105 = vector.broadcast %cst_75 : f32 to vector<32x8xf32>
    %c0_76 = arith.constant 0 : index
    %c0_77 = arith.constant 0 : index
    %106 = vector.load %arg7[%c0_76, %c0_77] : memref<512x16xf32, #tpu.memory_space<vmem>>, vector<32x16xf32>
    %107 = vector.extract_strided_slice %104 {offsets = [0, 0], sizes = [16, 8], strides = [1, 1]} : vector<16x128xf32> to vector<16x8xf32>
    %cst_78 = arith.constant dense<0.000000e+00> : vector<32x8xf32>
    %108 = tpu.matmul %106, %107, %cst_78 {dimension_numbers = #tpu.dot_dimension_numbers<[1], [0], [0], [1], [0, 0, 1, 1], [], []>} : vector<32x16xf32>, vector<16x8xf32>, vector<32x8xf32> -> vector<32x8xf32>
    %109 = arith.addf %105, %108 : vector<32x8xf32>
    %c32 = arith.constant 32 : index
    %c0_79 = arith.constant 0 : index
    %110 = vector.load %arg7[%c32, %c0_79] : memref<512x16xf32, #tpu.memory_space<vmem>>, vector<32x16xf32>
    %111 = vector.extract_strided_slice %104 {offsets = [0, 8], sizes = [16, 8], strides = [1, 1]} : vector<16x128xf32> to vector<16x8xf32>
    %cst_80 = arith.constant dense<0.000000e+00> : vector<32x8xf32>
    %112 = tpu.matmul %110, %111, %cst_80 {dimension_numbers = #tpu.dot_dimension_numbers<[1], [0], [0], [1], [0, 0, 1, 1], [], []>} : vector<32x16xf32>, vector<16x8xf32>, vector<32x8xf32> -> vector<32x8xf32>
    %113 = arith.addf %109, %112 : vector<32x8xf32>
    %c64 = arith.constant 64 : index
    %c0_81 = arith.constant 0 : index
    %114 = vector.load %arg7[%c64, %c0_81] : memref<512x16xf32, #tpu.memory_space<vmem>>, vector<32x16xf32>
    %115 = vector.extract_strided_slice %104 {offsets = [0, 16], sizes = [16, 8], strides = [1, 1]} : vector<16x128xf32> to vector<16x8xf32>
    %cst_82 = arith.constant dense<0.000000e+00> : vector<32x8xf32>
    %116 = tpu.matmul %114, %115, %cst_82 {dimension_numbers = #tpu.dot_dimension_numbers<[1], [0], [0], [1], [0, 0, 1, 1], [], []>} : vector<32x16xf32>, vector<16x8xf32>, vector<32x8xf32> -> vector<32x8xf32>
    %117 = arith.addf %113, %116 : vector<32x8xf32>
    %c96 = arith.constant 96 : index
    %c0_83 = arith.constant 0 : index
    %118 = vector.load %arg7[%c96, %c0_83] : memref<512x16xf32, #tpu.memory_space<vmem>>, vector<32x16xf32>
    %119 = vector.extract_strided_slice %104 {offsets = [0, 24], sizes = [16, 8], strides = [1, 1]} : vector<16x128xf32> to vector<16x8xf32>
    %cst_84 = arith.constant dense<0.000000e+00> : vector<32x8xf32>
    %120 = tpu.matmul %118, %119, %cst_84 {dimension_numbers = #tpu.dot_dimension_numbers<[1], [0], [0], [1], [0, 0, 1, 1], [], []>} : vector<32x16xf32>, vector<16x8xf32>, vector<32x8xf32> -> vector<32x8xf32>
    %121 = arith.addf %117, %120 : vector<32x8xf32>
    %c128 = arith.constant 128 : index
    %c0_85 = arith.constant 0 : index
    %122 = vector.load %arg7[%c128, %c0_85] : memref<512x16xf32, #tpu.memory_space<vmem>>, vector<32x16xf32>
    %123 = vector.extract_strided_slice %104 {offsets = [0, 32], sizes = [16, 8], strides = [1, 1]} : vector<16x128xf32> to vector<16x8xf32>
    %cst_86 = arith.constant dense<0.000000e+00> : vector<32x8xf32>
    %124 = tpu.matmul %122, %123, %cst_86 {dimension_numbers = #tpu.dot_dimension_numbers<[1], [0], [0], [1], [0, 0, 1, 1], [], []>} : vector<32x16xf32>, vector<16x8xf32>, vector<32x8xf32> -> vector<32x8xf32>
    %125 = arith.addf %121, %124 : vector<32x8xf32>
    %c160 = arith.constant 160 : index
    %c0_87 = arith.constant 0 : index
    %126 = vector.load %arg7[%c160, %c0_87] : memref<512x16xf32, #tpu.memory_space<vmem>>, vector<32x16xf32>
    %127 = vector.extract_strided_slice %104 {offsets = [0, 40], sizes = [16, 8], strides = [1, 1]} : vector<16x128xf32> to vector<16x8xf32>
    %cst_88 = arith.constant dense<0.000000e+00> : vector<32x8xf32>
    %128 = tpu.matmul %126, %127, %cst_88 {dimension_numbers = #tpu.dot_dimension_numbers<[1], [0], [0], [1], [0, 0, 1, 1], [], []>} : vector<32x16xf32>, vector<16x8xf32>, vector<32x8xf32> -> vector<32x8xf32>
    %129 = arith.addf %125, %128 : vector<32x8xf32>
    %c192 = arith.constant 192 : index
    %c0_89 = arith.constant 0 : index
    %130 = vector.load %arg7[%c192, %c0_89] : memref<512x16xf32, #tpu.memory_space<vmem>>, vector<32x16xf32>
    %131 = vector.extract_strided_slice %104 {offsets = [0, 48], sizes = [16, 8], strides = [1, 1]} : vector<16x128xf32> to vector<16x8xf32>
    %cst_90 = arith.constant dense<0.000000e+00> : vector<32x8xf32>
    %132 = tpu.matmul %130, %131, %cst_90 {dimension_numbers = #tpu.dot_dimension_numbers<[1], [0], [0], [1], [0, 0, 1, 1], [], []>} : vector<32x16xf32>, vector<16x8xf32>, vector<32x8xf32> -> vector<32x8xf32>
    %133 = arith.addf %129, %132 : vector<32x8xf32>
    %c224 = arith.constant 224 : index
    %c0_91 = arith.constant 0 : index
    %134 = vector.load %arg7[%c224, %c0_91] : memref<512x16xf32, #tpu.memory_space<vmem>>, vector<32x16xf32>
    %135 = vector.extract_strided_slice %104 {offsets = [0, 56], sizes = [16, 8], strides = [1, 1]} : vector<16x128xf32> to vector<16x8xf32>
    %cst_92 = arith.constant dense<0.000000e+00> : vector<32x8xf32>
    %136 = tpu.matmul %134, %135, %cst_92 {dimension_numbers = #tpu.dot_dimension_numbers<[1], [0], [0], [1], [0, 0, 1, 1], [], []>} : vector<32x16xf32>, vector<16x8xf32>, vector<32x8xf32> -> vector<32x8xf32>
    %137 = arith.addf %133, %136 : vector<32x8xf32>
    %c256 = arith.constant 256 : index
    %c0_93 = arith.constant 0 : index
    %138 = vector.load %arg7[%c256, %c0_93] : memref<512x16xf32, #tpu.memory_space<vmem>>, vector<32x16xf32>
    %139 = vector.extract_strided_slice %104 {offsets = [0, 64], sizes = [16, 8], strides = [1, 1]} : vector<16x128xf32> to vector<16x8xf32>
    %cst_94 = arith.constant dense<0.000000e+00> : vector<32x8xf32>
    %140 = tpu.matmul %138, %139, %cst_94 {dimension_numbers = #tpu.dot_dimension_numbers<[1], [0], [0], [1], [0, 0, 1, 1], [], []>} : vector<32x16xf32>, vector<16x8xf32>, vector<32x8xf32> -> vector<32x8xf32>
    %141 = arith.addf %137, %140 : vector<32x8xf32>
    %c288 = arith.constant 288 : index
    %c0_95 = arith.constant 0 : index
    %142 = vector.load %arg7[%c288, %c0_95] : memref<512x16xf32, #tpu.memory_space<vmem>>, vector<32x16xf32>
    %143 = vector.extract_strided_slice %104 {offsets = [0, 72], sizes = [16, 8], strides = [1, 1]} : vector<16x128xf32> to vector<16x8xf32>
    %cst_96 = arith.constant dense<0.000000e+00> : vector<32x8xf32>
    %144 = tpu.matmul %142, %143, %cst_96 {dimension_numbers = #tpu.dot_dimension_numbers<[1], [0], [0], [1], [0, 0, 1, 1], [], []>} : vector<32x16xf32>, vector<16x8xf32>, vector<32x8xf32> -> vector<32x8xf32>
    %145 = arith.addf %141, %144 : vector<32x8xf32>
    %c320 = arith.constant 320 : index
    %c0_97 = arith.constant 0 : index
    %146 = vector.load %arg7[%c320, %c0_97] : memref<512x16xf32, #tpu.memory_space<vmem>>, vector<32x16xf32>
    %147 = vector.extract_strided_slice %104 {offsets = [0, 80], sizes = [16, 8], strides = [1, 1]} : vector<16x128xf32> to vector<16x8xf32>
    %cst_98 = arith.constant dense<0.000000e+00> : vector<32x8xf32>
    %148 = tpu.matmul %146, %147, %cst_98 {dimension_numbers = #tpu.dot_dimension_numbers<[1], [0], [0], [1], [0, 0, 1, 1], [], []>} : vector<32x16xf32>, vector<16x8xf32>, vector<32x8xf32> -> vector<32x8xf32>
    %149 = arith.addf %145, %148 : vector<32x8xf32>
    %c352 = arith.constant 352 : index
    %c0_99 = arith.constant 0 : index
    %150 = vector.load %arg7[%c352, %c0_99] : memref<512x16xf32, #tpu.memory_space<vmem>>, vector<32x16xf32>
    %151 = vector.extract_strided_slice %104 {offsets = [0, 88], sizes = [16, 8], strides = [1, 1]} : vector<16x128xf32> to vector<16x8xf32>
    %cst_100 = arith.constant dense<0.000000e+00> : vector<32x8xf32>
    %152 = tpu.matmul %150, %151, %cst_100 {dimension_numbers = #tpu.dot_dimension_numbers<[1], [0], [0], [1], [0, 0, 1, 1], [], []>} : vector<32x16xf32>, vector<16x8xf32>, vector<32x8xf32> -> vector<32x8xf32>
    %153 = arith.addf %149, %152 : vector<32x8xf32>
    %c384 = arith.constant 384 : index
    %c0_101 = arith.constant 0 : index
    %154 = vector.load %arg7[%c384, %c0_101] : memref<512x16xf32, #tpu.memory_space<vmem>>, vector<32x16xf32>
    %155 = vector.extract_strided_slice %104 {offsets = [0, 96], sizes = [16, 8], strides = [1, 1]} : vector<16x128xf32> to vector<16x8xf32>
    %cst_102 = arith.constant dense<0.000000e+00> : vector<32x8xf32>
    %156 = tpu.matmul %154, %155, %cst_102 {dimension_numbers = #tpu.dot_dimension_numbers<[1], [0], [0], [1], [0, 0, 1, 1], [], []>} : vector<32x16xf32>, vector<16x8xf32>, vector<32x8xf32> -> vector<32x8xf32>
    %157 = arith.addf %153, %156 : vector<32x8xf32>
    %c416 = arith.constant 416 : index
    %c0_103 = arith.constant 0 : index
    %158 = vector.load %arg7[%c416, %c0_103] : memref<512x16xf32, #tpu.memory_space<vmem>>, vector<32x16xf32>
    %159 = vector.extract_strided_slice %104 {offsets = [0, 104], sizes = [16, 8], strides = [1, 1]} : vector<16x128xf32> to vector<16x8xf32>
    %cst_104 = arith.constant dense<0.000000e+00> : vector<32x8xf32>
    %160 = tpu.matmul %158, %159, %cst_104 {dimension_numbers = #tpu.dot_dimension_numbers<[1], [0], [0], [1], [0, 0, 1, 1], [], []>} : vector<32x16xf32>, vector<16x8xf32>, vector<32x8xf32> -> vector<32x8xf32>
    %161 = arith.addf %157, %160 : vector<32x8xf32>
    %c448 = arith.constant 448 : index
    %c0_105 = arith.constant 0 : index
    %162 = vector.load %arg7[%c448, %c0_105] : memref<512x16xf32, #tpu.memory_space<vmem>>, vector<32x16xf32>
    %163 = vector.extract_strided_slice %104 {offsets = [0, 112], sizes = [16, 8], strides = [1, 1]} : vector<16x128xf32> to vector<16x8xf32>
    %cst_106 = arith.constant dense<0.000000e+00> : vector<32x8xf32>
    %164 = tpu.matmul %162, %163, %cst_106 {dimension_numbers = #tpu.dot_dimension_numbers<[1], [0], [0], [1], [0, 0, 1, 1], [], []>} : vector<32x16xf32>, vector<16x8xf32>, vector<32x8xf32> -> vector<32x8xf32>
    %165 = arith.addf %161, %164 : vector<32x8xf32>
    %c480 = arith.constant 480 : index
    %c0_107 = arith.constant 0 : index
    %166 = vector.load %arg7[%c480, %c0_107] : memref<512x16xf32, #tpu.memory_space<vmem>>, vector<32x16xf32>
    %167 = vector.extract_strided_slice %104 {offsets = [0, 120], sizes = [16, 8], strides = [1, 1]} : vector<16x128xf32> to vector<16x8xf32>
    %cst_108 = arith.constant dense<0.000000e+00> : vector<32x8xf32>
    %168 = tpu.matmul %166, %167, %cst_108 {dimension_numbers = #tpu.dot_dimension_numbers<[1], [0], [0], [1], [0, 0, 1, 1], [], []>} : vector<32x16xf32>, vector<16x8xf32>, vector<32x8xf32> -> vector<32x8xf32>
    %169 = arith.addf %165, %168 : vector<32x8xf32>
    %c0_109 = arith.constant 0 : index
    %c0_110 = arith.constant 0 : index
    %170 = vector.load %arg8[%c0_109, %c0_110] : memref<32x1xf32, #tpu.memory_space<vmem>>, vector<32x1xf32>
    %171 = vector.broadcast %170 : vector<32x1xf32> to vector<32x8xf32>
    %172 = arith.addf %169, %171 : vector<32x8xf32>
    %c0_111 = arith.constant 0 : index
    %c0_112 = arith.constant 0 : index
    %173 = vector.load %arg9[%c0_111, %c0_112] : memref<128x32xf32, #tpu.memory_space<vmem>>, vector<128x32xf32>
    %cst_113 = arith.constant dense<0.000000e+00> : vector<128x8xf32>
    %174 = tpu.matmul %173, %172, %cst_113 {dimension_numbers = #tpu.dot_dimension_numbers<[1], [0], [0], [1], [0, 0, 1, 1], [], []>} : vector<128x32xf32>, vector<32x8xf32>, vector<128x8xf32> -> vector<128x8xf32>
    %c0_114 = arith.constant 0 : index
    %c0_115 = arith.constant 0 : index
    %175 = vector.load %arg11[%c0_114, %c0_115] : memref<128x1xf32, #tpu.memory_space<vmem>>, vector<128x1xf32>
    %176 = vector.broadcast %175 : vector<128x1xf32> to vector<128x8xf32>
    %177 = arith.addf %174, %176 : vector<128x8xf32>
    %cst_116 = arith.constant 0.000000e+00 : f32
    %178 = vector.broadcast %cst_116 : f32 to vector<32x1xf32>
    %cst_117 = arith.constant 0.000000e+00 : f32
    %179 = vector.broadcast %cst_117 : f32 to vector<32x1xf32>
    %180 = vector.extract_strided_slice %177 {offsets = [0, 0], sizes = [128, 1], strides = [1, 1]} : vector<128x8xf32> to vector<128x1xf32>
    %c0_118 = arith.constant 0 : index
    %c0_119 = arith.constant 0 : index
    %181 = vector.load %arg10[%c0_118, %c0_119] : memref<128x32xf32, #tpu.memory_space<vmem>>, vector<128x32xf32>
    %cst_120 = arith.constant dense<0.000000e+00> : vector<128x1xf32>
    %182 = tpu.matmul %181, %178, %cst_120 {dimension_numbers = #tpu.dot_dimension_numbers<[1], [0], [0], [1], [0, 0, 1, 1], [], []>} : vector<128x32xf32>, vector<32x1xf32>, vector<128x1xf32> -> vector<128x1xf32>
    %183 = arith.addf %180, %182 : vector<128x1xf32>
    %184 = vector.extract_strided_slice %183 {offsets = [0, 0], sizes = [32, 1], strides = [1, 1]} : vector<128x1xf32> to vector<32x1xf32>
    %185 = arith.negf %184 : vector<32x1xf32>
    %186 = math.exp %185 : vector<32x1xf32>
    %cst_121 = arith.constant 1.000000e+00 : f32
    %187 = vector.broadcast %cst_121 : f32 to vector<32x1xf32>
    %188 = arith.addf %187, %186 : vector<32x1xf32>
    %189 = arith.divf %187, %188 : vector<32x1xf32>
    %190 = vector.extract_strided_slice %183 {offsets = [32, 0], sizes = [32, 1], strides = [1, 1]} : vector<128x1xf32> to vector<32x1xf32>
    %191 = arith.negf %190 : vector<32x1xf32>
    %192 = math.exp %191 : vector<32x1xf32>
    %cst_122 = arith.constant 1.000000e+00 : f32
    %193 = vector.broadcast %cst_122 : f32 to vector<32x1xf32>
    %194 = arith.addf %193, %192 : vector<32x1xf32>
    %195 = arith.divf %193, %194 : vector<32x1xf32>
    %196 = vector.extract_strided_slice %183 {offsets = [64, 0], sizes = [32, 1], strides = [1, 1]} : vector<128x1xf32> to vector<32x1xf32>
    %197 = math.tanh %196 : vector<32x1xf32>
    %198 = vector.extract_strided_slice %183 {offsets = [96, 0], sizes = [32, 1], strides = [1, 1]} : vector<128x1xf32> to vector<32x1xf32>
    %199 = arith.negf %198 : vector<32x1xf32>
    %200 = math.exp %199 : vector<32x1xf32>
    %cst_123 = arith.constant 1.000000e+00 : f32
    %201 = vector.broadcast %cst_123 : f32 to vector<32x1xf32>
    %202 = arith.addf %201, %200 : vector<32x1xf32>
    %203 = arith.divf %201, %202 : vector<32x1xf32>
    %204 = arith.mulf %195, %179 : vector<32x1xf32>
    %205 = arith.mulf %189, %197 : vector<32x1xf32>
    %206 = arith.addf %204, %205 : vector<32x1xf32>
    %207 = math.tanh %206 : vector<32x1xf32>
    %208 = arith.mulf %203, %207 : vector<32x1xf32>
    %209 = vector.extract_strided_slice %177 {offsets = [0, 1], sizes = [128, 1], strides = [1, 1]} : vector<128x8xf32> to vector<128x1xf32>
    %c0_124 = arith.constant 0 : index
    %c0_125 = arith.constant 0 : index
    %210 = vector.load %arg10[%c0_124, %c0_125] : memref<128x32xf32, #tpu.memory_space<vmem>>, vector<128x32xf32>
    %cst_126 = arith.constant dense<0.000000e+00> : vector<128x1xf32>
    %211 = tpu.matmul %210, %208, %cst_126 {dimension_numbers = #tpu.dot_dimension_numbers<[1], [0], [0], [1], [0, 0, 1, 1], [], []>} : vector<128x32xf32>, vector<32x1xf32>, vector<128x1xf32> -> vector<128x1xf32>
    %212 = arith.addf %209, %211 : vector<128x1xf32>
    %213 = vector.extract_strided_slice %212 {offsets = [0, 0], sizes = [32, 1], strides = [1, 1]} : vector<128x1xf32> to vector<32x1xf32>
    %214 = arith.negf %213 : vector<32x1xf32>
    %215 = math.exp %214 : vector<32x1xf32>
    %cst_127 = arith.constant 1.000000e+00 : f32
    %216 = vector.broadcast %cst_127 : f32 to vector<32x1xf32>
    %217 = arith.addf %216, %215 : vector<32x1xf32>
    %218 = arith.divf %216, %217 : vector<32x1xf32>
    %219 = vector.extract_strided_slice %212 {offsets = [32, 0], sizes = [32, 1], strides = [1, 1]} : vector<128x1xf32> to vector<32x1xf32>
    %220 = arith.negf %219 : vector<32x1xf32>
    %221 = math.exp %220 : vector<32x1xf32>
    %cst_128 = arith.constant 1.000000e+00 : f32
    %222 = vector.broadcast %cst_128 : f32 to vector<32x1xf32>
    %223 = arith.addf %222, %221 : vector<32x1xf32>
    %224 = arith.divf %222, %223 : vector<32x1xf32>
    %225 = vector.extract_strided_slice %212 {offsets = [64, 0], sizes = [32, 1], strides = [1, 1]} : vector<128x1xf32> to vector<32x1xf32>
    %226 = math.tanh %225 : vector<32x1xf32>
    %227 = vector.extract_strided_slice %212 {offsets = [96, 0], sizes = [32, 1], strides = [1, 1]} : vector<128x1xf32> to vector<32x1xf32>
    %228 = arith.negf %227 : vector<32x1xf32>
    %229 = math.exp %228 : vector<32x1xf32>
    %cst_129 = arith.constant 1.000000e+00 : f32
    %230 = vector.broadcast %cst_129 : f32 to vector<32x1xf32>
    %231 = arith.addf %230, %229 : vector<32x1xf32>
    %232 = arith.divf %230, %231 : vector<32x1xf32>
    %233 = arith.mulf %224, %206 : vector<32x1xf32>
    %234 = arith.mulf %218, %226 : vector<32x1xf32>
    %235 = arith.addf %233, %234 : vector<32x1xf32>
    %236 = math.tanh %235 : vector<32x1xf32>
    %237 = arith.mulf %232, %236 : vector<32x1xf32>
    %238 = vector.extract_strided_slice %177 {offsets = [0, 2], sizes = [128, 1], strides = [1, 1]} : vector<128x8xf32> to vector<128x1xf32>
    %c0_130 = arith.constant 0 : index
    %c0_131 = arith.constant 0 : index
    %239 = vector.load %arg10[%c0_130, %c0_131] : memref<128x32xf32, #tpu.memory_space<vmem>>, vector<128x32xf32>
    %cst_132 = arith.constant dense<0.000000e+00> : vector<128x1xf32>
    %240 = tpu.matmul %239, %237, %cst_132 {dimension_numbers = #tpu.dot_dimension_numbers<[1], [0], [0], [1], [0, 0, 1, 1], [], []>} : vector<128x32xf32>, vector<32x1xf32>, vector<128x1xf32> -> vector<128x1xf32>
    %241 = arith.addf %238, %240 : vector<128x1xf32>
    %242 = vector.extract_strided_slice %241 {offsets = [0, 0], sizes = [32, 1], strides = [1, 1]} : vector<128x1xf32> to vector<32x1xf32>
    %243 = arith.negf %242 : vector<32x1xf32>
    %244 = math.exp %243 : vector<32x1xf32>
    %cst_133 = arith.constant 1.000000e+00 : f32
    %245 = vector.broadcast %cst_133 : f32 to vector<32x1xf32>
    %246 = arith.addf %245, %244 : vector<32x1xf32>
    %247 = arith.divf %245, %246 : vector<32x1xf32>
    %248 = vector.extract_strided_slice %241 {offsets = [32, 0], sizes = [32, 1], strides = [1, 1]} : vector<128x1xf32> to vector<32x1xf32>
    %249 = arith.negf %248 : vector<32x1xf32>
    %250 = math.exp %249 : vector<32x1xf32>
    %cst_134 = arith.constant 1.000000e+00 : f32
    %251 = vector.broadcast %cst_134 : f32 to vector<32x1xf32>
    %252 = arith.addf %251, %250 : vector<32x1xf32>
    %253 = arith.divf %251, %252 : vector<32x1xf32>
    %254 = vector.extract_strided_slice %241 {offsets = [64, 0], sizes = [32, 1], strides = [1, 1]} : vector<128x1xf32> to vector<32x1xf32>
    %255 = math.tanh %254 : vector<32x1xf32>
    %256 = vector.extract_strided_slice %241 {offsets = [96, 0], sizes = [32, 1], strides = [1, 1]} : vector<128x1xf32> to vector<32x1xf32>
    %257 = arith.negf %256 : vector<32x1xf32>
    %258 = math.exp %257 : vector<32x1xf32>
    %cst_135 = arith.constant 1.000000e+00 : f32
    %259 = vector.broadcast %cst_135 : f32 to vector<32x1xf32>
    %260 = arith.addf %259, %258 : vector<32x1xf32>
    %261 = arith.divf %259, %260 : vector<32x1xf32>
    %262 = arith.mulf %253, %235 : vector<32x1xf32>
    %263 = arith.mulf %247, %255 : vector<32x1xf32>
    %264 = arith.addf %262, %263 : vector<32x1xf32>
    %265 = math.tanh %264 : vector<32x1xf32>
    %266 = arith.mulf %261, %265 : vector<32x1xf32>
    %267 = vector.extract_strided_slice %177 {offsets = [0, 3], sizes = [128, 1], strides = [1, 1]} : vector<128x8xf32> to vector<128x1xf32>
    %c0_136 = arith.constant 0 : index
    %c0_137 = arith.constant 0 : index
    %268 = vector.load %arg10[%c0_136, %c0_137] : memref<128x32xf32, #tpu.memory_space<vmem>>, vector<128x32xf32>
    %cst_138 = arith.constant dense<0.000000e+00> : vector<128x1xf32>
    %269 = tpu.matmul %268, %266, %cst_138 {dimension_numbers = #tpu.dot_dimension_numbers<[1], [0], [0], [1], [0, 0, 1, 1], [], []>} : vector<128x32xf32>, vector<32x1xf32>, vector<128x1xf32> -> vector<128x1xf32>
    %270 = arith.addf %267, %269 : vector<128x1xf32>
    %271 = vector.extract_strided_slice %270 {offsets = [0, 0], sizes = [32, 1], strides = [1, 1]} : vector<128x1xf32> to vector<32x1xf32>
    %272 = arith.negf %271 : vector<32x1xf32>
    %273 = math.exp %272 : vector<32x1xf32>
    %cst_139 = arith.constant 1.000000e+00 : f32
    %274 = vector.broadcast %cst_139 : f32 to vector<32x1xf32>
    %275 = arith.addf %274, %273 : vector<32x1xf32>
    %276 = arith.divf %274, %275 : vector<32x1xf32>
    %277 = vector.extract_strided_slice %270 {offsets = [32, 0], sizes = [32, 1], strides = [1, 1]} : vector<128x1xf32> to vector<32x1xf32>
    %278 = arith.negf %277 : vector<32x1xf32>
    %279 = math.exp %278 : vector<32x1xf32>
    %cst_140 = arith.constant 1.000000e+00 : f32
    %280 = vector.broadcast %cst_140 : f32 to vector<32x1xf32>
    %281 = arith.addf %280, %279 : vector<32x1xf32>
    %282 = arith.divf %280, %281 : vector<32x1xf32>
    %283 = vector.extract_strided_slice %270 {offsets = [64, 0], sizes = [32, 1], strides = [1, 1]} : vector<128x1xf32> to vector<32x1xf32>
    %284 = math.tanh %283 : vector<32x1xf32>
    %285 = vector.extract_strided_slice %270 {offsets = [96, 0], sizes = [32, 1], strides = [1, 1]} : vector<128x1xf32> to vector<32x1xf32>
    %286 = arith.negf %285 : vector<32x1xf32>
    %287 = math.exp %286 : vector<32x1xf32>
    %cst_141 = arith.constant 1.000000e+00 : f32
    %288 = vector.broadcast %cst_141 : f32 to vector<32x1xf32>
    %289 = arith.addf %288, %287 : vector<32x1xf32>
    %290 = arith.divf %288, %289 : vector<32x1xf32>
    %291 = arith.mulf %282, %264 : vector<32x1xf32>
    %292 = arith.mulf %276, %284 : vector<32x1xf32>
    %293 = arith.addf %291, %292 : vector<32x1xf32>
    %294 = math.tanh %293 : vector<32x1xf32>
    %295 = arith.mulf %290, %294 : vector<32x1xf32>
    %296 = vector.extract_strided_slice %177 {offsets = [0, 4], sizes = [128, 1], strides = [1, 1]} : vector<128x8xf32> to vector<128x1xf32>
    %c0_142 = arith.constant 0 : index
    %c0_143 = arith.constant 0 : index
    %297 = vector.load %arg10[%c0_142, %c0_143] : memref<128x32xf32, #tpu.memory_space<vmem>>, vector<128x32xf32>
    %cst_144 = arith.constant dense<0.000000e+00> : vector<128x1xf32>
    %298 = tpu.matmul %297, %295, %cst_144 {dimension_numbers = #tpu.dot_dimension_numbers<[1], [0], [0], [1], [0, 0, 1, 1], [], []>} : vector<128x32xf32>, vector<32x1xf32>, vector<128x1xf32> -> vector<128x1xf32>
    %299 = arith.addf %296, %298 : vector<128x1xf32>
    %300 = vector.extract_strided_slice %299 {offsets = [0, 0], sizes = [32, 1], strides = [1, 1]} : vector<128x1xf32> to vector<32x1xf32>
    %301 = arith.negf %300 : vector<32x1xf32>
    %302 = math.exp %301 : vector<32x1xf32>
    %cst_145 = arith.constant 1.000000e+00 : f32
    %303 = vector.broadcast %cst_145 : f32 to vector<32x1xf32>
    %304 = arith.addf %303, %302 : vector<32x1xf32>
    %305 = arith.divf %303, %304 : vector<32x1xf32>
    %306 = vector.extract_strided_slice %299 {offsets = [32, 0], sizes = [32, 1], strides = [1, 1]} : vector<128x1xf32> to vector<32x1xf32>
    %307 = arith.negf %306 : vector<32x1xf32>
    %308 = math.exp %307 : vector<32x1xf32>
    %cst_146 = arith.constant 1.000000e+00 : f32
    %309 = vector.broadcast %cst_146 : f32 to vector<32x1xf32>
    %310 = arith.addf %309, %308 : vector<32x1xf32>
    %311 = arith.divf %309, %310 : vector<32x1xf32>
    %312 = vector.extract_strided_slice %299 {offsets = [64, 0], sizes = [32, 1], strides = [1, 1]} : vector<128x1xf32> to vector<32x1xf32>
    %313 = math.tanh %312 : vector<32x1xf32>
    %314 = vector.extract_strided_slice %299 {offsets = [96, 0], sizes = [32, 1], strides = [1, 1]} : vector<128x1xf32> to vector<32x1xf32>
    %315 = arith.negf %314 : vector<32x1xf32>
    %316 = math.exp %315 : vector<32x1xf32>
    %cst_147 = arith.constant 1.000000e+00 : f32
    %317 = vector.broadcast %cst_147 : f32 to vector<32x1xf32>
    %318 = arith.addf %317, %316 : vector<32x1xf32>
    %319 = arith.divf %317, %318 : vector<32x1xf32>
    %320 = arith.mulf %311, %293 : vector<32x1xf32>
    %321 = arith.mulf %305, %313 : vector<32x1xf32>
    %322 = arith.addf %320, %321 : vector<32x1xf32>
    %323 = math.tanh %322 : vector<32x1xf32>
    %324 = arith.mulf %319, %323 : vector<32x1xf32>
    %325 = vector.extract_strided_slice %177 {offsets = [0, 5], sizes = [128, 1], strides = [1, 1]} : vector<128x8xf32> to vector<128x1xf32>
    %c0_148 = arith.constant 0 : index
    %c0_149 = arith.constant 0 : index
    %326 = vector.load %arg10[%c0_148, %c0_149] : memref<128x32xf32, #tpu.memory_space<vmem>>, vector<128x32xf32>
    %cst_150 = arith.constant dense<0.000000e+00> : vector<128x1xf32>
    %327 = tpu.matmul %326, %324, %cst_150 {dimension_numbers = #tpu.dot_dimension_numbers<[1], [0], [0], [1], [0, 0, 1, 1], [], []>} : vector<128x32xf32>, vector<32x1xf32>, vector<128x1xf32> -> vector<128x1xf32>
    %328 = arith.addf %325, %327 : vector<128x1xf32>
    %329 = vector.extract_strided_slice %328 {offsets = [0, 0], sizes = [32, 1], strides = [1, 1]} : vector<128x1xf32> to vector<32x1xf32>
    %330 = arith.negf %329 : vector<32x1xf32>
    %331 = math.exp %330 : vector<32x1xf32>
    %cst_151 = arith.constant 1.000000e+00 : f32
    %332 = vector.broadcast %cst_151 : f32 to vector<32x1xf32>
    %333 = arith.addf %332, %331 : vector<32x1xf32>
    %334 = arith.divf %332, %333 : vector<32x1xf32>
    %335 = vector.extract_strided_slice %328 {offsets = [32, 0], sizes = [32, 1], strides = [1, 1]} : vector<128x1xf32> to vector<32x1xf32>
    %336 = arith.negf %335 : vector<32x1xf32>
    %337 = math.exp %336 : vector<32x1xf32>
    %cst_152 = arith.constant 1.000000e+00 : f32
    %338 = vector.broadcast %cst_152 : f32 to vector<32x1xf32>
    %339 = arith.addf %338, %337 : vector<32x1xf32>
    %340 = arith.divf %338, %339 : vector<32x1xf32>
    %341 = vector.extract_strided_slice %328 {offsets = [64, 0], sizes = [32, 1], strides = [1, 1]} : vector<128x1xf32> to vector<32x1xf32>
    %342 = math.tanh %341 : vector<32x1xf32>
    %343 = vector.extract_strided_slice %328 {offsets = [96, 0], sizes = [32, 1], strides = [1, 1]} : vector<128x1xf32> to vector<32x1xf32>
    %344 = arith.negf %343 : vector<32x1xf32>
    %345 = math.exp %344 : vector<32x1xf32>
    %cst_153 = arith.constant 1.000000e+00 : f32
    %346 = vector.broadcast %cst_153 : f32 to vector<32x1xf32>
    %347 = arith.addf %346, %345 : vector<32x1xf32>
    %348 = arith.divf %346, %347 : vector<32x1xf32>
    %349 = arith.mulf %340, %322 : vector<32x1xf32>
    %350 = arith.mulf %334, %342 : vector<32x1xf32>
    %351 = arith.addf %349, %350 : vector<32x1xf32>
    %352 = math.tanh %351 : vector<32x1xf32>
    %353 = arith.mulf %348, %352 : vector<32x1xf32>
    %354 = vector.extract_strided_slice %177 {offsets = [0, 6], sizes = [128, 1], strides = [1, 1]} : vector<128x8xf32> to vector<128x1xf32>
    %c0_154 = arith.constant 0 : index
    %c0_155 = arith.constant 0 : index
    %355 = vector.load %arg10[%c0_154, %c0_155] : memref<128x32xf32, #tpu.memory_space<vmem>>, vector<128x32xf32>
    %cst_156 = arith.constant dense<0.000000e+00> : vector<128x1xf32>
    %356 = tpu.matmul %355, %353, %cst_156 {dimension_numbers = #tpu.dot_dimension_numbers<[1], [0], [0], [1], [0, 0, 1, 1], [], []>} : vector<128x32xf32>, vector<32x1xf32>, vector<128x1xf32> -> vector<128x1xf32>
    %357 = arith.addf %354, %356 : vector<128x1xf32>
    %358 = vector.extract_strided_slice %357 {offsets = [0, 0], sizes = [32, 1], strides = [1, 1]} : vector<128x1xf32> to vector<32x1xf32>
    %359 = arith.negf %358 : vector<32x1xf32>
    %360 = math.exp %359 : vector<32x1xf32>
    %cst_157 = arith.constant 1.000000e+00 : f32
    %361 = vector.broadcast %cst_157 : f32 to vector<32x1xf32>
    %362 = arith.addf %361, %360 : vector<32x1xf32>
    %363 = arith.divf %361, %362 : vector<32x1xf32>
    %364 = vector.extract_strided_slice %357 {offsets = [32, 0], sizes = [32, 1], strides = [1, 1]} : vector<128x1xf32> to vector<32x1xf32>
    %365 = arith.negf %364 : vector<32x1xf32>
    %366 = math.exp %365 : vector<32x1xf32>
    %cst_158 = arith.constant 1.000000e+00 : f32
    %367 = vector.broadcast %cst_158 : f32 to vector<32x1xf32>
    %368 = arith.addf %367, %366 : vector<32x1xf32>
    %369 = arith.divf %367, %368 : vector<32x1xf32>
    %370 = vector.extract_strided_slice %357 {offsets = [64, 0], sizes = [32, 1], strides = [1, 1]} : vector<128x1xf32> to vector<32x1xf32>
    %371 = math.tanh %370 : vector<32x1xf32>
    %372 = vector.extract_strided_slice %357 {offsets = [96, 0], sizes = [32, 1], strides = [1, 1]} : vector<128x1xf32> to vector<32x1xf32>
    %373 = arith.negf %372 : vector<32x1xf32>
    %374 = math.exp %373 : vector<32x1xf32>
    %cst_159 = arith.constant 1.000000e+00 : f32
    %375 = vector.broadcast %cst_159 : f32 to vector<32x1xf32>
    %376 = arith.addf %375, %374 : vector<32x1xf32>
    %377 = arith.divf %375, %376 : vector<32x1xf32>
    %378 = arith.mulf %369, %351 : vector<32x1xf32>
    %379 = arith.mulf %363, %371 : vector<32x1xf32>
    %380 = arith.addf %378, %379 : vector<32x1xf32>
    %381 = math.tanh %380 : vector<32x1xf32>
    %382 = arith.mulf %377, %381 : vector<32x1xf32>
    %383 = vector.extract_strided_slice %177 {offsets = [0, 7], sizes = [128, 1], strides = [1, 1]} : vector<128x8xf32> to vector<128x1xf32>
    %c0_160 = arith.constant 0 : index
    %c0_161 = arith.constant 0 : index
    %384 = vector.load %arg10[%c0_160, %c0_161] : memref<128x32xf32, #tpu.memory_space<vmem>>, vector<128x32xf32>
    %cst_162 = arith.constant dense<0.000000e+00> : vector<128x1xf32>
    %385 = tpu.matmul %384, %382, %cst_162 {dimension_numbers = #tpu.dot_dimension_numbers<[1], [0], [0], [1], [0, 0, 1, 1], [], []>} : vector<128x32xf32>, vector<32x1xf32>, vector<128x1xf32> -> vector<128x1xf32>
    %386 = arith.addf %383, %385 : vector<128x1xf32>
    %387 = vector.extract_strided_slice %386 {offsets = [0, 0], sizes = [32, 1], strides = [1, 1]} : vector<128x1xf32> to vector<32x1xf32>
    %388 = arith.negf %387 : vector<32x1xf32>
    %389 = math.exp %388 : vector<32x1xf32>
    %cst_163 = arith.constant 1.000000e+00 : f32
    %390 = vector.broadcast %cst_163 : f32 to vector<32x1xf32>
    %391 = arith.addf %390, %389 : vector<32x1xf32>
    %392 = arith.divf %390, %391 : vector<32x1xf32>
    %393 = vector.extract_strided_slice %386 {offsets = [32, 0], sizes = [32, 1], strides = [1, 1]} : vector<128x1xf32> to vector<32x1xf32>
    %394 = arith.negf %393 : vector<32x1xf32>
    %395 = math.exp %394 : vector<32x1xf32>
    %cst_164 = arith.constant 1.000000e+00 : f32
    %396 = vector.broadcast %cst_164 : f32 to vector<32x1xf32>
    %397 = arith.addf %396, %395 : vector<32x1xf32>
    %398 = arith.divf %396, %397 : vector<32x1xf32>
    %399 = vector.extract_strided_slice %386 {offsets = [64, 0], sizes = [32, 1], strides = [1, 1]} : vector<128x1xf32> to vector<32x1xf32>
    %400 = math.tanh %399 : vector<32x1xf32>
    %401 = vector.extract_strided_slice %386 {offsets = [96, 0], sizes = [32, 1], strides = [1, 1]} : vector<128x1xf32> to vector<32x1xf32>
    %402 = arith.negf %401 : vector<32x1xf32>
    %403 = math.exp %402 : vector<32x1xf32>
    %cst_165 = arith.constant 1.000000e+00 : f32
    %404 = vector.broadcast %cst_165 : f32 to vector<32x1xf32>
    %405 = arith.addf %404, %403 : vector<32x1xf32>
    %406 = arith.divf %404, %405 : vector<32x1xf32>
    %407 = arith.mulf %398, %380 : vector<32x1xf32>
    %408 = arith.mulf %392, %400 : vector<32x1xf32>
    %409 = arith.addf %407, %408 : vector<32x1xf32>
    %410 = math.tanh %409 : vector<32x1xf32>
    %411 = arith.mulf %406, %410 : vector<32x1xf32>
    %c0_166 = arith.constant 0 : index
    %c0_167 = arith.constant 0 : index
    %412 = vector.load %arg12[%c0_166, %c0_167] : memref<8x32xf32, #tpu.memory_space<vmem>>, vector<8x32xf32>
    %cst_168 = arith.constant dense<0.000000e+00> : vector<8x1xf32>
    %413 = tpu.matmul %412, %411, %cst_168 {dimension_numbers = #tpu.dot_dimension_numbers<[1], [0], [0], [1], [0, 0, 1, 1], [], []>} : vector<8x32xf32>, vector<32x1xf32>, vector<8x1xf32> -> vector<8x1xf32>
    %c0_169 = arith.constant 0 : index
    %c0_170 = arith.constant 0 : index
    %414 = vector.load %arg13[%c0_169, %c0_170] : memref<8x1xf32, #tpu.memory_space<vmem>>, vector<8x1xf32>
    %415 = arith.addf %413, %414 : vector<8x1xf32>
    %c0_171 = arith.constant 0 : index
    %c0_172 = arith.constant 0 : index
    %416 = vector.load %arg14[%c0_171, %c0_172] : memref<8x1xf32, #tpu.memory_space<vmem>>, vector<8x1xf32>
    tpu.vector_store %arg14[%c0_171, %c0_172], %415 {strides = array<i32>} : memref<8x1xf32, #tpu.memory_space<vmem>>, vector<8x1xf32>,
    return
  }
  func.func @transform_0(%arg0: i32) -> (i32, i32) {
    %c0_i32 = arith.constant 0 : i32
    %c0_i32_0 = arith.constant 0 : i32
    %c0_i32_1 = arith.constant 0 : i32
    return %c0_i32, %c0_i32_0 : i32, i32
  }
  func.func @transform_1(%arg0: i32) -> (i32, i32, i32) {
    %c0_i32 = arith.constant 0 : i32
    %c0_i32_0 = arith.constant 0 : i32
    %c0_i32_1 = arith.constant 0 : i32
    %c0_i32_2 = arith.constant 0 : i32
    return %c0_i32, %c0_i32_0, %c0_i32_1 : i32, i32, i32
  }
  func.func @transform_2(%arg0: i32) -> (i32, i32) {
    %c0_i32 = arith.constant 0 : i32
    %c0_i32_0 = arith.constant 0 : i32
    %c0_i32_1 = arith.constant 0 : i32
    return %c0_i32, %c0_i32_0 : i32, i32
  }
  func.func @transform_3(%arg0: i32) -> (i32, i32, i32) {
    %c0_i32 = arith.constant 0 : i32
    %c0_i32_0 = arith.constant 0 : i32
    %c0_i32_1 = arith.constant 0 : i32
    %c0_i32_2 = arith.constant 0 : i32
    return %c0_i32, %c0_i32_0, %c0_i32_1 : i32, i32, i32
  }
  func.func @transform_4(%arg0: i32) -> (i32, i32) {
    %c0_i32 = arith.constant 0 : i32
    %c0_i32_0 = arith.constant 0 : i32
    %c0_i32_1 = arith.constant 0 : i32
    return %c0_i32, %c0_i32_0 : i32, i32
  }
  func.func @transform_5(%arg0: i32) -> (i32, i32) {
    %c0_i32 = arith.constant 0 : i32
    %c0_i32_0 = arith.constant 0 : i32
    %c0_i32_1 = arith.constant 0 : i32
    return %c0_i32, %c0_i32_0 : i32, i32
  }
  func.func @transform_6(%arg0: i32) -> (i32, i32) {
    %c0_i32 = arith.constant 0 : i32
    %c0_i32_0 = arith.constant 0 : i32
    %c0_i32_1 = arith.constant 0 : i32
    return %c0_i32, %c0_i32_0 : i32, i32
  }
  func.func @transform_7(%arg0: i32) -> (i32, i32) {
    %c0_i32 = arith.constant 0 : i32
    %c0_i32_0 = arith.constant 0 : i32
    %c0_i32_1 = arith.constant 0 : i32
    return %c0_i32, %c0_i32_0 : i32, i32
  }
  func.func @transform_8(%arg0: i32) -> (i32, i32) {
    %c0_i32 = arith.constant 0 : i32
    %c0_i32_0 = arith.constant 0 : i32
    %c0_i32_1 = arith.constant 0 : i32
    return %c0_i32, %c0_i32_0 : i32, i32
  }
  func.func @transform_9(%arg0: i32) -> (i32, i32) {
    %c0_i32 = arith.constant 0 : i32
    %c0_i32_0 = arith.constant 0 : i32
    %c0_i32_1 = arith.constant 0 : i32
    return %c0_i32, %c0_i32_0 : i32, i32
  }
  func.func @transform_10(%arg0: i32) -> (i32, i32) {
    %c0_i32 = arith.constant 0 : i32
    %c0_i32_0 = arith.constant 0 : i32
    %c0_i32_1 = arith.constant 0 : i32
    return %c0_i32, %c0_i32_0 : i32, i32
  }
  func.func @transform_11(%arg0: i32) -> (i32, i32) {
    %c0_i32 = arith.constant 0 : i32
    %c0_i32_0 = arith.constant 0 : i32
    %c0_i32_1 = arith.constant 0 : i32
    return %c0_i32, %c0_i32_0 : i32, i32
  }
  func.func @transform_12(%arg0: i32) -> (i32, i32) {
    %c0_i32 = arith.constant 0 : i32
    %c0_i32_0 = arith.constant 0 : i32
    %c0_i32_1 = arith.constant 0 : i32
    return %c0_i32, %c0_i32_0 : i32, i32
  }
  func.func @transform_13(%arg0: i32) -> (i32, i32) {
    %c0_i32 = arith.constant 0 : i32
    %c0_i32_0 = arith.constant 0 : i32
    %c0_i32_1 = arith.constant 0 : i32
    return %c0_i32, %c0_i32_0 : i32, i32
  }
}

</mosaic_0001>

<bundles_post_ra>
// kernel: genetic_convlstm_forward.1
= control target key start
LH: loop header
LB: loop body
LE: loop exit
PB: predicated region body
PF: predicated region fallthrough
CT: control target
= control target key end

     0   :  { %v21282_v2 = vmov 0.0   ;;  %s21283_s29 = smov 127   ;;  %s21284_s25 = smov 126   ;;  %vm111_vm0 = vcmask 1039360   ;;  %vm143_vm1 = vcmask 64512   ;;  %vm1320_vm2 = vcmask 1031168   ;;  %s25631_s0 = inlined_call_operand.vmem [shape: f32[8,2048], index: 0, kind: input, shape index: {}]   ;;  %s25632_s1 = inlined_call_operand.vmem [shape: f32[9,8,8], index: 1, kind: input, shape index: {}]   ;;  %s25633_s2 = inlined_call_operand.vmem [shape: f32[8,1], index: 2, kind: input, shape index: {}]   ;;  %s25634_s3 = inlined_call_operand.vmem [shape: f32[9,16,8], index: 3, kind: input, shape index: {}]   ;;  %s25635_s4 = inlined_call_operand.vmem [shape: f32[16,1], index: 4, kind: input, shape index: {}]   ;;  %s25636_s5 = inlined_call_operand.vmem [shape: f32[1980,128], index: 5, kind: input, shape index: {}]   ;;  %s25637_s6 = inlined_call_operand.vmem [shape: f32[512,16], index: 6, kind: input, shape index: {}]   ;;  %s25638_s7 = inlined_call_operand.vmem [shape: f32[32,1], index: 7, kind: input, shape index: {}]   ;;  %s25639_s10 = inlined_call_operand.vmem [shape: f32[128,1], index: 10, kind: input, shape index: {}]   ;;  %s25640_s8 = inlined_call_operand.vmem [shape: f32[128,32], index: 8, kind: input, shape index: {}]   ;;  %s25641_s9 = inlined_call_operand.vmem [shape: f32[128,32], index: 9, kind: input, shape index: {}]   ;;  %s25642_s11 = inlined_call_operand.vmem [shape: f32[8,32], index: 11, kind: input, shape index: {}]   ;;  %s25643_s12 = inlined_call_operand.vmem [shape: f32[8,1], index: 12, kind: input, shape index: {}]   ;;  %s25644_s13 = inlined_call_operand.vmem [shape: f32[8,1], index: 13, kind: output, shape index: {}]  }
   0x1   :  { %v21393_v0 = vld [vmem:[%s25631_s0 + $0x8] sm:$0xff]  ;;  %v21398_v1 = vld [vmem:[%s25631_s0] sm:$0xff]  ;;  %211 = vmatprep.mubr.f32.mxu1 %v21282_v2  ;;  %353 = vmatprep.mubr.f32.mxu0 %v21282_v2  ;;  %v21409_v3 = vld [vmem:[%s25631_s0 + $0x10] sm:$0xff]  ;;  %s21286_s26 = smov 111   ;;  %s21287_s30 = smov 110   ;;  %vm1973_vm3 = vcmask 916480  }
   0x2   :  { %81 = vrot.lane.b32.xlu0 %v21393_v0, %s21283_s29  ;;  %79 = vrot.lane.b32.xlu1 %v21398_v1, %s21283_s29  ;;  %v21414_v4 = vld [vmem:[%s25631_s0 + $0x18] sm:$0xff]  ;;  %v21423_v5 = vld [vmem:[%s25631_s0 + $0x20] sm:$0xff]  ;;  %s21288_s16 = smov 96   ;;  %s21289_s21 = smov 95   ;;  %vm2626_vm4 = vcmask 908288   ;;  %vm3279_vm5 = vcmask 900096  }
   0x3   :  { %v21428_v6 = vld [vmem:[%s25631_s0 + $0x28] sm:$0xff]  ;;  %v21437_v7 = vld [vmem:[%s25631_s0 + $0x30] sm:$0xff]  ;;  %v21442_v8 = vld [vmem:[%s25631_s0 + $0x38] sm:$0xff]  ;;  %s21290_s24 = smov 94   ;;  %vm3932_vm6 = vcmask 785408   ;;  %vm4585_vm7 = vcmask 777216  }
   0x4   :  { %v21451_v9 = vld [vmem:[%s25631_s0 + $0x40] sm:$0xff]  ;;  %v21456_v10 = vld [vmem:[%s25631_s0 + $0x48] sm:$0xff]  ;;  %v21465_v11 = vld [vmem:[%s25631_s0 + $0x50] sm:$0xff]  ;;  %vm5238_vm8 = vcmask 769024   ;;  %vm12587_vm9 = vcmask 490496   ;;  %vm12594_vm10 = vcmask 1043456  }
   0x5   :  { %v21470_v12 = vld [vmem:[%s25631_s0 + $0x58] sm:$0xff]  ;;  %v21479_v13 = vld [vmem:[%s25631_s0 + $0x60] sm:$0xff]  ;;  %v21484_v14 = vld [vmem:[%s25631_s0 + $0x68] sm:$0xff]  ;;  %vm21293_vm11 = vmmov 1   ;;  %vm13214_vm13 = vcmask 130048   ;;  %s21295_s27 = smov 104  }
   0x6   :  { %83 = vrot.lane.b32.xlu0 %v21409_v3, %s21283_s29  ;;  %85 = vrot.lane.b32.xlu1 %v21414_v4, %s21283_s29  ;;  %v21493_v15 = vld [vmem:[%s25631_s0 + $0x70] sm:$0xff]  ;;  %v21498_v16 = vld [vmem:[%s25631_s0 + $0x78] sm:$0xff]  ;;  %s21285_s0 = smov 112   ;;  %vm19974_vm12 = vmpackc.low %vm12594_vm10, %vm21293_vm11  ;;  %s21296_s28 = smov 80   ;;  %vm15103_vm14 = vcmask 261120   ;;  %vm21318_vm15 = vmmov 0  }
   0x7   :  { %v21596_v22 = vld [vmem:[%s25632_s1 + $0x8] sm:$0xff]  ;;  %v60_v51 = vld [vmem:[%s25632_s1] sm:$0xff]  ;;  %s21298_s14 = smov 64   ;;  %s21299_s15 = smov 72  }
   0x8   :  { %s21306_s19 = smov 8   ;;  %s21310_s20 = smov 125  }
   0x9   :  { %s21311_s22 = smov 4   ;;  %s21314_s23 = smov 123  }
   0xa   :  { %87 = vrot.lane.b32.xlu0 %v21423_v5, %s21283_s29  ;;  %89 = vrot.lane.b32.xlu1 %v21428_v6, %s21283_s29 }
   0xe   :  { %91 = vrot.lane.b32.xlu0 %v21437_v7, %s21283_s29  ;;  %93 = vrot.lane.b32.xlu1 %v21442_v8, %s21283_s29 }
  0x12   :  { %95 = vrot.lane.b32.xlu0 %v21451_v9, %s21283_s29  ;;  %97 = vrot.lane.b32.xlu1 %v21456_v10, %s21283_s29 }
  0x16   :  { %99 = vrot.lane.b32.xlu0 %v21465_v11, %s21283_s29  ;;  %101 = vrot.lane.b32.xlu1 %v21470_v12, %s21283_s29 }
  0x1a   :  { %103 = vrot.lane.b32.xlu0 %v21479_v13, %s21283_s29  ;;  %105 = vrot.lane.b32.xlu1 %v21484_v14, %s21283_s29 }
  0x1e   :  { %107 = vrot.lane.b32.xlu0 %v21493_v15, %s21283_s29  ;;  %109 = vrot.lane.b32.xlu1 %v21498_v16, %s21283_s29 }
  0x22   :  { %1290 = vrot.lane.b32.xlu0 %v21393_v0, %s21284_s25  ;;  %1292 = vrot.lane.b32.xlu1 %v21409_v3, %s21284_s25 }
  0x26   :  { %1288 = vrot.lane.b32.xlu0 %v21398_v1, %s21284_s25  ;;  %1294 = vrot.lane.b32.xlu1 %v21414_v4, %s21284_s25 }
  0x2a   :  { %1296 = vrot.lane.b32.xlu0 %v21423_v5, %s21284_s25  ;;  %1298 = vrot.lane.b32.xlu1 %v21428_v6, %s21284_s25 }
  0x2e   :  { %1300 = vrot.lane.b32.xlu0 %v21437_v7, %s21284_s25  ;;  %1302 = vrot.lane.b32.xlu1 %v21442_v8, %s21284_s25 }
  0x32   :  { %1304 = vrot.lane.b32.xlu0 %v21451_v9, %s21284_s25  ;;  %1306 = vrot.lane.b32.xlu1 %v21456_v10, %s21284_s25 }
  0x36   :  { %1308 = vrot.lane.b32.xlu0 %v21465_v11, %s21284_s25  ;;  %1310 = vrot.lane.b32.xlu1 %v21470_v12, %s21284_s25 }
  0x3a   :  { %1312 = vrot.lane.b32.xlu0 %v21479_v13, %s21284_s25  ;;  %1314 = vrot.lane.b32.xlu1 %v21484_v14, %s21284_s25 }
  0x3e   :  { %1316 = vrot.lane.b32.xlu0 %v21493_v15, %s21284_s25  ;;  %1318 = vrot.lane.b32.xlu1 %v21498_v16, %s21284_s25 }
  0x42   :  { %1943 = vrot.lane.b32.xlu0 %v21393_v0, %s21285_s0  ;;  %1945 = vrot.lane.b32.xlu1 %v21409_v3, %s21285_s0 }
  0x46   :  { %1941 = vrot.lane.b32.xlu0 %v21398_v1, %s21285_s0  ;;  %1947 = vrot.lane.b32.xlu1 %v21414_v4, %s21285_s0 }
  0x4a   :  { %1949 = vrot.lane.b32.xlu0 %v21423_v5, %s21285_s0  ;;  %1951 = vrot.lane.b32.xlu1 %v21428_v6, %s21285_s0 }
  0x4e   :  { %1953 = vrot.lane.b32.xlu0 %v21437_v7, %s21285_s0  ;;  %1955 = vrot.lane.b32.xlu1 %v21442_v8, %s21285_s0 }
  0x52   :  { %1957 = vrot.lane.b32.xlu0 %v21451_v9, %s21285_s0  ;;  %1959 = vrot.lane.b32.xlu1 %v21456_v10, %s21285_s0 }
  0x56   :  { %1961 = vrot.lane.b32.xlu0 %v21465_v11, %s21285_s0  ;;  %1963 = vrot.lane.b32.xlu1 %v21470_v12, %s21285_s0 }
  0x5a   :  { %1965 = vrot.lane.b32.xlu0 %v21479_v13, %s21285_s0  ;;  %1967 = vrot.lane.b32.xlu1 %v21484_v14, %s21285_s0 }
  0x5e   :  { %1969 = vrot.lane.b32.xlu0 %v21493_v15, %s21285_s0  ;;  %1971 = vrot.lane.b32.xlu1 %v21498_v16, %s21285_s0 }
  0x62   :  { %2596 = vrot.lane.b32.xlu0 %v21393_v0, %s21286_s26  ;;  %2598 = vrot.lane.b32.xlu1 %v21409_v3, %s21286_s26 }
  0x66   :  { %2594 = vrot.lane.b32.xlu0 %v21398_v1, %s21286_s26  ;;  %2600 = vrot.lane.b32.xlu1 %v21414_v4, %s21286_s26 }
  0x6a   :  { %2602 = vrot.lane.b32.xlu0 %v21423_v5, %s21286_s26  ;;  %2604 = vrot.lane.b32.xlu1 %v21428_v6, %s21286_s26 }
  0x6e   :  { %2606 = vrot.lane.b32.xlu0 %v21437_v7, %s21286_s26  ;;  %2608 = vrot.lane.b32.xlu1 %v21442_v8, %s21286_s26 }
  0x72   :  { %2610 = vrot.lane.b32.xlu0 %v21451_v9, %s21286_s26  ;;  %2612 = vrot.lane.b32.xlu1 %v21456_v10, %s21286_s26 }
  0x74   :  { %v82_v17 = vpop.permute.xlu0 %81  ;;  %v80_v18 = vpop.permute.xlu1 %79 }
  0x75   :  { %v112_v23 = vsel %vm111_vm0, %v80_v18, %v82_v17 }
  0x76   :  { %2614 = vrot.lane.b32.xlu0 %v21465_v11, %s21286_s26  ;;  %2616 = vrot.lane.b32.xlu1 %v21470_v12, %s21286_s26 }
  0x78   :  { %v84_v19 = vpop.permute.xlu0 %83  ;;  %v86_v20 = vpop.permute.xlu1 %85 }
  0x79   :  { %v113_v21 = vsel %vm111_vm0, %v82_v17, %v84_v19  ;;  %v114_v27 = vsel %vm111_vm0, %v84_v19, %v86_v20 }
  0x7a   :  { %147 = vmatprep.subr.mxu1 %v113_v21  ;;  %2618 = vrot.lane.b32.xlu0 %v21479_v13, %s21286_s26  ;;  %v21722_v21 = vld [vmem:[%s25632_s1 + $0x10] sm:$0xff] }
  0x7b   :  { %2620 = vrot.lane.b32.xlu1 %v21484_v14, %s21286_s26  ;;  %148 = vmatpush1.msra.mxu1 %v112_v23 }
  0x7c   :  { %v88_v24 = vpop.permute.xlu0 %87  ;;  %v90_v25 = vpop.permute.xlu1 %89  ;;  %18171 = vmatmul.mubr.msk.f32.vlgmr.msra.gmra.mrb[0].mxu1 %vm143_vm1, %v21596_v22 }
  0x7d   :  { %v115_v26 = vsel %vm111_vm0, %v86_v20, %v88_v24  ;;  %282 = vmatprep.mubr.f32.mxu1 %v21282_v2  ;;  %v116_v31 = vsel %vm111_vm0, %v88_v24, %v90_v25 }
  0x7e   :  { %2622 = vrot.lane.b32.xlu0 %v21493_v15, %s21286_s26  ;;  %218 = vmatprep.subr.mxu1 %v115_v26 }
  0x7f   :  { %2624 = vrot.lane.b32.xlu1 %v21498_v16, %s21286_s26  ;;  %219 = vmatpush1.msra.mxu1 %v114_v27 }
  0x80   :  { %v92_v28 = vpop.permute.xlu0 %91  ;;  %v94_v29 = vpop.permute.xlu1 %93  ;;  %18172 = vmatmul.mubr.msk.f32.vlgmr.msra.gmra.mrb[2].mxu1 %vm143_vm1, %v21596_v22 }
  0x81   :  { %v117_v30 = vsel %vm111_vm0, %v90_v25, %v92_v28  ;;  %424 = vmatprep.mubr.f32.mxu1 %v21282_v2  ;;  %v118_v35 = vsel %vm111_vm0, %v92_v28, %v94_v29 }
  0x82   :  { %3249 = vrot.lane.b32.xlu0 %v21393_v0, %s21287_s30  ;;  %289 = vmatprep.subr.mxu0 %v117_v30 }
  0x83   :  { %3251 = vrot.lane.b32.xlu1 %v21409_v3, %s21287_s30  ;;  %290 = vmatpush1.msra.mxu0 %v116_v31 }
  0x84   :  { %v96_v32 = vpop.permute.xlu0 %95  ;;  %v98_v33 = vpop.permute.xlu1 %97  ;;  %18173 = vmatmul.mubr.msk.f32.vlgmr.msra.gmra.mrb[0].mxu0 %vm143_vm1, %v21596_v22 }
  0x85   :  { %v119_v34 = vsel %vm111_vm0, %v94_v29, %v96_v32  ;;  %495 = vmatprep.mubr.f32.mxu0 %v21282_v2  ;;  %v120_v39 = vsel %vm111_vm0, %v96_v32, %v98_v33 }
  0x86   :  { %3247 = vrot.lane.b32.xlu0 %v21398_v1, %s21287_s30  ;;  %360 = vmatprep.subr.mxu1 %v119_v34 }
  0x87   :  { %3253 = vrot.lane.b32.xlu1 %v21414_v4, %s21287_s30  ;;  %361 = vmatpush1.msra.mxu1 %v118_v35 }
  0x88   :  { %v100_v36 = vpop.permute.xlu0 %99  ;;  %v102_v37 = vpop.permute.xlu1 %101  ;;  %18174 = vmatmul.mubr.msk.f32.vlgmr.msra.gmra.mrb[4].mxu1 %vm143_vm1, %v21596_v22 }
  0x89   :  { %v121_v38 = vsel %vm111_vm0, %v98_v33, %v100_v36  ;;  %566 = vmatprep.mubr.f32.mxu1 %v21282_v2  ;;  %v122_v43 = vsel %vm111_vm0, %v100_v36, %v102_v37 }
  0x8a   :  { %3255 = vrot.lane.b32.xlu0 %v21423_v5, %s21287_s30  ;;  %431 = vmatprep.subr.mxu0 %v121_v38 }
  0x8b   :  { %3257 = vrot.lane.b32.xlu1 %v21428_v6, %s21287_s30  ;;  %432 = vmatpush1.msra.mxu0 %v120_v39 }
  0x8c   :  { %v104_v40 = vpop.permute.xlu0 %103  ;;  %v106_v41 = vpop.permute.xlu1 %105  ;;  %18175 = vmatmul.mubr.msk.f32.vlgmr.msra.gmra.mrb[2].mxu0 %vm143_vm1, %v21596_v22 }
  0x8d   :  { %v123_v42 = vsel %vm111_vm0, %v102_v37, %v104_v40  ;;  %637 = vmatprep.mubr.f32.mxu0 %v21282_v2  ;;  %v124_v48 = vsel %vm111_vm0, %v104_v40, %v106_v41 }
  0x8e   :  { %3259 = vrot.lane.b32.xlu0 %v21437_v7, %s21287_s30  ;;  %502 = vmatprep.subr.mxu1 %v123_v42 }
  0x8f   :  { %3261 = vrot.lane.b32.xlu1 %v21442_v8, %s21287_s30  ;;  %503 = vmatpush1.msra.mxu1 %v122_v43 }
  0x90   :  { %v108_v44 = vpop.permute.xlu0 %107  ;;  %18176 = vmatmul.mubr.msk.f32.vlgmr.msra.gmra.mrb[6].mxu1 %vm143_vm1, %v21596_v22  ;;  %v110_v45 = vpop.permute.xlu1 %109 }
  0x91   :  { %644 = vmatprep.subr.mxu1 %v110_v45  ;;  %v125_v46 = vsel %vm111_vm0, %v106_v41, %v108_v44  ;;  %v126_v47 = vsel %vm111_vm0, %v108_v44, %v110_v45  ;;  %708 = vmatprep.mubr.f32.mxu1 %v21282_v2  ;;  %v21784_v45 = vld [vmem:[%s25632_s1 + $0x18] sm:$0xff] }
  0x92   :  { %3263 = vrot.lane.b32.xlu0 %v21451_v9, %s21287_s30  ;;  %573 = vmatprep.subr.mxu0 %v125_v46 }
  0x93   :  { %3265 = vrot.lane.b32.xlu1 %v21456_v10, %s21287_s30  ;;  %645 = vmatpush1.msra.mxu1 %v126_v47 }
  0x94   :  { %574 = vmatpush1.msra.mxu0 %v124_v48  ;;  %v1291_v49 = vpop.permute.xlu0 %1290  ;;  %18178 = vmatmul.mubr.msk.f32.vlgmr.msra.gmra.mrb[8].mxu1 %vm143_vm1, %v21596_v22  ;;  %v1293_v50 = vpop.permute.xlu1 %1292 }
  0x95   :  { %18177 = vmatmul.mubr.msk.f32.vlgmr.msra.gmra.mrb[4].mxu0 %vm143_vm1, %v21596_v22  ;;  %718 = vmatprep.subr.mxu0 %v21393_v0  ;;  %v1322_v60 = vsel %vm1320_vm2, %v1291_v49, %v1293_v50 }
  0x96   :  { %3267 = vrot.lane.b32.xlu0 %v21465_v11, %s21287_s30  ;;  %789 = vmatprep.subr.mxu1 %v21414_v4 }
  0x97   :  { %3269 = vrot.lane.b32.xlu1 %v21470_v12, %s21287_s30  ;;  %719 = vmatpush1.msra.mxu0 %v21398_v1 }
  0x98   :  { %782 = vmatprep.mubr.f32.mxu0 %v21282_v2  ;;  %790 = vmatpush1.msra.mxu1 %v21409_v3  ;;  %v1289_v52 = vpop.permute.xlu0 %1288  ;;  %v1295_v53 = vpop.permute.xlu1 %1294 }
  0x99   :  { %853 = vmatprep.mubr.f32.mxu1 %v21282_v2  ;;  %18179 = vmatmul.mubr.msk.f32.vlgmr.msra.gmra.mrb[6].mxu0 %vm143_vm1, %v60_v51  ;;  %v1321_v17 = vsel %vm1320_vm2, %v1289_v52, %v1291_v49  ;;  %v1323_v18 = vsel %vm1320_vm2, %v1293_v50, %v1295_v53 }
  0x9a   :  { %18180 = vmatmul.mubr.msk.f32.vlgmr.msra.gmra.mrb[2].mxu1 %vm143_vm1, %v60_v51  ;;  %3271 = vrot.lane.b32.xlu0 %v21479_v13, %s21287_s30 }
  0x9b   :  { %3273 = vrot.lane.b32.xlu1 %v21484_v14, %s21287_s30  ;;  %860 = vmatprep.subr.mxu0 %v21428_v6 }
  0x9c   :  { %931 = vmatprep.subr.mxu1 %v21442_v8  ;;  %861 = vmatpush1.msra.mxu0 %v21423_v5  ;;  %v1297_v54 = vpop.permute.xlu0 %1296  ;;  %v1299_v55 = vpop.permute.xlu1 %1298 }
  0x9d   :  { %924 = vmatprep.mubr.f32.mxu0 %v21282_v2  ;;  %932 = vmatpush1.msra.mxu1 %v21437_v7  ;;  %v1324_v61 = vsel %vm1320_vm2, %v1295_v53, %v1297_v54  ;;  %v1325_v24 = vsel %vm1320_vm2, %v1297_v54, %v1299_v55 }
  0x9e   :  { %995 = vmatprep.mubr.f32.mxu1 %v21282_v2  ;;  %18181 = vmatmul.mubr.msk.f32.vlgmr.msra.gmra.mrb[0].mxu0 %vm143_vm1, %v60_v51 }
  0x9f   :  { %18182 = vmatmul.mubr.msk.f32.vlgmr.msra.gmra.mrb[4].mxu1 %vm143_vm1, %v60_v51  ;;  %1002 = vmatprep.subr.mxu0 %v21456_v10 }
  0xa0   :  { %1073 = vmatprep.subr.mxu1 %v21470_v12  ;;  %3275 = vrot.lane.b32.xlu0 %v21493_v15, %s21287_s30  ;;  %v1301_v56 = vpop.permute.xlu0 %1300  ;;  %v1303_v57 = vpop.permute.xlu1 %1302 }
  0xa1   :  { %3277 = vrot.lane.b32.xlu1 %v21498_v16, %s21287_s30  ;;  %1003 = vmatpush1.msra.mxu0 %v21451_v9  ;;  %v1326_v19 = vsel %vm1320_vm2, %v1299_v55, %v1301_v56  ;;  %v1327_v26 = vsel %vm1320_vm2, %v1301_v56, %v1303_v57 }
  0xa2   :  { %1074 = vmatpush1.msra.mxu1 %v21465_v11  ;;  %1066 = vmatprep.mubr.f32.mxu0 %v21282_v2 }
  0xa3   :  { %1137 = vmatprep.mubr.f32.mxu1 %v21282_v2  ;;  %1144 = vmatprep.subr.mxu0 %v21484_v14 }
  0xa4   :  { %1215 = vmatprep.subr.mxu1 %v21498_v16  ;;  %18183 = vmatmul.mubr.msk.f32.vlgmr.msra.gmra.mrb[2].mxu0 %vm143_vm1, %v60_v51  ;;  %v1305_v58 = vpop.permute.xlu0 %1304  ;;  %v1307_v59 = vpop.permute.xlu1 %1306 }
  0xa5   :  { %18184 = vmatmul.mubr.msk.f32.vlgmr.msra.gmra.mrb[6].mxu1 %vm143_vm1, %v60_v51  ;;  %1145 = vmatpush1.msra.mxu0 %v21479_v13  ;;  %v1328_v20 = vsel %vm1320_vm2, %v1303_v57, %v1305_v58  ;;  %v1329_v30 = vsel %vm1320_vm2, %v1305_v58, %v1307_v59 }
  0xa6   :  { %1216 = vmatpush1.msra.mxu1 %v21493_v15  ;;  %1355 = vmatprep.subr.mxu0 %v1322_v60 }
  0xa7   :  { %1426 = vmatprep.subr.mxu1 %v1324_v61  ;;  %3902 = vrot.lane.b32.xlu0 %v21393_v0, %s21288_s16 }
  0xa8   :  { %3904 = vrot.lane.b32.xlu1 %v21409_v3, %s21288_s16  ;;  %1208 = vmatprep.mubr.f32.mxu0 %v21282_v2  ;;  %v1309_v62 = vpop.permute.xlu0 %1308  ;;  %v1311_v63 = vpop.permute.xlu1 %1310 }
  0xa9   :  { %1279 = vmatprep.mubr.f32.mxu1 %v21282_v2  ;;  %18185 = vmatmul.mubr.msk.f32.vlgmr.msra.gmra.mrb[4].mxu0 %vm143_vm1, %v60_v51  ;;  %v1330_v25 = vsel %vm1320_vm2, %v1307_v59, %v1309_v62  ;;  %v1331_v33 = vsel %vm1320_vm2, %v1309_v62, %v1311_v63 }
  0xaa   :  { %18186 = vmatmul.mubr.msk.f32.vlgmr.msra.gmra.mrb[8].mxu1 %vm143_vm1, %v60_v51  ;;  %1356 = vmatpush1.msra.mxu0 %v1321_v17 }
  0xab   :  { %1427 = vmatpush1.msra.mxu1 %v1323_v18  ;;  %1497 = vmatprep.subr.mxu0 %v1326_v19 }
  0xac   :  { %3900 = vrot.lane.b32.xlu0 %v21398_v1, %s21288_s16  ;;  %3906 = vrot.lane.b32.xlu1 %v21414_v4, %s21288_s16  ;;  %v1313_v22 = vpop.permute.xlu0 %1312  ;;  %v1315_v23 = vpop.permute.xlu1 %1314 }
  0xad   :  { %1568 = vmatprep.subr.mxu1 %v1328_v20  ;;  %1419 = vmatprep.mubr.f32.mxu0 %v21282_v2  ;;  %v1332_v29 = vsel %vm1320_vm2, %v1311_v63, %v1313_v22  ;;  %v1333_v39 = vsel %vm1320_vm2, %v1313_v22, %v1315_v23 }
  0xae   :  { %1490 = vmatprep.mubr.f32.mxu1 %v21282_v2  ;;  %18188 = vmatmul.mubr.msk.f32.vlgmr.msra.gmra.mrb[6].mxu0 %vm143_vm1, %v21722_v21 }
  0xaf   :  { %18189 = vmatmul.mubr.msk.f32.vlgmr.msra.gmra.mrb[2].mxu1 %vm143_vm1, %v21722_v21  ;;  %1498 = vmatpush1.msra.mxu0 %v1325_v24 }
  0xb0   :  { %1569 = vmatpush1.msra.mxu1 %v1327_v26  ;;  %3908 = vrot.lane.b32.xlu0 %v21423_v5, %s21288_s16  ;;  %v1317_v27 = vpop.permute.xlu0 %1316  ;;  %v1319_v28 = vpop.permute.xlu1 %1318 }
  0xb1   :  { %3910 = vrot.lane.b32.xlu1 %v21428_v6, %s21288_s16  ;;  %1639 = vmatprep.subr.mxu0 %v1330_v25  ;;  %v1334_v34 = vsel %vm1320_vm2, %v1315_v23, %v1317_v27  ;;  %v1335_v35 = vsel %vm1320_vm2, %v1317_v27, %v1319_v28  ;;  %v21853_v25 = vld [vmem:[%s25632_s1 + $0x20] sm:$0xff] }
  0xb2   :  { %1561 = vmatprep.mubr.f32.mxu0 %v21282_v2  ;;  %1632 = vmatprep.mubr.f32.mxu1 %v21282_v2 }
  0xb3   :  { %18190 = vmatmul.mubr.msk.f32.vlgmr.msra.gmra.mrb[0].mxu0 %vm143_vm1, %v21722_v21  ;;  %18191 = vmatmul.mubr.msk.f32.vlgmr.msra.gmra.mrb[4].mxu1 %vm143_vm1, %v21722_v21 }
  0xb4   :  { %1640 = vmatpush1.msra.mxu0 %v1329_v30  ;;  %3912 = vrot.lane.b32.xlu0 %v21437_v7, %s21288_s16  ;;  %v1944_v31 = vpop.permute.xlu0 %1943  ;;  %v1946_v32 = vpop.permute.xlu1 %1945 }
  0xb5   :  { %3914 = vrot.lane.b32.xlu1 %v21442_v8, %s21288_s16  ;;  %1710 = vmatprep.subr.mxu1 %v1332_v29  ;;  %v1975_v38 = vsel %vm1973_vm3, %v1944_v31, %v1946_v32 }
  0xb6   :  { %1711 = vmatpush1.msra.mxu1 %v1331_v33  ;;  %1774 = vmatprep.mubr.f32.mxu1 %v21282_v2 }
  0xb7   :  { %1852 = vmatprep.subr.mxu1 %v1319_v28  ;;  %1703 = vmatprep.mubr.f32.mxu0 %v21282_v2 }
  0xb8   :  { %3916 = vrot.lane.b32.xlu0 %v21451_v9, %s21288_s16  ;;  %18193 = vmatmul.mubr.msk.f32.vlgmr.msra.gmra.mrb[6].mxu1 %vm143_vm1, %v21722_v21  ;;  %v1942_v36 = vpop.permute.xlu0 %1941  ;;  %v1948_v37 = vpop.permute.xlu1 %1947 }
  0xb9   :  { %3918 = vrot.lane.b32.xlu1 %v21456_v10, %s21288_s16  ;;  %1781 = vmatprep.subr.mxu0 %v1334_v34  ;;  %v1974_v40 = vsel %vm1973_vm3, %v1942_v36, %v1944_v31  ;;  %v1976_v44 = vsel %vm1973_vm3, %v1946_v32, %v1948_v37 }
  0xba   :  { %1853 = vmatpush1.msra.mxu1 %v1335_v35  ;;  %18192 = vmatmul.mubr.msk.f32.vlgmr.msra.gmra.mrb[2].mxu0 %vm143_vm1, %v21722_v21 }
  0xbb   :  { %1782 = vmatpush1.msra.mxu0 %v1333_v39  ;;  %1845 = vmatprep.mubr.f32.mxu0 %v21282_v2 }
  0xbc   :  { %3920 = vrot.lane.b32.xlu0 %v21465_v11, %s21288_s16  ;;  %2008 = vmatprep.subr.mxu0 %v1975_v38  ;;  %v1950_v41 = vpop.permute.xlu0 %1949  ;;  %v1952_v42 = vpop.permute.xlu1 %1951 }
  0xbd   :  { %3922 = vrot.lane.b32.xlu1 %v21470_v12, %s21288_s16  ;;  %1916 = vmatprep.mubr.f32.mxu1 %v21282_v2  ;;  %v1977_v43 = vsel %vm1973_vm3, %v1948_v37, %v1950_v41  ;;  %v1978_v49 = vsel %vm1973_vm3, %v1950_v41, %v1952_v42 }
  0xbe   :  { %18194 = vmatmul.mubr.msk.f32.vlgmr.msra.gmra.mrb[4].mxu0 %vm143_vm1, %v21722_v21  ;;  %2079 = vmatprep.subr.mxu1 %v1977_v43 }
  0xbf   :  { %2009 = vmatpush1.msra.mxu0 %v1974_v40  ;;  %18195 = vmatmul.mubr.msk.f32.vlgmr.msra.gmra.mrb[8].mxu1 %vm143_vm1, %v21722_v21 }
  0xc0   :  { %3924 = vrot.lane.b32.xlu0 %v21479_v13, %s21288_s16  ;;  %2080 = vmatpush1.msra.mxu1 %v1976_v44  ;;  %v1954_v46 = vpop.permute.xlu0 %1953  ;;  %v1956_v47 = vpop.permute.xlu1 %1955 }
  0xc1   :  { %3926 = vrot.lane.b32.xlu1 %v21484_v14, %s21288_s16  ;;  %2072 = vmatprep.mubr.f32.mxu0 %v21282_v2  ;;  %v1979_v48 = vsel %vm1973_vm3, %v1952_v42, %v1954_v46  ;;  %v1980_v53 = vsel %vm1973_vm3, %v1954_v46, %v1956_v47 }
  0xc2   :  { %2150 = vmatprep.subr.mxu0 %v1979_v48  ;;  %18197 = vmatmul.mubr.msk.f32.vlgmr.msra.gmra.mrb[6].mxu0 %vm143_vm1, %v21784_v45 }
  0xc3   :  { %2151 = vmatpush1.msra.mxu0 %v1978_v49  ;;  %2143 = vmatprep.mubr.f32.mxu1 %v21282_v2  ;;  %v21929_v49 = vld [vmem:[%s25632_s1 + $0x28] sm:$0xff] }
  0xc4   :  { %3928 = vrot.lane.b32.xlu0 %v21493_v15, %s21288_s16  ;;  %v1958_v50 = vpop.permute.xlu0 %1957  ;;  %v1960_v51 = vpop.permute.xlu1 %1959  ;;  %18198 = vmatmul.mubr.msk.f32.vlgmr.msra.gmra.mrb[2].mxu1 %vm143_vm1, %v21784_v45 }
  0xc5   :  { %3930 = vrot.lane.b32.xlu1 %v21498_v16, %s21288_s16  ;;  %v1981_v52 = vsel %vm1973_vm3, %v1956_v47, %v1958_v50  ;;  %2214 = vmatprep.mubr.f32.mxu0 %v21282_v2  ;;  %v1982_v57 = vsel %vm1973_vm3, %v1958_v50, %v1960_v51 }
  0xc6   :  { %2221 = vmatprep.subr.mxu1 %v1981_v52  ;;  %18199 = vmatmul.mubr.msk.f32.vlgmr.msra.gmra.mrb[0].mxu0 %vm143_vm1, %v21784_v45 }
  0xc7   :  { %2222 = vmatpush1.msra.mxu1 %v1980_v53  ;;  %2285 = vmatprep.mubr.f32.mxu1 %v21282_v2 }
  0xc8   :  { %4555 = vrot.lane.b32.xlu0 %v21393_v0, %s21289_s21  ;;  %v1962_v54 = vpop.permute.xlu0 %1961  ;;  %v1964_v55 = vpop.permute.xlu1 %1963  ;;  %18200 = vmatmul.mubr.msk.f32.vlgmr.msra.gmra.mrb[4].mxu1 %vm143_vm1, %v21784_v45 }
  0xc9   :  { %4557 = vrot.lane.b32.xlu1 %v21409_v3, %s21289_s21  ;;  %v1983_v56 = vsel %vm1973_vm3, %v1960_v51, %v1962_v54  ;;  %2427 = vmatprep.mubr.f32.mxu1 %v21282_v2  ;;  %v1984_v61 = vsel %vm1973_vm3, %v1962_v54, %v1964_v55  ;;  %v21291_v51 = vmov 0  }
  0xca   :  { %2292 = vmatprep.subr.mxu0 %v1983_v56  ;;  %2356 = vmatprep.mubr.f32.mxu0 %v21282_v2 }
  0xcb   :  { %2293 = vmatpush1.msra.mxu0 %v1982_v57  ;;  %20592 = vset.pattern.permute.xlu0 %v21291_v51  ;;  %v5857_v57 = vld [vmem:[%s25633_s2] sm:$0xff]  ;;  %s21303_s2 = smov 40  }
  0xcc   :  { %4553 = vrot.lane.b32.xlu0 %v21398_v1, %s21289_s21  ;;  %v1966_v58 = vpop.permute.xlu0 %1965  ;;  %v1968_v59 = vpop.permute.xlu1 %1967  ;;  %18201 = vmatmul.mubr.msk.f32.vlgmr.msra.gmra.mrb[2].mxu0 %vm143_vm1, %v21784_v45 }
  0xcd   :  { %4559 = vrot.lane.b32.xlu1 %v21414_v4, %s21289_s21  ;;  %v1985_v60 = vsel %vm1973_vm3, %v1964_v55, %v1966_v58  ;;  %2498 = vmatprep.mubr.f32.mxu0 %v21282_v2  ;;  %v1986_v19 = vsel %vm1973_vm3, %v1966_v58, %v1968_v59 }
  0xce   :  { %2363 = vmatprep.subr.mxu1 %v1985_v60  ;;  %20593 = vset.pattern.permute.xlu1 %v21291_v51  ;;  %v18232_v51 = vld [vmem:[%s25632_s1 + $0x38] sm:$0xff] }
  0xcf   :  { %2364 = vmatpush1.msra.mxu1 %v1984_v61 }
  0xd0   :  { %4561 = vrot.lane.b32.xlu0 %v21423_v5, %s21289_s21  ;;  %v1970_v62 = vpop.permute.xlu0 %1969  ;;  %v1972_v63 = vpop.permute.xlu1 %1971  ;;  %18202 = vmatmul.mubr.msk.f32.vlgmr.msra.gmra.mrb[6].mxu1 %vm143_vm1, %v21784_v45 }
  0xd1   :  { %4563 = vrot.lane.b32.xlu1 %v21428_v6, %s21289_s21  ;;  %2505 = vmatprep.subr.mxu1 %v1972_v63  ;;  %v1987_v17 = vsel %vm1973_vm3, %v1968_v59, %v1970_v62  ;;  %v1988_v18 = vsel %vm1973_vm3, %v1970_v62, %v1972_v63 }
  0xd2   :  { %2434 = vmatprep.subr.mxu0 %v1987_v17  ;;  %2506 = vmatpush1.msra.mxu1 %v1988_v18 }
  0xd3   :  { %2435 = vmatpush1.msra.mxu0 %v1986_v19  ;;  %2569 = vmatprep.mubr.f32.mxu1 %v21282_v2 }
  0xd4   :  { %4565 = vrot.lane.b32.xlu0 %v21437_v7, %s21289_s21  ;;  %v2597_v20 = vpop.permute.xlu0 %2596  ;;  %v2599_v21 = vpop.permute.xlu1 %2598  ;;  %18203 = vmatmul.mubr.msk.f32.vlgmr.msra.gmra.mrb[4].mxu0 %vm143_vm1, %v21784_v45 }
  0xd5   :  { %4567 = vrot.lane.b32.xlu1 %v21442_v8, %s21289_s21  ;;  %v2628_v22 = vsel %vm2626_vm4, %v2597_v20, %v2599_v21  ;;  %18204 = vmatmul.mubr.msk.f32.vlgmr.msra.gmra.mrb[8].mxu1 %vm143_vm1, %v21784_v45 }
  0xd6   :  { %2661 = vmatprep.subr.mxu0 %v2628_v22  ;;  %2725 = vmatprep.mubr.f32.mxu0 %v21282_v2 }
  0xd7   :  { %2796 = vmatprep.mubr.f32.mxu1 %v21282_v2 }
  0xd8   :  { %4569 = vrot.lane.b32.xlu0 %v21451_v9, %s21289_s21  ;;  %v2595_v23 = vpop.permute.xlu0 %2594  ;;  %v2601_v24 = vpop.permute.xlu1 %2600 }
  0xd9   :  { %4571 = vrot.lane.b32.xlu1 %v21456_v10, %s21289_s21  ;;  %v2627_v26 = vsel %vm2626_vm4, %v2595_v23, %v2597_v20  ;;  %v2629_v30 = vsel %vm2626_vm4, %v2599_v21, %v2601_v24 }
  0xda   :  { %2662 = vmatpush1.msra.mxu0 %v2627_v26 }
  0xdb   :  { %18206 = vmatmul.mubr.msk.f32.vlgmr.msra.gmra.mrb[6].mxu0 %vm143_vm1, %v21853_v25 }
  0xdc   :  { %4573 = vrot.lane.b32.xlu0 %v21465_v11, %s21289_s21  ;;  %v2603_v27 = vpop.permute.xlu0 %2602  ;;  %v2605_v28 = vpop.permute.xlu1 %2604  ;;  %2867 = vmatprep.mubr.f32.mxu0 %v21282_v2 }
  0xdd   :  { %4575 = vrot.lane.b32.xlu1 %v21470_v12, %s21289_s21  ;;  %v2630_v29 = vsel %vm2626_vm4, %v2601_v24, %v2603_v27  ;;  %v2631_v34 = vsel %vm2626_vm4, %v2603_v27, %v2605_v28 }
  0xde   :  { %2732 = vmatprep.subr.mxu1 %v2630_v29 }
  0xdf   :  { %2733 = vmatpush1.msra.mxu1 %v2629_v30 }
  0xe0   :  { %4577 = vrot.lane.b32.xlu0 %v21479_v13, %s21289_s21  ;;  %v2607_v31 = vpop.permute.xlu0 %2606  ;;  %v2609_v32 = vpop.permute.xlu1 %2608  ;;  %18207 = vmatmul.mubr.msk.f32.vlgmr.msra.gmra.mrb[2].mxu1 %vm143_vm1, %v21853_v25 }
  0xe1   :  { %4579 = vrot.lane.b32.xlu1 %v21484_v14, %s21289_s21  ;;  %v2632_v33 = vsel %vm2626_vm4, %v2605_v28, %v2607_v31  ;;  %2938 = vmatprep.mubr.f32.mxu1 %v21282_v2  ;;  %v2633_v38 = vsel %vm2626_vm4, %v2607_v31, %v2609_v32  ;;  %v18223_v28 = vld [vmem:[%s25632_s1 + $0x30] sm:$0xff] }
  0xe2   :  { %2803 = vmatprep.subr.mxu0 %v2632_v33 }
  0xe3   :  { %2804 = vmatpush1.msra.mxu0 %v2631_v34 }
  0xe4   :  { %4581 = vrot.lane.b32.xlu0 %v21493_v15, %s21289_s21  ;;  %v2611_v35 = vpop.permute.xlu0 %2610  ;;  %v2613_v36 = vpop.permute.xlu1 %2612  ;;  %18208 = vmatmul.mubr.msk.f32.vlgmr.msra.gmra.mrb[0].mxu0 %vm143_vm1, %v21853_v25 }
  0xe5   :  { %4583 = vrot.lane.b32.xlu1 %v21498_v16, %s21289_s21  ;;  %v2634_v37 = vsel %vm2626_vm4, %v2609_v32, %v2611_v35  ;;  %3009 = vmatprep.mubr.f32.mxu0 %v21282_v2  ;;  %v2635_v42 = vsel %vm2626_vm4, %v2611_v35, %v2613_v36 }
  0xe6   :  { %2874 = vmatprep.subr.mxu1 %v2634_v37 }
  0xe7   :  { %2875 = vmatpush1.msra.mxu1 %v2633_v38 }
  0xe8   :  { %5208 = vrot.lane.b32.xlu0 %v21393_v0, %s21290_s24  ;;  %v2615_v39 = vpop.permute.xlu0 %2614  ;;  %v2617_v40 = vpop.permute.xlu1 %2616  ;;  %18209 = vmatmul.mubr.msk.f32.vlgmr.msra.gmra.mrb[4].mxu1 %vm143_vm1, %v21853_v25 }
  0xe9   :  { %5210 = vrot.lane.b32.xlu1 %v21409_v3, %s21290_s24  ;;  %v2636_v41 = vsel %vm2626_vm4, %v2613_v36, %v2615_v39  ;;  %3080 = vmatprep.mubr.f32.mxu1 %v21282_v2  ;;  %v2637_v44 = vsel %vm2626_vm4, %v2615_v39, %v2617_v40 }
  0xea   :  { %2945 = vmatprep.subr.mxu0 %v2636_v41 }
  0xeb   :  { %2946 = vmatpush1.msra.mxu0 %v2635_v42 }
  0xec   :  { %5206 = vrot.lane.b32.xlu0 %v21398_v1, %s21290_s24  ;;  %v2619_v0 = vpop.permute.xlu0 %2618  ;;  %18210 = vmatmul.mubr.msk.f32.vlgmr.msra.gmra.mrb[2].mxu0 %vm143_vm1, %v21853_v25 }
  0xed   :  { %5212 = vrot.lane.b32.xlu1 %v21414_v4, %s21290_s24  ;;  %v2621_v43 = vpop.permute.xlu1 %2620  ;;  %v2638_v3 = vsel %vm2626_vm4, %v2617_v40, %v2619_v0  ;;  %3151 = vmatprep.mubr.f32.mxu0 %v21282_v2 }
  0xee   :  { %3016 = vmatprep.subr.mxu1 %v2638_v3  ;;  %v2639_v47 = vsel %vm2626_vm4, %v2619_v0, %v2621_v43 }
  0xef   :  { %3017 = vmatpush1.msra.mxu1 %v2637_v44 }
  0xf0   :  { %5214 = vrot.lane.b32.xlu0 %v21423_v5, %s21290_s24  ;;  %v2623_v1 = vpop.permute.xlu0 %2622  ;;  %18211 = vmatmul.mubr.msk.f32.vlgmr.msra.gmra.mrb[6].mxu1 %vm143_vm1, %v21853_v25 }
  0xf1   :  { %5216 = vrot.lane.b32.xlu1 %v21428_v6, %s21290_s24  ;;  %v2625_v4 = vpop.permute.xlu1 %2624  ;;  %v2640_v45 = vsel %vm2626_vm4, %v2621_v43, %v2623_v1  ;;  %3222 = vmatprep.mubr.f32.mxu1 %v21282_v2 }
  0xf2   :  { %3158 = vmatprep.subr.mxu1 %v2625_v4  ;;  %3087 = vmatprep.subr.mxu0 %v2640_v45  ;;  %v2641_v46 = vsel %vm2626_vm4, %v2623_v1, %v2625_v4 }
  0xf3   :  { %3159 = vmatpush1.msra.mxu1 %v2641_v46  ;;  %3088 = vmatpush1.msra.mxu0 %v2639_v47 }
  0xf4   :  { %5218 = vrot.lane.b32.xlu0 %v21437_v7, %s21290_s24  ;;  %v3250_v5 = vpop.permute.xlu0 %3249  ;;  %18212 = vmatmul.mubr.msk.f32.vlgmr.msra.gmra.mrb[4].mxu0 %vm143_vm1, %v21853_v25 }
  0xf5   :  { %5220 = vrot.lane.b32.xlu1 %v21442_v8, %s21290_s24  ;;  %v3252_v6 = vpop.permute.xlu1 %3251  ;;  %18213 = vmatmul.mubr.msk.f32.vlgmr.msra.gmra.mrb[8].mxu1 %vm143_vm1, %v21853_v25 }
  0xf6   :  { %v3281_v48 = vsel %vm3279_vm5, %v3250_v5, %v3252_v6  ;;  %3378 = vmatprep.mubr.f32.mxu0 %v21282_v2  ;;  %3449 = vmatprep.mubr.f32.mxu1 %v21282_v2 }
  0xf7   :  { %3314 = vmatprep.subr.mxu0 %v3281_v48 }
  0xf8   :  { %5222 = vrot.lane.b32.xlu0 %v21451_v9, %s21290_s24  ;;  %v3248_v7 = vpop.permute.xlu0 %3247 }
  0xf9   :  { %5224 = vrot.lane.b32.xlu1 %v21456_v10, %s21290_s24  ;;  %v3280_v8 = vsel %vm3279_vm5, %v3248_v7, %v3250_v5  ;;  %v3254_v50 = vpop.permute.xlu1 %3253 }
  0xfa   :  { %3315 = vmatpush1.msra.mxu0 %v3280_v8  ;;  %v3282_v53 = vsel %vm3279_vm5, %v3252_v6, %v3254_v50 }
  0xfb   :  { %18215 = vmatmul.mubr.msk.f32.vlgmr.msra.gmra.mrb[6].mxu0 %vm143_vm1, %v21929_v49 }
  0xfc   :  { %5226 = vrot.lane.b32.xlu0 %v21465_v11, %s21290_s24  ;;  %v3256_v9 = vpop.permute.xlu0 %3255  ;;  %3520 = vmatprep.mubr.f32.mxu0 %v21282_v2 }
  0xfd   :  { %5228 = vrot.lane.b32.xlu1 %v21470_v12, %s21290_s24  ;;  %v3258_v52 = vpop.permute.xlu1 %3257  ;;  %v3283_v10 = vsel %vm3279_vm5, %v3254_v50, %v3256_v9 }
  0xfe   :  { %3385 = vmatprep.subr.mxu1 %v3283_v10  ;;  %v3284_v55 = vsel %vm3279_vm5, %v3256_v9, %v3258_v52 }
  0xff   :  { %3386 = vmatpush1.msra.mxu1 %v3282_v53 }
 0x100   :  { %5230 = vrot.lane.b32.xlu0 %v21479_v13, %s21290_s24  ;;  %v3260_v54 = vpop.permute.xlu0 %3259  ;;  %18216 = vmatmul.mubr.msk.f32.vlgmr.msra.gmra.mrb[2].mxu1 %vm143_vm1, %v21929_v49 }
 0x101   :  { %5232 = vrot.lane.b32.xlu1 %v21484_v14, %s21290_s24  ;;  %v3262_v11 = vpop.permute.xlu1 %3261  ;;  %v3285_v12 = vsel %vm3279_vm5, %v3258_v52, %v3260_v54  ;;  %3591 = vmatprep.mubr.f32.mxu1 %v21282_v2 }
 0x102   :  { %3456 = vmatprep.subr.mxu0 %v3285_v12  ;;  %v3286_v58 = vsel %vm3279_vm5, %v3260_v54, %v3262_v11 }
 0x103   :  { %3457 = vmatpush1.msra.mxu0 %v3284_v55 }
 0x104   :  { %5234 = vrot.lane.b32.xlu0 %v21493_v15, %s21290_s24  ;;  %v3264_v13 = vpop.permute.xlu0 %3263  ;;  %18217 = vmatmul.mubr.msk.f32.vlgmr.msra.gmra.mrb[0].mxu0 %vm143_vm1, %v21929_v49 }
 0x105   :  { %5236 = vrot.lane.b32.xlu1 %v21498_v16, %s21290_s24  ;;  %v3266_v14 = vpop.permute.xlu1 %3265  ;;  %v3287_v56 = vsel %vm3279_vm5, %v3262_v11, %v3264_v13  ;;  %3662 = vmatprep.mubr.f32.mxu0 %v21282_v2 }
 0x106   :  { %3527 = vmatprep.subr.mxu1 %v3287_v56  ;;  %v3288_v60 = vsel %vm3279_vm5, %v3264_v13, %v3266_v14 }
 0x107   :  { %3528 = vmatpush1.msra.mxu1 %v3286_v58 }
 0x108   :  { %v3268_v15 = vpop.permute.xlu0 %3267  ;;  %18218 = vmatmul.mubr.msk.f32.vlgmr.msra.gmra.mrb[4].mxu1 %vm143_vm1, %v21929_v49  ;;  %5860 = vperm.xlu0 %20592, %v5857_v57  }
 0x109   :  { %v3270_v59 = vpop.permute.xlu1 %3269  ;;  %v3289_v16 = vsel %vm3279_vm5, %v3266_v14, %v3268_v15  ;;  %3733 = vmatprep.mubr.f32.mxu1 %v21282_v2 }
 0x10a   :  { %3598 = vmatprep.subr.mxu0 %v3289_v16  ;;  %v3290_v17 = vsel %vm3279_vm5, %v3268_v15, %v3270_v59 }
 0x10b   :  { %3599 = vmatpush1.msra.mxu0 %v3288_v60 }
 0x10c   :  { %v3272_v61 = vpop.permute.xlu0 %3271  ;;  %18219 = vmatmul.mubr.msk.f32.vlgmr.msra.gmra.mrb[2].mxu0 %vm143_vm1, %v21929_v49 }
 0x10d   :  { %v3274_v62 = vpop.permute.xlu1 %3273  ;;  %v3291_v63 = vsel %vm3279_vm5, %v3270_v59, %v3272_v61  ;;  %3804 = vmatprep.mubr.f32.mxu0 %v21282_v2 }
 0x10e   :  { %3669 = vmatprep.subr.mxu1 %v3291_v63  ;;  %v3292_v22 = vsel %vm3279_vm5, %v3272_v61, %v3274_v62 }
 0x10f   :  { %3670 = vmatpush1.msra.mxu1 %v3290_v17 }
 0x110   :  { %18220 = vmatmul.mubr.msk.f32.vlgmr.msra.gmra.mrb[6].mxu1 %vm143_vm1, %v21929_v49 }
 0x111   :  { %3875 = vmatprep.mubr.f32.mxu1 %v21282_v2 }
 0x112   :  { %v3276_v18 = vpop.permute.xlu0 %3275 }
 0x113   :  { %v3278_v19 = vpop.permute.xlu1 %3277  ;;  %v3293_v20 = vsel %vm3279_vm5, %v3274_v62, %v3276_v18 }
 0x114   :  { %3811 = vmatprep.subr.mxu1 %v3278_v19  ;;  %3740 = vmatprep.subr.mxu0 %v3293_v20  ;;  %v3294_v21 = vsel %vm3279_vm5, %v3276_v18, %v3278_v19 }
 0x115   :  { %3812 = vmatpush1.msra.mxu1 %v3294_v21  ;;  %3741 = vmatpush1.msra.mxu0 %v3292_v22 }
 0x116   :  { %18221 = vmatmul.mubr.msk.f32.vlgmr.msra.gmra.mrb[4].mxu0 %vm143_vm1, %v21929_v49  ;;  %18222 = vmatmul.mubr.msk.f32.vlgmr.msra.gmra.mrb[8].mxu1 %vm143_vm1, %v21929_v49 }
 0x117   :  { %4031 = vmatprep.mubr.f32.mxu0 %v21282_v2  ;;  %4102 = vmatprep.mubr.f32.mxu1 %v21282_v2 }
 0x119   :  { %v3903_v23 = vpop.permute.xlu0 %3902 }
 0x11a   :  { %v3905_v24 = vpop.permute.xlu1 %3904 }
 0x11b   :  { %v3934_v25 = vsel %vm3932_vm6, %v3903_v23, %v3905_v24 }
 0x11c   :  { %3967 = vmatprep.subr.mxu0 %v3934_v25 }
 0x11e   :  { %v3901_v26 = vpop.permute.xlu0 %3900  ;;  %v3907_v27 = vpop.permute.xlu1 %3906 }
 0x11f   :  { %v3933_v29 = vsel %vm3932_vm6, %v3901_v26, %v3903_v23  ;;  %v3935_v33 = vsel %vm3932_vm6, %v3905_v24, %v3907_v27 }
 0x120   :  { %3968 = vmatpush1.msra.mxu0 %v3933_v29 }
 0x121   :  { %18224 = vmatmul.mubr.msk.f32.vlgmr.msra.gmra.mrb[6].mxu0 %vm143_vm1, %v18223_v28 }
 0x122   :  { %v3909_v30 = vpop.permute.xlu0 %3908  ;;  %4173 = vmatprep.mubr.f32.mxu0 %v21282_v2 }
 0x123   :  { %v3911_v31 = vpop.permute.xlu1 %3910  ;;  %v3936_v32 = vsel %vm3932_vm6, %v3907_v27, %v3909_v30 }
 0x124   :  { %4038 = vmatprep.subr.mxu1 %v3936_v32  ;;  %v3937_v37 = vsel %vm3932_vm6, %v3909_v30, %v3911_v31  ;;  %v18241_v30 = vld [vmem:[%s25632_s1 + $0x40] sm:$0xff]  ;;  %s21312_s1 = smov 124  }
 0x125   :  { %4039 = vmatpush1.msra.mxu1 %v3935_v33 }
 0x126   :  { %v3913_v34 = vpop.permute.xlu0 %3912  ;;  %18225 = vmatmul.mubr.msk.f32.vlgmr.msra.gmra.mrb[2].mxu1 %vm143_vm1, %v18223_v28 }
 0x127   :  { %v3915_v35 = vpop.permute.xlu1 %3914  ;;  %v3938_v36 = vsel %vm3932_vm6, %v3911_v31, %v3913_v34  ;;  %4244 = vmatprep.mubr.f32.mxu1 %v21282_v2 }
 0x128   :  { %4109 = vmatprep.subr.mxu0 %v3938_v36  ;;  %v3939_v41 = vsel %vm3932_vm6, %v3913_v34, %v3915_v35 }
 0x129   :  { %4110 = vmatpush1.msra.mxu0 %v3937_v37 }
 0x12a   :  { %v3917_v38 = vpop.permute.xlu0 %3916  ;;  %18226 = vmatmul.mubr.msk.f32.vlgmr.msra.gmra.mrb[0].mxu0 %vm143_vm1, %v18223_v28 }
 0x12b   :  { %v3919_v39 = vpop.permute.xlu1 %3918  ;;  %v3940_v40 = vsel %vm3932_vm6, %v3915_v35, %v3917_v38  ;;  %4315 = vmatprep.mubr.f32.mxu0 %v21282_v2 }
 0x12c   :  { %4180 = vmatprep.subr.mxu1 %v3940_v40  ;;  %v3941_v3 = vsel %vm3932_vm6, %v3917_v38, %v3919_v39 }
 0x12d   :  { %4181 = vmatpush1.msra.mxu1 %v3939_v41 }
 0x12e   :  { %v3921_v42 = vpop.permute.xlu0 %3920  ;;  %18227 = vmatmul.mubr.msk.f32.vlgmr.msra.gmra.mrb[4].mxu1 %vm143_vm1, %v18223_v28 }
 0x12f   :  { %v3923_v0 = vpop.permute.xlu1 %3922  ;;  %v3942_v43 = vsel %vm3932_vm6, %v3919_v39, %v3921_v42  ;;  %4386 = vmatprep.mubr.f32.mxu1 %v21282_v2 }
 0x130   :  { %4251 = vmatprep.subr.mxu0 %v3942_v43  ;;  %v3943_v45 = vsel %vm3932_vm6, %v3921_v42, %v3923_v0 }
 0x131   :  { %4252 = vmatpush1.msra.mxu0 %v3941_v3 }
 0x132   :  { %v3925_v44 = vpop.permute.xlu0 %3924  ;;  %18228 = vmatmul.mubr.msk.f32.vlgmr.msra.gmra.mrb[2].mxu0 %vm143_vm1, %v18223_v28 }
 0x133   :  { %v3927_v1 = vpop.permute.xlu1 %3926  ;;  %v3944_v4 = vsel %vm3932_vm6, %v3923_v0, %v3925_v44  ;;  %4457 = vmatprep.mubr.f32.mxu0 %v21282_v2 }
 0x134   :  { %4322 = vmatprep.subr.mxu1 %v3944_v4  ;;  %v3945_v48 = vsel %vm3932_vm6, %v3925_v44, %v3927_v1 }
 0x135   :  { %4323 = vmatpush1.msra.mxu1 %v3943_v45 }
 0x136   :  { %v3929_v46 = vpop.permute.xlu0 %3928  ;;  %18229 = vmatmul.mubr.msk.f32.vlgmr.msra.gmra.mrb[6].mxu1 %vm143_vm1, %v18223_v28 }
 0x137   :  { %v3931_v47 = vpop.permute.xlu1 %3930  ;;  %v3946_v5 = vsel %vm3932_vm6, %v3927_v1, %v3929_v46  ;;  %4528 = vmatprep.mubr.f32.mxu1 %v21282_v2 }
 0x138   :  { %4464 = vmatprep.subr.mxu1 %v3931_v47  ;;  %4393 = vmatprep.subr.mxu0 %v3946_v5  ;;  %v3947_v6 = vsel %vm3932_vm6, %v3929_v46, %v3931_v47 }
 0x139   :  { %4465 = vmatpush1.msra.mxu1 %v3947_v6  ;;  %4394 = vmatpush1.msra.mxu0 %v3945_v48 }
 0x13a   :  { %v4556_v7 = vpop.permute.xlu0 %4555  ;;  %18230 = vmatmul.mubr.msk.f32.vlgmr.msra.gmra.mrb[4].mxu0 %vm143_vm1, %v18223_v28  ;;  %18231 = vmatmul.mubr.msk.f32.vlgmr.msra.gmra.mrb[8].mxu1 %vm143_vm1, %v18223_v28 }
 0x13b   :  { %v4558_v49 = vpop.permute.xlu1 %4557  ;;  %4684 = vmatprep.mubr.f32.mxu0 %v21282_v2  ;;  %4755 = vmatprep.mubr.f32.mxu1 %v21282_v2 }
 0x13c   :  { %v4587_v8 = vsel %vm4585_vm7, %v4556_v7, %v4558_v49 }
 0x13d   :  { %4620 = vmatprep.subr.mxu0 %v4587_v8 }
 0x13e   :  { %v4554_v50 = vpop.permute.xlu0 %4553 }
 0x13f   :  { %v4586_v9 = vsel %vm4585_vm7, %v4554_v50, %v4556_v7  ;;  %v4560_v52 = vpop.permute.xlu1 %4559 }
 0x140   :  { %4621 = vmatpush1.msra.mxu0 %v4586_v9  ;;  %v4588_v11 = vsel %vm4585_vm7, %v4558_v49, %v4560_v52 }
 0x141   :  { %18233 = vmatmul.mubr.msk.f32.vlgmr.msra.gmra.mrb[6].mxu0 %vm143_vm1, %v18232_v51 }
 0x142   :  { %v4562_v10 = vpop.permute.xlu0 %4561  ;;  %4826 = vmatprep.mubr.f32.mxu0 %v21282_v2 }
 0x143   :  { %v4564_v53 = vpop.permute.xlu1 %4563  ;;  %v4589_v54 = vsel %vm4585_vm7, %v4560_v52, %v4562_v10 }
 0x144   :  { %4691 = vmatprep.subr.mxu1 %v4589_v54  ;;  %v4590_v14 = vsel %vm4585_vm7, %v4562_v10, %v4564_v53 }
 0x145   :  { %4692 = vmatpush1.msra.mxu1 %v4588_v11 }
 0x146   :  { %v4566_v12 = vpop.permute.xlu0 %4565  ;;  %18234 = vmatmul.mubr.msk.f32.vlgmr.msra.gmra.mrb[2].mxu1 %vm143_vm1, %v18232_v51 }
 0x147   :  { %v4568_v55 = vpop.permute.xlu1 %4567  ;;  %v4591_v13 = vsel %vm4585_vm7, %v4564_v53, %v4566_v12  ;;  %4897 = vmatprep.mubr.f32.mxu1 %v21282_v2 }
 0x148   :  { %4762 = vmatprep.subr.mxu0 %v4591_v13  ;;  %v4592_v15 = vsel %vm4585_vm7, %v4566_v12, %v4568_v55 }
 0x149   :  { %4763 = vmatpush1.msra.mxu0 %v4590_v14 }
 0x14a   :  { %v4570_v56 = vpop.permute.xlu0 %4569  ;;  %18235 = vmatmul.mubr.msk.f32.vlgmr.msra.gmra.mrb[0].mxu0 %vm143_vm1, %v18232_v51 }
 0x14b   :  { %v4572_v57 = vpop.permute.xlu1 %4571  ;;  %v4593_v58 = vsel %vm4585_vm7, %v4568_v55, %v4570_v56  ;;  %4968 = vmatprep.mubr.f32.mxu0 %v21282_v2 }
 0x14c   :  { %4833 = vmatprep.subr.mxu1 %v4593_v58  ;;  %v4594_v62 = vsel %vm4585_vm7, %v4570_v56, %v4572_v57 }
 0x14d   :  { %4834 = vmatpush1.msra.mxu1 %v4592_v15 }
 0x14e   :  { %v4574_v59 = vpop.permute.xlu0 %4573  ;;  %18236 = vmatmul.mubr.msk.f32.vlgmr.msra.gmra.mrb[4].mxu1 %vm143_vm1, %v18232_v51 }
 0x14f   :  { %v4576_v16 = vpop.permute.xlu1 %4575  ;;  %v4595_v60 = vsel %vm4585_vm7, %v4572_v57, %v4574_v59  ;;  %5039 = vmatprep.mubr.f32.mxu1 %v21282_v2  ;;  %v22040_v61 = vpop.f32.mrb[0].mxu1 }
 0x150   :  { %4904 = vmatprep.subr.mxu0 %v4595_v60  ;;  %v22043_v63 = vpop.f32.mrb[1].mxu1  ;;  %v4596_v20 = vsel %vm4585_vm7, %v4574_v59, %v4576_v16 }
 0x151   :  { %4905 = vmatpush1.msra.mxu0 %v4594_v62 }
 0x152   :  { %v4578_v17 = vpop.permute.xlu0 %4577  ;;  %18237 = vmatmul.mubr.msk.f32.vlgmr.msra.gmra.mrb[2].mxu0 %vm143_vm1, %v18232_v51 }
 0x153   :  { %v4580_v18 = vpop.permute.xlu1 %4579  ;;  %v4597_v19 = vsel %vm4585_vm7, %v4576_v16, %v4578_v17  ;;  %5110 = vmatprep.mubr.f32.mxu0 %v21282_v2 }
 0x154   :  { %4975 = vmatprep.subr.mxu1 %v4597_v19  ;;  %v4598_v25 = vsel %vm4585_vm7, %v4578_v17, %v4580_v18 }
 0x155   :  { %4976 = vmatpush1.msra.mxu1 %v4596_v20 }
 0x156   :  { %v4582_v21 = vpop.permute.xlu0 %4581  ;;  %18238 = vmatmul.mubr.msk.f32.vlgmr.msra.gmra.mrb[6].mxu1 %vm143_vm1, %v18232_v51 }
 0x157   :  { %v4584_v22 = vpop.permute.xlu1 %4583  ;;  %v4599_v23 = vsel %vm4585_vm7, %v4580_v18, %v4582_v21  ;;  %5181 = vmatprep.mubr.f32.mxu1 %v21282_v2 }
 0x158   :  { %5117 = vmatprep.subr.mxu1 %v4584_v22  ;;  %5046 = vmatprep.subr.mxu0 %v4599_v23  ;;  %v4600_v24 = vsel %vm4585_vm7, %v4582_v21, %v4584_v22 }
 0x159   :  { %5118 = vmatpush1.msra.mxu1 %v4600_v24  ;;  %5047 = vmatpush1.msra.mxu0 %v4598_v25 }
 0x15a   :  { %v5209_v26 = vpop.permute.xlu0 %5208  ;;  %18239 = vmatmul.mubr.msk.f32.vlgmr.msra.gmra.mrb[4].mxu0 %vm143_vm1, %v18232_v51  ;;  %18240 = vmatmul.mubr.msk.f32.vlgmr.msra.gmra.mrb[8].mxu1 %vm143_vm1, %v18232_v51 }
 0x15b   :  { %v5211_v27 = vpop.permute.xlu1 %5210  ;;  %5337 = vmatprep.mubr.f32.mxu0 %v21282_v2  ;;  %5408 = vmatprep.mubr.f32.mxu1 %v21282_v2 }
 0x15c   :  { %v5240_v28 = vsel %vm5238_vm8, %v5209_v26, %v5211_v27 }
 0x15d   :  { %5273 = vmatprep.subr.mxu0 %v5240_v28 }
 0x15e   :  { %v5207_v29 = vpop.permute.xlu0 %5206 }
 0x15f   :  { %v5239_v31 = vsel %vm5238_vm8, %v5207_v29, %v5209_v26  ;;  %v5213_v32 = vpop.permute.xlu1 %5212 }
 0x160   :  { %5274 = vmatpush1.msra.mxu0 %v5239_v31  ;;  %v5241_v36 = vsel %vm5238_vm8, %v5211_v27, %v5213_v32 }
 0x161   :  { %18242 = vmatmul.mubr.msk.f32.vlgmr.msra.gmra.mrb[6].mxu0 %vm143_vm1, %v18241_v30 }
 0x162   :  { %v5215_v33 = vpop.permute.xlu0 %5214  ;;  %5479 = vmatprep.mubr.f32.mxu0 %v21282_v2 }
 0x163   :  { %v5217_v34 = vpop.permute.xlu1 %5216  ;;  %v5242_v35 = vsel %vm5238_vm8, %v5213_v32, %v5215_v33 }
 0x164   :  { %5344 = vmatprep.subr.mxu1 %v5242_v35  ;;  %v5243_v40 = vsel %vm5238_vm8, %v5215_v33, %v5217_v34 }
 0x165   :  { %5345 = vmatpush1.msra.mxu1 %v5241_v36 }
 0x166   :  { %v5219_v37 = vpop.permute.xlu0 %5218  ;;  %18243 = vmatmul.mubr.msk.f32.vlgmr.msra.gmra.mrb[2].mxu1 %vm143_vm1, %v18241_v30 }
 0x167   :  { %v5221_v38 = vpop.permute.xlu1 %5220  ;;  %v5244_v39 = vsel %vm5238_vm8, %v5217_v34, %v5219_v37  ;;  %5550 = vmatprep.mubr.f32.mxu1 %v21282_v2 }
 0x168   :  { %5415 = vmatprep.subr.mxu0 %v5244_v39  ;;  %v5245_v43 = vsel %vm5238_vm8, %v5219_v37, %v5221_v38 }
 0x169   :  { %5416 = vmatpush1.msra.mxu0 %v5243_v40 }
 0x16a   :  { %v5223_v41 = vpop.permute.xlu0 %5222  ;;  %18244 = vmatmul.mubr.msk.f32.vlgmr.msra.gmra.mrb[0].mxu0 %vm143_vm1, %v18241_v30 }
 0x16b   :  { %v5225_v42 = vpop.permute.xlu1 %5224  ;;  %v5246_v0 = vsel %vm5238_vm8, %v5221_v38, %v5223_v41  ;;  %5621 = vmatprep.mubr.f32.mxu0 %v21282_v2 }
 0x16c   :  { %5486 = vmatprep.subr.mxu1 %v5246_v0  ;;  %v5247_v4 = vsel %vm5238_vm8, %v5223_v41, %v5225_v42 }
 0x16d   :  { %5487 = vmatpush1.msra.mxu1 %v5245_v43 }
 0x16e   :  { %v5227_v3 = vpop.permute.xlu0 %5226  ;;  %18245 = vmatmul.mubr.msk.f32.vlgmr.msra.gmra.mrb[4].mxu1 %vm143_vm1, %v18241_v30 }
 0x16f   :  { %v5229_v44 = vpop.permute.xlu1 %5228  ;;  %v5248_v1 = vsel %vm5238_vm8, %v5225_v42, %v5227_v3  ;;  %5692 = vmatprep.mubr.f32.mxu1 %v21282_v2 }
 0x170   :  { %5557 = vmatprep.subr.mxu0 %v5248_v1  ;;  %v5249_v5 = vsel %vm5238_vm8, %v5227_v3, %v5229_v44 }
 0x171   :  { %5558 = vmatpush1.msra.mxu0 %v5247_v4 }
 0x172   :  { %v5231_v45 = vpop.permute.xlu0 %5230  ;;  %18246 = vmatmul.mubr.msk.f32.vlgmr.msra.gmra.mrb[2].mxu0 %vm143_vm1, %v18241_v30 }
 0x173   :  { %v5233_v46 = vpop.permute.xlu1 %5232  ;;  %v5250_v47 = vsel %vm5238_vm8, %v5229_v44, %v5231_v45  ;;  %5763 = vmatprep.mubr.f32.mxu0 %v21282_v2 }
 0x174   :  { %5628 = vmatprep.subr.mxu1 %v5250_v47  ;;  %v5251_v48 = vsel %vm5238_vm8, %v5231_v45, %v5233_v46  ;;  %v22253_v47 = vld [vmem:[%s25634_s3 + $0x10] sm:$0xff] }
 0x175   :  { %5629 = vmatpush1.msra.mxu1 %v5249_v5 }
 0x176   :  { %v5235_v6 = vpop.permute.xlu0 %5234  ;;  %18247 = vmatmul.mubr.msk.f32.vlgmr.msra.gmra.mrb[6].mxu1 %vm143_vm1, %v18241_v30 }
 0x177   :  { %v5237_v7 = vpop.permute.xlu1 %5236  ;;  %v5252_v49 = vsel %vm5238_vm8, %v5233_v46, %v5235_v6  ;;  %5834 = vmatprep.mubr.f32.mxu1 %v21282_v2 }
 0x178   :  { %5699 = vmatprep.subr.mxu0 %v5252_v49  ;;  %5770 = vmatprep.subr.mxu1 %v5237_v7  ;;  %v5253_v8 = vsel %vm5238_vm8, %v5235_v6, %v5237_v7 }
 0x179   :  { %5700 = vmatpush1.msra.mxu0 %v5251_v48  ;;  %5771 = vmatpush1.msra.mxu1 %v5253_v8  ;;  %v22264_v48 = vld [vmem:[%s25634_s3 + $0x18] sm:$0xff] }
 0x17a   :  { %18248 = vmatmul.mubr.msk.f32.vlgmr.msra.gmra.mrb[4].mxu0 %vm143_vm1, %v18241_v30  ;;  %18249 = vmatmul.mubr.msk.f32.vlgmr.msra.gmra.mrb[8].mxu1 %vm143_vm1, %v18241_v30 }
 0x17b   :  { %6126 = vmatprep.mubr.f32.mxu1 %v21282_v2  ;;  %6049 = vmatprep.mubr.f32.mxu0 %v21282_v2 }
 0x187   :  { %v5861_v10 = vpop.permute.xlu0 %5860 }
 0x234   :  { %v5339_v50 = vpop.f32.mrb[6].mxu0 }
 0x235   :  { %v20110_v51 = vadd.f32 %v5339_v50, %v22040_v61  ;;  %v5341_v9 = vpop.f32.mrb[7].mxu0 }
 0x236   :  { %v20111_v52 = vadd.f32 %v5341_v9, %v22043_v63 }
 0x237   :  { %v5863_v25 = vadd.f32 %v20110_v51, %v5861_v10 }
 0x238   :  { %v5864_v19 = vadd.f32 %v20111_v52, %v5861_v10 }
 0x239   :  { %v5410_v53 = vpop.f32.mrb[2].mxu1  ;;  %v22124_v33 = vmax.f32 %v5863_v25, 0.0 }
 0x23a   :  { %v5865_v54 = vadd.f32 %v5861_v10, %v5410_v53  ;;  %v5412_v11 = vpop.f32.mrb[3].mxu1  ;;  %v22116_v24 = vmax.f32 %v5864_v19, 0.0 }
 0x23b   :  { %v5866_v56 = vadd.f32 %v5861_v10, %v5412_v11 }
 0x23c   :  { %v22094_v12 = vmax.f32 %v5865_v54, 0.0 }
 0x23d   :  { %v5481_v55 = vpop.f32.mrb[0].mxu0  ;;  %v22102_v59 = vmax.f32 %v5866_v56, 0.0 }
 0x23e   :  { %v5867_v13 = vadd.f32 %v5861_v10, %v5481_v55  ;;  %5920 = vrot.lane.b32.xlu0 %v22094_v12, %s21283_s29  ;;  %v5483_v14 = vpop.f32.mrb[1].mxu0 }
 0x23f   :  { %v5868_v34 = vadd.f32 %v5861_v10, %v5483_v14 }
 0x240   :  { %v22098_v57 = vmax.f32 %v5867_v13, 0.0 }
 0x241   :  { %v5552_v58 = vpop.f32.mrb[4].mxu1  ;;  %v22138_v38 = vmax.f32 %v5868_v34, 0.0 }
 0x242   :  { %5924 = vrot.lane.b32.xlu1 %v22098_v57, %s21283_s29  ;;  %v5554_v15 = vpop.f32.mrb[5].mxu1  ;;  %v5869_v16 = vadd.f32 %v5861_v10, %v5552_v58 }
 0x243   :  { %v5870_v17 = vadd.f32 %v5861_v10, %v5554_v15 }
 0x244   :  { %v22106_v63 = vmax.f32 %v5869_v16, 0.0 }
 0x245   :  { %v5623_v60 = vpop.f32.mrb[2].mxu0  ;;  %v22114_v22 = vmax.f32 %v5870_v17, 0.0 }
 0x246   :  { %v5871_v61 = vadd.f32 %v5861_v10, %v5623_v60  ;;  %5922 = vrot.lane.b32.xlu1 %v22102_v59, %s21283_s29  ;;  %v5625_v62 = vpop.f32.mrb[3].mxu0 }
 0x247   :  { %v5872_v39 = vadd.f32 %v5861_v10, %v5625_v62 }
 0x248   :  { %v22108_v18 = vmax.f32 %v5871_v61, 0.0 }
 0x249   :  { %v5694_v20 = vpop.f32.mrb[6].mxu1  ;;  %v22146_v42 = vmax.f32 %v5872_v39, 0.0 }
 0x24a   :  { %5928 = vrot.lane.b32.xlu1 %v22106_v63, %s21283_s29  ;;  %5932 = vrot.lane.b32.xlu0 %v22108_v18, %s21283_s29  ;;  %v5696_v21 = vpop.f32.mrb[7].mxu1  ;;  %v5873_v30 = vadd.f32 %v5861_v10, %v5694_v20 }
 0x24b   :  { %v5874_v23 = vadd.f32 %v5861_v10, %v5696_v21 }
 0x24c   :  { %v22130_v35 = vmax.f32 %v5873_v30, 0.0  ;;  %v22376_v30 = vld [vmem:[%s25634_s3 + $0x8] sm:$0xff] }
 0x24d   :  { %v5765_v26 = vpop.f32.mrb[4].mxu0  ;;  %v5836_v27 = vpop.f32.mrb[8].mxu1  ;;  %v22122_v31 = vmax.f32 %v5874_v23, 0.0 }
 0x24e   :  { %5930 = vrot.lane.b32.xlu1 %v22114_v22, %s21283_s29  ;;  %5918 = vrot.lane.b32.xlu0 %v22116_v24, %s21283_s29  ;;  %v5767_v28 = vpop.f32.mrb[5].mxu0  ;;  %v5838_v29 = vpop.f32.mrb[9].mxu1  ;;  %v5875_v32 = vadd.f32 %v5861_v10, %v5765_v26  ;;  %v5877_v37 = vadd.f32 %v5861_v10, %v5836_v27  ;;  %v22355_v27 = vld [vmem:[%s25634_s3] sm:$0xff] }
 0x24f   :  { %v5878_v41 = vadd.f32 %v5861_v10, %v5838_v29  ;;  %v5876_v0 = vadd.f32 %v5861_v10, %v5767_v28 }
 0x250   :  { %v22132_v36 = vmax.f32 %v5875_v32, 0.0  ;;  %v22140_v40 = vmax.f32 %v5877_v37, 0.0 }
 0x251   :  { %v22148_v43 = vmax.f32 %v5878_v41, 0.0  ;;  %v22154_v3 = vmax.f32 %v5876_v0, 0.0 }
 0x252   :  { %5916 = vrot.lane.b32.xlu1 %v22124_v33, %s21283_s29  ;;  %5938 = vrot.lane.b32.xlu0 %v22122_v31, %s21283_s29 }
 0x256   :  { %5936 = vrot.lane.b32.xlu0 %v22130_v35, %s21283_s29  ;;  %5940 = vrot.lane.b32.xlu1 %v22132_v36, %s21283_s29 }
 0x25a   :  { %5926 = vrot.lane.b32.xlu1 %v22138_v38, %s21283_s29  ;;  %5944 = vrot.lane.b32.xlu0 %v22140_v40, %s21283_s29 }
 0x25e   :  { %5934 = vrot.lane.b32.xlu0 %v22146_v42, %s21283_s29  ;;  %5946 = vrot.lane.b32.xlu1 %v22148_v43, %s21283_s29 }
 0x262   :  { %7232 = vrot.lane.b32.xlu0 %v22102_v59, %s21284_s25  ;;  %5942 = vrot.lane.b32.xlu1 %v22154_v3, %s21283_s29 }
 0x266   :  { %7230 = vrot.lane.b32.xlu0 %v22094_v12, %s21284_s25  ;;  %7234 = vrot.lane.b32.xlu1 %v22098_v57, %s21284_s25 }
 0x26a   :  { %7242 = vrot.lane.b32.xlu0 %v22108_v18, %s21284_s25  ;;  %7240 = vrot.lane.b32.xlu1 %v22114_v22, %s21284_s25 }
 0x26e   :  { %7228 = vrot.lane.b32.xlu0 %v22116_v24, %s21284_s25  ;;  %7238 = vrot.lane.b32.xlu1 %v22106_v63, %s21284_s25 }
 0x272   :  { %7248 = vrot.lane.b32.xlu0 %v22122_v31, %s21284_s25  ;;  %7226 = vrot.lane.b32.xlu1 %v22124_v33, %s21284_s25 }
 0x276   :  { %7246 = vrot.lane.b32.xlu0 %v22130_v35, %s21284_s25  ;;  %7250 = vrot.lane.b32.xlu1 %v22132_v36, %s21284_s25 }
 0x27a   :  { %7254 = vrot.lane.b32.xlu0 %v22140_v40, %s21284_s25  ;;  %7236 = vrot.lane.b32.xlu1 %v22138_v38, %s21284_s25 }
 0x27e   :  { %7244 = vrot.lane.b32.xlu0 %v22146_v42, %s21284_s25  ;;  %7256 = vrot.lane.b32.xlu1 %v22148_v43, %s21284_s25 }
 0x282   :  { %7954 = vrot.lane.b32.xlu0 %v22098_v57, %s21285_s0  ;;  %7952 = vrot.lane.b32.xlu1 %v22102_v59, %s21285_s0 }
 0x286   :  { %7252 = vrot.lane.b32.xlu0 %v22154_v3, %s21284_s25  ;;  %7950 = vrot.lane.b32.xlu1 %v22094_v12, %s21285_s0 }
 0x28a   :  { %7962 = vrot.lane.b32.xlu0 %v22108_v18, %s21285_s0  ;;  %7960 = vrot.lane.b32.xlu1 %v22114_v22, %s21285_s0 }
 0x28e   :  { %7948 = vrot.lane.b32.xlu0 %v22116_v24, %s21285_s0  ;;  %7958 = vrot.lane.b32.xlu1 %v22106_v63, %s21285_s0 }
 0x292   :  { %7968 = vrot.lane.b32.xlu0 %v22122_v31, %s21285_s0  ;;  %7946 = vrot.lane.b32.xlu1 %v22124_v33, %s21285_s0 }
 0x296   :  { %7966 = vrot.lane.b32.xlu0 %v22130_v35, %s21285_s0  ;;  %7970 = vrot.lane.b32.xlu1 %v22132_v36, %s21285_s0 }
 0x29a   :  { %7974 = vrot.lane.b32.xlu0 %v22140_v40, %s21285_s0  ;;  %7956 = vrot.lane.b32.xlu1 %v22138_v38, %s21285_s0 }
 0x29e   :  { %7964 = vrot.lane.b32.xlu0 %v22146_v42, %s21285_s0  ;;  %7976 = vrot.lane.b32.xlu1 %v22148_v43, %s21285_s0 }
 0x2a2   :  { %8674 = vrot.lane.b32.xlu0 %v22098_v57, %s21286_s26  ;;  %8672 = vrot.lane.b32.xlu1 %v22102_v59, %s21286_s26 }
 0x2a6   :  { %7972 = vrot.lane.b32.xlu0 %v22154_v3, %s21285_s0  ;;  %8670 = vrot.lane.b32.xlu1 %v22094_v12, %s21286_s26 }
 0x2aa   :  { %8682 = vrot.lane.b32.xlu0 %v22108_v18, %s21286_s26  ;;  %8680 = vrot.lane.b32.xlu1 %v22114_v22, %s21286_s26 }
 0x2ae   :  { %8668 = vrot.lane.b32.xlu0 %v22116_v24, %s21286_s26  ;;  %8678 = vrot.lane.b32.xlu1 %v22106_v63, %s21286_s26 }
 0x2b0   :  { %v5921_v1 = vpop.permute.xlu0 %5920 }
 0x2b2   :  { %8688 = vrot.lane.b32.xlu0 %v22122_v31, %s21286_s26  ;;  %8666 = vrot.lane.b32.xlu1 %v22124_v33, %s21286_s26 }
 0x2b4   :  { %v5925_v44 = vpop.permute.xlu1 %5924 }
 0x2b6   :  { %8686 = vrot.lane.b32.xlu0 %v22130_v35, %s21286_s26  ;;  %8690 = vrot.lane.b32.xlu1 %v22132_v36, %s21286_s26 }
 0x2b8   :  { %v5923_v4 = vpop.permute.xlu1 %5922 }
 0x2b9   :  { %v5951_v45 = vsel %vm111_vm0, %v5923_v4, %v5925_v44  ;;  %v5950_v46 = vsel %vm111_vm0, %v5921_v1, %v5923_v4 }
 0x2ba   :  { %8694 = vrot.lane.b32.xlu0 %v22140_v40, %s21286_s26  ;;  %8676 = vrot.lane.b32.xlu1 %v22138_v38, %s21286_s26 }
 0x2bb   :  { %6062 = vmatprep.subr.mxu1 %v5951_v45 }
 0x2bc   :  { %6063 = vmatpush1.msra.mxu1 %v5950_v46  ;;  %v5933_v5 = vpop.permute.xlu0 %5932  ;;  %v5929_v6 = vpop.permute.xlu1 %5928 }
 0x2bd   :  { %18254 = vmatmul.mubr.msk.f32.vlgmr.msra.gmra.mrb[10].mxu1 %vm143_vm1, %v22253_v47 }
 0x2be   :  { %8684 = vrot.lane.b32.xlu0 %v22146_v42, %s21286_s26  ;;  %8696 = vrot.lane.b32.xlu1 %v22148_v43, %s21286_s26 }
 0x2bf   :  { %6132 = vmatprep.mubr.f32.mxu1 %v21282_v2 }
 0x2c0   :  { %v5919_v7 = vpop.permute.xlu0 %5918  ;;  %v5931_v49 = vpop.permute.xlu1 %5930 }
 0x2c1   :  { %18255 = vmatmul.mubr.msk.f32.gmra.mrb[12].mxu1 %vm143_vm1, %v22264_v48  ;;  %v5949_v8 = vsel %vm111_vm0, %v5919_v7, %v5921_v1  ;;  %v5955_v50 = vsel %vm111_vm0, %v5931_v49, %v5933_v5  ;;  %v5954_v51 = vsel %vm111_vm0, %v5929_v6, %v5931_v49 }
 0x2c2   :  { %5985 = vmatprep.subr.mxu0 %v5949_v8  ;;  %9394 = vrot.lane.b32.xlu0 %v22098_v57, %s21287_s30 }
 0x2c3   :  { %9392 = vrot.lane.b32.xlu1 %v22102_v59, %s21287_s30  ;;  %6216 = vmatprep.subr.mxu1 %v5955_v50  ;;  %v22501_v50 = vld [vmem:[%s25634_s3 + $0x20] sm:$0xff] }
 0x2c4   :  { %6217 = vmatpush1.msra.mxu1 %v5954_v51  ;;  %6280 = vmatprep.mubr.f32.mxu1 %v21282_v2  ;;  %v5939_v9 = vpop.permute.xlu0 %5938  ;;  %v5917_v52 = vpop.permute.xlu1 %5916 }
 0x2c5   :  { %18258 = vmatmul.mubr.msk.f32.vlgmr.msra.gmra.mrb[14].mxu1 %vm143_vm1, %v22253_v47  ;;  %v5948_v10 = vsel %vm111_vm0, %v5917_v52, %v5919_v7 }
 0x2c6   :  { %8692 = vrot.lane.b32.xlu0 %v22154_v3, %s21286_s26  ;;  %5986 = vmatpush1.msra.mxu0 %v5948_v10  ;;  %s21297_s26 = smov 88  }
 0x2c7   :  { %9390 = vrot.lane.b32.xlu1 %v22094_v12, %s21287_s30  ;;  %6286 = vmatprep.mubr.f32.mxu1 %v21282_v2 }
 0x2c8   :  { %v5937_v53 = vpop.permute.xlu0 %5936  ;;  %18252 = vmatmul.mubr.msk.f32.vlgmr.msra.gmra.mrb[8].mxu0 %vm143_vm1, %v22253_v47  ;;  %v5941_v54 = vpop.permute.xlu1 %5940 }
 0x2c9   :  { %18259 = vmatmul.mubr.msk.f32.gmra.mrb[16].mxu1 %vm143_vm1, %v22264_v48  ;;  %v5959_v11 = vsel %vm111_vm0, %v5939_v9, %v5941_v54  ;;  %6055 = vmatprep.mubr.f32.mxu0 %v21282_v2  ;;  %v5958_v55 = vsel %vm111_vm0, %v5937_v53, %v5939_v9 }
 0x2ca   :  { %9402 = vrot.lane.b32.xlu0 %v22108_v18, %s21287_s30  ;;  %6370 = vmatprep.subr.mxu1 %v5959_v11 }
 0x2cb   :  { %9400 = vrot.lane.b32.xlu1 %v22114_v22, %s21287_s30  ;;  %6371 = vmatpush1.msra.mxu1 %v5958_v55 }
 0x2cc   :  { %6434 = vmatprep.mubr.f32.mxu1 %v21282_v2  ;;  %v5945_v13 = vpop.permute.xlu0 %5944  ;;  %18253 = vmatmul.mubr.msk.f32.gmra.mrb[10].mxu0 %vm143_vm1, %v22264_v48  ;;  %v5927_v14 = vpop.permute.xlu1 %5926 }
 0x2cd   :  { %18262 = vmatmul.mubr.msk.f32.vlgmr.msra.gmra.mrb[18].mxu1 %vm143_vm1, %v22253_v47  ;;  %v5953_v56 = vsel %vm111_vm0, %v5927_v14, %v5929_v6  ;;  %v5952_v58 = vsel %vm111_vm0, %v5925_v44, %v5927_v14  ;;  %6203 = vmatprep.mubr.f32.mxu0 %v21282_v2 }
 0x2ce   :  { %9388 = vrot.lane.b32.xlu0 %v22116_v24, %s21287_s30  ;;  %6139 = vmatprep.subr.mxu0 %v5953_v56 }
 0x2cf   :  { %9398 = vrot.lane.b32.xlu1 %v22106_v63, %s21287_s30  ;;  %6140 = vmatpush1.msra.mxu0 %v5952_v58 }
 0x2d0   :  { %6440 = vmatprep.mubr.f32.mxu1 %v21282_v2  ;;  %v5935_v15 = vpop.permute.xlu0 %5934  ;;  %18256 = vmatmul.mubr.msk.f32.vlgmr.msra.gmra.mrb[12].mxu0 %vm143_vm1, %v22253_v47  ;;  %v5947_v16 = vpop.permute.xlu1 %5946 }
 0x2d1   :  { %18263 = vmatmul.mubr.msk.f32.gmra.mrb[20].mxu1 %vm143_vm1, %v22264_v48  ;;  %6524 = vmatprep.subr.mxu1 %v5947_v16  ;;  %v5957_v60 = vsel %vm111_vm0, %v5935_v15, %v5937_v53  ;;  %v5962_v61 = vsel %vm111_vm0, %v5945_v13, %v5947_v16  ;;  %v5956_v62 = vsel %vm111_vm0, %v5933_v5, %v5935_v15  ;;  %v22527_v53 = vld [vmem:[%s25634_s3 + $0x28] sm:$0xff] }
 0x2d2   :  { %9408 = vrot.lane.b32.xlu0 %v22122_v31, %s21287_s30  ;;  %6293 = vmatprep.subr.mxu0 %v5957_v60 }
 0x2d3   :  { %9386 = vrot.lane.b32.xlu1 %v22124_v33, %s21287_s30  ;;  %6525 = vmatpush1.msra.mxu1 %v5962_v61 }
 0x2d4   :  { %6209 = vmatprep.mubr.f32.mxu0 %v21282_v2  ;;  %6294 = vmatpush1.msra.mxu0 %v5956_v62  ;;  %v22321_v17 = vpop.permute.xlu0 %7232  ;;  %v5943_v19 = vpop.permute.xlu1 %5942 }
 0x2d5   :  { %6588 = vmatprep.mubr.f32.mxu1 %v21282_v2  ;;  %6684 = vmatprep.subr.mxu1 %v22102_v59  ;;  %v5961_v20 = vsel %vm111_vm0, %v5943_v19, %v5945_v13  ;;  %v5960_v25 = vsel %vm111_vm0, %v5941_v54, %v5943_v19  ;;  %vm18164_vm0 = vcmask 7168  }
 0x2d6   :  { %18257 = vmatmul.mubr.msk.f32.gmra.mrb[14].mxu0 %vm143_vm1, %v22264_v48  ;;  %18266 = vmatmul.mubr.msk.f32.vlgmr.msra.gmra.mrb[22].mxu1 %vm143_vm1, %v22253_v47 }
 0x2d7   :  { %6685 = vmatpush1.msra.mxu1 %v22094_v12  ;;  %9406 = vrot.lane.b32.xlu0 %v22130_v35, %s21287_s30 }
 0x2d8   :  { %6838 = vmatprep.subr.mxu1 %v22114_v22  ;;  %9410 = vrot.lane.b32.xlu1 %v22132_v36, %s21287_s30  ;;  %v22336_v21 = vpop.permute.xlu0 %7230  ;;  %v22338_v23 = vpop.permute.xlu1 %7234 }
 0x2d9   :  { %6447 = vmatprep.subr.mxu0 %v5961_v20  ;;  %6357 = vmatprep.mubr.f32.mxu0 %v21282_v2  ;;  %v7261_v1 = vsel %vm1320_vm2, %v22321_v17, %v22338_v23  ;;  %v7260_v5 = vsel %vm1320_vm2, %v22336_v21, %v22321_v17 }
 0x2da   :  { %6594 = vmatprep.mubr.f32.mxu1 %v21282_v2  ;;  %18260 = vmatmul.mubr.msk.f32.vlgmr.msra.gmra.mrb[16].mxu0 %vm143_vm1, %v22253_v47 }
 0x2db   :  { %6448 = vmatpush1.msra.mxu0 %v5960_v25  ;;  %18267 = vmatmul.mubr.msk.f32.gmra.mrb[24].mxu1 %vm143_vm1, %v22264_v48 }
 0x2dc   :  { %6607 = vmatprep.subr.mxu0 %v22116_v24  ;;  %9414 = vrot.lane.b32.xlu0 %v22140_v40, %s21287_s30  ;;  %v22350_v26 = vpop.permute.xlu0 %7242  ;;  %v22357_v28 = vpop.permute.xlu1 %7240 }
 0x2dd   :  { %9396 = vrot.lane.b32.xlu1 %v22138_v38, %s21287_s30  ;;  %6363 = vmatprep.mubr.f32.mxu0 %v21282_v2  ;;  %v7265_v6 = vsel %vm1320_vm2, %v22357_v28, %v22350_v26 }
 0x2de   :  { %6748 = vmatprep.mubr.f32.mxu1 %v21282_v2  ;;  %18261 = vmatmul.mubr.msk.f32.gmra.mrb[18].mxu0 %vm143_vm1, %v22264_v48 }
 0x2df   :  { %18270 = vmatmul.mubr.msk.f32.vlgmr.msra.gmra.mrb[10].mxu1 %vm143_vm1, %v22355_v27  ;;  %6511 = vmatprep.mubr.f32.mxu0 %v21282_v2 }
 0x2e0   :  { %6839 = vmatpush1.msra.mxu1 %v22106_v63  ;;  %9404 = vrot.lane.b32.xlu0 %v22146_v42, %s21287_s30  ;;  %v22371_v29 = vpop.permute.xlu0 %7228  ;;  %v22378_v32 = vpop.permute.xlu1 %7238 }
 0x2e1   :  { %6992 = vmatprep.subr.mxu1 %v22122_v31  ;;  %9416 = vrot.lane.b32.xlu1 %v22148_v43, %s21287_s30  ;;  %v7259_v49 = vsel %vm1320_vm2, %v22371_v29, %v22336_v21  ;;  %v7264_v9 = vsel %vm1320_vm2, %v22378_v32, %v22357_v28 }
 0x2e2   :  { %6754 = vmatprep.mubr.f32.mxu1 %v21282_v2  ;;  %18264 = vmatmul.mubr.msk.f32.vlgmr.msra.gmra.mrb[20].mxu0 %vm143_vm1, %v22253_v47 }
 0x2e3   :  { %6608 = vmatpush1.msra.mxu0 %v22124_v33  ;;  %18271 = vmatmul.mubr.msk.f32.gmra.mrb[12].mxu1 %vm143_vm1, %v22376_v30 }
 0x2e4   :  { %6761 = vmatprep.subr.mxu0 %v22138_v38  ;;  %10114 = vrot.lane.b32.xlu0 %v22098_v57, %s21288_s16  ;;  %v22392_v34 = vpop.permute.xlu0 %7248  ;;  %v22394_v37 = vpop.permute.xlu1 %7226 }
 0x2e5   :  { %10112 = vrot.lane.b32.xlu1 %v22102_v59, %s21288_s16  ;;  %6517 = vmatprep.mubr.f32.mxu0 %v21282_v2  ;;  %v7258_v11 = vsel %vm1320_vm2, %v22394_v37, %v22371_v29 }
 0x2e6   :  { %6902 = vmatprep.mubr.f32.mxu1 %v21282_v2  ;;  %18265 = vmatmul.mubr.msk.f32.gmra.mrb[22].mxu0 %vm143_vm1, %v22264_v48 }
 0x2e7   :  { %18274 = vmatmul.mubr.msk.f32.vlgmr.msra.gmra.mrb[14].mxu1 %vm143_vm1, %v22355_v27  ;;  %6671 = vmatprep.mubr.f32.mxu0 %v21282_v2 }
 0x2e8   :  { %6993 = vmatpush1.msra.mxu1 %v22130_v35  ;;  %9412 = vrot.lane.b32.xlu0 %v22154_v3, %s21287_s30  ;;  %v22408_v39 = vpop.permute.xlu0 %7246  ;;  %v22410_v41 = vpop.permute.xlu1 %7250  ;;  %s21304_s30 = smov 16  }
 0x2e9   :  { %7146 = vmatprep.subr.mxu1 %v22148_v43  ;;  %10110 = vrot.lane.b32.xlu1 %v22094_v12, %s21288_s16  ;;  %v7269_v52 = vsel %vm1320_vm2, %v22392_v34, %v22410_v41  ;;  %v7268_v56 = vsel %vm1320_vm2, %v22408_v39, %v22392_v34 }
 0x2ea   :  { %6908 = vmatprep.mubr.f32.mxu1 %v21282_v2  ;;  %18268 = vmatmul.mubr.msk.f32.vlgmr.msra.gmra.mrb[8].mxu0 %vm143_vm1, %v22355_v27 }
 0x2eb   :  { %6762 = vmatpush1.msra.mxu0 %v22098_v57  ;;  %18275 = vmatmul.mubr.msk.f32.gmra.mrb[16].mxu1 %vm143_vm1, %v22376_v30 }
 0x2ec   :  { %6915 = vmatprep.subr.mxu0 %v22146_v42  ;;  %10122 = vrot.lane.b32.xlu0 %v22108_v18, %s21288_s16  ;;  %v22424_v0 = vpop.permute.xlu0 %7254  ;;  %v22426_v44 = vpop.permute.xlu1 %7236 }
 0x2ed   :  { %10120 = vrot.lane.b32.xlu1 %v22114_v22, %s21288_s16  ;;  %6677 = vmatprep.mubr.f32.mxu0 %v21282_v2  ;;  %v7263_v55 = vsel %vm1320_vm2, %v22426_v44, %v22378_v32  ;;  %v7262_v16 = vsel %vm1320_vm2, %v22338_v23, %v22426_v44 }
 0x2ee   :  { %7056 = vmatprep.mubr.f32.mxu1 %v21282_v2  ;;  %18269 = vmatmul.mubr.msk.f32.gmra.mrb[10].mxu0 %vm143_vm1, %v22376_v30 }
 0x2ef   :  { %18278 = vmatmul.mubr.msk.f32.vlgmr.msra.gmra.mrb[18].mxu1 %vm143_vm1, %v22355_v27  ;;  %6825 = vmatprep.mubr.f32.mxu0 %v21282_v2 }
 0x2f0   :  { %7147 = vmatpush1.msra.mxu1 %v22140_v40  ;;  %10108 = vrot.lane.b32.xlu0 %v22116_v24, %s21288_s16  ;;  %v22443_v4 = vpop.permute.xlu0 %7244  ;;  %v22445_v45 = vpop.permute.xlu1 %7256 }
 0x2f1   :  { %7372 = vmatprep.subr.mxu1 %v7261_v1  ;;  %10118 = vrot.lane.b32.xlu1 %v22106_v63, %s21288_s16  ;;  %v7267_v60 = vsel %vm1320_vm2, %v22443_v4, %v22408_v39  ;;  %v7272_v17 = vsel %vm1320_vm2, %v22424_v0, %v22445_v45  ;;  %v7266_v23 = vsel %vm1320_vm2, %v22350_v26, %v22443_v4 }
 0x2f2   :  { %7062 = vmatprep.mubr.f32.mxu1 %v21282_v2  ;;  %18272 = vmatmul.mubr.msk.f32.vlgmr.msra.gmra.mrb[12].mxu0 %vm143_vm1, %v22355_v27 }
 0x2f3   :  { %6916 = vmatpush1.msra.mxu0 %v22108_v18  ;;  %18279 = vmatmul.mubr.msk.f32.gmra.mrb[20].mxu1 %vm143_vm1, %v22376_v30 }
 0x2f4   :  { %7069 = vmatprep.subr.mxu0 %v22154_v3  ;;  %10128 = vrot.lane.b32.xlu0 %v22122_v31, %s21288_s16  ;;  %v22458_v46 = vpop.permute.xlu0 %7954  ;;  %v22460_v47 = vpop.permute.xlu1 %7952 }
 0x2f5   :  { %10106 = vrot.lane.b32.xlu1 %v22124_v33, %s21288_s16  ;;  %6831 = vmatprep.mubr.f32.mxu0 %v21282_v2  ;;  %v7981_v19 = vsel %vm1973_vm3, %v22460_v47, %v22458_v46 }
 0x2f6   :  { %7210 = vmatprep.mubr.f32.mxu1 %v21282_v2  ;;  %18273 = vmatmul.mubr.msk.f32.gmra.mrb[14].mxu0 %vm143_vm1, %v22376_v30 }
 0x2f7   :  { %18282 = vmatmul.mubr.msk.f32.vlgmr.msra.gmra.mrb[22].mxu1 %vm143_vm1, %v22355_v27  ;;  %6979 = vmatprep.mubr.f32.mxu0 %v21282_v2 }
 0x2f8   :  { %7373 = vmatpush1.msra.mxu1 %v7260_v5  ;;  %10126 = vrot.lane.b32.xlu0 %v22130_v35, %s21288_s16  ;;  %v22479_v48 = vpop.permute.xlu0 %7252  ;;  %v22481_v7 = vpop.permute.xlu1 %7950 }
 0x2f9   :  { %7526 = vmatprep.subr.mxu1 %v7265_v6  ;;  %10130 = vrot.lane.b32.xlu1 %v22132_v36, %s21288_s16  ;;  %v7271_v25 = vsel %vm1320_vm2, %v22479_v48, %v22424_v0  ;;  %v7980_v26 = vsel %vm1973_vm3, %v22481_v7, %v22460_v47  ;;  %v7270_v34 = vsel %vm1320_vm2, %v22410_v41, %v22479_v48  ;;  %v22669_v0 = vld [vmem:[%s25634_s3 + $0x30] sm:$0xff] }
 0x2fa   :  { %7216 = vmatprep.mubr.f32.mxu1 %v21282_v2  ;;  %18276 = vmatmul.mubr.msk.f32.vlgmr.msra.gmra.mrb[16].mxu0 %vm143_vm1, %v22355_v27 }
 0x2fb   :  { %7070 = vmatpush1.msra.mxu0 %v22132_v36  ;;  %18283 = vmatmul.mubr.msk.f32.gmra.mrb[24].mxu1 %vm143_vm1, %v22376_v30 }
 0x2fc   :  { %7295 = vmatprep.subr.mxu0 %v7259_v49  ;;  %10134 = vrot.lane.b32.xlu0 %v22140_v40, %s21288_s16  ;;  %v22496_v8 = vpop.permute.xlu0 %7962  ;;  %v22503_v51 = vpop.permute.xlu1 %7960 }
 0x2fd   :  { %10116 = vrot.lane.b32.xlu1 %v22138_v38, %s21288_s16  ;;  %6985 = vmatprep.mubr.f32.mxu0 %v21282_v2  ;;  %v7985_v29 = vsel %vm1973_vm3, %v22503_v51, %v22496_v8 }
 0x2fe   :  { %7436 = vmatprep.mubr.f32.mxu1 %v21282_v2  ;;  %18277 = vmatmul.mubr.msk.f32.gmra.mrb[18].mxu0 %vm143_vm1, %v22376_v30 }
 0x2ff   :  { %18288 = vmatmul.mubr.msk.f32.vlgmr.msra.gmra.mrb[10].mxu1 %vm143_vm1, %v22501_v50  ;;  %7133 = vmatprep.mubr.f32.mxu0 %v21282_v2 }
 0x300   :  { %7527 = vmatpush1.msra.mxu1 %v7264_v9  ;;  %10124 = vrot.lane.b32.xlu0 %v22146_v42, %s21288_s16  ;;  %v22522_v10 = vpop.permute.xlu0 %7948  ;;  %v22529_v54 = vpop.permute.xlu1 %7958 }
 0x301   :  { %7680 = vmatprep.subr.mxu1 %v7269_v52  ;;  %10136 = vrot.lane.b32.xlu1 %v22148_v43, %s21288_s16  ;;  %v7979_v37 = vsel %vm1973_vm3, %v22522_v10, %v22481_v7  ;;  %v7984_v44 = vsel %vm1973_vm3, %v22529_v54, %v22503_v51 }
 0x302   :  { %7442 = vmatprep.mubr.f32.mxu1 %v21282_v2  ;;  %18280 = vmatmul.mubr.msk.f32.vlgmr.msra.gmra.mrb[20].mxu0 %vm143_vm1, %v22355_v27 }
 0x303   :  { %7296 = vmatpush1.msra.mxu0 %v7258_v11  ;;  %18289 = vmatmul.mubr.msk.f32.gmra.mrb[12].mxu1 %vm143_vm1, %v22527_v53 }
 0x304   :  { %7449 = vmatprep.subr.mxu0 %v7263_v55  ;;  %10834 = vrot.lane.b32.xlu0 %v22098_v57, %s21289_s21  ;;  %v22546_v13 = vpop.permute.xlu0 %7968  ;;  %v22548_v14 = vpop.permute.xlu1 %7946  ;;  %v22837_v55 = vld [vmem:[%s25634_s3 + $0x40] sm:$0xff] }
 0x305   :  { %10832 = vrot.lane.b32.xlu1 %v22102_v59, %s21289_s21  ;;  %7139 = vmatprep.mubr.f32.mxu0 %v21282_v2  ;;  %v7978_v5 = vsel %vm1973_vm3, %v22548_v14, %v22522_v10 }
 0x306   :  { %7590 = vmatprep.mubr.f32.mxu1 %v21282_v2  ;;  %18281 = vmatmul.mubr.msk.f32.gmra.mrb[22].mxu0 %vm143_vm1, %v22376_v30 }
 0x307   :  { %18292 = vmatmul.mubr.msk.f32.vlgmr.msra.gmra.mrb[14].mxu1 %vm143_vm1, %v22501_v50  ;;  %7359 = vmatprep.mubr.f32.mxu0 %v21282_v2 }
 0x308   :  { %7681 = vmatpush1.msra.mxu1 %v7268_v56  ;;  %10132 = vrot.lane.b32.xlu0 %v22154_v3, %s21288_s16  ;;  %v22564_v58 = vpop.permute.xlu0 %7966  ;;  %v22566_v15 = vpop.permute.xlu1 %7970  ;;  %v22863_v56 = vld [vmem:[%s25634_s3 + $0x48] sm:$0xff] }
 0x309   :  { %7834 = vmatprep.subr.mxu1 %v22445_v45  ;;  %10830 = vrot.lane.b32.xlu1 %v22094_v12, %s21289_s21  ;;  %v7989_v1 = vsel %vm1973_vm3, %v22546_v13, %v22566_v15  ;;  %v22695_v45 = vld [vmem:[%s25634_s3 + $0x38] sm:$0xff] }
 0x30a   :  { %7596 = vmatprep.mubr.f32.mxu1 %v21282_v2  ;;  %18286 = vmatmul.mubr.msk.f32.vlgmr.msra.gmra.mrb[8].mxu0 %vm143_vm1, %v22501_v50 }
 0x30b   :  { %7450 = vmatpush1.msra.mxu0 %v7262_v16  ;;  %18293 = vmatmul.mubr.msk.f32.gmra.mrb[16].mxu1 %vm143_vm1, %v22527_v53 }
 0x30c   :  { %7603 = vmatprep.subr.mxu0 %v7267_v60  ;;  %10842 = vrot.lane.b32.xlu0 %v22108_v18, %s21289_s21  ;;  %v22584_v61 = vpop.permute.xlu0 %7974  ;;  %v22586_v62 = vpop.permute.xlu1 %7956 }
 0x30d   :  { %10840 = vrot.lane.b32.xlu1 %v22114_v22, %s21289_s21  ;;  %7365 = vmatprep.mubr.f32.mxu0 %v21282_v2  ;;  %v7983_v6 = vsel %vm1973_vm3, %v22586_v62, %v22529_v54 }
 0x30e   :  { %7744 = vmatprep.mubr.f32.mxu1 %v21282_v2  ;;  %18287 = vmatmul.mubr.msk.f32.gmra.mrb[10].mxu0 %vm143_vm1, %v22527_v53 }
 0x30f   :  { %18296 = vmatmul.mubr.msk.f32.vlgmr.msra.gmra.mrb[18].mxu1 %vm143_vm1, %v22501_v50  ;;  %7513 = vmatprep.mubr.f32.mxu0 %v21282_v2 }
 0x310   :  { %7835 = vmatpush1.msra.mxu1 %v7272_v17  ;;  %10828 = vrot.lane.b32.xlu0 %v22116_v24, %s21289_s21  ;;  %v22605_v20 = vpop.permute.xlu0 %7964  ;;  %v22607_v21 = vpop.permute.xlu1 %7976 }
 0x311   :  { %8092 = vmatprep.subr.mxu1 %v7981_v19  ;;  %10838 = vrot.lane.b32.xlu1 %v22106_v63, %s21289_s21  ;;  %v7987_v51 = vsel %vm1973_vm3, %v22605_v20, %v22564_v58  ;;  %v7986_v10 = vsel %vm1973_vm3, %v22496_v8, %v22605_v20 }
 0x312   :  { %7750 = vmatprep.mubr.f32.mxu1 %v21282_v2  ;;  %18290 = vmatmul.mubr.msk.f32.vlgmr.msra.gmra.mrb[12].mxu0 %vm143_vm1, %v22501_v50 }
 0x313   :  { %7604 = vmatpush1.msra.mxu0 %v7266_v23  ;;  %18297 = vmatmul.mubr.msk.f32.gmra.mrb[20].mxu1 %vm143_vm1, %v22527_v53 }
 0x314   :  { %7757 = vmatprep.subr.mxu0 %v7271_v25  ;;  %10848 = vrot.lane.b32.xlu0 %v22122_v31, %s21289_s21  ;;  %v22624_v27 = vpop.permute.xlu0 %8674  ;;  %v22626_v28 = vpop.permute.xlu1 %8672 }
 0x315   :  { %10826 = vrot.lane.b32.xlu1 %v22124_v33, %s21289_s21  ;;  %7519 = vmatprep.mubr.f32.mxu0 %v21282_v2 }
 0x316   :  { %7898 = vmatprep.mubr.f32.mxu1 %v21282_v2  ;;  %18291 = vmatmul.mubr.msk.f32.gmra.mrb[14].mxu0 %vm143_vm1, %v22527_v53 }
 0x317   :  { %18300 = vmatmul.mubr.msk.f32.vlgmr.msra.gmra.mrb[22].mxu1 %vm143_vm1, %v22501_v50  ;;  %7667 = vmatprep.mubr.f32.mxu0 %v21282_v2 }
 0x318   :  { %8093 = vmatpush1.msra.mxu1 %v7980_v26  ;;  %10846 = vrot.lane.b32.xlu0 %v22130_v35, %s21289_s21  ;;  %v22645_v30 = vpop.permute.xlu0 %7972  ;;  %v22647_v32 = vpop.permute.xlu1 %8670 }
 0x319   :  { %8246 = vmatprep.subr.mxu1 %v7985_v29  ;;  %10850 = vrot.lane.b32.xlu1 %v22132_v36, %s21289_s21  ;;  %v7990_v11 = vsel %vm1973_vm3, %v22566_v15, %v22645_v30  ;;  %v12263_v15 = vld [vmem:[%s25635_s4] sm:$0xff] }
 0x31a   :  { %7904 = vmatprep.mubr.f32.mxu1 %v21282_v2  ;;  %18294 = vmatmul.mubr.msk.f32.vlgmr.msra.gmra.mrb[16].mxu0 %vm143_vm1, %v22501_v50 }
 0x31b   :  { %7758 = vmatpush1.msra.mxu0 %v7270_v34  ;;  %18301 = vmatmul.mubr.msk.f32.gmra.mrb[24].mxu1 %vm143_vm1, %v22527_v53 }
 0x31c   :  { %8015 = vmatprep.subr.mxu0 %v7979_v37  ;;  %10854 = vrot.lane.b32.xlu0 %v22140_v40, %s21289_s21  ;;  %v22664_v39 = vpop.permute.xlu0 %8682  ;;  %v22671_v41 = vpop.permute.xlu1 %8680 }
 0x31d   :  { %10836 = vrot.lane.b32.xlu1 %v22138_v38, %s21289_s21  ;;  %7673 = vmatprep.mubr.f32.mxu0 %v21282_v2 }
 0x31e   :  { %8156 = vmatprep.mubr.f32.mxu1 %v21282_v2  ;;  %18295 = vmatmul.mubr.msk.f32.gmra.mrb[18].mxu0 %vm143_vm1, %v22527_v53 }
 0x31f   :  { %18306 = vmatmul.mubr.msk.f32.vlgmr.msra.gmra.mrb[10].mxu1 %vm143_vm1, %v22669_v0  ;;  %7821 = vmatprep.mubr.f32.mxu0 %v21282_v2 }
 0x320   :  { %8247 = vmatpush1.msra.mxu1 %v7984_v44  ;;  %10844 = vrot.lane.b32.xlu0 %v22146_v42, %s21289_s21  ;;  %v22690_v4 = vpop.permute.xlu0 %8668  ;;  %v22697_v47 = vpop.permute.xlu1 %8678 }
 0x321   :  { %8400 = vmatprep.subr.mxu1 %v7989_v1  ;;  %10856 = vrot.lane.b32.xlu1 %v22148_v43, %s21289_s21  ;;  %v22983_v1 = vld [vmem:[%s25634_s3 + $0x50] sm:$0xff] }
 0x322   :  { %8162 = vmatprep.mubr.f32.mxu1 %v21282_v2  ;;  %18298 = vmatmul.mubr.msk.f32.vlgmr.msra.gmra.mrb[20].mxu0 %vm143_vm1, %v22501_v50  ;;  %v7982_v50 = vsel %vm1973_vm3, %v22458_v46, %v22586_v62 }
 0x323   :  { %8016 = vmatpush1.msra.mxu0 %v7978_v5  ;;  %18307 = vmatmul.mubr.msk.f32.gmra.mrb[12].mxu1 %vm143_vm1, %v22695_v45 }
 0x324   :  { %8169 = vmatprep.subr.mxu0 %v7983_v6  ;;  %11554 = vrot.lane.b32.xlu0 %v22098_v57, %s21290_s24  ;;  %v22714_v48 = vpop.permute.xlu0 %8688  ;;  %v22716_v7 = vpop.permute.xlu1 %8666  ;;  %v7988_v57 = vsel %vm1973_vm3, %v22564_v58, %v22546_v13  ;;  %v23005_v6 = vld [vmem:[%s25634_s3 + $0x58] sm:$0xff] }
 0x325   :  { %11552 = vrot.lane.b32.xlu1 %v22102_v59, %s21290_s24  ;;  %7827 = vmatprep.mubr.f32.mxu0 %v21282_v2 }
 0x326   :  { %8310 = vmatprep.mubr.f32.mxu1 %v21282_v2  ;;  %18299 = vmatmul.mubr.msk.f32.gmra.mrb[22].mxu0 %vm143_vm1, %v22527_v53 }
 0x327   :  { %18310 = vmatmul.mubr.msk.f32.vlgmr.msra.gmra.mrb[14].mxu1 %vm143_vm1, %v22669_v0  ;;  %8079 = vmatprep.mubr.f32.mxu0 %v21282_v2 }
 0x328   :  { %8401 = vmatpush1.msra.mxu1 %v7988_v57  ;;  %10852 = vrot.lane.b32.xlu0 %v22154_v3, %s21289_s21  ;;  %v22732_v59 = vpop.permute.xlu0 %8686  ;;  %v22734_v49 = vpop.permute.xlu1 %8690  ;;  %s21294_s21 = smov 120  }
 0x329   :  { %8554 = vmatprep.subr.mxu1 %v22607_v21  ;;  %11550 = vrot.lane.b32.xlu1 %v22094_v12, %s21290_s24 }
 0x32a   :  { %8316 = vmatprep.mubr.f32.mxu1 %v21282_v2  ;;  %18304 = vmatmul.mubr.msk.f32.vlgmr.msra.gmra.mrb[8].mxu0 %vm143_vm1, %v22669_v0 }
 0x32b   :  { %8170 = vmatpush1.msra.mxu0 %v7982_v50  ;;  %18311 = vmatmul.mubr.msk.f32.gmra.mrb[16].mxu1 %vm143_vm1, %v22695_v45  ;;  %v12264_v50 = vld [vmem:[%s25635_s4 + $0x8] sm:$0xff]  ;;  %s21309_s4 = smov 3  }
 0x32c   :  { %8323 = vmatprep.subr.mxu0 %v7987_v51  ;;  %11546 = vrot.lane.b32.xlu0 %v22124_v33, %s21290_s24  ;;  %v22752_v12 = vpop.permute.xlu0 %8694  ;;  %v22754_v9 = vpop.permute.xlu1 %8676  ;;  %v7992_v33 = vsel %vm1973_vm3, %v22584_v61, %v22607_v21 }
 0x32d   :  { %11548 = vrot.lane.b32.xlu1 %v22116_v24, %s21290_s24  ;;  %8085 = vmatprep.mubr.f32.mxu0 %v21282_v2  ;;  %v8701_v24 = vsel %vm2626_vm4, %v22626_v28, %v22624_v27  ;;  %v8702_v62 = vsel %vm2626_vm4, %v22624_v27, %v22754_v9 }
 0x32e   :  { %8464 = vmatprep.mubr.f32.mxu1 %v21282_v2  ;;  %18305 = vmatmul.mubr.msk.f32.gmra.mrb[10].mxu0 %vm143_vm1, %v22695_v45 }
 0x32f   :  { %18314 = vmatmul.mubr.msk.f32.vlgmr.msra.gmra.mrb[18].mxu1 %vm143_vm1, %v22669_v0  ;;  %8233 = vmatprep.mubr.f32.mxu0 %v21282_v2 }
 0x330   :  { %8555 = vmatpush1.msra.mxu1 %v7992_v33  ;;  %11562 = vrot.lane.b32.xlu0 %v22108_v18, %s21290_s24  ;;  %v22773_v46 = vpop.permute.xlu0 %8684  ;;  %v22775_v52 = vpop.permute.xlu1 %8696  ;;  %v7991_v18 = vsel %vm1973_vm3, %v22645_v30, %v22584_v61  ;;  %v8708_v61 = vsel %vm2626_vm4, %v22732_v59, %v22714_v48 }
 0x331   :  { %8812 = vmatprep.subr.mxu1 %v8701_v24  ;;  %11560 = vrot.lane.b32.xlu1 %v22114_v22, %s21290_s24  ;;  %v8707_v19 = vsel %vm2626_vm4, %v22773_v46, %v22732_v59  ;;  %v8712_v21 = vsel %vm2626_vm4, %v22752_v12, %v22775_v52 }
 0x332   :  { %8470 = vmatprep.mubr.f32.mxu1 %v21282_v2  ;;  %18308 = vmatmul.mubr.msk.f32.vlgmr.msra.gmra.mrb[12].mxu0 %vm143_vm1, %v22669_v0 }
 0x333   :  { %8324 = vmatpush1.msra.mxu0 %v7986_v10  ;;  %18315 = vmatmul.mubr.msk.f32.gmra.mrb[20].mxu1 %vm143_vm1, %v22695_v45 }
 0x334   :  { %8477 = vmatprep.subr.mxu0 %v7991_v18  ;;  %11556 = vrot.lane.b32.xlu0 %v22138_v38, %s21290_s24  ;;  %v22792_v22 = vpop.permute.xlu0 %9394  ;;  %v8700_v38 = vsel %vm2626_vm4, %v22647_v32, %v22626_v28  ;;  %v8706_v28 = vsel %vm2626_vm4, %v22664_v39, %v22773_v46 }
 0x335   :  { %11558 = vrot.lane.b32.xlu1 %v22106_v63, %s21290_s24  ;;  %8239 = vmatprep.mubr.f32.mxu0 %v21282_v2  ;;  %v22797_v8 = vpop.permute.xlu1 %9392  ;;  %v8705_v63 = vsel %vm2626_vm4, %v22671_v41, %v22664_v39 }
 0x336   :  { %8618 = vmatprep.mubr.f32.mxu1 %v21282_v2  ;;  %18309 = vmatmul.mubr.msk.f32.gmra.mrb[14].mxu0 %vm143_vm1, %v22695_v45  ;;  %v9421_v25 = vsel %vm3279_vm5, %v22797_v8, %v22792_v22 }
 0x337   :  { %18318 = vmatmul.mubr.msk.f32.vlgmr.msra.gmra.mrb[22].mxu1 %vm143_vm1, %v22669_v0  ;;  %8387 = vmatprep.mubr.f32.mxu0 %v21282_v2 }
 0x338   :  { %8813 = vmatpush1.msra.mxu1 %v8700_v38  ;;  %11570 = vrot.lane.b32.xlu0 %v22132_v36, %s21290_s24  ;;  %v22813_v53 = vpop.permute.xlu0 %8692  ;;  %v8699_v36 = vsel %vm2626_vm4, %v22690_v4, %v22647_v32 }
 0x339   :  { %8966 = vmatprep.subr.mxu1 %v8705_v63  ;;  %11568 = vrot.lane.b32.xlu1 %v22122_v31, %s21290_s24  ;;  %v22817_v54 = vpop.permute.xlu1 %9390  ;;  %v8711_v29 = vsel %vm2626_vm4, %v22813_v53, %v22752_v12 }
 0x33a   :  { %8624 = vmatprep.mubr.f32.mxu1 %v21282_v2  ;;  %18312 = vmatmul.mubr.msk.f32.vlgmr.msra.gmra.mrb[16].mxu0 %vm143_vm1, %v22669_v0  ;;  %v9420_v32 = vsel %vm3279_vm5, %v22817_v54, %v22797_v8 }
 0x33b   :  { %8478 = vmatpush1.msra.mxu0 %v7990_v11  ;;  %18319 = vmatmul.mubr.msk.f32.gmra.mrb[24].mxu1 %vm143_vm1, %v22695_v45 }
 0x33c   :  { %8735 = vmatprep.subr.mxu0 %v8699_v36  ;;  %11564 = vrot.lane.b32.xlu0 %v22146_v42, %s21290_s24  ;;  %v22832_v31 = vpop.permute.xlu0 %9402  ;;  %v8704_v42 = vsel %vm2626_vm4, %v22697_v47, %v22671_v41 }
 0x33d   :  { %11566 = vrot.lane.b32.xlu1 %v22130_v35, %s21290_s24  ;;  %8393 = vmatprep.mubr.f32.mxu0 %v21282_v2  ;;  %v22842_v13 = vpop.permute.xlu1 %9400  ;;  %v8709_v35 = vsel %vm2626_vm4, %v22714_v48, %v22734_v49 }
 0x33e   :  { %8876 = vmatprep.mubr.f32.mxu1 %v21282_v2  ;;  %18313 = vmatmul.mubr.msk.f32.gmra.mrb[18].mxu0 %vm143_vm1, %v22695_v45  ;;  %v9425_v37 = vsel %vm3279_vm5, %v22842_v13, %v22832_v31 }
 0x33f   :  { %18324 = vmatmul.mubr.msk.f32.vlgmr.msra.gmra.mrb[10].mxu1 %vm143_vm1, %v22837_v55  ;;  %8541 = vmatprep.mubr.f32.mxu0 %v21282_v2 }
 0x340   :  { %8967 = vmatpush1.msra.mxu1 %v8704_v42  ;;  %11574 = vrot.lane.b32.xlu0 %v22140_v40, %s21290_s24  ;;  %v22858_v14 = vpop.permute.xlu0 %9388  ;;  %v8698_v40 = vsel %vm2626_vm4, %v22716_v7, %v22690_v4 }
 0x341   :  { %9120 = vmatprep.subr.mxu1 %v8709_v35  ;;  %11572 = vrot.lane.b32.xlu1 %v22154_v3, %s21290_s24  ;;  %v22867_v58 = vpop.permute.xlu1 %9398  ;;  %v8703_v3 = vsel %vm2626_vm4, %v22754_v9, %v22697_v47  ;;  %v9419_v44 = vsel %vm3279_vm5, %v22858_v14, %v22817_v54 }
 0x342   :  { %8882 = vmatprep.mubr.f32.mxu1 %v21282_v2  ;;  %18316 = vmatmul.mubr.msk.f32.vlgmr.msra.gmra.mrb[20].mxu0 %vm143_vm1, %v22669_v0  ;;  %v8710_v0 = vsel %vm2626_vm4, %v22734_v49, %v22813_v53 }
 0x343   :  { %8736 = vmatpush1.msra.mxu0 %v8698_v40  ;;  %18325 = vmatmul.mubr.msk.f32.gmra.mrb[12].mxu1 %vm143_vm1, %v22863_v56 }
 0x344   :  { %8889 = vmatprep.subr.mxu0 %v8703_v3  ;;  %12267 = vperm.xlu0 %20592, %v12263_v15   ;;  %v22883_v16 = vpop.permute.xlu0 %9408  ;;  %v23144_v3 = vld [vmem:[%s25634_s3 + $0x68] sm:$0xff] }
 0x345   :  { %11576 = vrot.lane.b32.xlu1 %v22148_v43, %s21290_s24  ;;  %8547 = vmatprep.mubr.f32.mxu0 %v21282_v2  ;;  %v22888_v60 = vpop.permute.xlu1 %9386  ;;  %s21300_s24 = smov 48  }
 0x346   :  { %9030 = vmatprep.mubr.f32.mxu1 %v21282_v2  ;;  %18317 = vmatmul.mubr.msk.f32.gmra.mrb[22].mxu0 %vm143_vm1, %v22695_v45  ;;  %v9424_v45 = vsel %vm3279_vm5, %v22867_v58, %v22842_v13  ;;  %v9418_v48 = vsel %vm3279_vm5, %v22888_v60, %v22858_v14  ;;  %v23122_v14 = vld [vmem:[%s25634_s3 + $0x60] sm:$0xff] }
 0x347   :  { %18328 = vmatmul.mubr.msk.f32.vlgmr.msra.gmra.mrb[14].mxu1 %vm143_vm1, %v22837_v55  ;;  %8799 = vmatprep.mubr.f32.mxu0 %v21282_v2 }
 0x348   :  { %9121 = vmatpush1.msra.mxu1 %v8708_v61  ;;  %9036 = vmatprep.mubr.f32.mxu1 %v21282_v2 }
 0x349   :  { %9274 = vmatprep.subr.mxu1 %v22775_v52  ;;  %v22901_v43 = vpop.permute.xlu0 %9406  ;;  %12272 = vperm.xlu1 %20593, %v12264_v50  }
 0x34a   :  { %18322 = vmatmul.mubr.msk.f32.vlgmr.msra.gmra.mrb[8].mxu0 %vm143_vm1, %v22837_v55  ;;  %v22908_v17 = vpop.permute.xlu1 %9410  ;;  %v9428_v51 = vsel %vm3279_vm5, %v22901_v43, %v22883_v16 }
 0x34b   :  { %8890 = vmatpush1.msra.mxu0 %v8702_v62  ;;  %18329 = vmatmul.mubr.msk.f32.gmra.mrb[16].mxu1 %vm143_vm1, %v22863_v56  ;;  %v9429_v5 = vsel %vm3279_vm5, %v22883_v16, %v22908_v17 }
 0x34c   :  { %9043 = vmatprep.subr.mxu0 %v8707_v19  ;;  %8805 = vmatprep.mubr.f32.mxu0 %v21282_v2 }
 0x34d   :  { %9184 = vmatprep.mubr.f32.mxu1 %v21282_v2 }
 0x34e   :  { %v22917_v20 = vpop.permute.xlu0 %9414  ;;  %18323 = vmatmul.mubr.msk.f32.gmra.mrb[10].mxu0 %vm143_vm1, %v22863_v56 }
 0x34f   :  { %18332 = vmatmul.mubr.msk.f32.vlgmr.msra.gmra.mrb[18].mxu1 %vm143_vm1, %v22837_v55  ;;  %v22926_v23 = vpop.permute.xlu1 %9396  ;;  %8953 = vmatprep.mubr.f32.mxu0 %v21282_v2 }
 0x350   :  { %9275 = vmatpush1.msra.mxu1 %v8712_v21  ;;  %9190 = vmatprep.mubr.f32.mxu1 %v21282_v2  ;;  %v9423_v59 = vsel %vm3279_vm5, %v22926_v23, %v22867_v58  ;;  %v9422_v33 = vsel %vm3279_vm5, %v22792_v22, %v22926_v23 }
 0x351   :  { %9532 = vmatprep.subr.mxu1 %v9421_v25 }
 0x352   :  { %v22933_v27 = vpop.permute.xlu0 %9404  ;;  %18326 = vmatmul.mubr.msk.f32.vlgmr.msra.gmra.mrb[12].mxu0 %vm143_vm1, %v22837_v55 }
 0x353   :  { %9044 = vmatpush1.msra.mxu0 %v8706_v28  ;;  %18333 = vmatmul.mubr.msk.f32.gmra.mrb[20].mxu1 %vm143_vm1, %v22863_v56  ;;  %v22942_v26 = vpop.permute.xlu1 %9416  ;;  %v9427_v46 = vsel %vm3279_vm5, %v22933_v27, %v22901_v43  ;;  %v9426_v38 = vsel %vm3279_vm5, %v22832_v31, %v22933_v27 }
 0x354   :  { %9197 = vmatprep.subr.mxu0 %v8711_v29  ;;  %8959 = vmatprep.mubr.f32.mxu0 %v21282_v2  ;;  %v9432_v10 = vsel %vm3279_vm5, %v22917_v20, %v22942_v26 }
 0x355   :  { %9338 = vmatprep.mubr.f32.mxu1 %v21282_v2 }
 0x356   :  { %v22949_v30 = vpop.permute.xlu0 %10114  ;;  %18327 = vmatmul.mubr.msk.f32.gmra.mrb[14].mxu0 %vm143_vm1, %v22863_v56 }
 0x357   :  { %18336 = vmatmul.mubr.msk.f32.vlgmr.msra.gmra.mrb[22].mxu1 %vm143_vm1, %v22837_v55  ;;  %v22958_v34 = vpop.permute.xlu1 %10112  ;;  %9107 = vmatprep.mubr.f32.mxu0 %v21282_v2 }
 0x358   :  { %9533 = vmatpush1.msra.mxu1 %v9420_v32  ;;  %9344 = vmatprep.mubr.f32.mxu1 %v21282_v2  ;;  %v10141_v22 = vsel %vm3932_vm6, %v22958_v34, %v22949_v30 }
 0x359   :  { %9686 = vmatprep.subr.mxu1 %v9425_v37 }
 0x35a   :  { %v22965_v39 = vpop.permute.xlu0 %9412  ;;  %18330 = vmatmul.mubr.msk.f32.vlgmr.msra.gmra.mrb[16].mxu0 %vm143_vm1, %v22837_v55 }
 0x35b   :  { %9198 = vmatpush1.msra.mxu0 %v8710_v0  ;;  %18337 = vmatmul.mubr.msk.f32.gmra.mrb[24].mxu1 %vm143_vm1, %v22863_v56  ;;  %v22974_v41 = vpop.permute.xlu1 %10110  ;;  %v9431_v53 = vsel %vm3279_vm5, %v22965_v39, %v22917_v20  ;;  %v9430_v13 = vsel %vm3279_vm5, %v22908_v17, %v22965_v39 }
 0x35c   :  { %9455 = vmatprep.subr.mxu0 %v9419_v44  ;;  %9113 = vmatprep.mubr.f32.mxu0 %v21282_v2  ;;  %v10140_v11 = vsel %vm3932_vm6, %v22974_v41, %v22958_v34 }
 0x35d   :  { %9596 = vmatprep.mubr.f32.mxu1 %v21282_v2 }
 0x35e   :  { %v22986_v4 = vpop.permute.xlu0 %10122  ;;  %18331 = vmatmul.mubr.msk.f32.gmra.mrb[18].mxu0 %vm143_vm1, %v22863_v56 }
 0x35f   :  { %18342 = vmatmul.mubr.msk.f32.vlgmr.msra.gmra.mrb[10].mxu1 %vm143_vm1, %v22983_v1  ;;  %v22995_v47 = vpop.permute.xlu1 %10120  ;;  %9261 = vmatprep.mubr.f32.mxu0 %v21282_v2 }
 0x360   :  { %9687 = vmatpush1.msra.mxu1 %v9424_v45  ;;  %9602 = vmatprep.mubr.f32.mxu1 %v21282_v2  ;;  %v10145_v31 = vsel %vm3932_vm6, %v22995_v47, %v22986_v4 }
 0x361   :  { %9840 = vmatprep.subr.mxu1 %v9429_v5 }
 0x362   :  { %v23010_v7 = vpop.permute.xlu0 %10108  ;;  %18334 = vmatmul.mubr.msk.f32.vlgmr.msra.gmra.mrb[20].mxu0 %vm143_vm1, %v22837_v55 }
 0x363   :  { %9456 = vmatpush1.msra.mxu0 %v9418_v48  ;;  %18343 = vmatmul.mubr.msk.f32.gmra.mrb[12].mxu1 %vm143_vm1, %v23005_v6  ;;  %v23016_v57 = vpop.permute.xlu1 %10118  ;;  %v10139_v35 = vsel %vm3932_vm6, %v23010_v7, %v22974_v41  ;;  %v23272_v48 = vld [vmem:[%s25634_s3 + $0x78] sm:$0xff] }
 0x364   :  { %9609 = vmatprep.subr.mxu0 %v9423_v59  ;;  %9267 = vmatprep.mubr.f32.mxu0 %v21282_v2  ;;  %v10144_v58 = vsel %vm3932_vm6, %v23016_v57, %v22995_v47 }
 0x365   :  { %9750 = vmatprep.mubr.f32.mxu1 %v21282_v2 }
 0x366   :  { %v23023_v49 = vpop.permute.xlu0 %10128  ;;  %18335 = vmatmul.mubr.msk.f32.gmra.mrb[22].mxu0 %vm143_vm1, %v22863_v56 }
 0x367   :  { %18346 = vmatmul.mubr.msk.f32.vlgmr.msra.gmra.mrb[14].mxu1 %vm143_vm1, %v22983_v1  ;;  %v23035_v12 = vpop.permute.xlu1 %10106  ;;  %9519 = vmatprep.mubr.f32.mxu0 %v21282_v2 }
 0x368   :  { %9841 = vmatpush1.msra.mxu1 %v9428_v51  ;;  %9756 = vmatprep.mubr.f32.mxu1 %v21282_v2  ;;  %v10138_v16 = vsel %vm3932_vm6, %v23035_v12, %v23010_v7 }
 0x369   :  { %9994 = vmatprep.subr.mxu1 %v22942_v26 }
 0x36a   :  { %v23040_v9 = vpop.permute.xlu0 %10126  ;;  %18340 = vmatmul.mubr.msk.f32.vlgmr.msra.gmra.mrb[8].mxu0 %vm143_vm1, %v22983_v1 }
 0x36b   :  { %9610 = vmatpush1.msra.mxu0 %v9422_v33  ;;  %18347 = vmatmul.mubr.msk.f32.gmra.mrb[16].mxu1 %vm143_vm1, %v23005_v6  ;;  %v23049_v24 = vpop.permute.xlu1 %10130  ;;  %v10148_v17 = vsel %vm3932_vm6, %v23040_v9, %v23023_v49 }
 0x36c   :  { %9763 = vmatprep.subr.mxu0 %v9427_v46  ;;  %9525 = vmatprep.mubr.f32.mxu0 %v21282_v2  ;;  %v10149_v40 = vsel %vm3932_vm6, %v23023_v49, %v23049_v24 }
 0x36d   :  { %9904 = vmatprep.mubr.f32.mxu1 %v21282_v2 }
 0x36e   :  { %v23056_v52 = vpop.permute.xlu0 %10134  ;;  %18341 = vmatmul.mubr.msk.f32.gmra.mrb[10].mxu0 %vm143_vm1, %v23005_v6 }
 0x36f   :  { %18350 = vmatmul.mubr.msk.f32.vlgmr.msra.gmra.mrb[18].mxu1 %vm143_vm1, %v22983_v1  ;;  %v23065_v18 = vpop.permute.xlu1 %10116  ;;  %9673 = vmatprep.mubr.f32.mxu0 %v21282_v2 }
 0x370   :  { %9995 = vmatpush1.msra.mxu1 %v9432_v10  ;;  %9910 = vmatprep.mubr.f32.mxu1 %v21282_v2  ;;  %v10143_v43 = vsel %vm3932_vm6, %v23065_v18, %v23016_v57  ;;  %v10142_v20 = vsel %vm3932_vm6, %v22949_v30, %v23065_v18 }
 0x371   :  { %10252 = vmatprep.subr.mxu1 %v10141_v22 }
 0x372   :  { %v23072_v8 = vpop.permute.xlu0 %10124  ;;  %18344 = vmatmul.mubr.msk.f32.vlgmr.msra.gmra.mrb[12].mxu0 %vm143_vm1, %v22983_v1 }
 0x373   :  { %9764 = vmatpush1.msra.mxu0 %v9426_v38  ;;  %18351 = vmatmul.mubr.msk.f32.gmra.mrb[20].mxu1 %vm143_vm1, %v23005_v6  ;;  %v23081_v63 = vpop.permute.xlu1 %10136  ;;  %v10147_v23 = vsel %vm3932_vm6, %v23072_v8, %v23040_v9  ;;  %v10146_v29 = vsel %vm3932_vm6, %v22986_v4, %v23072_v8  ;;  %v23250_v4 = vld [vmem:[%s25634_s3 + $0x70] sm:$0xff] }
 0x374   :  { %9917 = vmatprep.subr.mxu0 %v9431_v53  ;;  %9679 = vmatprep.mubr.f32.mxu0 %v21282_v2  ;;  %v10152_v27 = vsel %vm3932_vm6, %v23056_v52, %v23081_v63 }
 0x375   :  { %10058 = vmatprep.mubr.f32.mxu1 %v21282_v2 }
 0x376   :  { %v23088_v54 = vpop.permute.xlu0 %10834  ;;  %18345 = vmatmul.mubr.msk.f32.gmra.mrb[14].mxu0 %vm143_vm1, %v23005_v6 }
 0x377   :  { %18354 = vmatmul.mubr.msk.f32.vlgmr.msra.gmra.mrb[22].mxu1 %vm143_vm1, %v22983_v1  ;;  %v23097_v36 = vpop.permute.xlu1 %10832  ;;  %9827 = vmatprep.mubr.f32.mxu0 %v21282_v2 }
 0x378   :  { %10253 = vmatpush1.msra.mxu1 %v10140_v11  ;;  %10064 = vmatprep.mubr.f32.mxu1 %v21282_v2  ;;  %v10861_v26 = vsel %vm4585_vm7, %v23097_v36, %v23088_v54 }
 0x379   :  { %10406 = vmatprep.subr.mxu1 %v10145_v31  ;;  %v23357_v31 = vld [vmem:[%s25634_s3 + $0x80] sm:$0xff] }
 0x37a   :  { %v23104_v55 = vpop.permute.xlu0 %10132  ;;  %18348 = vmatmul.mubr.msk.f32.vlgmr.msra.gmra.mrb[16].mxu0 %vm143_vm1, %v22983_v1 }
 0x37b   :  { %9918 = vmatpush1.msra.mxu0 %v9430_v13  ;;  %18355 = vmatmul.mubr.msk.f32.gmra.mrb[24].mxu1 %vm143_vm1, %v23005_v6  ;;  %v23113_v42 = vpop.permute.xlu1 %10830  ;;  %v10151_v34 = vsel %vm3932_vm6, %v23104_v55, %v23056_v52  ;;  %v10150_v44 = vsel %vm3932_vm6, %v23049_v24, %v23104_v55 }
 0x37c   :  { %10175 = vmatprep.subr.mxu0 %v10139_v35  ;;  %9833 = vmatprep.mubr.f32.mxu0 %v21282_v2  ;;  %v10860_v37 = vsel %vm4585_vm7, %v23113_v42, %v23097_v36  ;;  %v23374_v35 = vld [vmem:[%s25634_s3 + $0x88] sm:$0xff]  ;;  %s21301_s3 = smov 56  }
 0x37d   :  { %10316 = vmatprep.mubr.f32.mxu1 %v21282_v2 }
 0x37e   :  { %v23125_v56 = vpop.permute.xlu0 %10842  ;;  %18349 = vmatmul.mubr.msk.f32.gmra.mrb[18].mxu0 %vm143_vm1, %v23005_v6 }
 0x37f   :  { %18360 = vmatmul.mubr.msk.f32.vlgmr.msra.gmra.mrb[10].mxu1 %vm143_vm1, %v23122_v14  ;;  %v23134_v15 = vpop.permute.xlu1 %10840  ;;  %9981 = vmatprep.mubr.f32.mxu0 %v21282_v2 }
 0x380   :  { %10407 = vmatpush1.msra.mxu1 %v10144_v58  ;;  %10322 = vmatprep.mubr.f32.mxu1 %v21282_v2  ;;  %v10865_v0 = vsel %vm4585_vm7, %v23134_v15, %v23125_v56 }
 0x381   :  { %10560 = vmatprep.subr.mxu1 %v10149_v40 }
 0x382   :  { %v23149_v60 = vpop.permute.xlu0 %10828  ;;  %18352 = vmatmul.mubr.msk.f32.vlgmr.msra.gmra.mrb[20].mxu0 %vm143_vm1, %v22983_v1 }
 0x383   :  { %10176 = vmatpush1.msra.mxu0 %v10138_v16  ;;  %18361 = vmatmul.mubr.msk.f32.gmra.mrb[12].mxu1 %vm143_vm1, %v23144_v3  ;;  %v23155_v61 = vpop.permute.xlu1 %10838  ;;  %v10859_v1 = vsel %vm4585_vm7, %v23149_v60, %v23113_v42 }
 0x384   :  { %10329 = vmatprep.subr.mxu0 %v10143_v43  ;;  %9987 = vmatprep.mubr.f32.mxu0 %v21282_v2  ;;  %v10864_v5 = vsel %vm4585_vm7, %v23155_v61, %v23134_v15 }
 0x385   :  { %10470 = vmatprep.mubr.f32.mxu1 %v21282_v2 }
 0x386   :  { %18353 = vmatmul.mubr.msk.f32.gmra.mrb[22].mxu0 %vm143_vm1, %v23005_v6  ;;  %v23164_v62 = vpop.permute.xlu0 %10848 }
 0x387   :  { %18364 = vmatmul.mubr.msk.f32.vlgmr.msra.gmra.mrb[14].mxu1 %vm143_vm1, %v23122_v14  ;;  %v23171_v19 = vpop.permute.xlu1 %10826  ;;  %10239 = vmatprep.mubr.f32.mxu0 %v21282_v2 }
 0x388   :  { %10561 = vmatpush1.msra.mxu1 %v10148_v17  ;;  %10476 = vmatprep.mubr.f32.mxu1 %v21282_v2  ;;  %v10858_v7 = vsel %vm4585_vm7, %v23171_v19, %v23149_v60  ;;  %v12387_v60 = vld [vmem:[%s25636_s5 + $0x180] sm:$0xff] }
 0x389   :  { %10714 = vmatprep.subr.mxu1 %v23081_v63 }
 0x38a   :  { %18358 = vmatmul.mubr.msk.f32.vlgmr.msra.gmra.mrb[8].mxu0 %vm143_vm1, %v23122_v14  ;;  %v23189_v25 = vpop.permute.xlu0 %10846 }
 0x38b   :  { %10330 = vmatpush1.msra.mxu0 %v10142_v20  ;;  %18365 = vmatmul.mubr.msk.f32.gmra.mrb[16].mxu1 %vm143_vm1, %v23144_v3  ;;  %v23183_v21 = vpop.permute.xlu1 %10850  ;;  %v10868_v50 = vsel %vm4585_vm7, %v23189_v25, %v23164_v62  ;;  %v12371_v20 = vld [vmem:[%s25636_s5 + $0x100] sm:$0xff] }
 0x38c   :  { %10483 = vmatprep.subr.mxu0 %v10147_v23  ;;  %10245 = vmatprep.mubr.f32.mxu0 %v21282_v2  ;;  %v10869_v6 = vsel %vm4585_vm7, %v23164_v62, %v23183_v21 }
 0x38d   :  { %10624 = vmatprep.mubr.f32.mxu1 %v21282_v2 }
 0x38e   :  { %18359 = vmatmul.mubr.msk.f32.gmra.mrb[10].mxu0 %vm143_vm1, %v23144_v3  ;;  %v23211_v30 = vpop.permute.xlu0 %10854 }
 0x38f   :  { %18368 = vmatmul.mubr.msk.f32.vlgmr.msra.gmra.mrb[18].mxu1 %vm143_vm1, %v23122_v14  ;;  %v23199_v28 = vpop.permute.xlu1 %10836  ;;  %10393 = vmatprep.mubr.f32.mxu0 %v21282_v2 }
 0x390   :  { %10715 = vmatpush1.msra.mxu1 %v10152_v27  ;;  %10630 = vmatprep.mubr.f32.mxu1 %v21282_v2  ;;  %v10863_v57 = vsel %vm4585_vm7, %v23199_v28, %v23155_v61  ;;  %v10862_v12 = vsel %vm4585_vm7, %v23088_v54, %v23199_v28  ;;  %v12388_v61 = vld [vmem:[%s25636_s5 + $0x188] sm:$0xff]  ;;  %v12390_v27 = vld [vmem:[%s25636_s5 + $0x198] sm:$0xff] }
 0x391   :  { %10972 = vmatprep.subr.mxu1 %v10861_v26  ;;  %v19747_v62 = vpack.c.bf16 %v12388_v61, %v12387_v60 }
 0x392   :  { %18362 = vmatmul.mubr.msk.f32.vlgmr.msra.gmra.mrb[12].mxu0 %vm143_vm1, %v23122_v14  ;;  %v10845_v41 = vpop.permute.xlu0 %10844 }
 0x393   :  { %10484 = vmatpush1.msra.mxu0 %v10146_v29  ;;  %18369 = vmatmul.mubr.msk.f32.gmra.mrb[20].mxu1 %vm143_vm1, %v23144_v3  ;;  %v23215_v32 = vpop.permute.xlu1 %10856  ;;  %v10867_v33 = vsel %vm4585_vm7, %v10845_v41, %v23189_v25  ;;  %v10866_v18 = vsel %vm4585_vm7, %v23125_v56, %v10845_v41  ;;  %v12389_v25 = vld [vmem:[%s25636_s5 + $0x190] sm:$0xff] }
 0x394   :  { %10637 = vmatprep.subr.mxu0 %v10151_v34  ;;  %10399 = vmatprep.mubr.f32.mxu0 %v21282_v2  ;;  %v10872_v24 = vsel %vm4585_vm7, %v23211_v30, %v23215_v32  ;;  %v19751_v29 = vpack.c.bf16 %v12390_v27, %v12389_v25  ;;  %v12391_v34 = vld [vmem:[%s25636_s5 + $0x1a0] sm:$0xff]  ;;  %v12364_v27 = vld [vmem:[%s25636_s5 + $0xc8] sm:$0xff] }
 0x395   :  { %10778 = vmatprep.mubr.f32.mxu1 %v21282_v2  ;;  %v12363_v25 = vld [vmem:[%s25636_s5 + $0xc0] sm:$0xff] }
 0x396   :  { %18363 = vmatmul.mubr.msk.f32.gmra.mrb[14].mxu0 %vm143_vm1, %v23144_v3  ;;  %v23257_v47 = vpop.permute.xlu0 %11554 }
 0x397   :  { %18372 = vmatmul.mubr.msk.f32.vlgmr.msra.gmra.mrb[22].mxu1 %vm143_vm1, %v23122_v14  ;;  %10547 = vmatprep.mubr.f32.mxu0 %v21282_v2  ;;  %v23230_v39 = vpop.permute.xlu1 %11552 }
 0x398   :  { %10973 = vmatpush1.msra.mxu1 %v10860_v37  ;;  %10784 = vmatprep.mubr.f32.mxu1 %v21282_v2  ;;  %v11581_v52 = vsel %vm5238_vm8, %v23230_v39, %v23257_v47  ;;  %v12392_v37 = vld [vmem:[%s25636_s5 + $0x1a8] sm:$0xff] }
 0x399   :  { %11126 = vmatprep.subr.mxu1 %v10865_v0  ;;  %v12356_v0 = vld [vmem:[%s25636_s5 + $0x88] sm:$0xff] }
 0x39a   :  { %18366 = vmatmul.mubr.msk.f32.vlgmr.msra.gmra.mrb[16].mxu0 %vm143_vm1, %v23122_v14  ;;  %v10853_v49 = vpop.permute.xlu0 %10852 }
 0x39b   :  { %10638 = vmatpush1.msra.mxu0 %v10150_v44  ;;  %18373 = vmatmul.mubr.msk.f32.gmra.mrb[24].mxu1 %vm143_vm1, %v23144_v3  ;;  %v23253_v45 = vpop.permute.xlu1 %11550  ;;  %v10871_v22 = vsel %vm4585_vm7, %v10853_v49, %v23211_v30  ;;  %v10870_v54 = vsel %vm4585_vm7, %v23183_v21, %v10853_v49  ;;  %v12372_v21 = vld [vmem:[%s25636_s5 + $0x108] sm:$0xff]  ;;  %v12373_v30 = vld [vmem:[%s25636_s5 + $0x110] sm:$0xff]  ;;  %v19755_v44 = vpack.c.bf16 %v12392_v37, %v12391_v34 }
 0x39c   :  { %10895 = vmatprep.subr.mxu0 %v10859_v1  ;;  %10553 = vmatprep.mubr.f32.mxu0 %v21282_v2  ;;  %v11580_v63 = vsel %vm5238_vm8, %v23253_v45, %v23230_v39  ;;  %v19749_v26 = vpack.c.bf16 %v12372_v21, %v12371_v20  ;;  %v12355_v39 = vld [vmem:[%s25636_s5 + $0x80] sm:$0xff]  ;;  %v12384_v20 = vld [vmem:[%s25636_s5 + $0x168] sm:$0xff] }
 0x39d   :  { %11036 = vmatprep.mubr.f32.mxu1 %v21282_v2  ;;  %v12375_v1 = vld [vmem:[%s25636_s5 + $0x120] sm:$0xff] }
 0x39e   :  { %18367 = vmatmul.mubr.msk.f32.gmra.mrb[18].mxu0 %vm143_vm1, %v23144_v3  ;;  %v11547_v9 = vpop.permute.xlu0 %11546 }
 0x39f   :  { %18378 = vmatmul.mubr.msk.f32.vlgmr.msra.gmra.mrb[10].mxu1 %vm143_vm1, %v23250_v4  ;;  %10701 = vmatprep.mubr.f32.mxu0 %v21282_v2  ;;  %v23284_v59 = vpop.permute.xlu1 %11548 }
 0x3a0   :  { %11127 = vmatpush1.msra.mxu1 %v10864_v5  ;;  %11042 = vmatprep.mubr.f32.mxu1 %v21282_v2  ;;  %v11579_v11 = vsel %vm5238_vm8, %v23284_v59, %v23253_v45  ;;  %v11578_v56 = vsel %vm5238_vm8, %v11547_v9, %v23284_v59  ;;  %v19715_v45 = vpack.c.bf16 %v12356_v0, %v12355_v39  ;;  %v12393_v5 = vld [vmem:[%s25636_s5 + $0x1b0] sm:$0xff]  ;;  %v12395_v9 = vld [vmem:[%s25636_s5 + $0x1c0] sm:$0xff]  ;;  %v12386_v0 = vld [vmem:[%s25636_s5 + $0x178] sm:$0xff] }
 0x3a1   :  { %11280 = vmatprep.subr.mxu1 %v10869_v6  ;;  %v12394_v6 = vld [vmem:[%s25636_s5 + $0x1b8] sm:$0xff]  ;;  %v12377_v59 = vld [vmem:[%s25636_s5 + $0x130] sm:$0xff] }
 0x3a2   :  { %18370 = vmatmul.mubr.msk.f32.vlgmr.msra.gmra.mrb[20].mxu0 %vm143_vm1, %v23122_v14  ;;  %v23321_v10 = vpop.permute.xlu0 %11562  ;;  %v19759_v49 = vpack.c.bf16 %v12394_v6, %v12393_v5  ;;  %v12385_v39 = vld [vmem:[%s25636_s5 + $0x170] sm:$0xff]  ;;  %v12350_v6 = vld [vmem:[%s25636_s5 + $0x58] sm:$0xff] }
 0x3a3   :  { %10896 = vmatpush1.msra.mxu0 %v10858_v7  ;;  %18379 = vmatmul.mubr.msk.f32.gmra.mrb[12].mxu1 %vm143_vm1, %v23272_v48  ;;  %v11561_v51 = vpop.permute.xlu1 %11560  ;;  %v12339_v7 = vld [vmem:[%s25636_s5] sm:$0xff]  ;;  %v12349_v5 = vld [vmem:[%s25636_s5 + $0x50] sm:$0xff] }
 0x3a4   :  { %11049 = vmatprep.subr.mxu0 %v10863_v57  ;;  %10707 = vmatprep.mubr.f32.mxu0 %v21282_v2  ;;  %v11585_v53 = vsel %vm5238_vm8, %v11561_v51, %v23321_v10  ;;  %v12340_v57 = vld [vmem:[%s25636_s5 + $0x8] sm:$0xff] }
 0x3a5   :  { %11190 = vmatprep.mubr.f32.mxu1 %v21282_v2 }
 0x3a6   :  { %18371 = vmatmul.mubr.msk.f32.gmra.mrb[22].mxu0 %vm143_vm1, %v23144_v3  ;;  %v11557_v38 = vpop.permute.xlu0 %11556 }
 0x3a7   :  { %18382 = vmatmul.mubr.msk.f32.vlgmr.msra.gmra.mrb[14].mxu1 %vm143_vm1, %v23250_v4  ;;  %10959 = vmatprep.mubr.f32.mxu0 %v21282_v2  ;;  %v11559_v46 = vpop.permute.xlu1 %11558  ;;  %v11582_v16 = vsel %vm5238_vm8, %v23257_v47, %v11557_v38 }
 0x3a8   :  { %11281 = vmatpush1.msra.mxu1 %v10868_v50  ;;  %11196 = vmatprep.mubr.f32.mxu1 %v21282_v2  ;;  %v11584_v13 = vsel %vm5238_vm8, %v11559_v46, %v11561_v51  ;;  %v11583_v58 = vsel %vm5238_vm8, %v11557_v38, %v11559_v46  ;;  %v12378_v50 = vld [vmem:[%s25636_s5 + $0x138] sm:$0xff]  ;;  %v12357_v51 = vld [vmem:[%s25636_s5 + $0x90] sm:$0xff]  ;;  %v12380_v38 = vld [vmem:[%s25636_s5 + $0x148] sm:$0xff] }
 0x3a9   :  { %11434 = vmatprep.subr.mxu1 %v23215_v32  ;;  %v12374_v32 = vld [vmem:[%s25636_s5 + $0x118] sm:$0xff]  ;;  %v19761_v46 = vpack.c.bf16 %v12378_v50, %v12377_v59  ;;  %v12368_v59 = vld [vmem:[%s25636_s5 + $0xe8] sm:$0xff]  ;;  %v12351_v50 = vld [vmem:[%s25636_s5 + $0x60] sm:$0xff] }
 0x3aa   :  { %18376 = vmatmul.mubr.msk.f32.vlgmr.msra.gmra.mrb[8].mxu0 %vm143_vm1, %v23250_v4  ;;  %v23359_v55 = vpop.permute.xlu0 %11570  ;;  %v19753_v41 = vpack.c.bf16 %v12374_v32, %v12373_v30  ;;  %v12347_v30 = vld [vmem:[%s25636_s5 + $0x40] sm:$0xff]  ;;  %v12348_v32 = vld [vmem:[%s25636_s5 + $0x48] sm:$0xff] }
 0x3ab   :  { %11050 = vmatpush1.msra.mxu0 %v10862_v12  ;;  %18383 = vmatmul.mubr.msk.f32.gmra.mrb[16].mxu1 %vm143_vm1, %v23272_v48  ;;  %v11569_v8 = vpop.permute.xlu1 %11568  ;;  %v12358_v12 = vld [vmem:[%s25636_s5 + $0x98] sm:$0xff]  ;;  %v19733_v37 = vpack.c.bf16 %v12348_v32, %v12347_v30 }
 0x3ac   :  { %11203 = vmatprep.subr.mxu0 %v10867_v33  ;;  %10965 = vmatprep.mubr.f32.mxu0 %v21282_v2  ;;  %v11589_v42 = vsel %vm5238_vm8, %v11569_v8, %v23359_v55  ;;  %v12396_v33 = vld [vmem:[%s25636_s5 + $0x1c8] sm:$0xff]  ;;  %v12458_v30 = vld [vmem:[%s25636_s5 + $0x3b8] sm:$0xff] }
 0x3ad   :  { %11344 = vmatprep.mubr.f32.mxu1 %v21282_v2 }
 0x3ae   :  { %18377 = vmatmul.mubr.msk.f32.gmra.mrb[10].mxu0 %vm143_vm1, %v23272_v48  ;;  %v11565_v40 = vpop.permute.xlu0 %11564 }
 0x3af   :  { %18386 = vmatmul.mubr.msk.f32.vlgmr.msra.gmra.mrb[18].mxu1 %vm143_vm1, %v23250_v4  ;;  %11113 = vmatprep.mubr.f32.mxu0 %v21282_v2  ;;  %v11567_v36 = vpop.permute.xlu1 %11566  ;;  %v11586_v23 = vsel %vm5238_vm8, %v23321_v10, %v11565_v40  ;;  %v12341_v10 = vld [vmem:[%s25636_s5 + $0x10] sm:$0xff] }
 0x3b0   :  { %11435 = vmatpush1.msra.mxu1 %v10872_v24  ;;  %11350 = vmatprep.mubr.f32.mxu1 %v21282_v2  ;;  %v11588_v15 = vsel %vm5238_vm8, %v11567_v36, %v11569_v8  ;;  %v11587_v43 = vsel %vm5238_vm8, %v11565_v40, %v11567_v36  ;;  %v19717_v24 = vpack.c.bf16 %v12340_v57, %v12339_v7  ;;  %v12362_v40 = vld [vmem:[%s25636_s5 + $0xb8] sm:$0xff]  ;;  %v12367_v57 = vld [vmem:[%s25636_s5 + $0xe0] sm:$0xff] }
 0x3b1   :  { %11692 = vmatprep.subr.mxu1 %v11581_v52  ;;  %v19719_v52 = vpack.c.bf16 %v12358_v12, %v12357_v51  ;;  %v19763_v8 = vpack.c.bf16 %v12396_v33, %v12395_v9  ;;  %v19737_v7 = vpack.c.bf16 %v12350_v6, %v12349_v5  ;;  %v12352_v51 = vld [vmem:[%s25636_s5 + $0x68] sm:$0xff]  ;;  %v12369_v9 = vld [vmem:[%s25636_s5 + $0xf0] sm:$0xff]  ;;  %v12370_v33 = vld [vmem:[%s25636_s5 + $0xf8] sm:$0xff] }
 0x3b2   :  { %18380 = vmatmul.mubr.msk.f32.vlgmr.msra.gmra.mrb[12].mxu0 %vm143_vm1, %v23250_v4  ;;  %v11575_v17 = vpop.permute.xlu0 %11574  ;;  %v19741_v12 = vpack.c.bf16 %v12352_v51, %v12351_v50  ;;  %v12442_v6 = vld [vmem:[%s25636_s5 + $0x338] sm:$0xff] }
 0x3b3   :  { %11204 = vmatpush1.msra.mxu0 %v10866_v18  ;;  %18387 = vmatmul.mubr.msk.f32.gmra.mrb[20].mxu1 %vm143_vm1, %v23272_v48  ;;  %v23376_v14 = vpop.permute.xlu1 %11572  ;;  %v12342_v18 = vld [vmem:[%s25636_s5 + $0x18] sm:$0xff] }
 0x3b4   :  { %11357 = vmatprep.subr.mxu0 %v10871_v22  ;;  %11119 = vmatprep.mubr.f32.mxu0 %v21282_v2  ;;  %v11591_v28 = vsel %vm5238_vm8, %v23376_v14, %v11575_v17  ;;  %v11590_v47 = vsel %vm5238_vm8, %v23359_v55, %v23376_v14  ;;  %v12379_v22 = vld [vmem:[%s25636_s5 + $0x140] sm:$0xff]  ;;  %v19721_v36 = vpack.c.bf16 %v12342_v18, %v12341_v10  ;;  %v12381_v14 = vld [vmem:[%s25636_s5 + $0x150] sm:$0xff] }
 0x3b5   :  { %11498 = vmatprep.mubr.f32.mxu1 %v21282_v2  ;;  %v19765_v55 = vpack.c.bf16 %v12380_v38, %v12379_v22  ;;  %v12419_v18 = vld [vmem:[%s25636_s5 + $0x280] sm:$0xff]  ;;  %v12420_v22 = vld [vmem:[%s25636_s5 + $0x288] sm:$0xff] }
 0x3b6   :  { %18381 = vmatmul.mubr.msk.f32.gmra.mrb[14].mxu0 %vm143_vm1, %v23272_v48 }
 0x3b7   :  { %18390 = vmatmul.mubr.msk.f32.vlgmr.msra.gmra.mrb[22].mxu1 %vm143_vm1, %v23250_v4  ;;  %11267 = vmatprep.mubr.f32.mxu0 %v21282_v2  ;;  %v11577_v3 = vpop.permute.xlu1 %11576 }
 0x3b8   :  { %11693 = vmatpush1.msra.mxu1 %v11580_v63  ;;  %11504 = vmatprep.mubr.f32.mxu1 %v21282_v2  ;;  %v11592_v19 = vsel %vm5238_vm8, %v11575_v17, %v11577_v3  ;;  %v12359_v63 = vld [vmem:[%s25636_s5 + $0xa0] sm:$0xff] }
 0x3b9   :  { %11846 = vmatprep.subr.mxu1 %v11585_v53  ;;  %v12360_v53 = vld [vmem:[%s25636_s5 + $0xa8] sm:$0xff] }
 0x3ba   :  { %18384 = vmatmul.mubr.msk.f32.vlgmr.msra.gmra.mrb[16].mxu0 %vm143_vm1, %v23250_v4 }
 0x3bb   :  { %11358 = vmatpush1.msra.mxu0 %v10870_v54  ;;  %18391 = vmatmul.mubr.msk.f32.gmra.mrb[24].mxu1 %vm143_vm1, %v23272_v48  ;;  %v12397_v54 = vld [vmem:[%s25636_s5 + $0x1d0] sm:$0xff] }
 0x3bc   :  { %11615 = vmatprep.subr.mxu0 %v11579_v11  ;;  %11273 = vmatprep.mubr.f32.mxu0 %v21282_v2  ;;  %v12398_v11 = vld [vmem:[%s25636_s5 + $0x1d8] sm:$0xff] }
 0x3bd   :  { %11756 = vmatprep.mubr.f32.mxu1 %v21282_v2 }
 0x3be   :  { %18385 = vmatmul.mubr.msk.f32.gmra.mrb[18].mxu0 %vm143_vm1, %v23272_v48 }
 0x3bf   :  { %18396 = vmatmul.mubr.msk.f32.vlgmr.msra.gmra.mrb[10].mxu1 %vm143_vm1, %v23357_v31  ;;  %11421 = vmatprep.mubr.f32.mxu0 %v21282_v2 }
 0x3c0   :  { %11847 = vmatpush1.msra.mxu1 %v11584_v13  ;;  %11762 = vmatprep.mubr.f32.mxu1 %v21282_v2  ;;  %v19723_v13 = vpack.c.bf16 %v12360_v53, %v12359_v63 }
 0x3c1   :  { %12000 = vmatprep.subr.mxu1 %v11589_v42  ;;  %v12344_v42 = vld [vmem:[%s25636_s5 + $0x28] sm:$0xff] }
 0x3c2   :  { %18388 = vmatmul.mubr.msk.f32.vlgmr.msra.gmra.mrb[20].mxu0 %vm143_vm1, %v23250_v4  ;;  %v12376_v4 = vld [vmem:[%s25636_s5 + $0x128] sm:$0xff] }
 0x3c3   :  { %11616 = vmatpush1.msra.mxu0 %v11578_v56  ;;  %18397 = vmatmul.mubr.msk.f32.gmra.mrb[12].mxu1 %vm143_vm1, %v23374_v35  ;;  %v19767_v56 = vpack.c.bf16 %v12398_v11, %v12397_v54  ;;  %v23646_v38 = vpop.permute.xlu0 %12267  ;;  %v12435_v11 = vld [vmem:[%s25636_s5 + $0x300] sm:$0xff] }
 0x3c4   :  { %11769 = vmatprep.subr.mxu0 %v11583_v58  ;;  %11427 = vmatprep.mubr.f32.mxu0 %v21282_v2  ;;  %v12382_v58 = vld [vmem:[%s25636_s5 + $0x158] sm:$0xff] }
 0x3c5   :  { %11910 = vmatprep.mubr.f32.mxu1 %v21282_v2  ;;  %v19769_v61 = vpack.c.bf16 %v12382_v58, %v12381_v14 }
 0x3c6   :  { %18389 = vmatmul.mubr.msk.f32.gmra.mrb[22].mxu0 %vm143_vm1, %v23272_v48  ;;  %v19757_v48 = vpack.c.bf16 %v12376_v4, %v12375_v1  ;;  %v12366_v1 = vld [vmem:[%s25636_s5 + $0xd8] sm:$0xff]  ;;  %v12451_v4 = vld [vmem:[%s25636_s5 + $0x380] sm:$0xff] }
 0x3c7   :  { %18400 = vmatmul.mubr.msk.f32.vlgmr.msra.gmra.mrb[14].mxu1 %vm143_vm1, %v23357_v31  ;;  %11679 = vmatprep.mubr.f32.mxu0 %v21282_v2 }
 0x3c8   :  { %12001 = vmatpush1.msra.mxu1 %v11588_v15  ;;  %11916 = vmatprep.mubr.f32.mxu1 %v21282_v2  ;;  %v12361_v15 = vld [vmem:[%s25636_s5 + $0xb0] sm:$0xff] }
 0x3c9   :  { %12154 = vmatprep.subr.mxu1 %v11577_v3  ;;  %v12399_v3 = vld [vmem:[%s25636_s5 + $0x1e0] sm:$0xff] }
 0x3ca   :  { %18394 = vmatmul.mubr.msk.f32.vlgmr.msra.gmra.mrb[8].mxu0 %vm143_vm1, %v23357_v31 }
 0x3cb   :  { %11770 = vmatpush1.msra.mxu0 %v11582_v16  ;;  %18401 = vmatmul.mubr.msk.f32.gmra.mrb[16].mxu1 %vm143_vm1, %v23374_v35  ;;  %v12400_v16 = vld [vmem:[%s25636_s5 + $0x1e8] sm:$0xff] }
 0x3cc   :  { %11923 = vmatprep.subr.mxu0 %v11587_v43  ;;  %11685 = vmatprep.mubr.f32.mxu0 %v21282_v2  ;;  %v19727_v43 = vpack.c.bf16 %v12362_v40, %v12361_v15  ;;  %v19771_v17 = vpack.c.bf16 %v12400_v16, %v12399_v3 }
 0x3cd   :  { %12064 = vmatprep.mubr.f32.mxu1 %v21282_v2 }
 0x3ce   :  { %18395 = vmatmul.mubr.msk.f32.gmra.mrb[10].mxu0 %vm143_vm1, %v23374_v35 }
 0x3cf   :  { %18404 = vmatmul.mubr.msk.f32.vlgmr.msra.gmra.mrb[18].mxu1 %vm143_vm1, %v23357_v31  ;;  %11833 = vmatprep.mubr.f32.mxu0 %v21282_v2 }
 0x3d0   :  { %12155 = vmatpush1.msra.mxu1 %v11592_v19  ;;  %12070 = vmatprep.mubr.f32.mxu1 %v21282_v2  ;;  %v12383_v19 = vld [vmem:[%s25636_s5 + $0x160] sm:$0xff] }
 0x3d1   :  { %19748 = vmatprep.subr.bf16.mxu1 %v19747_v62  ;;  %v12345_v62 = vld [vmem:[%s25636_s5 + $0x30] sm:$0xff] }
 0x3d2   :  { %18398 = vmatmul.mubr.msk.f32.vlgmr.msra.gmra.mrb[12].mxu0 %vm143_vm1, %v23357_v31 }
 0x3d3   :  { %11924 = vmatpush1.msra.mxu0 %v11586_v23  ;;  %18405 = vmatmul.mubr.msk.f32.gmra.mrb[20].mxu1 %vm143_vm1, %v23374_v35  ;;  %v19773_v23 = vpack.c.bf16 %v12384_v20, %v12383_v19 }
 0x3d4   :  { %12077 = vmatprep.subr.mxu0 %v11591_v28  ;;  %11839 = vmatprep.mubr.f32.mxu0 %v21282_v2  ;;  %v12401_v28 = vld [vmem:[%s25636_s5 + $0x1f0] sm:$0xff] }
 0x3d5   :  { %12218 = vmatprep.mubr.f32.mxu1 %v21282_v2 }
 0x3d6   :  { %18399 = vmatmul.mubr.msk.f32.gmra.mrb[14].mxu0 %vm143_vm1, %v23374_v35 }
 0x3d7   :  { %18408 = vmatmul.mubr.msk.f32.vlgmr.msra.gmra.mrb[22].mxu1 %vm143_vm1, %v23357_v31  ;;  %11987 = vmatprep.mubr.f32.mxu0 %v21282_v2 }
 0x3d8   :  { %12224 = vmatprep.mubr.f32.mxu1 %v21282_v2  ;;  %19750 = vmatpush3.bf16.msra.mxu1 %v19749_v26  ;;  %v19731_v26 = vpack.c.bf16 %v12364_v27, %v12363_v25  ;;  %v12439_v27 = vld [vmem:[%s25636_s5 + $0x320] sm:$0xff] }
 0x3d9   :  { %19752 = vmatprep.subr.bf16.mxu1 %v19751_v29  ;;  %v12402_v29 = vld [vmem:[%s25636_s5 + $0x1f8] sm:$0xff] }
 0x3da   :  { %18402 = vmatmul.mubr.msk.f32.vlgmr.msra.gmra.mrb[16].mxu0 %vm143_vm1, %v23357_v31  ;;  %v19775_v34 = vpack.c.bf16 %v12402_v29, %v12401_v28  ;;  %v12440_v28 = vld [vmem:[%s25636_s5 + $0x328] sm:$0xff]  ;;  %v12457_v29 = vld [vmem:[%s25636_s5 + $0x3b0] sm:$0xff] }
 0x3db   :  { %12078 = vmatpush1.msra.mxu0 %v11590_v47  ;;  %18409 = vmatmul.mubr.msk.f32.gmra.mrb[24].mxu1 %vm143_vm1, %v23374_v35  ;;  %v12452_v47 = vld [vmem:[%s25636_s5 + $0x388] sm:$0xff]  ;;  %v19823_v5 = vpack.c.bf16 %v12458_v30, %v12457_v29 }
 0x3dc   :  { %11993 = vmatprep.mubr.f32.mxu0 %v21282_v2  ;;  %19754 = vmatpush3.bf16.msra.mxu1 %v19753_v41  ;;  %v19777_v41 = vpack.c.bf16 %v12386_v0, %v12385_v39 }
 0x3dd   :  { %19756 = vmatprep.subr.bf16.mxu1 %v19755_v44  ;;  %19716 = vmatprep.subr.bf16.mxu0 %v19715_v45  ;;  %v12365_v44 = vld [vmem:[%s25636_s5 + $0xd0] sm:$0xff] }
 0x3de   :  { %18403 = vmatmul.mubr.msk.f32.gmra.mrb[18].mxu0 %vm143_vm1, %v23374_v35  ;;  %v19735_v45 = vpack.c.bf16 %v12366_v1, %v12365_v44  ;;  %v12403_v44 = vld [vmem:[%s25636_s5 + $0x200] sm:$0xff]  ;;  %v12404_v1 = vld [vmem:[%s25636_s5 + $0x208] sm:$0xff] }
 0x3df   :  { %12141 = vmatprep.mubr.f32.mxu0 %v21282_v2  ;;  %v19781_v51 = vpack.c.bf16 %v12404_v1, %v12403_v44  ;;  %v12447_v44 = vld [vmem:[%s25636_s5 + $0x360] sm:$0xff] }
 0x3e0   :  { %19758 = vmatpush3.bf16.msra.mxu1 %v19757_v48  ;;  %v19811_v48 = vpack.c.bf16 %v12452_v47, %v12451_v4  ;;  %v12441_v4 = vld [vmem:[%s25636_s5 + $0x330] sm:$0xff] }
 0x3e1   :  { %19760 = vmatprep.subr.bf16.mxu1 %v19759_v49  ;;  %v19739_v49 = vpack.c.bf16 %v12368_v59, %v12367_v57  ;;  %v12459_v57 = vld [vmem:[%s25636_s5 + $0x3c0] sm:$0xff]  ;;  %v12460_v59 = vld [vmem:[%s25636_s5 + $0x3c8] sm:$0xff] }
 0x3e2   :  { %18406 = vmatmul.mubr.msk.f32.vlgmr.msra.gmra.mrb[20].mxu0 %vm143_vm1, %v23357_v31  ;;  %v12343_v31 = vld [vmem:[%s25636_s5 + $0x20] sm:$0xff] }
 0x3e3   :  { %12147 = vmatprep.mubr.f32.mxu0 %v21282_v2  ;;  %19718 = vmatpush3.bf16.msra.mxu0 %v19717_v24  ;;  %v19725_v60 = vpack.c.bf16 %v12344_v42, %v12343_v31  ;;  %v19743_v24 = vpack.c.bf16 %v12370_v33, %v12369_v9  ;;  %v12453_v31 = vld [vmem:[%s25636_s5 + $0x390] sm:$0xff]  ;;  %v12454_v42 = vld [vmem:[%s25636_s5 + $0x398] sm:$0xff] }
 0x3e4   :  { %19762 = vmatpush3.bf16.msra.mxu1 %v19761_v46  ;;  %19720 = vmatprep.subr.bf16.mxu0 %v19719_v52  ;;  %v12353_v46 = vld [vmem:[%s25636_s5 + $0x70] sm:$0xff]  ;;  %v12354_v52 = vld [vmem:[%s25636_s5 + $0x78] sm:$0xff]  ;;  %v19815_v3 = vpack.c.bf16 %v12454_v42, %v12453_v31 }
 0x3e5   :  { %19764 = vmatprep.subr.bf16.mxu1 %v19763_v8  ;;  %v19745_v10 = vpack.c.bf16 %v12354_v52, %v12353_v46  ;;  %v19779_v8 = vpack.c.bf16 %v12420_v22, %v12419_v18  ;;  %v19825_v46 = vpack.c.bf16 %v12442_v6, %v12441_v4  ;;  %v12406_v18 = vld [vmem:[%s25636_s5 + $0x218] sm:$0xff]  ;;  %v12443_v22 = vld [vmem:[%s25636_s5 + $0x340] sm:$0xff]  ;;  %v12428_v6 = vld [vmem:[%s25636_s5 + $0x2c8] sm:$0xff] }
 0x3e6   :  { %18407 = vmatmul.mubr.msk.f32.gmra.mrb[22].mxu0 %vm143_vm1, %v23374_v35  ;;  %v12346_v35 = vld [vmem:[%s25636_s5 + $0x38] sm:$0xff] }
 0x3e7   :  { %19722 = vmatpush3.bf16.msra.mxu0 %v19721_v36  ;;  %v19729_v21 = vpack.c.bf16 %v12346_v35, %v12345_v62  ;;  %v12436_v36 = vld [vmem:[%s25636_s5 + $0x308] sm:$0xff]  ;;  %v12455_v62 = vld [vmem:[%s25636_s5 + $0x3a0] sm:$0xff]  ;;  %v12462_v31 = vld [vmem:[%s25636_s5 + $0x3d8] sm:$0xff] }
 0x3e8   :  { %19766 = vmatpush3.bf16.msra.mxu1 %v19765_v55  ;;  %19724 = vmatprep.subr.bf16.mxu0 %v19723_v13  ;;  %v23656_v13 = vpop.permute.xlu1 %12272  ;;  %v19813_v58 = vpack.c.bf16 %v12436_v36, %v12435_v11  ;;  %v12456_v35 = vld [vmem:[%s25636_s5 + $0x3a8] sm:$0xff]  ;;  %v12423_v11 = vld [vmem:[%s25636_s5 + $0x2a0] sm:$0xff] }
 0x3e9   :  { %19768 = vmatprep.subr.bf16.mxu1 %v19767_v56  ;;  %v19819_v25 = vpack.c.bf16 %v12456_v35, %v12455_v62  ;;  %v12424_v36 = vld [vmem:[%s25636_s5 + $0x2a8] sm:$0xff] }
 0x3eb   :  { %19726 = vmatpush3.bf16.msra.mxu0 %v19725_v60  ;;  %v12437_v60 = vld [vmem:[%s25636_s5 + $0x310] sm:$0xff] }
 0x3ec   :  { %19770 = vmatpush3.bf16.msra.mxu1 %v19769_v61  ;;  %19728 = vmatprep.subr.bf16.mxu0 %v19727_v43  ;;  %v12438_v61 = vld [vmem:[%s25636_s5 + $0x318] sm:$0xff] }
 0x3ed   :  { %19772 = vmatprep.subr.bf16.mxu1 %v19771_v17  ;;  %v19817_v20 = vpack.c.bf16 %v12438_v61, %v12437_v60  ;;  %v12407_v60 = vld [vmem:[%s25636_s5 + $0x220] sm:$0xff]  ;;  %v12408_v61 = vld [vmem:[%s25636_s5 + $0x228] sm:$0xff] }
 0x3ee   :  { %v19789_v29 = vpack.c.bf16 %v12408_v61, %v12407_v60  ;;  %v12500_v60 = vld [vmem:[%s25636_s5 + $0x508] sm:$0xff]  ;;  %v12431_v61 = vld [vmem:[%s25636_s5 + $0x2e0] sm:$0xff] }
 0x3ef   :  { %19730 = vmatpush3.bf16.msra.mxu0 %v19729_v21 }
 0x3f0   :  { %19774 = vmatpush3.bf16.msra.mxu1 %v19773_v23  ;;  %19732 = vmatprep.subr.bf16.mxu0 %v19731_v26 }
 0x3f1   :  { %19776 = vmatprep.subr.bf16.mxu1 %v19775_v34 }
 0x3f3   :  { %19734 = vmatpush3.bf16.msra.mxu0 %v19733_v37 }
 0x3f4   :  { %19778 = vmatpush3.bf16.msra.mxu1 %v19777_v41  ;;  %19736 = vmatprep.subr.bf16.mxu0 %v19735_v45  ;;  %v19821_v41 = vpack.c.bf16 %v12440_v28, %v12439_v27  ;;  %v12464_v27 = vld [vmem:[%s25636_s5 + $0x3e8] sm:$0xff] }
 0x3f5   :  { %19812 = vmatprep.subr.bf16.mxu1 %v19811_v48  ;;  %v12421_v48 = vld [vmem:[%s25636_s5 + $0x290] sm:$0xff] }
 0x3f7   :  { %19738 = vmatpush3.bf16.msra.mxu0 %v19737_v7  ;;  %v12422_v7 = vld [vmem:[%s25636_s5 + $0x298] sm:$0xff] }
 0x3f8   :  { %19740 = vmatprep.subr.bf16.mxu0 %v19739_v49  ;;  %v19783_v52 = vpack.c.bf16 %v12422_v7, %v12421_v48  ;;  %v12465_v48 = vld [vmem:[%s25636_s5 + $0x3f0] sm:$0xff]  ;;  %v12466_v7 = vld [vmem:[%s25636_s5 + $0x3f8] sm:$0xff] }
 0x3fb   :  { %19742 = vmatpush3.bf16.msra.mxu0 %v19741_v12 }
 0x3fc   :  { %19744 = vmatprep.subr.bf16.mxu0 %v19743_v24 }
 0x3ff   :  { %19746 = vmatpush3.bf16.msra.mxu0 %v19745_v10  ;;  %v12405_v10 = vld [vmem:[%s25636_s5 + $0x210] sm:$0xff] }
 0x400   :  { %19780 = vmatprep.subr.bf16.mxu0 %v19779_v8 }
 0x492   :  { %v11758_v63 = vpop.f32.mrb[10].mxu1 }
 0x493   :  { %v12277_v53 = vadd.f32 %v23646_v38, %v11758_v63  ;;  %v11760_v54 = vpop.f32.mrb[11].mxu1 }
 0x494   :  { %v12278_v55 = vadd.f32 %v23646_v38, %v11760_v54  ;;  %v12444_v54 = vld [vmem:[%s25636_s5 + $0x348] sm:$0xff] }
 0x495   :  { %v12309_v15 = vmax.f32 %v12277_v53, 0.0  ;;  %v19827_v53 = vpack.c.bf16 %v12460_v59, %v12459_v57 }
 0x496   :  { %v12310_v14 = vmax.f32 %v12278_v55, 0.0  ;;  %v11764_v56 = vpop.f32.mrb[12].mxu1  ;;  %v12461_v55 = vld [vmem:[%s25636_s5 + $0x3d0] sm:$0xff] }
 0x497   :  { %v11766_v40 = vpop.f32.mrb[13].mxu1  ;;  %v12293_v16 = vadd.f32 %v23656_v13, %v11764_v56  ;;  %v19785_v56 = vpack.c.bf16 %v12406_v18, %v12405_v10  ;;  %v19839_v10 = vpack.c.bf16 %v12466_v7, %v12465_v48  ;;  %v12450_v18 = vld [vmem:[%s25636_s5 + $0x378] sm:$0xff] }
 0x498   :  { %v12294_v43 = vadd.f32 %v23656_v13, %v11766_v40  ;;  %12737 = vmatprep.mubr.f32.mxu1 %v12310_v14 }
 0x499   :  { %12738 = vmatmul.mubr.f32.vlgmr.msra.gmra.mrb[26].mxu1 %v12309_v15  ;;  %v12325_v23 = vmax.f32 %v12293_v16, 0.0  ;;  %v19787_v16 = vpack.c.bf16 %v12424_v36, %v12423_v11 }
 0x49a   :  { %v12326_v17 = vmax.f32 %v12294_v43, 0.0  ;;  %19814 = vmatpush3.bf16.msra.mxu1 %v19813_v58  ;;  %v23678_v19 = vpop.f32.mrb[14].mxu1  ;;  %v12445_v43 = vld [vmem:[%s25636_s5 + $0x350] sm:$0xff] }
 0x49b   :  { %v11914_v21 = vpop.f32.mrb[15].mxu1  ;;  %19816 = vmatprep.subr.bf16.mxu1 %v19815_v3  ;;  %v19829_v3 = vpack.c.bf16 %v12444_v54, %v12443_v22  ;;  %v12429_v22 = vld [vmem:[%s25636_s5 + $0x2d0] sm:$0xff]  ;;  %v12516_v54 = vld [vmem:[%s25636_s5 + $0x588] sm:$0xff] }
 0x49c   :  { %v12282_v26 = vadd.f32 %v23646_v38, %v11914_v21  ;;  %12742 = vmatprep.mubr.f32.mxu1 %v12326_v17  ;;  %v19831_v17 = vpack.c.bf16 %v12462_v31, %v12461_v55  ;;  %v12425_v21 = vld [vmem:[%s25636_s5 + $0x2b0] sm:$0xff] }
 0x49d   :  { %12743 = vmatmul.mubr.f32.gmra.mrb[28].mxu1 %v12325_v23  ;;  %v11681_v32 = vpop.f32.mrb[8].mxu0  ;;  %v12426_v23 = vld [vmem:[%s25636_s5 + $0x2b8] sm:$0xff] }
 0x49e   :  { %v12314_v34 = vmax.f32 %v12282_v26, 0.0  ;;  %19818 = vmatpush3.bf16.msra.mxu1 %v19817_v20  ;;  %v12275_v37 = vadd.f32 %v23646_v38, %v11681_v32  ;;  %v23694_v39 = vpop.f32.mrb[16].mxu1  ;;  %v11683_v0 = vpop.f32.mrb[9].mxu0  ;;  %v12446_v20 = vld [vmem:[%s25636_s5 + $0x358] sm:$0xff] }
 0x49f   :  { %v12276_v45 = vadd.f32 %v23646_v38, %v11683_v0  ;;  %v23706_v47 = vpop.f32.mrb[17].mxu1  ;;  %19820 = vmatprep.subr.bf16.mxu1 %v19819_v25  ;;  %v12463_v25 = vld [vmem:[%s25636_s5 + $0x3e0] sm:$0xff]  ;;  %v12409_v0 = vld [vmem:[%s25636_s5 + $0x230] sm:$0xff] }
 0x4a0   :  { %12887 = vmatprep.mubr.f32.mxu1 %v12314_v34  ;;  %v12307_v12 = vmax.f32 %v12275_v37, 0.0  ;;  %v19833_v34 = vpack.c.bf16 %v12446_v20, %v12445_v43  ;;  %v19791_v37 = vpack.c.bf16 %v12426_v23, %v12425_v21  ;;  %v19835_v4 = vpack.c.bf16 %v12464_v27, %v12463_v25  ;;  %v12415_v25 = vld [vmem:[%s25636_s5 + $0x260] sm:$0xff]  ;;  %v12416_v27 = vld [vmem:[%s25636_s5 + $0x268] sm:$0xff] }
 0x4a1   :  { %v12308_v49 = vmax.f32 %v12276_v45, 0.0  ;;  %v11687_v50 = vpop.f32.mrb[10].mxu0  ;;  %v12448_v45 = vld [vmem:[%s25636_s5 + $0x368] sm:$0xff]  ;;  %v12298_v43 = vadd.f32 %v23656_v13, %v23706_v47  ;;  %v19805_v7 = vpack.c.bf16 %v12416_v27, %v12415_v25 }
 0x4a2   :  { %19822 = vmatpush3.bf16.msra.mxu1 %v19821_v41  ;;  %v12291_v9 = vadd.f32 %v23656_v13, %v11687_v50  ;;  %v23724_v33 = vpop.f32.mrb[18].mxu1  ;;  %v11689_v24 = vpop.f32.mrb[11].mxu0  ;;  %v12410_v41 = vld [vmem:[%s25636_s5 + $0x238] sm:$0xff] }
 0x4a3   :  { %v12292_v8 = vadd.f32 %v23656_v13, %v11689_v24  ;;  %v23736_v63 = vpop.f32.mrb[19].mxu1  ;;  %12662 = vmatprep.mubr.f32.mxu0 %v12308_v49  ;;  %19824 = vmatprep.subr.bf16.mxu1 %v19823_v5  ;;  %v12427_v5 = vld [vmem:[%s25636_s5 + $0x2c0] sm:$0xff]  ;;  %v19793_v59 = vpack.c.bf16 %v12410_v41, %v12409_v0  ;;  %v12412_v24 = vld [vmem:[%s25636_s5 + $0x248] sm:$0xff]  ;;  %v12501_v0 = vld [vmem:[%s25636_s5 + $0x510] sm:$0xff] }
 0x4a4   :  { %12663 = vmatmul.mubr.f32.vlgmr.msra.gmra.mrb[24].mxu0 %v12307_v12  ;;  %v12323_v58 = vmax.f32 %v12291_v9, 0.0  ;;  %v19795_v12 = vpack.c.bf16 %v12428_v6, %v12427_v5  ;;  %v12411_v9 = vld [vmem:[%s25636_s5 + $0x240] sm:$0xff]  ;;  %v12502_v41 = vld [vmem:[%s25636_s5 + $0x518] sm:$0xff]  ;;  %v12520_v6 = vld [vmem:[%s25636_s5 + $0x5a8] sm:$0xff] }
 0x4a5   :  { %v12324_v42 = vmax.f32 %v12292_v8, 0.0  ;;  %19782 = vmatpush3.bf16.msra.mxu0 %v19781_v51  ;;  %v23753_v14 = vpop.f32.mrb[12].mxu0  ;;  %v19837_v51 = vpack.c.bf16 %v12448_v45, %v12447_v44  ;;  %v12430_v8 = vld [vmem:[%s25636_s5 + $0x2d8] sm:$0xff]  ;;  %v19797_v36 = vpack.c.bf16 %v12412_v24, %v12411_v9  ;;  %v12433_v44 = vld [vmem:[%s25636_s5 + $0x2f0] sm:$0xff]  ;;  %v12286_v45 = vadd.f32 %v23646_v38, %v23736_v63  ;;  %v12519_v5 = vld [vmem:[%s25636_s5 + $0x5a0] sm:$0xff] }
 0x4a6   :  { %19826 = vmatpush3.bf16.msra.mxu1 %v19825_v46  ;;  %v23755_v15 = vpop.f32.mrb[20].mxu1  ;;  %v11837_v40 = vpop.f32.mrb[13].mxu0  ;;  %19784 = vmatprep.subr.bf16.mxu0 %v19783_v52  ;;  %v12449_v46 = vld [vmem:[%s25636_s5 + $0x370] sm:$0xff]  ;;  %v12503_v9 = vld [vmem:[%s25636_s5 + $0x520] sm:$0xff] }
 0x4a7   :  { %v12280_v62 = vadd.f32 %v23646_v38, %v11837_v40  ;;  %v23767_v35 = vpop.f32.mrb[21].mxu1  ;;  %12667 = vmatprep.mubr.f32.mxu0 %v12324_v42  ;;  %19828 = vmatprep.subr.bf16.mxu1 %v19827_v53  ;;  %v12515_v53 = vld [vmem:[%s25636_s5 + $0x580] sm:$0xff]  ;;  %v19841_v31 = vpack.c.bf16 %v12450_v18, %v12449_v46  ;;  %v19799_v42 = vpack.c.bf16 %v12430_v8, %v12429_v22  ;;  %v12504_v18 = vld [vmem:[%s25636_s5 + $0x528] sm:$0xff] }
 0x4a8   :  { %12668 = vmatmul.mubr.f32.gmra.mrb[26].mxu0 %v12323_v58  ;;  %v12414_v58 = vld [vmem:[%s25636_s5 + $0x258] sm:$0xff]  ;;  %v12281_v40 = vadd.f32 %v23646_v38, %v23678_v19  ;;  %v12432_v19 = vld [vmem:[%s25636_s5 + $0x2e8] sm:$0xff]  ;;  %v12483_v22 = vld [vmem:[%s25636_s5 + $0x480] sm:$0xff] }
 0x4a9   :  { %v12312_v28 = vmax.f32 %v12280_v62, 0.0  ;;  %19786 = vmatpush3.bf16.msra.mxu0 %v19785_v56  ;;  %v23784_v26 = vpop.f32.mrb[14].mxu0  ;;  %v12413_v56 = vld [vmem:[%s25636_s5 + $0x250] sm:$0xff]  ;;  %v12484_v8 = vld [vmem:[%s25636_s5 + $0x488] sm:$0xff] }
 0x4aa   :  { %19830 = vmatpush3.bf16.msra.mxu1 %v19829_v3  ;;  %v23786_v30 = vpop.f32.mrb[22].mxu1  ;;  %v23788_v32 = vpop.f32.mrb[15].mxu0  ;;  %19788 = vmatprep.subr.bf16.mxu0 %v19787_v16  ;;  %v19875_v3 = vpack.c.bf16 %v12516_v54, %v12515_v53  ;;  %v12499_v16 = vld [vmem:[%s25636_s5 + $0x500] sm:$0xff]  ;;  %v12517_v62 = vld [vmem:[%s25636_s5 + $0x590] sm:$0xff]  ;;  %v19801_v21 = vpack.c.bf16 %v12414_v58, %v12413_v56  ;;  %v12318_v53 = vmax.f32 %v12286_v45, 0.0  ;;  %v19885_v56 = vpack.c.bf16 %v12504_v18, %v12503_v9  ;;  %v12490_v18 = vld [vmem:[%s25636_s5 + $0x4b8] sm:$0xff] }
 0x4ab   :  { %v23799_v1 = vpop.f32.mrb[23].mxu1  ;;  %12812 = vmatprep.mubr.f32.mxu0 %v12312_v28  ;;  %19832 = vmatprep.subr.bf16.mxu1 %v19831_v17  ;;  %v12518_v17 = vld [vmem:[%s25636_s5 + $0x598] sm:$0xff]  ;;  %v19877_v47 = vpack.c.bf16 %v12500_v60, %v12499_v16  ;;  %v12313_v28 = vmax.f32 %v12281_v40, 0.0  ;;  %v12521_v54 = vld [vmem:[%s25636_s5 + $0x5b0] sm:$0xff]  ;;  %v19843_v58 = vpack.c.bf16 %v12484_v8, %v12483_v22  ;;  %v12467_v40 = vld [vmem:[%s25636_s5 + $0x400] sm:$0xff]  ;;  %v12296_v60 = vadd.f32 %v23656_v13, %v23788_v32 }
 0x4ac   :  { %v12505_v16 = vld [vmem:[%s25636_s5 + $0x530] sm:$0xff]  ;;  %v12524_v32 = vld [vmem:[%s25636_s5 + $0x5c8] sm:$0xff]  ;;  %v12527_v22 = vld [vmem:[%s25636_s5 + $0x5e0] sm:$0xff] }
 0x4ad   :  { %19790 = vmatpush3.bf16.msra.mxu0 %v19789_v29  ;;  %v23816_v57 = vpop.f32.mrb[16].mxu0  ;;  %v12297_v29 = vadd.f32 %v23656_v13, %v23694_v39  ;;  %v12434_v39 = vld [vmem:[%s25636_s5 + $0x2f8] sm:$0xff]  ;;  %v12525_v45 = vld [vmem:[%s25636_s5 + $0x5d0] sm:$0xff]  ;;  %v12528_v8 = vld [vmem:[%s25636_s5 + $0x5e8] sm:$0xff] }
 0x4ae   :  { %19834 = vmatpush3.bf16.msra.mxu1 %v19833_v34  ;;  %v23818_v49 = vpop.f32.mrb[24].mxu1  ;;  %v23820_v50 = vpop.f32.mrb[17].mxu0  ;;  %19792 = vmatprep.subr.bf16.mxu0 %v19791_v37  ;;  %v19803_v34 = vpack.c.bf16 %v12432_v19, %v12431_v61  ;;  %v19879_v37 = vpack.c.bf16 %v12518_v17, %v12517_v62  ;;  %v19807_v46 = vpack.c.bf16 %v12434_v39, %v12433_v44  ;;  %v12506_v61 = vld [vmem:[%s25636_s5 + $0x538] sm:$0xff]  ;;  %v12523_v62 = vld [vmem:[%s25636_s5 + $0x5c0] sm:$0xff] }
 0x4af   :  { %v23831_v52 = vpop.f32.mrb[25].mxu1  ;;  %19836 = vmatprep.subr.bf16.mxu1 %v19835_v4  ;;  %v12330_v4 = vmax.f32 %v12298_v43, 0.0  ;;  %v12329_v24 = vmax.f32 %v12297_v29, 0.0  ;;  %v12485_v43 = vld [vmem:[%s25636_s5 + $0x490] sm:$0xff]  ;;  %v12486_v19 = vld [vmem:[%s25636_s5 + $0x498] sm:$0xff]  ;;  %v19889_v25 = vpack.c.bf16 %v12506_v61, %v12505_v16  ;;  %v12487_v44 = vld [vmem:[%s25636_s5 + $0x4a0] sm:$0xff] }
 0x4b0   :  { %v19847_v27 = vpack.c.bf16 %v12486_v19, %v12485_v43  ;;  %v12470_v29 = vld [vmem:[%s25636_s5 + $0x418] sm:$0xff]  ;;  %v12492_v16 = vld [vmem:[%s25636_s5 + $0x4c8] sm:$0xff] }
 0x4b1   :  { %19794 = vmatpush3.bf16.msra.mxu0 %v19793_v59  ;;  %v23848_v11 = vpop.f32.mrb[18].mxu0  ;;  %v19881_v59 = vpack.c.bf16 %v12502_v41, %v12501_v0  ;;  %v19891_v0 = vpack.c.bf16 %v12524_v32, %v12523_v62  ;;  %v12508_v41 = vld [vmem:[%s25636_s5 + $0x548] sm:$0xff]  ;;  %v12475_v62 = vld [vmem:[%s25636_s5 + $0x440] sm:$0xff] }
 0x4b2   :  { %19838 = vmatpush3.bf16.msra.mxu1 %v19837_v51  ;;  %v23850_v55 = vpop.f32.mrb[19].mxu0  ;;  %19796 = vmatprep.subr.bf16.mxu0 %v19795_v12  ;;  %v12417_v51 = vld [vmem:[%s25636_s5 + $0x270] sm:$0xff]  ;;  %v12418_v12 = vld [vmem:[%s25636_s5 + $0x278] sm:$0xff]  ;;  %v12476_v32 = vld [vmem:[%s25636_s5 + $0x448] sm:$0xff] }
 0x4b3   :  { %19840 = vmatprep.subr.bf16.mxu1 %v19839_v10  ;;  %v19883_v10 = vpack.c.bf16 %v12520_v6, %v12519_v5 }
 0x4b5   :  { %19798 = vmatpush3.bf16.msra.mxu0 %v19797_v36  ;;  %v23880_v20 = vpop.f32.mrb[20].mxu0  ;;  %v12522_v36 = vld [vmem:[%s25636_s5 + $0x5b8] sm:$0xff] }
 0x4b6   :  { %19842 = vmatpush3.bf16.msra.mxu1 %v19841_v31  ;;  %v23882_v23 = vpop.f32.mrb[21].mxu0  ;;  %19800 = vmatprep.subr.bf16.mxu0 %v19799_v42  ;;  %v19809_v31 = vpack.c.bf16 %v12418_v12, %v12417_v51  ;;  %v12279_v42 = vadd.f32 %v23646_v38, %v23753_v14  ;;  %v19887_v14 = vpack.c.bf16 %v12522_v36, %v12521_v54  ;;  %v12472_v51 = vld [vmem:[%s25636_s5 + $0x428] sm:$0xff]  ;;  %v12509_v12 = vld [vmem:[%s25636_s5 + $0x550] sm:$0xff] }
 0x4b7   :  { %19876 = vmatprep.subr.bf16.mxu1 %v19875_v3  ;;  %v12468_v3 = vld [vmem:[%s25636_s5 + $0x408] sm:$0xff] }
 0x4b8   :  { %v19845_v17 = vpack.c.bf16 %v12468_v3, %v12467_v40  ;;  %v12512_v40 = vld [vmem:[%s25636_s5 + $0x568] sm:$0xff]  ;;  %v12491_v3 = vld [vmem:[%s25636_s5 + $0x4c0] sm:$0xff] }
 0x4b9   :  { %12888 = vmatmul.mubr.f32.vlgmr.msra.gmra.mrb[30].mxu1 %v12313_v28  ;;  %19802 = vmatpush3.bf16.msra.mxu0 %v19801_v21  ;;  %v23912_v48 = vpop.f32.mrb[22].mxu0  ;;  %v12311_v21 = vmax.f32 %v12279_v42, 0.0  ;;  %v12469_v28 = vld [vmem:[%s25636_s5 + $0x410] sm:$0xff]  ;;  %v12474_v42 = vld [vmem:[%s25636_s5 + $0x438] sm:$0xff]  ;;  %v19859_v19 = vpack.c.bf16 %v12492_v16, %v12491_v3  ;;  %v12283_v3 = vadd.f32 %v23646_v38, %v23816_v57  ;;  %v12300_v57 = vadd.f32 %v23656_v13, %v23850_v55 }
 0x4ba   :  { %12892 = vmatprep.mubr.f32.mxu1 %v12330_v4  ;;  %19878 = vmatpush3.bf16.msra.mxu1 %v19877_v47  ;;  %v23914_v63 = vpop.f32.mrb[23].mxu0  ;;  %v12295_v47 = vadd.f32 %v23656_v13, %v23784_v26  ;;  %v12284_v26 = vadd.f32 %v23646_v38, %v23820_v50  ;;  %v12488_v4 = vld [vmem:[%s25636_s5 + $0x4a8] sm:$0xff]  ;;  %v12526_v50 = vld [vmem:[%s25636_s5 + $0x5d8] sm:$0xff]  ;;  %v19849_v39 = vpack.c.bf16 %v12470_v29, %v12469_v28 }
 0x4bb   :  { %19804 = vmatprep.subr.bf16.mxu0 %v19803_v34  ;;  %19880 = vmatprep.subr.bf16.mxu1 %v19879_v37  ;;  %v12507_v34 = vld [vmem:[%s25636_s5 + $0x540] sm:$0xff]  ;;  %v12328_v37 = vmax.f32 %v12296_v60, 0.0  ;;  %v12529_v60 = vld [vmem:[%s25636_s5 + $0x5f0] sm:$0xff]  ;;  %v19861_v28 = vpack.c.bf16 %v12476_v32, %v12475_v62  ;;  %v12550_v32 = vld [vmem:[%s25636_s5 + $0x698] sm:$0xff]  ;;  %v12299_v55 = vadd.f32 %v23656_v13, %v23848_v11  ;;  %v12288_v11 = vadd.f32 %v23646_v38, %v23882_v23 }
 0x4bc   :  { %v12327_v5 = vmax.f32 %v12295_v47, 0.0  ;;  %v19893_v6 = vpack.c.bf16 %v12508_v41, %v12507_v34  ;;  %v12316_v9 = vmax.f32 %v12284_v26, 0.0  ;;  %v12514_v47 = vld [vmem:[%s25636_s5 + $0x578] sm:$0xff]  ;;  %v12563_v41 = vld [vmem:[%s25636_s5 + $0x700] sm:$0xff]  ;;  %v12549_v62 = vld [vmem:[%s25636_s5 + $0x690] sm:$0xff] }
 0x4bd   :  { %12893 = vmatmul.mubr.f32.gmra.mrb[32].mxu1 %v12329_v24  ;;  %19806 = vmatpush3.bf16.msra.mxu0 %v19805_v7  ;;  %v19851_v7 = vpack.c.bf16 %v12488_v4, %v12487_v44  ;;  %v19895_v24 = vpack.c.bf16 %v12526_v50, %v12525_v45  ;;  %v12478_v26 = vld [vmem:[%s25636_s5 + $0x458] sm:$0xff]  ;;  %v12564_v44 = vld [vmem:[%s25636_s5 + $0x708] sm:$0xff]  ;;  %v12302_v4 = vadd.f32 %v23656_v13, %v23767_v35  ;;  %v12495_v45 = vld [vmem:[%s25636_s5 + $0x4e0] sm:$0xff] }
 0x4be   :  { %19882 = vmatpush3.bf16.msra.mxu1 %v19881_v59  ;;  %13037 = vmatprep.mubr.f32.mxu1 %v12318_v53  ;;  %v12471_v59 = vld [vmem:[%s25636_s5 + $0x420] sm:$0xff]  ;;  %v12480_v35 = vld [vmem:[%s25636_s5 + $0x468] sm:$0xff] }
 0x4bf   :  { %19808 = vmatprep.subr.bf16.mxu0 %v19807_v46  ;;  %19884 = vmatprep.subr.bf16.mxu1 %v19883_v10  ;;  %v12510_v46 = vld [vmem:[%s25636_s5 + $0x558] sm:$0xff]  ;;  %v12489_v10 = vld [vmem:[%s25636_s5 + $0x4b0] sm:$0xff]  ;;  %v19853_v53 = vpack.c.bf16 %v12472_v51, %v12471_v59  ;;  %v21292_v59 = vmov 0.0|0.0  }
 0x4c0   :  { %v19897_v54 = vpack.c.bf16 %v12510_v46, %v12509_v12  ;;  %v19855_v36 = vpack.c.bf16 %v12490_v18, %v12489_v10  ;;  %v12565_v12 = vld [vmem:[%s25636_s5 + $0x710] sm:$0xff]  ;;  %v12290_v46 = vadd.f32 %v23646_v38, %v23799_v1  ;;  %v12498_v10 = vld [vmem:[%s25636_s5 + $0x4f8] sm:$0xff] }
 0x4c1   :  { %19810 = vmatpush3.bf16.msra.mxu0 %v19809_v31  ;;  %v12473_v31 = vld [vmem:[%s25636_s5 + $0x430] sm:$0xff]  ;;  %v12482_v1 = vld [vmem:[%s25636_s5 + $0x478] sm:$0xff] }
 0x4c2   :  { %19886 = vmatpush3.bf16.msra.mxu1 %v19885_v56  ;;  %19844 = vmatprep.subr.bf16.mxu0 %v19843_v58  ;;  %v12511_v56 = vld [vmem:[%s25636_s5 + $0x560] sm:$0xff]  ;;  %v19899_v58 = vpack.c.bf16 %v12528_v8, %v12527_v22  ;;  %v19857_v61 = vpack.c.bf16 %v12474_v42, %v12473_v31  ;;  %v12481_v8 = vld [vmem:[%s25636_s5 + $0x470] sm:$0xff]  ;;  %v12568_v31 = vld [vmem:[%s25636_s5 + $0x728] sm:$0xff] }
 0x4c3   :  { %19888 = vmatprep.subr.bf16.mxu1 %v19887_v14  ;;  %v12530_v14 = vld [vmem:[%s25636_s5 + $0x5f8] sm:$0xff]  ;;  %v19901_v43 = vpack.c.bf16 %v12512_v40, %v12511_v56  ;;  %v12547_v42 = vld [vmem:[%s25636_s5 + $0x680] sm:$0xff]  ;;  %v12548_v56 = vld [vmem:[%s25636_s5 + $0x688] sm:$0xff]  ;;  %v19873_v40 = vpack.c.bf16 %v12482_v1, %v12481_v8 }
 0x4c4   :  { %12813 = vmatmul.mubr.f32.vlgmr.msra.gmra.mrb[28].mxu0 %v12311_v21  ;;  %v19903_v21 = vpack.c.bf16 %v12530_v14, %v12529_v60  ;;  %v19907_v60 = vpack.c.bf16 %v12548_v56, %v12547_v42  ;;  %v12531_v14 = vld [vmem:[%s25636_s5 + $0x600] sm:$0xff]  ;;  %v12557_v42 = vld [vmem:[%s25636_s5 + $0x6d0] sm:$0xff]  ;;  %v12558_v56 = vld [vmem:[%s25636_s5 + $0x6d8] sm:$0xff] }
 0x4c5   :  { %12817 = vmatprep.mubr.f32.mxu0 %v12328_v37  ;;  %19846 = vmatpush3.bf16.msra.mxu0 %v19845_v17  ;;  %v12513_v17 = vld [vmem:[%s25636_s5 + $0x570] sm:$0xff] }
 0x4c6   :  { %19890 = vmatpush3.bf16.msra.mxu1 %v19889_v25  ;;  %19848 = vmatprep.subr.bf16.mxu0 %v19847_v27  ;;  %v12493_v25 = vld [vmem:[%s25636_s5 + $0x4d0] sm:$0xff]  ;;  %v12494_v27 = vld [vmem:[%s25636_s5 + $0x4d8] sm:$0xff]  ;;  %v19905_v29 = vpack.c.bf16 %v12514_v47, %v12513_v17 }
 0x4c7   :  { %19892 = vmatprep.subr.bf16.mxu1 %v19891_v0  ;;  %v19863_v34 = vpack.c.bf16 %v12494_v27, %v12493_v25  ;;  %v12477_v37 = vld [vmem:[%s25636_s5 + $0x450] sm:$0xff]  ;;  %v12285_v0 = vadd.f32 %v23646_v38, %v23724_v33  ;;  %v12496_v33 = vld [vmem:[%s25636_s5 + $0x4e8] sm:$0xff]  ;;  %v19911_v25 = vpack.c.bf16 %v12550_v32, %v12549_v62 }
 0x4c8   :  { %12818 = vmatmul.mubr.f32.gmra.mrb[30].mxu0 %v12327_v5  ;;  %v19865_v50 = vpack.c.bf16 %v12478_v26, %v12477_v37  ;;  %v12479_v5 = vld [vmem:[%s25636_s5 + $0x460] sm:$0xff]  ;;  %v19867_v51 = vpack.c.bf16 %v12496_v33, %v12495_v45  ;;  %v12533_v27 = vld [vmem:[%s25636_s5 + $0x610] sm:$0xff]  ;;  %v12572_v37 = vld [vmem:[%s25636_s5 + $0x748] sm:$0xff] }
 0x4c9   :  { %19850 = vmatpush3.bf16.msra.mxu0 %v19849_v39  ;;  %12962 = vmatprep.mubr.f32.mxu0 %v12316_v9  ;;  %v19940_v39 = vpack.c.bf16 %v12564_v44, %v12563_v41  ;;  %v12566_v9 = vld [vmem:[%s25636_s5 + $0x718] sm:$0xff]  ;;  %v19869_v18 = vpack.c.bf16 %v12480_v35, %v12479_v5  ;;  %v12551_v26 = vld [vmem:[%s25636_s5 + $0x6a0] sm:$0xff]  ;;  %v12331_v44 = vmax.f32 %v12299_v55, 0.0  ;;  %v12536_v33 = vld [vmem:[%s25636_s5 + $0x628] sm:$0xff] }
 0x4ca   :  { %19894 = vmatpush3.bf16.msra.mxu1 %v19893_v6  ;;  %19852 = vmatprep.subr.bf16.mxu0 %v19851_v7  ;;  %v12317_v6 = vmax.f32 %v12285_v0, 0.0  ;;  %v12301_v7 = vadd.f32 %v23656_v13, %v23755_v15  ;;  %v12497_v15 = vld [vmem:[%s25636_s5 + $0x4f0] sm:$0xff]  ;;  %v19943_v22 = vpack.c.bf16 %v12566_v9, %v12565_v12  ;;  %v12552_v0 = vld [vmem:[%s25636_s5 + $0x6a8] sm:$0xff]  ;;  %v12535_v45 = vld [vmem:[%s25636_s5 + $0x620] sm:$0xff] }
 0x4cb   :  { %19896 = vmatprep.subr.bf16.mxu1 %v19895_v24  ;;  %v12334_v24 = vmax.f32 %v12302_v4, 0.0  ;;  %v19915_v4 = vpack.c.bf16 %v12552_v0, %v12551_v26  ;;  %v12574_v5 = vld [vmem:[%s25636_s5 + $0x758] sm:$0xff]  ;;  %v12553_v35 = vld [vmem:[%s25636_s5 + $0x6b0] sm:$0xff]  ;;  %v12583_v26 = vld [vmem:[%s25636_s5 + $0x7a0] sm:$0xff] }
 0x4cc   :  { %v12537_v9 = vld [vmem:[%s25636_s5 + $0x630] sm:$0xff]  ;;  %v12584_v0 = vld [vmem:[%s25636_s5 + $0x7a8] sm:$0xff] }
 0x4cd   :  { %19854 = vmatpush3.bf16.msra.mxu0 %v19853_v53  ;;  %v12567_v53 = vld [vmem:[%s25636_s5 + $0x720] sm:$0xff]  ;;  %v12581_v55 = vld [vmem:[%s25636_s5 + $0x790] sm:$0xff] }
 0x4ce   :  { %19898 = vmatpush3.bf16.msra.mxu1 %v19897_v54  ;;  %19856 = vmatprep.subr.bf16.mxu0 %v19855_v36  ;;  %v12333_v54 = vmax.f32 %v12301_v7, 0.0  ;;  %v19871_v36 = vpack.c.bf16 %v12498_v10, %v12497_v15  ;;  %v19946_v16 = vpack.c.bf16 %v12568_v31, %v12567_v53  ;;  %v19917_v7 = vpack.c.bf16 %v12536_v33, %v12535_v45  ;;  %v12576_v15 = vld [vmem:[%s25636_s5 + $0x768] sm:$0xff]  ;;  %v12555_v10 = vld [vmem:[%s25636_s5 + $0x6c0] sm:$0xff]  ;;  %v12578_v31 = vld [vmem:[%s25636_s5 + $0x778] sm:$0xff] }
 0x4cf   :  { %19900 = vmatprep.subr.bf16.mxu1 %v19899_v58  ;;  %v12322_v58 = vmax.f32 %v12290_v46, 0.0  ;;  %v12575_v46 = vld [vmem:[%s25636_s5 + $0x760] sm:$0xff]  ;;  %v12585_v45 = vld [vmem:[%s25636_s5 + $0x7b0] sm:$0xff]  ;;  %v12586_v33 = vld [vmem:[%s25636_s5 + $0x7b8] sm:$0xf] }
 0x4d0   :  { %v19958_v8 = vpack.c.bf16 %v12576_v15, %v12575_v46  ;;  %v12539_v53 = vld [vmem:[%s25636_s5 + $0x640] sm:$0xff] }
 0x4d1   :  { %19858 = vmatpush3.bf16.msra.mxu0 %v19857_v61  ;;  %v12532_v61 = vld [vmem:[%s25636_s5 + $0x608] sm:$0xff] }
 0x4d2   :  { %19902 = vmatpush3.bf16.msra.mxu1 %v19901_v43  ;;  %19860 = vmatprep.subr.bf16.mxu0 %v19859_v19  ;;  %v12569_v43 = vld [vmem:[%s25636_s5 + $0x730] sm:$0xff]  ;;  %v12570_v19 = vld [vmem:[%s25636_s5 + $0x738] sm:$0xff]  ;;  %v19909_v17 = vpack.c.bf16 %v12532_v61, %v12531_v14  ;;  %v12579_v14 = vld [vmem:[%s25636_s5 + $0x780] sm:$0xff] }
 0x4d3   :  { %19904 = vmatprep.subr.bf16.mxu1 %v19903_v21  ;;  %v12315_v21 = vmax.f32 %v12283_v3, 0.0  ;;  %v19949_v47 = vpack.c.bf16 %v12570_v19, %v12569_v43  ;;  %v19927_v3 = vpack.c.bf16 %v12558_v56, %v12557_v42  ;;  %v12580_v61 = vld [vmem:[%s25636_s5 + $0x788] sm:$0xff]  ;;  %v12559_v43 = vld [vmem:[%s25636_s5 + $0x6e0] sm:$0xff] }
 0x4d4   :  { %v19964_v62 = vpack.c.bf16 %v12580_v61, %v12579_v14 }
 0x4d5   :  { %19862 = vmatpush3.bf16.msra.mxu0 %v19861_v28  ;;  %v12534_v28 = vld [vmem:[%s25636_s5 + $0x618] sm:$0xff] }
 0x4d6   :  { %19906 = vmatpush3.bf16.msra.mxu1 %v19905_v29  ;;  %19864 = vmatprep.subr.bf16.mxu0 %v19863_v34  ;;  %v12571_v29 = vld [vmem:[%s25636_s5 + $0x740] sm:$0xff]  ;;  %v12332_v34 = vmax.f32 %v12300_v57, 0.0  ;;  %v19913_v41 = vpack.c.bf16 %v12534_v28, %v12533_v27  ;;  %v12560_v57 = vld [vmem:[%s25636_s5 + $0x6e8] sm:$0xff]  ;;  %v12562_v27 = vld [vmem:[%s25636_s5 + $0x6f8] sm:$0xff] }
 0x4d7   :  { %19939 = vmatprep.subr.bf16.mxu1 %v21292_v59  ;;  %v19952_v23 = vpack.c.bf16 %v12572_v37, %v12571_v29  ;;  %v19931_v32 = vpack.c.bf16 %v12560_v57, %v12559_v43  ;;  %v12546_v37 = vld [vmem:[%s25636_s5 + $0x678] sm:$0xff] }
 0x4d9   :  { %13038 = vmatmul.mubr.f32.vlgmr.msra.gmra.mrb[34].mxu1 %v12317_v6  ;;  %19866 = vmatpush3.bf16.msra.mxu0 %v19865_v50  ;;  %v12573_v50 = vld [vmem:[%s25636_s5 + $0x750] sm:$0xff]  ;;  %v12554_v6 = vld [vmem:[%s25636_s5 + $0x6b8] sm:$0xff] }
 0x4da   :  { %13042 = vmatprep.mubr.f32.mxu1 %v12334_v24  ;;  %19941 = vmatpush1.bf16.msra.mxu1 %v19940_v39  ;;  %v12320_v39 = vmax.f32 %v12288_v11, 0.0  ;;  %v19919_v12 = vpack.c.bf16 %v12554_v6, %v12553_v35  ;;  %v12538_v24 = vld [vmem:[%s25636_s5 + $0x638] sm:$0xff]  ;;  %v12545_v11 = vld [vmem:[%s25636_s5 + $0x670] sm:$0xff]  ;;  %v12306_v35 = vadd.f32 %v23656_v13, %v23831_v52 }
 0x4db   :  { %19868 = vmatprep.subr.bf16.mxu0 %v19867_v51  ;;  %19942 = vmatprep.subr.bf16.mxu1 %v21292_v59  ;;  %v19955_v51 = vpack.c.bf16 %v12574_v5, %v12573_v50 }
 0x4dd   :  { %13043 = vmatmul.mubr.f32.gmra.mrb[36].mxu1 %v12333_v54  ;;  %19870 = vmatpush3.bf16.msra.mxu0 %v19869_v18  ;;  %v12556_v18 = vld [vmem:[%s25636_s5 + $0x6c8] sm:$0xff] }
 0x4de   :  { %19944 = vmatpush1.bf16.msra.mxu1 %v19943_v22  ;;  %18411 = vmatprep.mubr.msk.f32.mxu1 %vm12587_vm9, %v12322_v58  ;;  %v19921_v22 = vpack.c.bf16 %v12538_v24, %v12537_v9  ;;  %v19923_v1 = vpack.c.bf16 %v12556_v18, %v12555_v10  ;;  %v12540_v54 = vld [vmem:[%s25636_s5 + $0x648] sm:$0xff] }
 0x4df   :  { %19872 = vmatprep.subr.bf16.mxu0 %v19871_v36  ;;  %19945 = vmatprep.subr.bf16.mxu1 %v21292_v59  ;;  %v12577_v36 = vld [vmem:[%s25636_s5 + $0x770] sm:$0xff]  ;;  %v19925_v58 = vpack.c.bf16 %v12540_v54, %v12539_v53 }
 0x4e1   :  { %19874 = vmatpush3.bf16.msra.mxu0 %v19873_v40  ;;  %v19961_v40 = vpack.c.bf16 %v12578_v31, %v12577_v36 }
 0x4e2   :  { %19947 = vmatpush1.bf16.msra.mxu1 %v19946_v16  ;;  %19908 = vmatprep.subr.bf16.mxu0 %v19907_v60  ;;  %v12541_v16 = vld [vmem:[%s25636_s5 + $0x650] sm:$0xff]  ;;  %v12542_v60 = vld [vmem:[%s25636_s5 + $0x658] sm:$0xff] }
 0x4e3   :  { %19948 = vmatprep.subr.bf16.mxu1 %v21292_v59  ;;  %v19929_v19 = vpack.c.bf16 %v12542_v60, %v12541_v16 }
 0x4e4   :  { %12963 = vmatmul.mubr.f32.vlgmr.msra.gmra.mrb[32].mxu0 %v12315_v21  ;;  %v12544_v21 = vld [vmem:[%s25636_s5 + $0x668] sm:$0xff] }
 0x4e5   :  { %12967 = vmatprep.mubr.f32.mxu0 %v12332_v34  ;;  %19910 = vmatpush3.bf16.msra.mxu0 %v19909_v17  ;;  %v12543_v17 = vld [vmem:[%s25636_s5 + $0x660] sm:$0xff] }
 0x4e6   :  { %19950 = vmatpush1.bf16.msra.mxu1 %v19949_v47  ;;  %19912 = vmatprep.subr.bf16.mxu0 %v19911_v25  ;;  %v12582_v47 = vld [vmem:[%s25636_s5 + $0x798] sm:$0xff]  ;;  %v12561_v25 = vld [vmem:[%s25636_s5 + $0x6f0] sm:$0xff]  ;;  %v19933_v28 = vpack.c.bf16 %v12544_v21, %v12543_v17  ;;  %s21313_s5 = smov 5  }
 0x4e7   :  { %19951 = vmatprep.subr.bf16.mxu1 %v21292_v59  ;;  %v19967_v29 = vpack.c.bf16 %v12582_v47, %v12581_v55  ;;  %v19935_v34 = vpack.c.bf16 %v12562_v27, %v12561_v25 }
 0x4e8   :  { %12968 = vmatmul.mubr.f32.gmra.mrb[34].mxu0 %v12331_v44  ;;  %v12287_v44 = vadd.f32 %v23646_v38, %v23880_v20  ;;  %v12303_v20 = vadd.f32 %v23656_v13, %v23912_v48  ;;  %v12305_v48 = vadd.f32 %v23656_v13, %v23818_v49 }
 0x4e9   :  { %19914 = vmatpush3.bf16.msra.mxu0 %v19913_v41  ;;  %13112 = vmatprep.mubr.f32.mxu0 %v12320_v39  ;;  %v19937_v41 = vpack.c.bf16 %v12546_v37, %v12545_v11  ;;  %v19973_v39 = vpack.c.bf16 %v12586_v33, %v12585_v45 }
 0x4ea   :  { %19953 = vmatpush1.bf16.msra.mxu1 %v19952_v23  ;;  %19916 = vmatprep.subr.bf16.mxu0 %v19915_v4  ;;  %v19970_v23 = vpack.c.bf16 %v12584_v0, %v12583_v26  ;;  %v12304_v4 = vadd.f32 %v23656_v13, %v23914_v63  ;;  %v12319_v50 = vmax.f32 %v12287_v44, 0.0  ;;  %v12289_v63 = vadd.f32 %v23646_v38, %v23786_v30 }
 0x4eb   :  { %19954 = vmatprep.subr.bf16.mxu1 %v21292_v59  ;;  %v12335_v6 = vmax.f32 %v12303_v20, 0.0  ;;  %v12337_v38 = vmax.f32 %v12305_v48, 0.0 }
 0x4ec   :  { %v12336_v5 = vmax.f32 %v12304_v4, 0.0 }
 0x4ed   :  { %19918 = vmatpush3.bf16.msra.mxu0 %v19917_v7  ;;  %v12321_v7 = vmax.f32 %v12289_v63, 0.0 }
 0x4ee   :  { %19956 = vmatpush1.bf16.msra.mxu1 %v19955_v51  ;;  %19920 = vmatprep.subr.bf16.mxu0 %v19919_v12  ;;  %v12338_v51 = vmax.f32 %v12306_v35, 0.0 }
 0x4ef   :  { %19957 = vmatprep.subr.bf16.mxu1 %v21292_v59 }
 0x4f1   :  { %19922 = vmatpush3.bf16.msra.mxu0 %v19921_v22 }
 0x4f2   :  { %19959 = vmatpush1.bf16.msra.mxu1 %v19958_v8  ;;  %19924 = vmatprep.subr.bf16.mxu0 %v19923_v1 }
 0x4f3   :  { %19960 = vmatprep.subr.bf16.mxu1 %v21292_v59 }
 0x4f5   :  { %19926 = vmatpush3.bf16.msra.mxu0 %v19925_v58 }
 0x4f6   :  { %19962 = vmatpush1.bf16.msra.mxu1 %v19961_v40  ;;  %19928 = vmatprep.subr.bf16.mxu0 %v19927_v3 }
 0x4f7   :  { %19963 = vmatprep.subr.bf16.mxu1 %v21292_v59 }
 0x4f9   :  { %19930 = vmatpush3.bf16.msra.mxu0 %v19929_v19 }
 0x4fa   :  { %19965 = vmatpush1.bf16.msra.mxu1 %v19964_v62  ;;  %19932 = vmatprep.subr.bf16.mxu0 %v19931_v32 }
 0x4fb   :  { %19966 = vmatprep.subr.bf16.mxu1 %v21292_v59 }
 0x4fd   :  { %19934 = vmatpush3.bf16.msra.mxu0 %v19933_v28 }
 0x4fe   :  { %19968 = vmatpush1.bf16.msra.mxu1 %v19967_v29  ;;  %19936 = vmatprep.subr.bf16.mxu0 %v19935_v34 }
 0x4ff   :  { %19969 = vmatprep.subr.bf16.mxu1 %v21292_v59 }
 0x501   :  { %19938 = vmatpush3.bf16.msra.mxu0 %v19937_v41 }
 0x502   :  { %19971 = vmatpush1.bf16.msra.mxu1 %v19970_v23 }
 0x503   :  { %19972 = vmatprep.subr.bf16.mxu1 %v21292_v59 }
 0x504   :  { %13113 = vmatmul.mubr.f32.vlgmr.msra.gmra.mrb[36].mxu0 %v12319_v50 }
 0x505   :  { %13117 = vmatprep.mubr.f32.mxu0 %v12336_v5 }
 0x506   :  { %19975 = vmatpush1.bf16.msk.msra.mxu1 %vm19974_vm12, %v19973_v39 }
 0x508   :  { %13118 = vmatmul.mubr.f32.gmra.mrb[38].mxu0 %v12335_v6  ;;  %v13202_v6 = vld [vmem:[%s25637_s6 + $0x20] sm:$0xff] }
 0x509   :  { %13188 = vmatmul.mubr.f32.vlgmr.msra.gmra.mrb[38].mxu1 %v12321_v7  ;;  %19266 = vmatprep.mubr.msk.f32.mxu0 %vm13214_vm13, %v13202_v6  ;;  %v13631_v6 = vld [vmem:[%s25637_s6 + $0x80] sm:$0xff] }
 0x50a   :  { %18412 = vmatprep.mubr.msk.f32.mxu1 %vm12587_vm9, %v12338_v51 }
 0x50d   :  { %13193 = vmatmul.mubr.f32.gmra.mrb[40].mxu1 %v12337_v38 }
 0x56c   :  { %v18788_v30 = vpop.f32.mrb[26].mxu1 }
 0x56d   :  { %v18789_v12 = vpop.f32.mrb[27].mxu1 }
 0x56e   :  { %v18790_v9 = vadd.f32 %v18789_v12, %v18788_v30  ;;  %v14963_v12 = vld [vmem:[%s25638_s7] sm:$0xff] }
 0x570   :  { %v18791_v24 = vpop.f32.mrb[28].mxu1 }
 0x571   :  { %v18792_v52 = vpop.f32.mrb[29].mxu1 }
 0x572   :  { %v18793_v46 = vadd.f32 %v18792_v52, %v18791_v24  ;;  %v14964_v24 = vld [vmem:[%s25638_s7 + $0x8] sm:$0xff]  ;;  %v15007_v52 = vld [vmem:[%s25639_s10] sm:$0xff] }
 0x577   :  { %v18750_v15 = vpop.f32.mrb[24].mxu0 }
 0x578   :  { %v18751_v10 = vpop.f32.mrb[25].mxu0 }
 0x579   :  { %v18752_v18 = vadd.f32 %v18751_v10, %v18750_v15  ;;  %v15011_v15 = vld [vmem:[%s25639_s10 + $0x20] sm:$0xff]  ;;  %v15008_v10 = vld [vmem:[%s25639_s10 + $0x8] sm:$0xff] }
 0x57b   :  { %v12740_v22 = vadd.f32 %v18790_v9, %v18752_v18  ;;  %v18753_v8 = vpop.f32.mrb[26].mxu0  ;;  %v14965_v9 = vld [vmem:[%s25638_s7 + $0x10] sm:$0xff] }
 0x57c   :  { %v18754_v1 = vpop.f32.mrb[27].mxu0  ;;  %v15009_v18 = vld [vmem:[%s25639_s10 + $0x10] sm:$0xff] }
 0x57d   :  { %v18755_v13 = vadd.f32 %v18754_v1, %v18753_v8  ;;  %v15013_v8 = vld [vmem:[%s25639_s10 + $0x30] sm:$0xff]  ;;  %v15010_v1 = vld [vmem:[%s25639_s10 + $0x18] sm:$0xff] }
 0x57f   :  { %v12745_v49 = vadd.f32 %v18793_v46, %v18755_v13  ;;  %v14966_v46 = vld [vmem:[%s25638_s7 + $0x18] sm:$0xff]  ;;  %v15015_v13 = vld [vmem:[%s25639_s10 + $0x40] sm:$0xff] }
 0x58c   :  { %v18864_v53 = vpop.f32.mrb[30].mxu1 }
 0x58d   :  { %v18865_v54 = vpop.f32.mrb[31].mxu1 }
 0x58e   :  { %v18866_v36 = vadd.f32 %v18865_v54, %v18864_v53  ;;  %v15019_v53 = vld [vmem:[%s25639_s10 + $0x60] sm:$0xff]  ;;  %v15016_v54 = vld [vmem:[%s25639_s10 + $0x48] sm:$0xff] }
 0x590   :  { %v18867_v31 = vpop.f32.mrb[32].mxu1 }
 0x591   :  { %v18868_v42 = vpop.f32.mrb[33].mxu1 }
 0x592   :  { %v18869_v56 = vadd.f32 %v18868_v42, %v18867_v31  ;;  %v15020_v31 = vld [vmem:[%s25639_s10 + $0x68] sm:$0xff]  ;;  %v15021_v42 = vld [vmem:[%s25639_s10 + $0x70] sm:$0xff] }
 0x597   :  { %v18826_v58 = vpop.f32.mrb[28].mxu0 }
 0x598   :  { %v18827_v40 = vpop.f32.mrb[29].mxu0 }
 0x599   :  { %v18828_v3 = vadd.f32 %v18827_v40, %v18826_v58  ;;  %v15022_v58 = vld [vmem:[%s25639_s10 + $0x78] sm:$0xff] }
 0x59b   :  { %v12815_v16 = vadd.f32 %v18828_v3, %v12740_v22  ;;  %v18829_v60 = vpop.f32.mrb[30].mxu0  ;;  %v15012_v22 = vld [vmem:[%s25639_s10 + $0x28] sm:$0xff] }
 0x59c   :  { %v18830_v14 = vpop.f32.mrb[31].mxu0 }
 0x59d   :  { %v18831_v61 = vadd.f32 %v18830_v14, %v18829_v60  ;;  %v12890_v43 = vadd.f32 %v18866_v36, %v12815_v16  ;;  %v15017_v36 = vld [vmem:[%s25639_s10 + $0x50] sm:$0xff] }
 0x59f   :  { %v12820_v57 = vadd.f32 %v18831_v61, %v12745_v49  ;;  %v15014_v49 = vld [vmem:[%s25639_s10 + $0x38] sm:$0xff] }
 0x5a1   :  { %v12895_v19 = vadd.f32 %v18869_v56, %v12820_v57  ;;  %v15018_v56 = vld [vmem:[%s25639_s10 + $0x58] sm:$0xff]  ;;  %v13203_v57 = vld [vmem:[%s25637_s6 + $0x28] sm:$0xff] }
 0x5ac   :  { %v18940_v62 = vpop.f32.mrb[34].mxu1 }
 0x5ad   :  { %v18941_v32 = vpop.f32.mrb[35].mxu1 }
 0x5ae   :  { %v18942_v17 = vadd.f32 %v18941_v32, %v18940_v62 }
 0x5b0   :  { %v18943_v21 = vpop.f32.mrb[36].mxu1 }
 0x5b1   :  { %v18944_v55 = vpop.f32.mrb[37].mxu1 }
 0x5b2   :  { %v18945_v47 = vadd.f32 %v18944_v55, %v18943_v21  ;;  %v13198_v21 = vld [vmem:[%s25637_s6] sm:$0xff] }
 0x5b7   :  { %v18902_v25 = vpop.f32.mrb[32].mxu0 }
 0x5b8   :  { %v18903_v27 = vpop.f32.mrb[33].mxu0 }
 0x5b9   :  { %v18904_v28 = vadd.f32 %v18903_v27, %v18902_v25  ;;  %v13199_v25 = vld [vmem:[%s25637_s6 + $0x8] sm:$0xff]  ;;  %v13200_v27 = vld [vmem:[%s25637_s6 + $0x10] sm:$0xff] }
 0x5bb   :  { %v12965_v29 = vadd.f32 %v18904_v28, %v12890_v43  ;;  %v18905_v34 = vpop.f32.mrb[34].mxu0 }
 0x5bc   :  { %v18906_v11 = vpop.f32.mrb[35].mxu0 }
 0x5bd   :  { %v18907_v37 = vadd.f32 %v18906_v11, %v18905_v34  ;;  %v13040_v26 = vadd.f32 %v18942_v17, %v12965_v29  ;;  %v13205_v17 = vld [vmem:[%s25637_s6 + $0x38] sm:$0xff]  ;;  %v13409_v11 = vld [vmem:[%s25637_s6 + $0x40] sm:$0xff] }
 0x5be   :  { %v13201_v34 = vld [vmem:[%s25637_s6 + $0x18] sm:$0xff] }
 0x5bf   :  { %v12970_v0 = vadd.f32 %v18907_v37, %v12895_v19  ;;  %v13204_v19 = vld [vmem:[%s25637_s6 + $0x30] sm:$0xff] }
 0x5c1   :  { %v13045_v41 = vadd.f32 %v18945_v47, %v12970_v0  ;;  %v13410_v0 = vld [vmem:[%s25637_s6 + $0x48] sm:$0xff] }
 0x5d7   :  { %v18978_v44 = vpop.f32.mrb[36].mxu0 }
 0x5d8   :  { %v18979_v23 = vpop.f32.mrb[37].mxu0 }
 0x5d9   :  { %v18980_v4 = vadd.f32 %v18979_v23, %v18978_v44 }
 0x5db   :  { %v18981_v45 = vpop.f32.mrb[38].mxu0  ;;  %v13115_v33 = vadd.f32 %v18980_v4, %v13040_v26  ;;  %v13412_v4 = vld [vmem:[%s25637_s6 + $0x58] sm:$0xff] }
 0x5dc   :  { %v13189_v50 = vpop.f32.mrb[38].mxu1  ;;  %v18982_v20 = vpop.f32.mrb[39].mxu0 }
 0x5dd   :  { %v13190_v39 = vadd.f32 %v13189_v50, %v13115_v33  ;;  %v18983_v63 = vadd.f32 %v18982_v20, %v18981_v45  ;;  %v13191_v5 = vpop.f32.mrb[39].mxu1  ;;  %v13520_v45 = vld [vmem:[%s25637_s6 + $0x60] sm:$0xff]  ;;  %v13521_v20 = vld [vmem:[%s25637_s6 + $0x68] sm:$0xff] }
 0x5df   :  { %v13120_v35 = vadd.f32 %v18983_v63, %v13045_v41  ;;  %v13411_v41 = vld [vmem:[%s25637_s6 + $0x50] sm:$0xff] }
 0x5e0   :  { %v13194_v7 = vpop.f32.mrb[40].mxu1 }
 0x5e1   :  { %v13195_v48 = vadd.f32 %v13194_v7, %v13120_v35  ;;  %v13196_v51 = vpop.f32.mrb[41].mxu1  ;;  %v13523_v35 = vld [vmem:[%s25637_s6 + $0x78] sm:$0xff] }
 0x5e2   :  { %v13632_v51 = vld [vmem:[%s25637_s6 + $0x88] sm:$0xff] }
 0x5e3   :  { %v20599_v38 = vpack.i.bf16 %v13195_v48, %v13190_v39  ;;  %v24307_v30 = vpack.c.bf16 %v13195_v48, %v13190_v39  ;;  %v13522_v39 = vld [vmem:[%s25637_s6 + $0x70] sm:$0xff] }
 0x5e5   :  { %20600 = vrot.lane.b32.xlu1 %v20599_v38, %s21285_s0  ;;  %20595 = vrot.lane.b32.xlu0 %v20599_v38, %s21294_s21  ;;  %s21302_s0 = smov 32  }
 0x5e9   :  { %20610 = vrot.lane.b32.xlu1 %v20599_v38, %s21288_s16  ;;  %20605 = vrot.lane.b32.xlu0 %v20599_v38, %s21295_s27  ;;  %s21305_s16 = smov 24  }
 0x5ed   :  { %20620 = vrot.lane.b32.xlu1 %v20599_v38, %s21296_s28  ;;  %20615 = vrot.lane.b32.xlu0 %v20599_v38, %s21297_s26  ;;  %s21315_s26 = smov 6  }
 0x5f1   :  { %20630 = vrot.lane.b32.xlu1 %v20599_v38, %s21298_s14  ;;  %20625 = vrot.lane.b32.xlu0 %v20599_v38, %s21299_s15  ;;  %s21317_s14 = smov 7  }
 0x5f5   :  { %20640 = vrot.lane.b32.xlu1 %v20599_v38, %s21300_s24  ;;  %20635 = vrot.lane.b32.xlu0 %v20599_v38, %s21301_s3 }
 0x5f9   :  { %20650 = vrot.lane.b32.xlu1 %v20599_v38, %s21302_s0  ;;  %20645 = vrot.lane.b32.xlu0 %v20599_v38, %s21303_s2 }
 0x5fd   :  { %20660 = vrot.lane.b32.xlu1 %v20599_v38, %s21304_s30  ;;  %20655 = vrot.lane.b32.xlu0 %v20599_v38, %s21305_s16  ;;  %s21307_s30 = smov 1  }
 0x601   :  { %14969 = vperm.xlu1 %20593, %v14963_v12   ;;  %20665 = vrot.lane.b32.xlu0 %v20599_v38, %s21306_s19  ;;  %v13633_v38 = vld [vmem:[%s25637_s6 + $0x90] sm:$0xff] }
 0x605   :  { %14979 = vperm.xlu1 %20593, %v14965_v9   ;;  %14974 = vperm.xlu0 %20592, %v14964_v24   ;;  %v13634_v9 = vld [vmem:[%s25637_s6 + $0x98] sm:$0xff]  ;;  %v13742_v24 = vld [vmem:[%s25637_s6 + $0xa0] sm:$0xff] }
 0x609   :  { %15025 = vperm.xlu1 %20593, %v15007_v52   ;;  %14984 = vperm.xlu0 %20592, %v14966_v46  }
 0x60d   :  { %15045 = vperm.xlu1 %20593, %v15011_v15   ;;  %15030 = vperm.xlu0 %20592, %v15008_v10   ;;  %v13743_v15 = vld [vmem:[%s25637_s6 + $0xa8] sm:$0xff]  ;;  %v13744_v10 = vld [vmem:[%s25637_s6 + $0xb0] sm:$0xff] }
 0x611   :  { %15035 = vperm.xlu1 %20593, %v15009_v18   ;;  %15050 = vperm.xlu0 %20592, %v15012_v22  }
 0x615   :  { %15055 = vperm.xlu1 %20593, %v15013_v8   ;;  %15040 = vperm.xlu0 %20592, %v15010_v1   ;;  %v13745_v8 = vld [vmem:[%s25637_s6 + $0xb8] sm:$0xff]  ;;  %v13853_v1 = vld [vmem:[%s25637_s6 + $0xc0] sm:$0xff] }
 0x619   :  { %15065 = vperm.xlu1 %20593, %v15015_v13   ;;  %15060 = vperm.xlu0 %20592, %v15014_v49  }
 0x61d   :  { %15085 = vperm.xlu1 %20593, %v15019_v53   ;;  %15070 = vperm.xlu0 %20592, %v15016_v54   ;;  %v13854_v53 = vld [vmem:[%s25637_s6 + $0xc8] sm:$0xff]  ;;  %v13855_v54 = vld [vmem:[%s25637_s6 + $0xd0] sm:$0xff] }
 0x621   :  { %15075 = vperm.xlu1 %20593, %v15017_v36   ;;  %15090 = vperm.xlu0 %20592, %v15020_v31  }
 0x625   :  { %15095 = vperm.xlu1 %20593, %v15021_v42   ;;  %15080 = vperm.xlu0 %20592, %v15018_v56   ;;  %v13856_v42 = vld [vmem:[%s25637_s6 + $0xd8] sm:$0xff]  ;;  %v13964_v56 = vld [vmem:[%s25637_s6 + $0xe0] sm:$0xff] }
 0x629   :  { %15100 = vperm.xlu0 %20592, %v15022_v58  }
 0x657   :  { %v20596_v40 = vpop.permute.xlu0 %20595  ;;  %v20601_v60 = vpop.permute.xlu1 %20600 }
 0x658   :  { %v20598_v3 = vunpack.i.h.bf16 %v20596_v40  ;;  %v20597_v16 = vunpack.i.l.bf16 %v20596_v40  ;;  %v20603_v61 = vunpack.i.h.bf16 %v20601_v60  ;;  %v20602_v43 = vunpack.i.l.bf16 %v20601_v60 }
 0x65a   :  { %v19976_v14 = vpack.c.bf16 %v20598_v3, %v20597_v16  ;;  %v19984_v62 = vpack.c.bf16 %v20603_v61, %v20602_v43  ;;  %v13965_v3 = vld [vmem:[%s25637_s6 + $0xe8] sm:$0xff]  ;;  %v13966_v16 = vld [vmem:[%s25637_s6 + $0xf0] sm:$0xff]  ;;  %v13967_v61 = vld [vmem:[%s25637_s6 + $0xf8] sm:$0xff] }
 0x65b   :  { %v20606_v32 = vpop.permute.xlu0 %20605  ;;  %v20611_v29 = vpop.permute.xlu1 %20610  ;;  %v14075_v43 = vld [vmem:[%s25637_s6 + $0x100] sm:$0xff] }
 0x65c   :  { %19977 = vmatprep.subr.bf16.mxu0 %v19976_v14  ;;  %v20608_v55 = vunpack.i.h.bf16 %v20606_v32  ;;  %v20607_v47 = vunpack.i.l.bf16 %v20606_v32  ;;  %v20613_v37 = vunpack.i.h.bf16 %v20611_v29  ;;  %v20612_v26 = vunpack.i.l.bf16 %v20611_v29  ;;  %v14077_v32 = vld [vmem:[%s25637_s6 + $0x110] sm:$0xff] }
 0x65d   :  { %19979 = vmatpush3.bf16.msra.mxu0 %v19976_v14  ;;  %v14188_v29 = vld [vmem:[%s25637_s6 + $0x130] sm:$0xff] }
 0x65e   :  { %19981 = vmatprep.subr.bf16.mxu0 %v24307_v30  ;;  %v19988_v28 = vpack.c.bf16 %v20608_v55, %v20607_v47  ;;  %v19992_v44 = vpack.c.bf16 %v20613_v37, %v20612_v26  ;;  %v14078_v55 = vld [vmem:[%s25637_s6 + $0x118] sm:$0xff]  ;;  %v14186_v47 = vld [vmem:[%s25637_s6 + $0x120] sm:$0xff] }
 0x65f   :  { %v20616_v23 = vpop.permute.xlu0 %20615  ;;  %v20621_v5 = vpop.permute.xlu1 %20620  ;;  %v14189_v37 = vld [vmem:[%s25637_s6 + $0x138] sm:$0xff]  ;;  %v14297_v26 = vld [vmem:[%s25637_s6 + $0x140] sm:$0xff] }
 0x660   :  { %19267 = vmatmul.mubr.msk.f32.vlgmr.msra.gmra.mrb[40].mxu0 %vm13214_vm13, %v13203_v57  ;;  %v20618_v33 = vunpack.i.h.bf16 %v20616_v23  ;;  %v20617_v50 = vunpack.i.l.bf16 %v20616_v23  ;;  %v20623_v7 = vunpack.i.h.bf16 %v20621_v5  ;;  %v20622_v48 = vunpack.i.l.bf16 %v20621_v5  ;;  %v14299_v23 = vld [vmem:[%s25637_s6 + $0x150] sm:$0xff] }
 0x661   :  { %19983 = vmatpush3.bf16.msra.mxu0 %v24307_v30  ;;  %19269 = vmatprep.mubr.msk.f32.mxu0 %vm13214_vm13, %v13204_v19  ;;  %v14410_v5 = vld [vmem:[%s25637_s6 + $0x170] sm:$0xff] }
 0x662   :  { %19985 = vmatprep.subr.bf16.mxu0 %v19984_v62  ;;  %v19996_v63 = vpack.c.bf16 %v20618_v33, %v20617_v50  ;;  %v20000_v30 = vpack.c.bf16 %v20623_v7, %v20622_v48  ;;  %v14300_v33 = vld [vmem:[%s25637_s6 + $0x158] sm:$0xff]  ;;  %v14408_v50 = vld [vmem:[%s25637_s6 + $0x160] sm:$0xff] }
 0x663   :  { %v20626_v12 = vpop.permute.xlu0 %20625  ;;  %v20631_v22 = vpop.permute.xlu1 %20630  ;;  %v14411_v7 = vld [vmem:[%s25637_s6 + $0x178] sm:$0xff]  ;;  %v14519_v48 = vld [vmem:[%s25637_s6 + $0x180] sm:$0xff] }
 0x664   :  { %19270 = vmatmul.mubr.msk.f32.gmra.mrb[42].mxu0 %vm13214_vm13, %v13205_v17  ;;  %v20628_v52 = vunpack.i.h.bf16 %v20626_v12  ;;  %v20627_v46 = vunpack.i.l.bf16 %v20626_v12  ;;  %v20633_v13 = vunpack.i.h.bf16 %v20631_v22  ;;  %v20632_v49 = vunpack.i.l.bf16 %v20631_v22  ;;  %v14521_v12 = vld [vmem:[%s25637_s6 + $0x190] sm:$0xff] }
 0x665   :  { %19276 = vmatprep.mubr.msk.f32.mxu0 %vm13214_vm13, %v13198_v21  ;;  %v14632_v22 = vld [vmem:[%s25637_s6 + $0x1b0] sm:$0xff] }
 0x666   :  { %v20004_v18 = vpack.c.bf16 %v20628_v52, %v20627_v46  ;;  %v20008_v36 = vpack.c.bf16 %v20633_v13, %v20632_v49  ;;  %v14522_v52 = vld [vmem:[%s25637_s6 + $0x198] sm:$0xff]  ;;  %v14630_v46 = vld [vmem:[%s25637_s6 + $0x1a0] sm:$0xff]  ;;  %v14742_v49 = vld [vmem:[%s25637_s6 + $0x1c8] sm:$0xff] }
 0x667   :  { %v20636_v31 = vpop.permute.xlu0 %20635  ;;  %v20641_v14 = vpop.permute.xlu1 %20640  ;;  %v14741_v13 = vld [vmem:[%s25637_s6 + $0x1c0] sm:$0xff] }
 0x668   :  { %19277 = vmatmul.mubr.msk.f32.vlgmr.msra.gmra.mrb[40].mxu0 %vm13214_vm13, %v13199_v25  ;;  %v20638_v58 = vunpack.i.h.bf16 %v20636_v31  ;;  %v20637_v40 = vunpack.i.l.bf16 %v20636_v31  ;;  %v20643_v57 = vunpack.i.h.bf16 %v20641_v14  ;;  %v20642_v19 = vunpack.i.l.bf16 %v20641_v14  ;;  %v14853_v31 = vld [vmem:[%s25637_s6 + $0x1e8] sm:$0xff] }
 0x669   :  { %19987 = vmatpush3.bf16.msra.mxu0 %v19984_v62  ;;  %19279 = vmatprep.mubr.msk.f32.mxu0 %vm13214_vm13, %v13200_v27  ;;  %v14076_v62 = vld [vmem:[%s25637_s6 + $0x108] sm:$0xff] }
 0x66a   :  { %19989 = vmatprep.subr.bf16.mxu0 %v19988_v28  ;;  %v20012_v60 = vpack.c.bf16 %v20638_v58, %v20637_v40  ;;  %v20016_v17 = vpack.c.bf16 %v20643_v57, %v20642_v19  ;;  %v14991_v58 = vld [vmem:[%s25640_s8] sm:$0xff] }
 0x66b   :  { %v20646_v21 = vpop.permute.xlu0 %20645  ;;  %19430 = vmatprep.mubr.msk.f32.mxu1 %vm15103_vm14, %v14991_v58  ;;  %v24631_v40 = vld [vmem:[%s25641_s9] sm:$0xff] }
 0x66c   :  { %19280 = vmatmul.mubr.msk.f32.gmra.mrb[42].mxu0 %vm13214_vm13, %v13201_v34  ;;  %v20648_v25 = vunpack.i.h.bf16 %v20646_v21  ;;  %v20647_v27 = vunpack.i.l.bf16 %v20646_v21 }
 0x66d   :  { %19286 = vmatprep.mubr.msk.f32.mxu0 %vm13214_vm13, %v13409_v11  ;;  %v20651_v11 = vpop.permute.xlu1 %20650 }
 0x66e   :  { %v20020_v34 = vpack.c.bf16 %v20648_v25, %v20647_v27  ;;  %v14992_v25 = vld [vmem:[%s25640_s8 + $0x8] sm:$0xff]  ;;  %v14993_v27 = vld [vmem:[%s25640_s8 + $0x10] sm:$0xff] }
 0x670   :  { %19287 = vmatmul.mubr.msk.f32.vlgmr.msra.gmra.mrb[40].mxu0 %vm13214_vm13, %v13410_v0  ;;  %v20653_v0 = vunpack.i.h.bf16 %v20651_v11 }
 0x671   :  { %19991 = vmatpush3.bf16.msra.mxu0 %v19988_v28  ;;  %19289 = vmatprep.mubr.msk.f32.mxu0 %vm13214_vm13, %v13411_v41  ;;  %v14187_v28 = vld [vmem:[%s25637_s6 + $0x128] sm:$0xff]  ;;  %v20652_v41 = vunpack.i.l.bf16 %v20651_v11  ;;  %v14997_v11 = vld [vmem:[%s25640_s8 + $0x30] sm:$0xff] }
 0x672   :  { %19993 = vmatprep.subr.bf16.mxu0 %v19992_v44 }
 0x674   :  { %19290 = vmatmul.mubr.msk.f32.gmra.mrb[42].mxu0 %vm13214_vm13, %v13412_v4  ;;  %v20024_v4 = vpack.c.bf16 %v20653_v0, %v20652_v41  ;;  %v15000_v0 = vld [vmem:[%s25640_s8 + $0x48] sm:$0xff]  ;;  %v15001_v41 = vld [vmem:[%s25640_s8 + $0x50] sm:$0xff] }
 0x675   :  { %19296 = vmatprep.mubr.msk.f32.mxu0 %vm13214_vm13, %v13520_v45  ;;  %v20656_v45 = vpop.permute.xlu0 %20655 }
 0x678   :  { %19297 = vmatmul.mubr.msk.f32.vlgmr.msra.gmra.mrb[40].mxu0 %vm13214_vm13, %v13521_v20  ;;  %v20658_v20 = vunpack.i.h.bf16 %v20656_v45 }
 0x679   :  { %19995 = vmatpush3.bf16.msra.mxu0 %v19992_v44  ;;  %19299 = vmatprep.mubr.msk.f32.mxu0 %vm13214_vm13, %v13522_v39  ;;  %v14298_v44 = vld [vmem:[%s25637_s6 + $0x148] sm:$0xff]  ;;  %v20657_v39 = vunpack.i.l.bf16 %v20656_v45  ;;  %v15005_v45 = vld [vmem:[%s25640_s8 + $0x70] sm:$0xff] }
 0x67a   :  { %19997 = vmatprep.subr.bf16.mxu0 %v19996_v63 }
 0x67c   :  { %19300 = vmatmul.mubr.msk.f32.gmra.mrb[42].mxu0 %vm13214_vm13, %v13523_v35  ;;  %v20028_v35 = vpack.c.bf16 %v20658_v20, %v20657_v39  ;;  %v24707_v20 = vld [vmem:[%s25641_s9 + $0x10] sm:$0xff]  ;;  %v24716_v39 = vld [vmem:[%s25641_s9 + $0x18] sm:$0xff] }
 0x67d   :  { %19306 = vmatprep.mubr.msk.f32.mxu0 %vm13214_vm13, %v13631_v6  ;;  %v20661_v6 = vpop.permute.xlu1 %20660 }
 0x680   :  { %19307 = vmatmul.mubr.msk.f32.vlgmr.msra.gmra.mrb[40].mxu0 %vm13214_vm13, %v13632_v51  ;;  %v20663_v51 = vunpack.i.h.bf16 %v20661_v6 }
 0x681   :  { %19999 = vmatpush3.bf16.msra.mxu0 %v19996_v63  ;;  %19309 = vmatprep.mubr.msk.f32.mxu0 %vm13214_vm13, %v13633_v38  ;;  %v14409_v63 = vld [vmem:[%s25637_s6 + $0x168] sm:$0xff]  ;;  %v20662_v38 = vunpack.i.l.bf16 %v20661_v6  ;;  %v24744_v6 = vld [vmem:[%s25641_s9 + $0x38] sm:$0xff] }
 0x682   :  { %20001 = vmatprep.subr.bf16.mxu0 %v20000_v30 }
 0x684   :  { %19310 = vmatmul.mubr.msk.f32.gmra.mrb[42].mxu0 %vm13214_vm13, %v13634_v9  ;;  %v20032_v9 = vpack.c.bf16 %v20663_v51, %v20662_v38  ;;  %v24763_v51 = vld [vmem:[%s25641_s9 + $0x50] sm:$0xff]  ;;  %v24772_v38 = vld [vmem:[%s25641_s9 + $0x58] sm:$0xff] }
 0x685   :  { %19316 = vmatprep.mubr.msk.f32.mxu0 %vm13214_vm13, %v13742_v24  ;;  %v20666_v24 = vpop.permute.xlu0 %20665 }
 0x688   :  { %19317 = vmatmul.mubr.msk.f32.vlgmr.msra.gmra.mrb[40].mxu0 %vm13214_vm13, %v13743_v15  ;;  %v20668_v15 = vunpack.i.h.bf16 %v20666_v24 }
 0x689   :  { %20003 = vmatpush3.bf16.msra.mxu0 %v20000_v30  ;;  %19319 = vmatprep.mubr.msk.f32.mxu0 %vm13214_vm13, %v13744_v10  ;;  %v14520_v30 = vld [vmem:[%s25637_s6 + $0x188] sm:$0xff]  ;;  %v20667_v10 = vunpack.i.l.bf16 %v20666_v24  ;;  %v24800_v24 = vld [vmem:[%s25641_s9 + $0x78] sm:$0xff] }
 0x68a   :  { %20005 = vmatprep.subr.bf16.mxu0 %v20004_v18 }
 0x68c   :  { %19320 = vmatmul.mubr.msk.f32.gmra.mrb[42].mxu0 %vm13214_vm13, %v13745_v8  ;;  %v20036_v8 = vpack.c.bf16 %v20668_v15, %v20667_v10 }
 0x68d   :  { %19326 = vmatprep.mubr.msk.f32.mxu0 %vm13214_vm13, %v13853_v1  ;;  %v14633_v1 = vld [vmem:[%s25637_s6 + $0x1b8] sm:$0xff] }
 0x690   :  { %19327 = vmatmul.mubr.msk.f32.vlgmr.msra.gmra.mrb[40].mxu0 %vm13214_vm13, %v13854_v53  ;;  %v14743_v53 = vld [vmem:[%s25637_s6 + $0x1d0] sm:$0xff] }
 0x691   :  { %20007 = vmatpush3.bf16.msra.mxu0 %v20004_v18  ;;  %19329 = vmatprep.mubr.msk.f32.mxu0 %vm13214_vm13, %v13855_v54  ;;  %v14631_v18 = vld [vmem:[%s25637_s6 + $0x1a8] sm:$0xff]  ;;  %v14744_v54 = vld [vmem:[%s25637_s6 + $0x1d8] sm:$0xff] }
 0x692   :  { %20009 = vmatprep.subr.bf16.mxu0 %v20008_v36 }
 0x694   :  { %19330 = vmatmul.mubr.msk.f32.gmra.mrb[42].mxu0 %vm13214_vm13, %v13856_v42  ;;  %v14854_v42 = vld [vmem:[%s25637_s6 + $0x1f0] sm:$0xff] }
 0x695   :  { %19336 = vmatprep.mubr.msk.f32.mxu0 %vm13214_vm13, %v13964_v56  ;;  %v14855_v56 = vld [vmem:[%s25637_s6 + $0x1f8] sm:$0xff] }
 0x698   :  { %19337 = vmatmul.mubr.msk.f32.vlgmr.msra.gmra.mrb[40].mxu0 %vm13214_vm13, %v13965_v3  ;;  %v14975_v3 = vpop.permute.xlu0 %14974 }
 0x699   :  { %20011 = vmatpush3.bf16.msra.mxu0 %v20008_v36  ;;  %19339 = vmatprep.mubr.msk.f32.mxu0 %vm13214_vm13, %v13966_v16  ;;  %v14852_v36 = vld [vmem:[%s25637_s6 + $0x1e0] sm:$0xff]  ;;  %v14970_v16 = vpop.permute.xlu1 %14969 }
 0x69a   :  { %20013 = vmatprep.subr.bf16.mxu0 %v20012_v60 }
 0x69c   :  { %19340 = vmatmul.mubr.msk.f32.gmra.mrb[42].mxu0 %vm13214_vm13, %v13967_v61  ;;  %v14985_v57 = vpop.permute.xlu0 %14984 }
 0x69d   :  { %19346 = vmatprep.mubr.msk.f32.mxu0 %vm13214_vm13, %v14075_v43 }
 0x6a0   :  { %19347 = vmatmul.mubr.msk.f32.vlgmr.msra.gmra.mrb[40].mxu0 %vm13214_vm13, %v14076_v62 }
 0x6a1   :  { %20015 = vmatpush3.bf16.msra.mxu0 %v20012_v60  ;;  %19349 = vmatprep.mubr.msk.f32.mxu0 %vm13214_vm13, %v14077_v32  ;;  %v14980_v32 = vpop.permute.xlu1 %14979 }
 0x6a2   :  { %20017 = vmatprep.subr.bf16.mxu0 %v20016_v17 }
 0x6a4   :  { %19350 = vmatmul.mubr.msk.f32.gmra.mrb[42].mxu0 %vm13214_vm13, %v14078_v55 }
 0x6a5   :  { %19356 = vmatprep.mubr.msk.f32.mxu0 %vm13214_vm13, %v14186_v47 }
 0x6a8   :  { %19357 = vmatmul.mubr.msk.f32.vlgmr.msra.gmra.mrb[40].mxu0 %vm13214_vm13, %v14187_v28  ;;  %v14994_v28 = vld [vmem:[%s25640_s8 + $0x18] sm:$0xff] }
 0x6a9   :  { %20019 = vmatpush3.bf16.msra.mxu0 %v20016_v17  ;;  %19359 = vmatprep.mubr.msk.f32.mxu0 %vm13214_vm13, %v14188_v29  ;;  %v14995_v29 = vld [vmem:[%s25640_s8 + $0x20] sm:$0xff] }
 0x6aa   :  { %20021 = vmatprep.subr.bf16.mxu0 %v20020_v34 }
 0x6ac   :  { %19360 = vmatmul.mubr.msk.f32.gmra.mrb[42].mxu0 %vm13214_vm13, %v14189_v37  ;;  %v14998_v37 = vld [vmem:[%s25640_s8 + $0x38] sm:$0xff] }
 0x6ad   :  { %19366 = vmatprep.mubr.msk.f32.mxu0 %vm13214_vm13, %v14297_v26  ;;  %v14999_v26 = vld [vmem:[%s25640_s8 + $0x40] sm:$0xff] }
 0x6b0   :  { %19367 = vmatmul.mubr.msk.f32.vlgmr.msra.gmra.mrb[40].mxu0 %vm13214_vm13, %v14298_v44  ;;  %v15002_v44 = vld [vmem:[%s25640_s8 + $0x58] sm:$0xff] }
 0x6b1   :  { %20023 = vmatpush3.bf16.msra.mxu0 %v20020_v34  ;;  %19369 = vmatprep.mubr.msk.f32.mxu0 %vm13214_vm13, %v14299_v23  ;;  %v14996_v34 = vld [vmem:[%s25640_s8 + $0x28] sm:$0xff]  ;;  %v15003_v23 = vld [vmem:[%s25640_s8 + $0x60] sm:$0xff] }
 0x6b2   :  { %20025 = vmatprep.subr.bf16.mxu0 %v20024_v4 }
 0x6b4   :  { %19370 = vmatmul.mubr.msk.f32.gmra.mrb[42].mxu0 %vm13214_vm13, %v14300_v33  ;;  %v15006_v33 = vld [vmem:[%s25640_s8 + $0x78] sm:$0xff] }
 0x6b5   :  { %19376 = vmatprep.mubr.msk.f32.mxu0 %vm13214_vm13, %v14408_v50  ;;  %v24702_v50 = vld [vmem:[%s25641_s9 + $0x8] sm:$0xff] }
 0x6b8   :  { %19377 = vmatmul.mubr.msk.f32.vlgmr.msra.gmra.mrb[40].mxu0 %vm13214_vm13, %v14409_v63  ;;  %v24721_v63 = vld [vmem:[%s25641_s9 + $0x20] sm:$0xff] }
 0x6b9   :  { %20027 = vmatpush3.bf16.msra.mxu0 %v20024_v4  ;;  %19379 = vmatprep.mubr.msk.f32.mxu0 %vm13214_vm13, %v14410_v5  ;;  %v15004_v4 = vld [vmem:[%s25640_s8 + $0x68] sm:$0xff] }
 0x6ba   :  { %20029 = vmatprep.subr.bf16.mxu0 %v20028_v35  ;;  %v24730_v5 = vld [vmem:[%s25641_s9 + $0x28] sm:$0xff] }
 0x6bc   :  { %19380 = vmatmul.mubr.msk.f32.gmra.mrb[42].mxu0 %vm13214_vm13, %v14411_v7  ;;  %v24749_v7 = vld [vmem:[%s25641_s9 + $0x40] sm:$0xff] }
 0x6bd   :  { %19386 = vmatprep.mubr.msk.f32.mxu0 %vm13214_vm13, %v14519_v48  ;;  %v24758_v48 = vld [vmem:[%s25641_s9 + $0x48] sm:$0xff] }
 0x6c0   :  { %19387 = vmatmul.mubr.msk.f32.vlgmr.msra.gmra.mrb[40].mxu0 %vm13214_vm13, %v14520_v30  ;;  %v24777_v30 = vld [vmem:[%s25641_s9 + $0x60] sm:$0xff] }
 0x6c1   :  { %20031 = vmatpush3.bf16.msra.mxu0 %v20028_v35  ;;  %19389 = vmatprep.mubr.msk.f32.mxu0 %vm13214_vm13, %v14521_v12  ;;  %v24735_v35 = vld [vmem:[%s25641_s9 + $0x30] sm:$0xff]  ;;  %v24786_v12 = vld [vmem:[%s25641_s9 + $0x68] sm:$0xff] }
 0x6c2   :  { %20033 = vmatprep.subr.bf16.mxu0 %v20032_v9 }
 0x6c4   :  { %19390 = vmatmul.mubr.msk.f32.gmra.mrb[42].mxu0 %vm13214_vm13, %v14522_v52 }
 0x6c5   :  { %19396 = vmatprep.mubr.msk.f32.mxu0 %vm13214_vm13, %v14630_v46 }
 0x6c8   :  { %19397 = vmatmul.mubr.msk.f32.vlgmr.msra.gmra.mrb[40].mxu0 %vm13214_vm13, %v14631_v18 }
 0x6c9   :  { %20035 = vmatpush3.bf16.msra.mxu0 %v20032_v9  ;;  %19399 = vmatprep.mubr.msk.f32.mxu0 %vm13214_vm13, %v14632_v22  ;;  %v24791_v9 = vld [vmem:[%s25641_s9 + $0x70] sm:$0xff] }
 0x6ca   :  { %20037 = vmatprep.subr.bf16.mxu0 %v20036_v8 }
 0x6cc   :  { %19400 = vmatmul.mubr.msk.f32.gmra.mrb[42].mxu0 %vm13214_vm13, %v14633_v1 }
 0x6cd   :  { %19406 = vmatprep.mubr.msk.f32.mxu0 %vm13214_vm13, %v14741_v13  ;;  %v15031_v13 = vpop.permute.xlu0 %15030 }
 0x6d0   :  { %19407 = vmatmul.mubr.msk.f32.vlgmr.msra.gmra.mrb[40].mxu0 %vm13214_vm13, %v14742_v49 }
 0x6d1   :  { %20039 = vmatpush3.bf16.msra.mxu0 %v20036_v8  ;;  %19409 = vmatprep.mubr.msk.f32.mxu0 %vm13214_vm13, %v14743_v53  ;;  %v15026_v53 = vpop.permute.xlu1 %15025 }
 0x6d4   :  { %19410 = vmatmul.mubr.msk.f32.gmra.mrb[42].mxu0 %vm13214_vm13, %v14744_v54 }
 0x6d5   :  { %19416 = vmatprep.mubr.msk.f32.mxu0 %vm13214_vm13, %v14852_v36  ;;  %v15051_v36 = vpop.permute.xlu0 %15050 }
 0x6d8   :  { %19417 = vmatmul.mubr.msk.f32.vlgmr.msra.gmra.mrb[40].mxu0 %vm13214_vm13, %v14853_v31 }
 0x6d9   :  { %19419 = vmatprep.mubr.msk.f32.mxu0 %vm13214_vm13, %v14854_v42 }
 0x6dc   :  { %19420 = vmatmul.mubr.msk.f32.gmra.mrb[42].mxu0 %vm13214_vm13, %v14855_v56  ;;  %v15046_v56 = vpop.permute.xlu1 %15045 }
 0x6dd   :  { %19552 = vmatprep.mubr.msk.f32.mxu0 %vm15103_vm14, %v24631_v40 }
 0x7ab   :  { %v19418_v60 = vpop.f32.mrb[40].mxu0 }
 0x7ac   :  { %v14988_v14 = vadd.f32 %v19418_v60, %v14975_v3  ;;  %v14940_v61 = vpop.f32.mrb[41].mxu0 }
 0x7ad   :  { %v14987_v43 = vadd.f32 %v14970_v16, %v14940_v61  ;;  %v15041_v16 = vpop.permute.xlu0 %15040 }
 0x7af   :  { %v20040_v19 = vpack.c.bf16 %v14988_v14, %v14987_v43  ;;  %v19421_v62 = vpop.f32.mrb[42].mxu0  ;;  %v15036_v14 = vpop.permute.xlu1 %15035 }
 0x7b0   :  { %v14990_v17 = vadd.f32 %v19421_v62, %v14985_v57  ;;  %v14950_v21 = vpop.f32.mrb[43].mxu0 }
 0x7b1   :  { %v14989_v55 = vadd.f32 %v14980_v32, %v14950_v21  ;;  %20041 = vmatprep.subr.bf16.mxu1 %v20040_v19  ;;  %v15061_v57 = vpop.permute.xlu0 %15060 }
 0x7b2   :  { %20043 = vmatpush3.bf16.msra.mxu1 %v20040_v19 }
 0x7b3   :  { %v20044_v47 = vpack.c.bf16 %v14990_v17, %v14989_v55  ;;  %v15056_v55 = vpop.permute.xlu1 %15055 }
 0x7b5   :  { %20045 = vmatprep.subr.bf16.mxu1 %v20044_v47 }
 0x7b6   :  { %20047 = vmatpush3.bf16.msra.mxu1 %v20044_v47 }
 0x7b7   :  { %19454 = vmatprep.subr.mxu1 %v21282_v2 }
 0x7b9   :  { %19431 = vmatmul.mubr.msk.f32.vlgmr.msra.gmra.mrb[42].mxu1 %vm15103_vm14, %v14992_v25 }
 0x7ba   :  { %19433 = vmatprep.mubr.msk.f32.mxu1 %vm15103_vm14, %v14993_v27  ;;  %19455 = vmatpush3.msra.mxu1 %v21282_v2 }
 0x7bd   :  { %19434 = vmatmul.mubr.msk.f32.gmra.mrb[44].mxu1 %vm15103_vm14, %v14994_v28 }
 0x7be   :  { %19436 = vmatprep.mubr.msk.f32.mxu1 %vm15103_vm14, %v14995_v29 }
 0x7c1   :  { %19437 = vmatmul.mubr.msk.f32.gmra.mrb[46].mxu1 %vm15103_vm14, %v14996_v34 }
 0x7c2   :  { %19439 = vmatprep.mubr.msk.f32.mxu1 %vm15103_vm14, %v14997_v11 }
 0x7c5   :  { %19440 = vmatmul.mubr.msk.f32.gmra.mrb[48].mxu1 %vm15103_vm14, %v14998_v37  ;;  %v15071_v37 = vpop.permute.xlu0 %15070 }
 0x7c6   :  { %19442 = vmatprep.mubr.msk.f32.mxu1 %vm15103_vm14, %v14999_v26 }
 0x7c9   :  { %19443 = vmatmul.mubr.msk.f32.gmra.mrb[50].mxu1 %vm15103_vm14, %v15000_v0 }
 0x7ca   :  { %19445 = vmatprep.mubr.msk.f32.mxu1 %vm15103_vm14, %v15001_v41 }
 0x7cd   :  { %19446 = vmatmul.mubr.msk.f32.gmra.mrb[52].mxu1 %vm15103_vm14, %v15002_v44 }
 0x7ce   :  { %19448 = vmatprep.mubr.msk.f32.mxu1 %vm15103_vm14, %v15003_v23 }
 0x7d1   :  { %19449 = vmatmul.mubr.msk.f32.gmra.mrb[54].mxu1 %vm15103_vm14, %v15004_v4 }
 0x7d2   :  { %19451 = vmatprep.mubr.msk.f32.mxu1 %vm15103_vm14, %v15005_v45  ;;  %v15066_v45 = vpop.permute.xlu1 %15065 }
 0x7d5   :  { %19452 = vmatmul.mubr.msk.f32.gmra.mrb[56].mxu1 %vm15103_vm14, %v15006_v33 }
 0x7d6   :  { %19456 = vmatprep.mubr.msk.f32.mxu1 %vm15103_vm14, %v24631_v40 }
 0x7d9   :  { %19457 = vmatmul.mubr.msk.f32.vlgmr.msra.gmra.mrb[58].mxu1 %vm15103_vm14, %v24702_v50 }
 0x7da   :  { %19459 = vmatprep.mubr.msk.f32.mxu1 %vm15103_vm14, %v24707_v20 }
 0x7dd   :  { %19460 = vmatmul.mubr.msk.f32.gmra.mrb[60].mxu1 %vm15103_vm14, %v24716_v39 }
 0x7de   :  { %19462 = vmatprep.mubr.msk.f32.mxu1 %vm15103_vm14, %v24721_v63 }
 0x7e1   :  { %19463 = vmatmul.mubr.msk.f32.gmra.mrb[62].mxu1 %vm15103_vm14, %v24730_v5 }
 0x7e2   :  { %19465 = vmatprep.mubr.msk.f32.mxu1 %vm15103_vm14, %v24735_v35 }
 0x7e5   :  { %19466 = vmatmul.mubr.msk.f32.gmra.mrb[64].mxu1 %vm15103_vm14, %v24744_v6 }
 0x7e6   :  { %19468 = vmatprep.mubr.msk.f32.mxu1 %vm15103_vm14, %v24749_v7 }
 0x7e9   :  { %19469 = vmatmul.mubr.msk.f32.gmra.mrb[66].mxu1 %vm15103_vm14, %v24758_v48 }
 0x7ea   :  { %19471 = vmatprep.mubr.msk.f32.mxu1 %vm15103_vm14, %v24763_v51 }
 0x7ed   :  { %19472 = vmatmul.mubr.msk.f32.gmra.mrb[68].mxu1 %vm15103_vm14, %v24772_v38 }
 0x7ee   :  { %19474 = vmatprep.mubr.msk.f32.mxu1 %vm15103_vm14, %v24777_v30 }
 0x7f1   :  { %19475 = vmatmul.mubr.msk.f32.gmra.mrb[70].mxu1 %vm15103_vm14, %v24786_v12 }
 0x7f2   :  { %19477 = vmatprep.mubr.msk.f32.mxu1 %vm15103_vm14, %v24791_v9 }
 0x7f5   :  { %19478 = vmatmul.mubr.msk.f32.gmra.mrb[72].mxu1 %vm15103_vm14, %v24800_v24 }
 0x7f6   :  { %19488 = vmatprep.mubr.msk.f32.mxu1 %vm15103_vm14, %v24631_v40 }
 0x88c   :  { %v19432_v52 = vpop.f32.mrb[42].mxu1 }
 0x88d   :  { %v15218_v46 = vpop.f32.mrb[43].mxu1  ;;  %v24820_v43 = vadd.f32 %v19432_v52, %v15031_v13  ;;  %v15091_v13 = vpop.permute.xlu0 %15090 }
 0x88e   :  { %v24822_v19 = vadd.f32 %v15218_v46, %v15026_v53 }
 0x890   :  { %v19435_v15 = vpop.f32.mrb[44].mxu1 }
 0x891   :  { %v15228_v10 = vpop.f32.mrb[45].mxu1  ;;  %v24826_v47 = vadd.f32 %v19435_v15, %v15041_v16 }
 0x892   :  { %v24828_v27 = vadd.f32 %v15228_v10, %v15036_v14 }
 0x894   :  { %v19438_v18 = vpop.f32.mrb[46].mxu1 }
 0x895   :  { %v15238_v22 = vpop.f32.mrb[47].mxu1  ;;  %v24832_v0 = vadd.f32 %v19438_v18, %v15051_v36 }
 0x896   :  { %v24834_v44 = vadd.f32 %v15238_v22, %v15046_v56 }
 0x898   :  { %v19441_v8 = vpop.f32.mrb[48].mxu1 }
 0x899   :  { %v15248_v1 = vpop.f32.mrb[49].mxu1  ;;  %v24838_v15 = vadd.f32 %v19441_v8, %v15061_v57 }
 0x89a   :  { %v24840_v53 = vadd.f32 %v15248_v1, %v15056_v55 }
 0x89c   :  { %v19444_v49 = vpop.f32.mrb[50].mxu1 }
 0x89d   :  { %v24806_v54 = vpop.f32.mrb[51].mxu1 }
 0x8a0   :  { %v24808_v31 = vpop.f32.mrb[52].mxu1 }
 0x8a1   :  { %v24810_v42 = vpop.f32.mrb[53].mxu1 }
 0x8a4   :  { %v24812_v58 = vpop.f32.mrb[54].mxu1 }
 0x8a5   :  { %v24814_v3 = vpop.f32.mrb[55].mxu1 }
 0x8a8   :  { %v24816_v60 = vpop.f32.mrb[56].mxu1 }
 0x8a9   :  { %v24818_v61 = vpop.f32.mrb[57].mxu1 }
 0x8ac   :  { %v19458_v62 = vpop.f32.mrb[58].mxu1 }
 0x8ad   :  { %v15507_v32 = vadd.f32 %v19458_v62, %v24820_v43  ;;  %v15427_v17 = vpop.f32.mrb[59].mxu1  ;;  %v15086_v62 = vpop.permute.xlu1 %15085 }
 0x8ae   :  { %v15506_v21 = vadd.f32 %v15427_v17, %v24822_v19 }
 0x8af   :  { %v18510_v25 = vmul.f32 -1.442695, %v15507_v32  ;;  %v24844_v32 = vadd.f32 %v19444_v49, %v15071_v37 }
 0x8b0   :  { %v18509_v28 = vmul.f32 -1.442695, %v15506_v21  ;;  %v19461_v29 = vpop.f32.mrb[60].mxu1 }
 0x8b1   :  { %20739 = vpow2.f32 %v18510_v25  ;;  %v15509_v34 = vadd.f32 %v19461_v29, %v24826_v47  ;;  %v15437_v11 = vpop.f32.mrb[61].mxu1  ;;  %v15081_v29 = vpop.permute.xlu0 %15080 }
 0x8b2   :  { %20741 = vpow2.f32 %v18509_v28  ;;  %v15508_v26 = vadd.f32 %v15437_v11, %v24828_v27 }
 0x8b3   :  { %v18512_v41 = vmul.f32 -1.442695, %v15509_v34  ;;  %v24848_v34 = vadd.f32 %v24806_v54, %v15066_v45 }
 0x8b4   :  { %v18511_v23 = vmul.f32 -1.442695, %v15508_v26  ;;  %v19464_v4 = vpop.f32.mrb[62].mxu1  ;;  %v24851_v26 = vadd.f32 %v24808_v31, %v15081_v29  ;;  %v24859_v31 = vadd.f32 %v24812_v58, %v15091_v13 }
 0x8b5   :  { %20743 = vpow2.f32 %v18512_v41  ;;  %v15511_v33 = vadd.f32 %v19464_v4, %v24832_v0  ;;  %v15447_v52 = vpop.f32.mrb[63].mxu1  ;;  %v15076_v4 = vpop.permute.xlu1 %15075 }
 0x8b6   :  { %20745 = vpow2.f32 %v18511_v23  ;;  %v15510_v46 = vadd.f32 %v15447_v52, %v24834_v44  ;;  %v24856_v54 = vadd.f32 %v24810_v42, %v15076_v4 }
 0x8b7   :  { %v18514_v10 = vmul.f32 -1.442695, %v15511_v33 }
 0x8b8   :  { %v18513_v18 = vmul.f32 -1.442695, %v15510_v46  ;;  %v19467_v36 = vpop.f32.mrb[64].mxu1 }
 0x8b9   :  { %20747 = vpow2.f32 %v18514_v10  ;;  %v15513_v22 = vadd.f32 %v19467_v36, %v24838_v15  ;;  %v15457_v56 = vpop.f32.mrb[65].mxu1 }
 0x8ba   :  { %20749 = vpow2.f32 %v18513_v18  ;;  %v15512_v16 = vadd.f32 %v15457_v56, %v24840_v53  ;;  %v24862_v18 = vadd.f32 %v24814_v3, %v15086_v62 }
 0x8bb   :  { %v20740_v14 = vpop.eup %20739  ;;  %v18516_v17 = vmul.f32 -1.442695, %v15513_v22 }
 0x8bc   :  { %v20742_v8 = vpop.eup %20741  ;;  %v15535_v57 = vadd.f32 1.0, %v20740_v14  ;;  %v18515_v21 = vmul.f32 -1.442695, %v15512_v16  ;;  %v19470_v25 = vpop.f32.mrb[66].mxu1 }
 0x8bd   :  { %v15534_v1 = vadd.f32 1.0, %v20742_v8  ;;  %20751 = vpow2.f32 %v18516_v17  ;;  %v15515_v55 = vadd.f32 %v19470_v25, %v24844_v32  ;;  %v15467_v28 = vpop.f32.mrb[67].mxu1  ;;  %v15101_v17 = vpop.permute.xlu0 %15100 }
 0x8be   :  { %20753 = vrcp.f32 %v15535_v57  ;;  %v15514_v41 = vadd.f32 %v15467_v28, %v24848_v34  ;;  %v15096_v8 = vpop.permute.xlu1 %15095  ;;  %v24868_v57 = vadd.f32 %v24816_v60, %v15101_v17 }
 0x8bf   :  { %v20744_v11 = vpop.eup %20743  ;;  %20755 = vrcp.f32 %v15534_v1 }
 0x8c0   :  { %v20746_v49 = vpop.eup %20745  ;;  %v15537_v37 = vadd.f32 1.0, %v20744_v11  ;;  %20757 = vpow2.f32 %v18515_v21  ;;  %v19473_v23 = vpop.f32.mrb[68].mxu1  ;;  %v24871_v21 = vadd.f32 %v24818_v61, %v15096_v8 }
 0x8c1   :  { %v15536_v33 = vadd.f32 1.0, %v20746_v49  ;;  %20759 = vtanh.f32 %v15515_v55  ;;  %v15517_v52 = vadd.f32 %v19473_v23, %v24851_v26  ;;  %v15477_v46 = vpop.f32.mrb[69].mxu1 }
 0x8c2   :  { %20761 = vrcp.f32 %v15537_v37  ;;  %v15516_v22 = vadd.f32 %v15477_v46, %v24856_v54 }
 0x8c3   :  { %v20748_v45 = vpop.eup %20747  ;;  %20763 = vrcp.f32 %v15536_v33 }
 0x8c4   :  { %v20750_v10 = vpop.eup %20749  ;;  %v15559_v36 = vadd.f32 1.0, %v20748_v45  ;;  %20765 = vtanh.f32 %v15514_v41  ;;  %v19476_v56 = vpop.f32.mrb[70].mxu1 }
 0x8c5   :  { %v15558_v16 = vadd.f32 1.0, %v20750_v10  ;;  %20767 = vtanh.f32 %v15517_v52  ;;  %v15519_v42 = vadd.f32 %v19476_v56, %v24859_v31  ;;  %v15487_v14 = vpop.f32.mrb[71].mxu1 }
 0x8c6   :  { %20769 = vrcp.f32 %v15559_v36  ;;  %v15518_v58 = vadd.f32 %v15487_v14, %v24862_v18 }
 0x8c7   :  { %v20752_v13 = vpop.eup %20751  ;;  %20771 = vrcp.f32 %v15558_v16  ;;  %v18518_v3 = vmul.f32 -1.442695, %v15519_v42 }
 0x8c8   :  { %v20754_v62 = vpop.eup %20753  ;;  %v15561_v25 = vadd.f32 1.0, %v20752_v13  ;;  %20773 = vtanh.f32 %v15516_v22  ;;  %v18517_v1 = vmul.f32 -1.442695, %v15518_v58  ;;  %v19479_v55 = vpop.f32.mrb[72].mxu1 }
 0x8c9   :  { %v20756_v28 = vpop.eup %20755  ;;  %20775 = vpow2.f32 %v18518_v3  ;;  %v15521_v29 = vadd.f32 %v19479_v55, %v24868_v57  ;;  %v15497_v11 = vpop.f32.mrb[73].mxu1 }
 0x8ca   :  { %v20758_v49 = vpop.eup %20757  ;;  %20777 = vrcp.f32 %v15561_v25  ;;  %v15520_v60 = vadd.f32 %v15497_v11, %v24871_v21 }
 0x8cb   :  { %v20760_v37 = vpop.eup %20759  ;;  %v15560_v41 = vadd.f32 1.0, %v20758_v49  ;;  %20779 = vpow2.f32 %v18517_v1  ;;  %v18520_v23 = vmul.f32 -1.442695, %v15521_v29 }
 0x8cc   :  { %v20762_v4 = vpop.eup %20761  ;;  %v15603_v61 = vmul.f32 %v20760_v37, %v20754_v62  ;;  %v18519_v33 = vmul.f32 -1.442695, %v15520_v60 }
 0x8cd   :  { %v20764_v52 = vpop.eup %20763  ;;  %20781 = vrcp.f32 %v15560_v41 }
 0x8ce   :  { %v20766_v46 = vpop.eup %20765  ;;  %20783 = vpow2.f32 %v18520_v23 }
 0x8cf   :  { %v20768_v45 = vpop.eup %20767  ;;  %v15602_v10 = vmul.f32 %v20766_v46, %v20756_v28  ;;  %20785 = vpow2.f32 %v18519_v33 }
 0x8d0   :  { %v20770_v36 = vpop.eup %20769  ;;  %v15605_v22 = vmul.f32 %v20768_v45, %v20762_v4 }
 0x8d1   :  { %v20772_v56 = vpop.eup %20771  ;;  %v15599_v16 = vmul.f32 0.0, %v20770_v36 }
 0x8d2   :  { %v20774_v42 = vpop.eup %20773  ;;  %v15598_v14 = vmul.f32 0.0, %v20772_v56 }
 0x8d3   :  { %v20776_v17 = vpop.eup %20775  ;;  %v24875_v58 = vadd.f32 %v15603_v61, %v15599_v16  ;;  %v15604_v13 = vmul.f32 %v20774_v42, %v20764_v52 }
 0x8d4   :  { %v20778_v8 = vpop.eup %20777  ;;  %v24877_v3 = vadd.f32 %v15602_v10, %v15598_v14  ;;  %v15587_v62 = vadd.f32 1.0, %v20776_v17 }
 0x8d5   :  { %v20780_v25 = vpop.eup %20779  ;;  %v15601_v1 = vmul.f32 0.0, %v20778_v8  ;;  %20787 = vtanh.f32 %v24875_v58 }
 0x8d6   :  { %20789 = vtanh.f32 %v24877_v3  ;;  %v15586_v55 = vadd.f32 1.0, %v20780_v25 }
 0x8d7   :  { %v20782_v28 = vpop.eup %20781  ;;  %v24881_v29 = vadd.f32 %v15605_v22, %v15601_v1  ;;  %20791 = vrcp.f32 %v15587_v62 }
 0x8d8   :  { %v20784_v11 = vpop.eup %20783  ;;  %v15600_v49 = vmul.f32 0.0, %v20782_v28  ;;  %20793 = vrcp.f32 %v15586_v55 }
 0x8d9   :  { %v20786_v60 = vpop.eup %20785  ;;  %20795 = vtanh.f32 %v24881_v29  ;;  %v15589_v37 = vadd.f32 1.0, %v20784_v11 }
 0x8da   :  { %v24884_v41 = vadd.f32 %v15604_v13, %v15600_v49  ;;  %v15588_v23 = vadd.f32 1.0, %v20786_v60 }
 0x8db   :  { %20797 = vrcp.f32 %v15589_v37 }
 0x8dc   :  { %20799 = vtanh.f32 %v24884_v41 }
 0x8dd   :  { %20801 = vrcp.f32 %v15588_v23 }
 0x8df   :  { %v20788_v4 = vpop.eup %20787 }
 0x8e0   :  { %v20790_v61 = vpop.eup %20789 }
 0x8e1   :  { %v20792_v33 = vpop.eup %20791 }
 0x8e2   :  { %v20794_v52 = vpop.eup %20793  ;;  %v15615_v46 = vmul.f32 %v20792_v33, %v20788_v4 }
 0x8e3   :  { %v20796_v45 = vpop.eup %20795  ;;  %v15614_v10 = vmul.f32 %v20794_v52, %v20790_v61 }
 0x8e5   :  { %v20798_v36 = vpop.eup %20797  ;;  %v20048_v22 = vpack.c.bf16 %v15615_v46, %v15614_v10 }
 0x8e6   :  { %v20800_v56 = vpop.eup %20799  ;;  %v15617_v16 = vmul.f32 %v20798_v36, %v20796_v45 }
 0x8e7   :  { %v20802_v42 = vpop.eup %20801  ;;  %20049 = vmatprep.subr.bf16.mxu1 %v20048_v22 }
 0x8e8   :  { %20051 = vmatpush3.bf16.msra.mxu1 %v20048_v22  ;;  %v15616_v14 = vmul.f32 %v20802_v42, %v20800_v56 }
 0x8ea   :  { %v20052_v17 = vpack.c.bf16 %v15617_v16, %v15616_v14 }
 0x8ec   :  { %20053 = vmatprep.subr.bf16.mxu1 %v20052_v17 }
 0x8ed   :  { %20055 = vmatpush3.bf16.msra.mxu1 %v20052_v17 }
 0x8f0   :  { %19489 = vmatmul.mubr.msk.f32.vlgmr.msra.gmra.mrb[74].mxu1 %vm15103_vm14, %v24702_v50 }
 0x8f1   :  { %19491 = vmatprep.mubr.msk.f32.mxu1 %vm15103_vm14, %v24707_v20 }
 0x8f4   :  { %19492 = vmatmul.mubr.msk.f32.gmra.mrb[76].mxu1 %vm15103_vm14, %v24716_v39 }
 0x8f5   :  { %19494 = vmatprep.mubr.msk.f32.mxu1 %vm15103_vm14, %v24721_v63 }
 0x8f8   :  { %19495 = vmatmul.mubr.msk.f32.gmra.mrb[78].mxu1 %vm15103_vm14, %v24730_v5 }
 0x8f9   :  { %19497 = vmatprep.mubr.msk.f32.mxu1 %vm15103_vm14, %v24735_v35 }
 0x8fc   :  { %19498 = vmatmul.mubr.msk.f32.gmra.mrb[80].mxu1 %vm15103_vm14, %v24744_v6 }
 0x8fd   :  { %19500 = vmatprep.mubr.msk.f32.mxu1 %vm15103_vm14, %v24749_v7 }
 0x900   :  { %19501 = vmatmul.mubr.msk.f32.gmra.mrb[82].mxu1 %vm15103_vm14, %v24758_v48 }
 0x901   :  { %19503 = vmatprep.mubr.msk.f32.mxu1 %vm15103_vm14, %v24763_v51 }
 0x904   :  { %19504 = vmatmul.mubr.msk.f32.gmra.mrb[84].mxu1 %vm15103_vm14, %v24772_v38 }
 0x905   :  { %19506 = vmatprep.mubr.msk.f32.mxu1 %vm15103_vm14, %v24777_v30 }
 0x908   :  { %19507 = vmatmul.mubr.msk.f32.gmra.mrb[86].mxu1 %vm15103_vm14, %v24786_v12 }
 0x909   :  { %19509 = vmatprep.mubr.msk.f32.mxu1 %vm15103_vm14, %v24791_v9 }
 0x90c   :  { %19510 = vmatmul.mubr.msk.f32.gmra.mrb[88].mxu1 %vm15103_vm14, %v24800_v24 }
 0x90d   :  { %19520 = vmatprep.mubr.msk.f32.mxu1 %vm15103_vm14, %v24631_v40 }
 0x9c3   :  { %v19490_v13 = vpop.f32.mrb[74].mxu1 }
 0x9c4   :  { %15781 = vrot.lane.b32.xlu0 %v19490_v13, %s21307_s30  ;;  %v15684_v8 = vpop.f32.mrb[75].mxu1 }
 0x9c5   :  { %15779 = vrot.lane.b32.xlu1 %v15684_v8, %s21307_s30 }
 0x9c7   :  { %v19493_v62 = vpop.f32.mrb[76].mxu1 }
 0x9c8   :  { %15785 = vrot.lane.b32.xlu0 %v19493_v62, %s21307_s30  ;;  %v15694_v25 = vpop.f32.mrb[77].mxu1 }
 0x9c9   :  { %15783 = vrot.lane.b32.xlu1 %v15694_v25, %s21307_s30 }
 0x9cb   :  { %v19496_v1 = vpop.f32.mrb[78].mxu1 }
 0x9cc   :  { %15789 = vrot.lane.b32.xlu0 %v19496_v1, %s21307_s30  ;;  %v15704_v55 = vpop.f32.mrb[79].mxu1 }
 0x9cd   :  { %15787 = vrot.lane.b32.xlu1 %v15704_v55, %s21307_s30 }
 0x9cf   :  { %v19499_v28 = vpop.f32.mrb[80].mxu1 }
 0x9d0   :  { %15793 = vrot.lane.b32.xlu0 %v19499_v28, %s21307_s30  ;;  %v15714_v11 = vpop.f32.mrb[81].mxu1 }
 0x9d1   :  { %15791 = vrot.lane.b32.xlu1 %v15714_v11, %s21307_s30 }
 0x9d3   :  { %v19502_v49 = vpop.f32.mrb[82].mxu1 }
 0x9d4   :  { %15797 = vrot.lane.b32.xlu0 %v19502_v49, %s21307_s30  ;;  %v15724_v60 = vpop.f32.mrb[83].mxu1 }
 0x9d5   :  { %15795 = vrot.lane.b32.xlu1 %v15724_v60, %s21307_s30 }
 0x9d7   :  { %v19505_v37 = vpop.f32.mrb[84].mxu1 }
 0x9d8   :  { %15801 = vrot.lane.b32.xlu0 %v19505_v37, %s21307_s30  ;;  %v15734_v23 = vpop.f32.mrb[85].mxu1 }
 0x9d9   :  { %15799 = vrot.lane.b32.xlu1 %v15734_v23, %s21307_s30 }
 0x9db   :  { %v19508_v4 = vpop.f32.mrb[86].mxu1 }
 0x9dc   :  { %15805 = vrot.lane.b32.xlu0 %v19508_v4, %s21307_s30  ;;  %v15744_v61 = vpop.f32.mrb[87].mxu1 }
 0x9dd   :  { %15803 = vrot.lane.b32.xlu1 %v15744_v61, %s21307_s30 }
 0x9df   :  { %v19511_v33 = vpop.f32.mrb[88].mxu1 }
 0x9e0   :  { %15809 = vrot.lane.b32.xlu0 %v19511_v33, %s21307_s30  ;;  %v15754_v52 = vpop.f32.mrb[89].mxu1 }
 0x9e1   :  { %15807 = vrot.lane.b32.xlu1 %v15754_v52, %s21307_s30 }
 0x9e4   :  { %15925 = vrot.lane.b32.xlu0 %v24875_v58, %s21307_s30 }
 0x9e5   :  { %15923 = vrot.lane.b32.xlu1 %v24877_v3, %s21307_s30 }
 0x9e8   :  { %15929 = vrot.lane.b32.xlu0 %v24881_v29, %s21307_s30 }
 0x9e9   :  { %15927 = vrot.lane.b32.xlu1 %v24884_v41, %s21307_s30 }
 0xa36   :  { %v15782_v46 = vpop.permute.xlu0 %15781 }
 0xa37   :  { %v15828_v45 = vadd.f32 %v15782_v46, %v24820_v43  ;;  %v15780_v10 = vpop.permute.xlu1 %15779 }
 0xa38   :  { %v15827_v36 = vadd.f32 %v15780_v10, %v24822_v19 }
 0xa39   :  { %v18538_v22 = vmul.f32 -1.442695, %v15828_v45 }
 0xa3a   :  { %v18537_v56 = vmul.f32 -1.442695, %v15827_v36  ;;  %v15786_v16 = vpop.permute.xlu0 %15785 }
 0xa3b   :  { %20803 = vpow2.f32 %v18538_v22  ;;  %v15830_v58 = vadd.f32 %v15786_v16, %v24826_v47  ;;  %v15784_v42 = vpop.permute.xlu1 %15783 }
 0xa3c   :  { %20805 = vpow2.f32 %v18537_v56  ;;  %v15829_v3 = vadd.f32 %v15784_v42, %v24828_v27 }
 0xa3d   :  { %v18540_v29 = vmul.f32 -1.442695, %v15830_v58 }
 0xa3e   :  { %v18539_v14 = vmul.f32 -1.442695, %v15829_v3  ;;  %v15790_v17 = vpop.permute.xlu0 %15789 }
 0xa3f   :  { %20807 = vpow2.f32 %v18540_v29  ;;  %v15832_v41 = vadd.f32 %v15790_v17, %v24832_v0  ;;  %v15788_v13 = vpop.permute.xlu1 %15787 }
 0xa40   :  { %20809 = vpow2.f32 %v18539_v14  ;;  %v15831_v8 = vadd.f32 %v15788_v13, %v24834_v44 }
 0xa41   :  { %v18542_v62 = vmul.f32 -1.442695, %v15832_v41 }
 0xa42   :  { %v18541_v25 = vmul.f32 -1.442695, %v15831_v8  ;;  %v15794_v1 = vpop.permute.xlu0 %15793 }
 0xa43   :  { %20811 = vpow2.f32 %v18542_v62  ;;  %v15834_v55 = vadd.f32 %v15794_v1, %v24838_v15  ;;  %v15792_v28 = vpop.permute.xlu1 %15791 }
 0xa44   :  { %20813 = vpow2.f32 %v18541_v25  ;;  %v15833_v11 = vadd.f32 %v15792_v28, %v24840_v53 }
 0xa45   :  { %v20804_v49 = vpop.eup %20803  ;;  %v18544_v60 = vmul.f32 -1.442695, %v15834_v55 }
 0xa46   :  { %v20806_v37 = vpop.eup %20805  ;;  %v15856_v23 = vadd.f32 1.0, %v20804_v49  ;;  %v18543_v4 = vmul.f32 -1.442695, %v15833_v11  ;;  %v15798_v61 = vpop.permute.xlu0 %15797 }
 0xa47   :  { %v15855_v33 = vadd.f32 1.0, %v20806_v37  ;;  %20815 = vpow2.f32 %v18544_v60  ;;  %v15836_v52 = vadd.f32 %v15798_v61, %v24844_v32  ;;  %v15796_v46 = vpop.permute.xlu1 %15795 }
 0xa48   :  { %20817 = vrcp.f32 %v15856_v23  ;;  %v15835_v22 = vadd.f32 %v15796_v46, %v24848_v34 }
 0xa49   :  { %v20808_v45 = vpop.eup %20807  ;;  %20819 = vrcp.f32 %v15855_v33 }
 0xa4a   :  { %v20810_v10 = vpop.eup %20809  ;;  %v15858_v36 = vadd.f32 1.0, %v20808_v45  ;;  %20821 = vpow2.f32 %v18543_v4  ;;  %v15802_v56 = vpop.permute.xlu0 %15801 }
 0xa4b   :  { %v15857_v16 = vadd.f32 1.0, %v20810_v10  ;;  %20823 = vtanh.f32 %v15836_v52  ;;  %v15838_v58 = vadd.f32 %v15802_v56, %v24851_v26  ;;  %v15800_v42 = vpop.permute.xlu1 %15799 }
 0xa4c   :  { %20825 = vrcp.f32 %v15858_v36  ;;  %v15837_v17 = vadd.f32 %v15800_v42, %v24856_v54 }
 0xa4d   :  { %v20812_v3 = vpop.eup %20811  ;;  %20827 = vrcp.f32 %v15857_v16 }
 0xa4e   :  { %v20814_v29 = vpop.eup %20813  ;;  %v15880_v14 = vadd.f32 1.0, %v20812_v3  ;;  %20829 = vtanh.f32 %v15835_v22  ;;  %v15806_v41 = vpop.permute.xlu0 %15805 }
 0xa4f   :  { %v15879_v13 = vadd.f32 1.0, %v20814_v29  ;;  %20831 = vtanh.f32 %v15838_v58  ;;  %v15840_v8 = vadd.f32 %v15806_v41, %v24859_v31  ;;  %v15804_v62 = vpop.permute.xlu1 %15803 }
 0xa50   :  { %20833 = vrcp.f32 %v15880_v14  ;;  %v15839_v25 = vadd.f32 %v15804_v62, %v24862_v18 }
 0xa51   :  { %v20816_v1 = vpop.eup %20815  ;;  %20835 = vrcp.f32 %v15879_v13  ;;  %v18546_v55 = vmul.f32 -1.442695, %v15840_v8 }
 0xa52   :  { %v20818_v28 = vpop.eup %20817  ;;  %v15882_v11 = vadd.f32 1.0, %v20816_v1  ;;  %20837 = vtanh.f32 %v15837_v17  ;;  %v18545_v49 = vmul.f32 -1.442695, %v15839_v25  ;;  %v15810_v60 = vpop.permute.xlu0 %15809 }
 0xa53   :  { %v20820_v37 = vpop.eup %20819  ;;  %20839 = vpow2.f32 %v18546_v55  ;;  %v15842_v23 = vadd.f32 %v15810_v60, %v24868_v57  ;;  %v15808_v4 = vpop.permute.xlu1 %15807 }
 0xa54   :  { %v20822_v61 = vpop.eup %20821  ;;  %20841 = vrcp.f32 %v15882_v11  ;;  %v15841_v33 = vadd.f32 %v15808_v4, %v24871_v21 }
 0xa55   :  { %v20824_v52 = vpop.eup %20823  ;;  %v15881_v46 = vadd.f32 1.0, %v20822_v61  ;;  %20843 = vpow2.f32 %v18545_v49  ;;  %v18548_v45 = vmul.f32 -1.442695, %v15842_v23 }
 0xa56   :  { %v20826_v10 = vpop.eup %20825  ;;  %v18547_v36 = vmul.f32 -1.442695, %v15841_v33  ;;  %v15926_v16 = vpop.permute.xlu0 %15925  ;;  %v15940_v29 = vmul.f32 %v20824_v52, %v20818_v28 }
 0xa57   :  { %v20828_v22 = vpop.eup %20827  ;;  %20845 = vrcp.f32 %v15881_v46  ;;  %v15924_v17 = vpop.permute.xlu1 %15923 }
 0xa58   :  { %v20830_v56 = vpop.eup %20829  ;;  %20847 = vpow2.f32 %v18548_v45 }
 0xa59   :  { %v20832_v58 = vpop.eup %20831  ;;  %20849 = vpow2.f32 %v18547_v36  ;;  %v15939_v13 = vmul.f32 %v20830_v56, %v20820_v37 }
 0xa5a   :  { %v20834_v42 = vpop.eup %20833  ;;  %v15930_v49 = vpop.permute.xlu0 %15929  ;;  %v15942_v23 = vmul.f32 %v20832_v58, %v20826_v10 }
 0xa5b   :  { %v20836_v3 = vpop.eup %20835  ;;  %v15936_v14 = vmul.f32 %v20834_v42, %v15926_v16  ;;  %v15928_v33 = vpop.permute.xlu1 %15927 }
 0xa5c   :  { %v20838_v41 = vpop.eup %20837  ;;  %v15935_v8 = vmul.f32 %v20836_v3, %v15924_v17 }
 0xa5d   :  { %v20840_v62 = vpop.eup %20839  ;;  %v24959_v25 = vadd.f32 %v15940_v29, %v15936_v14  ;;  %v15941_v46 = vmul.f32 %v20838_v41, %v20828_v22 }
 0xa5e   :  { %v20842_v1 = vpop.eup %20841  ;;  %v15908_v55 = vadd.f32 1.0, %v20840_v62  ;;  %v24961_v11 = vadd.f32 %v15939_v13, %v15935_v8 }
 0xa5f   :  { %v20844_v60 = vpop.eup %20843  ;;  %20851 = vtanh.f32 %v24959_v25  ;;  %v15938_v4 = vmul.f32 %v20842_v1, %v15930_v49 }
 0xa60   :  { %20853 = vrcp.f32 %v15908_v55  ;;  %v15907_v28 = vadd.f32 1.0, %v20844_v60 }
 0xa61   :  { %v20846_v61 = vpop.eup %20845  ;;  %20855 = vtanh.f32 %v24961_v11  ;;  %v24965_v37 = vadd.f32 %v15942_v23, %v15938_v4 }
 0xa62   :  { %v20848_v52 = vpop.eup %20847  ;;  %20857 = vrcp.f32 %v15907_v28  ;;  %v15937_v45 = vmul.f32 %v20846_v61, %v15928_v33 }
 0xa63   :  { %v20850_v36 = vpop.eup %20849  ;;  %v15910_v56 = vadd.f32 1.0, %v20848_v52  ;;  %20859 = vtanh.f32 %v24965_v37 }
 0xa64   :  { %v15909_v16 = vadd.f32 1.0, %v20850_v36  ;;  %v24968_v42 = vadd.f32 %v15941_v46, %v15937_v45 }
 0xa65   :  { %20861 = vrcp.f32 %v15910_v56 }
 0xa66   :  { %20863 = vrcp.f32 %v15909_v16 }
 0xa67   :  { %20865 = vtanh.f32 %v24968_v42 }
 0xa69   :  { %v20852_v10 = vpop.eup %20851 }
 0xa6a   :  { %v20854_v58 = vpop.eup %20853 }
 0xa6b   :  { %v20856_v3 = vpop.eup %20855  ;;  %v15952_v29 = vmul.f32 %v20854_v58, %v20852_v10 }
 0xa6c   :  { %v20858_v14 = vpop.eup %20857 }
 0xa6d   :  { %v20860_v17 = vpop.eup %20859  ;;  %v15951_v13 = vmul.f32 %v20858_v14, %v20856_v3 }
 0xa6f   :  { %v20862_v22 = vpop.eup %20861  ;;  %v20669_v41 = vpack.i.bf16 %v15952_v29, %v15951_v13 }
 0xa70   :  { %v20864_v8 = vpop.eup %20863  ;;  %v15954_v62 = vmul.f32 %v20862_v22, %v20860_v17 }
 0xa71   :  { %v20866_v1 = vpop.eup %20865  ;;  %20670 = vrot.lane.b32.xlu1 %v20669_v41, %s21283_s29 }
 0xa72   :  { %v15953_v55 = vmul.f32 %v20866_v1, %v20864_v8 }
 0xa74   :  { %v20674_v49 = vpack.i.bf16 %v15954_v62, %v15953_v55 }
 0xa76   :  { %20675 = vrot.lane.b32.xlu0 %v20674_v49, %s21283_s29  ;;  %s21308_s29 = smov 2  }
 0xae3   :  { %v20671_v60 = vpop.permute.xlu1 %20670 }
 0xae4   :  { %v20673_v23 = vunpack.i.h.bf16 %v20671_v60  ;;  %v20672_v4 = vunpack.i.l.bf16 %v20671_v60 }
 0xae6   :  { %v20056_v28 = vpack.c.bf16 %v20673_v23, %v20672_v4 }
 0xae8   :  { %v20676_v61 = vpop.permute.xlu0 %20675  ;;  %20057 = vmatprep.subr.bf16.mxu1 %v20056_v28 }
 0xae9   :  { %v20678_v33 = vunpack.i.h.bf16 %v20676_v61  ;;  %v20677_v52 = vunpack.i.l.bf16 %v20676_v61  ;;  %20059 = vmatpush3.bf16.msra.mxu1 %v20056_v28 }
 0xaeb   :  { %v20060_v46 = vpack.c.bf16 %v20678_v33, %v20677_v52 }
 0xaed   :  { %20061 = vmatprep.subr.bf16.mxu1 %v20060_v46 }
 0xaee   :  { %20063 = vmatpush3.bf16.msra.mxu1 %v20060_v46 }
 0xaf1   :  { %19521 = vmatmul.mubr.msk.f32.vlgmr.msra.gmra.mrb[90].mxu1 %vm15103_vm14, %v24702_v50 }
 0xaf2   :  { %19523 = vmatprep.mubr.msk.f32.mxu1 %vm15103_vm14, %v24707_v20 }
 0xaf5   :  { %19524 = vmatmul.mubr.msk.f32.gmra.mrb[92].mxu1 %vm15103_vm14, %v24716_v39 }
 0xaf6   :  { %19526 = vmatprep.mubr.msk.f32.mxu1 %vm15103_vm14, %v24721_v63 }
 0xaf9   :  { %19527 = vmatmul.mubr.msk.f32.gmra.mrb[94].mxu1 %vm15103_vm14, %v24730_v5 }
 0xafa   :  { %19529 = vmatprep.mubr.msk.f32.mxu1 %vm15103_vm14, %v24735_v35 }
 0xafd   :  { %19530 = vmatmul.mubr.msk.f32.gmra.mrb[96].mxu1 %vm15103_vm14, %v24744_v6 }
 0xafe   :  { %19532 = vmatprep.mubr.msk.f32.mxu1 %vm15103_vm14, %v24749_v7 }
 0xb01   :  { %19533 = vmatmul.mubr.msk.f32.gmra.mrb[98].mxu1 %vm15103_vm14, %v24758_v48 }
 0xb02   :  { %19535 = vmatprep.mubr.msk.f32.mxu1 %vm15103_vm14, %v24763_v51 }
 0xb05   :  { %19536 = vmatmul.mubr.msk.f32.gmra.mrb[100].mxu1 %vm15103_vm14, %v24772_v38 }
 0xb06   :  { %19538 = vmatprep.mubr.msk.f32.mxu1 %vm15103_vm14, %v24777_v30 }
 0xb09   :  { %19539 = vmatmul.mubr.msk.f32.gmra.mrb[102].mxu1 %vm15103_vm14, %v24786_v12 }
 0xb0a   :  { %19541 = vmatprep.mubr.msk.f32.mxu1 %vm15103_vm14, %v24791_v9 }
 0xb0d   :  { %19542 = vmatmul.mubr.msk.f32.gmra.mrb[104].mxu1 %vm15103_vm14, %v24800_v24 }
 0xb0e   :  { %19584 = vmatprep.mubr.msk.f32.mxu1 %vm15103_vm14, %v24631_v40 }
 0xbc4   :  { %v19522_v50 = vpop.f32.mrb[90].mxu1 }
 0xbc5   :  { %16134 = vrot.lane.b32.xlu0 %v19522_v50, %s21308_s29  ;;  %v16037_v20 = vpop.f32.mrb[91].mxu1 }
 0xbc6   :  { %16132 = vrot.lane.b32.xlu1 %v16037_v20, %s21308_s29 }
 0xbc8   :  { %v19525_v39 = vpop.f32.mrb[92].mxu1 }
 0xbc9   :  { %16138 = vrot.lane.b32.xlu0 %v19525_v39, %s21308_s29  ;;  %v16047_v63 = vpop.f32.mrb[93].mxu1 }
 0xbca   :  { %16136 = vrot.lane.b32.xlu1 %v16047_v63, %s21308_s29 }
 0xbcc   :  { %v19528_v5 = vpop.f32.mrb[94].mxu1 }
 0xbcd   :  { %16142 = vrot.lane.b32.xlu0 %v19528_v5, %s21308_s29  ;;  %v16057_v35 = vpop.f32.mrb[95].mxu1 }
 0xbce   :  { %16140 = vrot.lane.b32.xlu1 %v16057_v35, %s21308_s29 }
 0xbd0   :  { %v19531_v40 = vpop.f32.mrb[96].mxu1 }
 0xbd1   :  { %16146 = vrot.lane.b32.xlu0 %v19531_v40, %s21308_s29  ;;  %v16067_v6 = vpop.f32.mrb[97].mxu1 }
 0xbd2   :  { %16144 = vrot.lane.b32.xlu1 %v16067_v6, %s21308_s29 }
 0xbd4   :  { %v19534_v7 = vpop.f32.mrb[98].mxu1 }
 0xbd5   :  { %16150 = vrot.lane.b32.xlu0 %v19534_v7, %s21308_s29  ;;  %v16077_v48 = vpop.f32.mrb[99].mxu1 }
 0xbd6   :  { %16148 = vrot.lane.b32.xlu1 %v16077_v48, %s21308_s29 }
 0xbd8   :  { %v19537_v51 = vpop.f32.mrb[100].mxu1 }
 0xbd9   :  { %16154 = vrot.lane.b32.xlu0 %v19537_v51, %s21308_s29  ;;  %v16087_v38 = vpop.f32.mrb[101].mxu1 }
 0xbda   :  { %16152 = vrot.lane.b32.xlu1 %v16087_v38, %s21308_s29 }
 0xbdc   :  { %v19540_v30 = vpop.f32.mrb[102].mxu1 }
 0xbdd   :  { %16158 = vrot.lane.b32.xlu0 %v19540_v30, %s21308_s29  ;;  %v16097_v12 = vpop.f32.mrb[103].mxu1 }
 0xbde   :  { %16156 = vrot.lane.b32.xlu1 %v16097_v12, %s21308_s29 }
 0xbe0   :  { %v19543_v9 = vpop.f32.mrb[104].mxu1 }
 0xbe1   :  { %16162 = vrot.lane.b32.xlu0 %v19543_v9, %s21308_s29  ;;  %v16107_v24 = vpop.f32.mrb[105].mxu1 }
 0xbe2   :  { %16160 = vrot.lane.b32.xlu1 %v16107_v24, %s21308_s29 }
 0xbe5   :  { %16278 = vrot.lane.b32.xlu0 %v24959_v25, %s21307_s30 }
 0xbe6   :  { %16276 = vrot.lane.b32.xlu1 %v24961_v11, %s21307_s30 }
 0xbe9   :  { %16282 = vrot.lane.b32.xlu0 %v24965_v37, %s21307_s30 }
 0xbea   :  { %16280 = vrot.lane.b32.xlu1 %v24968_v42, %s21307_s30 }
 0xc37   :  { %v16135_v45 = vpop.permute.xlu0 %16134 }
 0xc38   :  { %v16181_v36 = vadd.f32 %v16135_v45, %v24820_v43  ;;  %v16133_v56 = vpop.permute.xlu1 %16132 }
 0xc39   :  { %v16180_v16 = vadd.f32 %v16133_v56, %v24822_v19 }
 0xc3a   :  { %v18566_v10 = vmul.f32 -1.442695, %v16181_v36 }
 0xc3b   :  { %v18565_v58 = vmul.f32 -1.442695, %v16180_v16  ;;  %v16139_v3 = vpop.permute.xlu0 %16138 }
 0xc3c   :  { %20867 = vpow2.f32 %v18566_v10  ;;  %v16183_v25 = vadd.f32 %v16139_v3, %v24826_v47  ;;  %v16137_v29 = vpop.permute.xlu1 %16136 }
 0xc3d   :  { %20869 = vpow2.f32 %v18565_v58  ;;  %v16182_v11 = vadd.f32 %v16137_v29, %v24828_v27 }
 0xc3e   :  { %v18568_v37 = vmul.f32 -1.442695, %v16183_v25 }
 0xc3f   :  { %v18567_v14 = vmul.f32 -1.442695, %v16182_v11  ;;  %v16143_v17 = vpop.permute.xlu0 %16142 }
 0xc40   :  { %20871 = vpow2.f32 %v18568_v37  ;;  %v16185_v42 = vadd.f32 %v16143_v17, %v24832_v0  ;;  %v16141_v13 = vpop.permute.xlu1 %16140 }
 0xc41   :  { %20873 = vpow2.f32 %v18567_v14  ;;  %v16184_v22 = vadd.f32 %v16141_v13, %v24834_v44 }
 0xc42   :  { %v18570_v41 = vmul.f32 -1.442695, %v16185_v42 }
 0xc43   :  { %v18569_v8 = vmul.f32 -1.442695, %v16184_v22  ;;  %v16147_v62 = vpop.permute.xlu0 %16146 }
 0xc44   :  { %20875 = vpow2.f32 %v18570_v41  ;;  %v16187_v1 = vadd.f32 %v16147_v62, %v24838_v15  ;;  %v16145_v55 = vpop.permute.xlu1 %16144 }
 0xc45   :  { %20877 = vpow2.f32 %v18569_v8  ;;  %v16186_v49 = vadd.f32 %v16145_v55, %v24840_v53 }
 0xc46   :  { %v20868_v60 = vpop.eup %20867  ;;  %v18572_v23 = vmul.f32 -1.442695, %v16187_v1 }
 0xc47   :  { %v20870_v4 = vpop.eup %20869  ;;  %v16209_v28 = vadd.f32 1.0, %v20868_v60  ;;  %v18571_v61 = vmul.f32 -1.442695, %v16186_v49  ;;  %v16151_v33 = vpop.permute.xlu0 %16150 }
 0xc48   :  { %v16208_v52 = vadd.f32 1.0, %v20870_v4  ;;  %20879 = vpow2.f32 %v18572_v23  ;;  %v16189_v46 = vadd.f32 %v16151_v33, %v24844_v32  ;;  %v16149_v50 = vpop.permute.xlu1 %16148 }
 0xc49   :  { %20881 = vrcp.f32 %v16209_v28  ;;  %v16188_v5 = vadd.f32 %v16149_v50, %v24848_v34 }
 0xc4a   :  { %v20872_v20 = vpop.eup %20871  ;;  %20883 = vrcp.f32 %v16208_v52 }
 0xc4b   :  { %v20874_v39 = vpop.eup %20873  ;;  %v16211_v63 = vadd.f32 1.0, %v20872_v20  ;;  %20885 = vpow2.f32 %v18571_v61  ;;  %v16155_v35 = vpop.permute.xlu0 %16154 }
 0xc4c   :  { %v16210_v40 = vadd.f32 1.0, %v20874_v39  ;;  %20887 = vtanh.f32 %v16189_v46  ;;  %v16191_v6 = vadd.f32 %v16155_v35, %v24851_v26  ;;  %v16153_v7 = vpop.permute.xlu1 %16152 }
 0xc4d   :  { %20889 = vrcp.f32 %v16211_v63  ;;  %v16190_v30 = vadd.f32 %v16153_v7, %v24856_v54 }
 0xc4e   :  { %v20876_v48 = vpop.eup %20875  ;;  %20891 = vrcp.f32 %v16210_v40 }
 0xc4f   :  { %v20878_v51 = vpop.eup %20877  ;;  %v16233_v38 = vadd.f32 1.0, %v20876_v48  ;;  %20893 = vtanh.f32 %v16188_v5  ;;  %v16159_v12 = vpop.permute.xlu0 %16158 }
 0xc50   :  { %v16232_v9 = vadd.f32 1.0, %v20878_v51  ;;  %20895 = vtanh.f32 %v16191_v6  ;;  %v16193_v24 = vadd.f32 %v16159_v12, %v24859_v31  ;;  %v16157_v45 = vpop.permute.xlu1 %16156 }
 0xc51   :  { %20897 = vrcp.f32 %v16233_v38  ;;  %v16192_v36 = vadd.f32 %v16157_v45, %v24862_v18 }
 0xc52   :  { %v20880_v56 = vpop.eup %20879  ;;  %20899 = vrcp.f32 %v16232_v9  ;;  %v18574_v16 = vmul.f32 -1.442695, %v16193_v24 }
 0xc53   :  { %v20882_v10 = vpop.eup %20881  ;;  %v16235_v58 = vadd.f32 1.0, %v20880_v56  ;;  %20901 = vtanh.f32 %v16190_v30  ;;  %v18573_v3 = vmul.f32 -1.442695, %v16192_v36  ;;  %v16163_v25 = vpop.permute.xlu0 %16162 }
 0xc54   :  { %v20884_v29 = vpop.eup %20883  ;;  %20903 = vpow2.f32 %v18574_v16  ;;  %v16195_v11 = vadd.f32 %v16163_v25, %v24868_v57  ;;  %v16161_v37 = vpop.permute.xlu1 %16160 }
 0xc55   :  { %v20886_v14 = vpop.eup %20885  ;;  %20905 = vrcp.f32 %v16235_v58  ;;  %v16194_v17 = vadd.f32 %v16161_v37, %v24871_v21 }
 0xc56   :  { %v20888_v42 = vpop.eup %20887  ;;  %v16234_v13 = vadd.f32 1.0, %v20886_v14  ;;  %20907 = vpow2.f32 %v18573_v3  ;;  %v18576_v22 = vmul.f32 -1.442695, %v16195_v11 }
 0xc57   :  { %v20890_v41 = vpop.eup %20889  ;;  %v18575_v8 = vmul.f32 -1.442695, %v16194_v17  ;;  %v16279_v55 = vpop.permute.xlu0 %16278  ;;  %v16293_v4 = vmul.f32 %v20888_v42, %v20882_v10 }
 0xc58   :  { %v20892_v62 = vpop.eup %20891  ;;  %20909 = vrcp.f32 %v16234_v13  ;;  %v16277_v61 = vpop.permute.xlu1 %16276 }
 0xc59   :  { %v20894_v1 = vpop.eup %20893  ;;  %20911 = vpow2.f32 %v18576_v22 }
 0xc5a   :  { %v20896_v49 = vpop.eup %20895  ;;  %20913 = vpow2.f32 %v18575_v8  ;;  %v16292_v52 = vmul.f32 %v20894_v1, %v20884_v29 }
 0xc5b   :  { %v20898_v60 = vpop.eup %20897  ;;  %v16283_v35 = vpop.permute.xlu0 %16282  ;;  %v16295_v6 = vmul.f32 %v20896_v49, %v20890_v41 }
 0xc5c   :  { %v20900_v23 = vpop.eup %20899  ;;  %v16289_v28 = vmul.f32 %v20898_v60, %v16279_v55  ;;  %v16281_v30 = vpop.permute.xlu1 %16280 }
 0xc5d   :  { %v20902_v33 = vpop.eup %20901  ;;  %v16288_v46 = vmul.f32 %v20900_v23, %v16277_v61  ;;  %v25062_v61 = vld [vmem:[%s25641_s9 + $0x8] sm:$0xff] }
 0xc5e   :  { %v20904_v50 = vpop.eup %20903  ;;  %v25045_v20 = vadd.f32 %v16293_v4, %v16289_v28  ;;  %v16294_v9 = vmul.f32 %v20902_v33, %v20892_v62  ;;  %v25069_v33 = vld [vmem:[%s25641_s9 + $0x10] sm:$0xff] }
 0xc5f   :  { %v20906_v39 = vpop.eup %20905  ;;  %v16261_v63 = vadd.f32 1.0, %v20904_v50  ;;  %v25047_v5 = vadd.f32 %v16292_v52, %v16288_v46  ;;  %v25076_v52 = vld [vmem:[%s25641_s9 + $0x18] sm:$0xff]  ;;  %v25083_v46 = vld [vmem:[%s25641_s9 + $0x20] sm:$0xff]  ;;  %v25090_v50 = vld [vmem:[%s25641_s9 + $0x28] sm:$0xff] }
 0xc60   :  { %v20908_v40 = vpop.eup %20907  ;;  %20915 = vtanh.f32 %v25045_v20  ;;  %v16291_v7 = vmul.f32 %v20906_v39, %v16283_v35  ;;  %v25097_v39 = vld [vmem:[%s25641_s9 + $0x30] sm:$0xff]  ;;  %v25111_v35 = vld [vmem:[%s25641_s9 + $0x40] sm:$0xff] }
 0xc61   :  { %20917 = vrcp.f32 %v16261_v63  ;;  %v16260_v48 = vadd.f32 1.0, %v20908_v40  ;;  %v25104_v63 = vld [vmem:[%s25641_s9 + $0x38] sm:$0xff]  ;;  %v25118_v40 = vld [vmem:[%s25641_s9 + $0x48] sm:$0xff] }
 0xc62   :  { %v20910_v51 = vpop.eup %20909  ;;  %20919 = vtanh.f32 %v25047_v5  ;;  %v25051_v38 = vadd.f32 %v16295_v6, %v16291_v7  ;;  %v25125_v6 = vld [vmem:[%s25641_s9 + $0x50] sm:$0xff]  ;;  %v25132_v7 = vld [vmem:[%s25641_s9 + $0x58] sm:$0xff] }
 0xc63   :  { %v20912_v12 = vpop.eup %20911  ;;  %20921 = vrcp.f32 %v16260_v48  ;;  %v16290_v24 = vmul.f32 %v20910_v51, %v16281_v30  ;;  %v25139_v48 = vld [vmem:[%s25641_s9 + $0x60] sm:$0xff]  ;;  %v25146_v51 = vld [vmem:[%s25641_s9 + $0x68] sm:$0xff]  ;;  %v25153_v30 = vld [vmem:[%s25641_s9 + $0x70] sm:$0xff] }
 0xc64   :  { %v20914_v45 = vpop.eup %20913  ;;  %v16263_v36 = vadd.f32 1.0, %v20912_v12  ;;  %20923 = vtanh.f32 %v25051_v38  ;;  %v25160_v12 = vld [vmem:[%s25641_s9 + $0x78] sm:$0xff] }
 0xc65   :  { %v16262_v56 = vadd.f32 1.0, %v20914_v45  ;;  %v25054_v16 = vadd.f32 %v16294_v9, %v16290_v24  ;;  %v25167_v9 = vld [vmem:[%s25641_s9] sm:$0xff] }
 0xc66   :  { %20925 = vrcp.f32 %v16263_v36 }
 0xc67   :  { %20927 = vrcp.f32 %v16262_v56 }
 0xc68   :  { %20929 = vtanh.f32 %v25054_v16 }
 0xc6a   :  { %v20916_v10 = vpop.eup %20915 }
 0xc6b   :  { %v20918_v58 = vpop.eup %20917 }
 0xc6c   :  { %v20920_v3 = vpop.eup %20919  ;;  %v16305_v25 = vmul.f32 %v20918_v58, %v20916_v10 }
 0xc6d   :  { %v20922_v29 = vpop.eup %20921 }
 0xc6e   :  { %v20924_v11 = vpop.eup %20923  ;;  %v16304_v37 = vmul.f32 %v20922_v29, %v20920_v3 }
 0xc70   :  { %v20926_v14 = vpop.eup %20925  ;;  %v20679_v17 = vpack.i.bf16 %v16305_v25, %v16304_v37 }
 0xc71   :  { %v20928_v42 = vpop.eup %20927  ;;  %v16307_v13 = vmul.f32 %v20926_v14, %v20924_v11 }
 0xc72   :  { %v20930_v22 = vpop.eup %20929  ;;  %20680 = vrot.lane.b32.xlu1 %v20679_v17, %s21284_s25 }
 0xc73   :  { %v16306_v41 = vmul.f32 %v20930_v22, %v20928_v42 }
 0xc75   :  { %v20684_v8 = vpack.i.bf16 %v16307_v13, %v16306_v41 }
 0xc77   :  { %20685 = vrot.lane.b32.xlu0 %v20684_v8, %s21284_s25 }
 0xce4   :  { %v20681_v62 = vpop.permute.xlu1 %20680 }
 0xce5   :  { %v20683_v1 = vunpack.i.h.bf16 %v20681_v62  ;;  %v20682_v55 = vunpack.i.l.bf16 %v20681_v62 }
 0xce7   :  { %v20064_v49 = vpack.c.bf16 %v20683_v1, %v20682_v55 }
 0xce9   :  { %v20686_v60 = vpop.permute.xlu0 %20685  ;;  %20065 = vmatprep.subr.bf16.mxu0 %v20064_v49 }
 0xcea   :  { %v20688_v23 = vunpack.i.h.bf16 %v20686_v60  ;;  %v20687_v4 = vunpack.i.l.bf16 %v20686_v60  ;;  %20067 = vmatpush3.bf16.msra.mxu0 %v20064_v49 }
 0xcec   :  { %v20068_v28 = vpack.c.bf16 %v20688_v23, %v20687_v4 }
 0xcee   :  { %20069 = vmatprep.subr.bf16.mxu0 %v20068_v28 }
 0xcef   :  { %20071 = vmatpush3.bf16.msra.mxu0 %v20068_v28 }
 0xcf2   :  { %19553 = vmatmul.mubr.msk.f32.vlgmr.msra.gmra.mrb[44].mxu0 %vm15103_vm14, %v25062_v61 }
 0xcf3   :  { %19555 = vmatprep.mubr.msk.f32.mxu0 %vm15103_vm14, %v25069_v33 }
 0xcf6   :  { %19556 = vmatmul.mubr.msk.f32.gmra.mrb[46].mxu0 %vm15103_vm14, %v25076_v52 }
 0xcf7   :  { %19558 = vmatprep.mubr.msk.f32.mxu0 %vm15103_vm14, %v25083_v46 }
 0xcfa   :  { %19559 = vmatmul.mubr.msk.f32.gmra.mrb[48].mxu0 %vm15103_vm14, %v25090_v50 }
 0xcfb   :  { %19561 = vmatprep.mubr.msk.f32.mxu0 %vm15103_vm14, %v25097_v39 }
 0xcfe   :  { %19562 = vmatmul.mubr.msk.f32.gmra.mrb[50].mxu0 %vm15103_vm14, %v25104_v63 }
 0xcff   :  { %19564 = vmatprep.mubr.msk.f32.mxu0 %vm15103_vm14, %v25111_v35 }
 0xd02   :  { %19565 = vmatmul.mubr.msk.f32.gmra.mrb[52].mxu0 %vm15103_vm14, %v25118_v40 }
 0xd03   :  { %19567 = vmatprep.mubr.msk.f32.mxu0 %vm15103_vm14, %v25125_v6 }
 0xd06   :  { %19568 = vmatmul.mubr.msk.f32.gmra.mrb[54].mxu0 %vm15103_vm14, %v25132_v7 }
 0xd07   :  { %19570 = vmatprep.mubr.msk.f32.mxu0 %vm15103_vm14, %v25139_v48 }
 0xd0a   :  { %19571 = vmatmul.mubr.msk.f32.gmra.mrb[56].mxu0 %vm15103_vm14, %v25146_v51 }
 0xd0b   :  { %19573 = vmatprep.mubr.msk.f32.mxu0 %vm15103_vm14, %v25153_v30 }
 0xd0e   :  { %19574 = vmatmul.mubr.msk.f32.gmra.mrb[58].mxu0 %vm15103_vm14, %v25160_v12 }
 0xd0f   :  { %19616 = vmatprep.mubr.msk.f32.mxu0 %vm15103_vm14, %v25167_v9 }
 0xdc5   :  { %v19554_v24 = vpop.f32.mrb[44].mxu0 }
 0xdc6   :  { %16487 = vrot.lane.b32.xlu0 %v19554_v24, %s21309_s4  ;;  %v16390_v45 = vpop.f32.mrb[45].mxu0 }
 0xdc7   :  { %16485 = vrot.lane.b32.xlu1 %v16390_v45, %s21309_s4 }
 0xdc9   :  { %v19557_v36 = vpop.f32.mrb[46].mxu0 }
 0xdca   :  { %16491 = vrot.lane.b32.xlu0 %v19557_v36, %s21309_s4  ;;  %v16400_v56 = vpop.f32.mrb[47].mxu0 }
 0xdcb   :  { %16489 = vrot.lane.b32.xlu1 %v16400_v56, %s21309_s4 }
 0xdcd   :  { %v19560_v10 = vpop.f32.mrb[48].mxu0 }
 0xdce   :  { %16495 = vrot.lane.b32.xlu0 %v19560_v10, %s21309_s4  ;;  %v16410_v58 = vpop.f32.mrb[49].mxu0 }
 0xdcf   :  { %16493 = vrot.lane.b32.xlu1 %v16410_v58, %s21309_s4 }
 0xdd1   :  { %v19563_v3 = vpop.f32.mrb[50].mxu0 }
 0xdd2   :  { %16499 = vrot.lane.b32.xlu0 %v19563_v3, %s21309_s4  ;;  %v16420_v25 = vpop.f32.mrb[51].mxu0 }
 0xdd3   :  { %16497 = vrot.lane.b32.xlu1 %v16420_v25, %s21309_s4 }
 0xdd5   :  { %v19566_v29 = vpop.f32.mrb[52].mxu0 }
 0xdd6   :  { %16503 = vrot.lane.b32.xlu0 %v19566_v29, %s21309_s4  ;;  %v16430_v11 = vpop.f32.mrb[53].mxu0 }
 0xdd7   :  { %16501 = vrot.lane.b32.xlu1 %v16430_v11, %s21309_s4 }
 0xdd9   :  { %v19569_v37 = vpop.f32.mrb[54].mxu0 }
 0xdda   :  { %16507 = vrot.lane.b32.xlu0 %v19569_v37, %s21309_s4  ;;  %v16440_v14 = vpop.f32.mrb[55].mxu0 }
 0xddb   :  { %16505 = vrot.lane.b32.xlu1 %v16440_v14, %s21309_s4 }
 0xddd   :  { %v19572_v17 = vpop.f32.mrb[56].mxu0 }
 0xdde   :  { %16511 = vrot.lane.b32.xlu0 %v19572_v17, %s21309_s4  ;;  %v16450_v42 = vpop.f32.mrb[57].mxu0 }
 0xddf   :  { %16509 = vrot.lane.b32.xlu1 %v16450_v42, %s21309_s4 }
 0xde1   :  { %v19575_v13 = vpop.f32.mrb[58].mxu0 }
 0xde2   :  { %16515 = vrot.lane.b32.xlu0 %v19575_v13, %s21309_s4  ;;  %v16460_v22 = vpop.f32.mrb[59].mxu0 }
 0xde3   :  { %16513 = vrot.lane.b32.xlu1 %v16460_v22, %s21309_s4 }
 0xde6   :  { %16631 = vrot.lane.b32.xlu0 %v25045_v20, %s21307_s30 }
 0xde7   :  { %16629 = vrot.lane.b32.xlu1 %v25047_v5, %s21307_s30 }
 0xdea   :  { %16635 = vrot.lane.b32.xlu0 %v25051_v38, %s21307_s30 }
 0xdeb   :  { %16633 = vrot.lane.b32.xlu1 %v25054_v16, %s21307_s30 }
 0xe38   :  { %v16488_v41 = vpop.permute.xlu0 %16487 }
 0xe39   :  { %v16534_v8 = vadd.f32 %v16488_v41, %v24820_v43  ;;  %v16486_v62 = vpop.permute.xlu1 %16485 }
 0xe3a   :  { %v16533_v1 = vadd.f32 %v16486_v62, %v24822_v19 }
 0xe3b   :  { %v18594_v55 = vmul.f32 -1.442695, %v16534_v8 }
 0xe3c   :  { %v18593_v49 = vmul.f32 -1.442695, %v16533_v1  ;;  %v16492_v60 = vpop.permute.xlu0 %16491 }
 0xe3d   :  { %20931 = vpow2.f32 %v18594_v55  ;;  %v16536_v20 = vadd.f32 %v16492_v60, %v24826_v47  ;;  %v16490_v23 = vpop.permute.xlu1 %16489 }
 0xe3e   :  { %20933 = vpow2.f32 %v18593_v49  ;;  %v16535_v5 = vadd.f32 %v16490_v23, %v24828_v27 }
 0xe3f   :  { %v18596_v38 = vmul.f32 -1.442695, %v16536_v20 }
 0xe40   :  { %v18595_v4 = vmul.f32 -1.442695, %v16535_v5  ;;  %v16496_v28 = vpop.permute.xlu0 %16495 }
 0xe41   :  { %20935 = vpow2.f32 %v18596_v38  ;;  %v16538_v16 = vadd.f32 %v16496_v28, %v24832_v0  ;;  %v16494_v24 = vpop.permute.xlu1 %16493 }
 0xe42   :  { %20937 = vpow2.f32 %v18595_v4  ;;  %v16537_v45 = vadd.f32 %v16494_v24, %v24834_v44 }
 0xe43   :  { %v18598_v36 = vmul.f32 -1.442695, %v16538_v16 }
 0xe44   :  { %v18597_v56 = vmul.f32 -1.442695, %v16537_v45  ;;  %v16500_v10 = vpop.permute.xlu0 %16499 }
 0xe45   :  { %20939 = vpow2.f32 %v18598_v36  ;;  %v16540_v58 = vadd.f32 %v16500_v10, %v24838_v15  ;;  %v16498_v3 = vpop.permute.xlu1 %16497 }
 0xe46   :  { %20941 = vpow2.f32 %v18597_v56  ;;  %v16539_v25 = vadd.f32 %v16498_v3, %v24840_v53 }
 0xe47   :  { %v20932_v29 = vpop.eup %20931  ;;  %v18600_v11 = vmul.f32 -1.442695, %v16540_v58 }
 0xe48   :  { %v20934_v37 = vpop.eup %20933  ;;  %v16562_v14 = vadd.f32 1.0, %v20932_v29  ;;  %v18599_v17 = vmul.f32 -1.442695, %v16539_v25  ;;  %v16504_v42 = vpop.permute.xlu0 %16503 }
 0xe49   :  { %v16561_v13 = vadd.f32 1.0, %v20934_v37  ;;  %20943 = vpow2.f32 %v18600_v11  ;;  %v16542_v22 = vadd.f32 %v16504_v42, %v24844_v32  ;;  %v16502_v41 = vpop.permute.xlu1 %16501 }
 0xe4a   :  { %20945 = vrcp.f32 %v16562_v14  ;;  %v16541_v55 = vadd.f32 %v16502_v41, %v24848_v34 }
 0xe4b   :  { %v20936_v8 = vpop.eup %20935  ;;  %20947 = vrcp.f32 %v16561_v13 }
 0xe4c   :  { %v20938_v62 = vpop.eup %20937  ;;  %v16564_v1 = vadd.f32 1.0, %v20936_v8  ;;  %20949 = vpow2.f32 %v18599_v17  ;;  %v16508_v49 = vpop.permute.xlu0 %16507 }
 0xe4d   :  { %v16563_v60 = vadd.f32 1.0, %v20938_v62  ;;  %20951 = vtanh.f32 %v16542_v22  ;;  %v16544_v20 = vadd.f32 %v16508_v49, %v24851_v26  ;;  %v16506_v23 = vpop.permute.xlu1 %16505 }
 0xe4e   :  { %20953 = vrcp.f32 %v16564_v1  ;;  %v16543_v28 = vadd.f32 %v16506_v23, %v24856_v54 }
 0xe4f   :  { %v20940_v5 = vpop.eup %20939  ;;  %20955 = vrcp.f32 %v16563_v60 }
 0xe50   :  { %v20942_v38 = vpop.eup %20941  ;;  %v16586_v4 = vadd.f32 1.0, %v20940_v5  ;;  %20957 = vtanh.f32 %v16541_v55  ;;  %v16512_v16 = vpop.permute.xlu0 %16511 }
 0xe51   :  { %v16585_v24 = vadd.f32 1.0, %v20942_v38  ;;  %20959 = vtanh.f32 %v16544_v20  ;;  %v16546_v45 = vadd.f32 %v16512_v16, %v24859_v31  ;;  %v16510_v36 = vpop.permute.xlu1 %16509 }
 0xe52   :  { %20961 = vrcp.f32 %v16586_v4  ;;  %v16545_v56 = vadd.f32 %v16510_v36, %v24862_v18 }
 0xe53   :  { %v20944_v10 = vpop.eup %20943  ;;  %20963 = vrcp.f32 %v16585_v24  ;;  %v18602_v58 = vmul.f32 -1.442695, %v16546_v45 }
 0xe54   :  { %v20946_v3 = vpop.eup %20945  ;;  %v16588_v25 = vadd.f32 1.0, %v20944_v10  ;;  %20965 = vtanh.f32 %v16543_v28  ;;  %v18601_v29 = vmul.f32 -1.442695, %v16545_v56  ;;  %v16516_v11 = vpop.permute.xlu0 %16515 }
 0xe55   :  { %v20948_v37 = vpop.eup %20947  ;;  %20967 = vpow2.f32 %v18602_v58  ;;  %v16548_v14 = vadd.f32 %v16516_v11, %v24868_v57  ;;  %v16514_v17 = vpop.permute.xlu1 %16513 }
 0xe56   :  { %v20950_v42 = vpop.eup %20949  ;;  %20969 = vrcp.f32 %v16588_v25  ;;  %v16547_v13 = vadd.f32 %v16514_v17, %v24871_v21 }
 0xe57   :  { %v20952_v22 = vpop.eup %20951  ;;  %v16587_v41 = vadd.f32 1.0, %v20950_v42  ;;  %20971 = vpow2.f32 %v18601_v29  ;;  %v18604_v8 = vmul.f32 -1.442695, %v16548_v14 }
 0xe58   :  { %v20954_v62 = vpop.eup %20953  ;;  %v18603_v1 = vmul.f32 -1.442695, %v16547_v13  ;;  %v16632_v60 = vpop.permute.xlu0 %16631  ;;  %v16646_v38 = vmul.f32 %v20952_v22, %v20946_v3 }
 0xe59   :  { %v20956_v55 = vpop.eup %20955  ;;  %20973 = vrcp.f32 %v16587_v41  ;;  %v16630_v28 = vpop.permute.xlu1 %16629 }
 0xe5a   :  { %v20958_v49 = vpop.eup %20957  ;;  %20975 = vpow2.f32 %v18604_v8 }
 0xe5b   :  { %v20960_v20 = vpop.eup %20959  ;;  %20977 = vpow2.f32 %v18603_v1  ;;  %v16645_v24 = vmul.f32 %v20958_v49, %v20948_v37 }
 0xe5c   :  { %v20962_v23 = vpop.eup %20961  ;;  %v16636_v29 = vpop.permute.xlu0 %16635  ;;  %v16648_v14 = vmul.f32 %v20960_v20, %v20954_v62 }
 0xe5d   :  { %v20964_v5 = vpop.eup %20963  ;;  %v16642_v4 = vmul.f32 %v20962_v23, %v16632_v60  ;;  %v16634_v13 = vpop.permute.xlu1 %16633 }
 0xe5e   :  { %v20966_v16 = vpop.eup %20965  ;;  %v16641_v45 = vmul.f32 %v20964_v5, %v16630_v28 }
 0xe5f   :  { %v20968_v36 = vpop.eup %20967  ;;  %v25211_v56 = vadd.f32 %v16646_v38, %v16642_v4  ;;  %v16647_v41 = vmul.f32 %v20966_v16, %v20956_v55 }
 0xe60   :  { %v20970_v10 = vpop.eup %20969  ;;  %v16614_v58 = vadd.f32 1.0, %v20968_v36  ;;  %v25213_v25 = vadd.f32 %v16645_v24, %v16641_v45 }
 0xe61   :  { %v20972_v11 = vpop.eup %20971  ;;  %20979 = vtanh.f32 %v25211_v56  ;;  %v16644_v17 = vmul.f32 %v20970_v10, %v16636_v29 }
 0xe62   :  { %20981 = vrcp.f32 %v16614_v58  ;;  %v16613_v3 = vadd.f32 1.0, %v20972_v11 }
 0xe63   :  { %v20974_v42 = vpop.eup %20973  ;;  %20983 = vtanh.f32 %v25213_v25  ;;  %v25217_v37 = vadd.f32 %v16648_v14, %v16644_v17 }
 0xe64   :  { %v20976_v22 = vpop.eup %20975  ;;  %20985 = vrcp.f32 %v16613_v3  ;;  %v16643_v8 = vmul.f32 %v20974_v42, %v16634_v13 }
 0xe65   :  { %v20978_v1 = vpop.eup %20977  ;;  %v16616_v49 = vadd.f32 1.0, %v20976_v22  ;;  %20987 = vtanh.f32 %v25217_v37 }
 0xe66   :  { %v16615_v60 = vadd.f32 1.0, %v20978_v1  ;;  %v25220_v23 = vadd.f32 %v16647_v41, %v16643_v8 }
 0xe67   :  { %20989 = vrcp.f32 %v16616_v49 }
 0xe68   :  { %20991 = vrcp.f32 %v16615_v60 }
 0xe69   :  { %20993 = vtanh.f32 %v25220_v23 }
 0xe6b   :  { %v20980_v62 = vpop.eup %20979 }
 0xe6c   :  { %v20982_v20 = vpop.eup %20981 }
 0xe6d   :  { %v20984_v5 = vpop.eup %20983  ;;  %v16658_v38 = vmul.f32 %v20982_v20, %v20980_v62 }
 0xe6e   :  { %v20986_v4 = vpop.eup %20985 }
 0xe6f   :  { %v20988_v28 = vpop.eup %20987  ;;  %v16657_v24 = vmul.f32 %v20986_v4, %v20984_v5 }
 0xe71   :  { %v20990_v55 = vpop.eup %20989  ;;  %v20689_v16 = vpack.i.bf16 %v16658_v38, %v16657_v24 }
 0xe72   :  { %v20992_v45 = vpop.eup %20991  ;;  %v16660_v36 = vmul.f32 %v20990_v55, %v20988_v28 }
 0xe73   :  { %v20994_v10 = vpop.eup %20993  ;;  %20690 = vrot.lane.b32.xlu1 %v20689_v16, %s21310_s20 }
 0xe74   :  { %v16659_v58 = vmul.f32 %v20994_v10, %v20992_v45 }
 0xe76   :  { %v20694_v29 = vpack.i.bf16 %v16660_v36, %v16659_v58 }
 0xe78   :  { %20695 = vrot.lane.b32.xlu0 %v20694_v29, %s21310_s20 }
 0xee5   :  { %v20691_v11 = vpop.permute.xlu1 %20690 }
 0xee6   :  { %v20693_v14 = vunpack.i.h.bf16 %v20691_v11  ;;  %v20692_v17 = vunpack.i.l.bf16 %v20691_v11 }
 0xee8   :  { %v20072_v3 = vpack.c.bf16 %v20693_v14, %v20692_v17 }
 0xeea   :  { %v20696_v42 = vpop.permute.xlu0 %20695  ;;  %20073 = vmatprep.subr.bf16.mxu1 %v20072_v3 }
 0xeeb   :  { %v20698_v13 = vunpack.i.h.bf16 %v20696_v42  ;;  %v20697_v22 = vunpack.i.l.bf16 %v20696_v42  ;;  %20075 = vmatpush3.bf16.msra.mxu1 %v20072_v3 }
 0xeed   :  { %v20076_v41 = vpack.c.bf16 %v20698_v13, %v20697_v22 }
 0xeef   :  { %20077 = vmatprep.subr.bf16.mxu1 %v20076_v41 }
 0xef0   :  { %20079 = vmatpush3.bf16.msra.mxu1 %v20076_v41 }
 0xef3   :  { %19585 = vmatmul.mubr.msk.f32.vlgmr.msra.gmra.mrb[106].mxu1 %vm15103_vm14, %v25062_v61 }
 0xef4   :  { %19587 = vmatprep.mubr.msk.f32.mxu1 %vm15103_vm14, %v25069_v33 }
 0xef7   :  { %19588 = vmatmul.mubr.msk.f32.gmra.mrb[108].mxu1 %vm15103_vm14, %v25076_v52 }
 0xef8   :  { %19590 = vmatprep.mubr.msk.f32.mxu1 %vm15103_vm14, %v25083_v46 }
 0xefb   :  { %19591 = vmatmul.mubr.msk.f32.gmra.mrb[110].mxu1 %vm15103_vm14, %v25090_v50 }
 0xefc   :  { %19593 = vmatprep.mubr.msk.f32.mxu1 %vm15103_vm14, %v25097_v39 }
 0xeff   :  { %19594 = vmatmul.mubr.msk.f32.gmra.mrb[112].mxu1 %vm15103_vm14, %v25104_v63 }
 0xf00   :  { %19596 = vmatprep.mubr.msk.f32.mxu1 %vm15103_vm14, %v25111_v35 }
 0xf03   :  { %19597 = vmatmul.mubr.msk.f32.gmra.mrb[114].mxu1 %vm15103_vm14, %v25118_v40 }
 0xf04   :  { %19599 = vmatprep.mubr.msk.f32.mxu1 %vm15103_vm14, %v25125_v6 }
 0xf07   :  { %19600 = vmatmul.mubr.msk.f32.gmra.mrb[116].mxu1 %vm15103_vm14, %v25132_v7 }
 0xf08   :  { %19602 = vmatprep.mubr.msk.f32.mxu1 %vm15103_vm14, %v25139_v48 }
 0xf0b   :  { %19603 = vmatmul.mubr.msk.f32.gmra.mrb[118].mxu1 %vm15103_vm14, %v25146_v51 }
 0xf0c   :  { %19605 = vmatprep.mubr.msk.f32.mxu1 %vm15103_vm14, %v25153_v30 }
 0xf0f   :  { %19606 = vmatmul.mubr.msk.f32.gmra.mrb[120].mxu1 %vm15103_vm14, %v25160_v12 }
 0xf10   :  { %19648 = vmatprep.mubr.msk.f32.mxu1 %vm15103_vm14, %v25167_v9 }
 0xfc6   :  { %v19586_v8 = vpop.f32.mrb[106].mxu1 }
 0xfc7   :  { %16840 = vrot.lane.b32.xlu0 %v19586_v8, %s21311_s22  ;;  %v16743_v1 = vpop.f32.mrb[107].mxu1 }
 0xfc8   :  { %16838 = vrot.lane.b32.xlu1 %v16743_v1, %s21311_s22 }
 0xfca   :  { %v19589_v49 = vpop.f32.mrb[108].mxu1 }
 0xfcb   :  { %16844 = vrot.lane.b32.xlu0 %v19589_v49, %s21311_s22  ;;  %v16753_v60 = vpop.f32.mrb[109].mxu1 }
 0xfcc   :  { %16842 = vrot.lane.b32.xlu1 %v16753_v60, %s21311_s22 }
 0xfce   :  { %v19592_v62 = vpop.f32.mrb[110].mxu1 }
 0xfcf   :  { %16848 = vrot.lane.b32.xlu0 %v19592_v62, %s21311_s22  ;;  %v16763_v20 = vpop.f32.mrb[111].mxu1 }
 0xfd0   :  { %16846 = vrot.lane.b32.xlu1 %v16763_v20, %s21311_s22 }
 0xfd2   :  { %v19595_v5 = vpop.f32.mrb[112].mxu1 }
 0xfd3   :  { %16852 = vrot.lane.b32.xlu0 %v19595_v5, %s21311_s22  ;;  %v16773_v38 = vpop.f32.mrb[113].mxu1 }
 0xfd4   :  { %16850 = vrot.lane.b32.xlu1 %v16773_v38, %s21311_s22 }
 0xfd6   :  { %v19598_v4 = vpop.f32.mrb[114].mxu1 }
 0xfd7   :  { %16856 = vrot.lane.b32.xlu0 %v19598_v4, %s21311_s22  ;;  %v16783_v28 = vpop.f32.mrb[115].mxu1 }
 0xfd8   :  { %16854 = vrot.lane.b32.xlu1 %v16783_v28, %s21311_s22 }
 0xfda   :  { %v19601_v24 = vpop.f32.mrb[116].mxu1 }
 0xfdb   :  { %16860 = vrot.lane.b32.xlu0 %v19601_v24, %s21311_s22  ;;  %v16793_v55 = vpop.f32.mrb[117].mxu1 }
 0xfdc   :  { %16858 = vrot.lane.b32.xlu1 %v16793_v55, %s21311_s22 }
 0xfde   :  { %v19604_v16 = vpop.f32.mrb[118].mxu1 }
 0xfdf   :  { %16864 = vrot.lane.b32.xlu0 %v19604_v16, %s21311_s22  ;;  %v16803_v45 = vpop.f32.mrb[119].mxu1 }
 0xfe0   :  { %16862 = vrot.lane.b32.xlu1 %v16803_v45, %s21311_s22 }
 0xfe2   :  { %v19607_v36 = vpop.f32.mrb[120].mxu1 }
 0xfe3   :  { %16868 = vrot.lane.b32.xlu0 %v19607_v36, %s21311_s22  ;;  %v16813_v10 = vpop.f32.mrb[121].mxu1 }
 0xfe4   :  { %16866 = vrot.lane.b32.xlu1 %v16813_v10, %s21311_s22 }
 0xfe7   :  { %16984 = vrot.lane.b32.xlu0 %v25211_v56, %s21307_s30 }
 0xfe8   :  { %16982 = vrot.lane.b32.xlu1 %v25213_v25, %s21307_s30 }
 0xfeb   :  { %16988 = vrot.lane.b32.xlu0 %v25217_v37, %s21307_s30 }
 0xfec   :  { %16986 = vrot.lane.b32.xlu1 %v25220_v23, %s21307_s30 }
0x1039   :  { %v16841_v58 = vpop.permute.xlu0 %16840 }
0x103a   :  { %v16887_v29 = vadd.f32 %v16841_v58, %v24820_v43  ;;  %v16839_v11 = vpop.permute.xlu1 %16838 }
0x103b   :  { %v16886_v14 = vadd.f32 %v16839_v11, %v24822_v19 }
0x103c   :  { %v18622_v17 = vmul.f32 -1.442695, %v16887_v29 }
0x103d   :  { %v18621_v3 = vmul.f32 -1.442695, %v16886_v14  ;;  %v16845_v42 = vpop.permute.xlu0 %16844 }
0x103e   :  { %20995 = vpow2.f32 %v18622_v17  ;;  %v16889_v56 = vadd.f32 %v16845_v42, %v24826_v47  ;;  %v16843_v13 = vpop.permute.xlu1 %16842 }
0x103f   :  { %20997 = vpow2.f32 %v18621_v3  ;;  %v16888_v25 = vadd.f32 %v16843_v13, %v24828_v27 }
0x1040   :  { %v18624_v37 = vmul.f32 -1.442695, %v16889_v56 }
0x1041   :  { %v18623_v22 = vmul.f32 -1.442695, %v16888_v25  ;;  %v16849_v41 = vpop.permute.xlu0 %16848 }
0x1042   :  { %20999 = vpow2.f32 %v18624_v37  ;;  %v16891_v23 = vadd.f32 %v16849_v41, %v24832_v0  ;;  %v16847_v8 = vpop.permute.xlu1 %16846 }
0x1043   :  { %21001 = vpow2.f32 %v18623_v22  ;;  %v16890_v1 = vadd.f32 %v16847_v8, %v24834_v44 }
0x1044   :  { %v18626_v49 = vmul.f32 -1.442695, %v16891_v23 }
0x1045   :  { %v18625_v60 = vmul.f32 -1.442695, %v16890_v1  ;;  %v16853_v62 = vpop.permute.xlu0 %16852 }
0x1046   :  { %21003 = vpow2.f32 %v18626_v49  ;;  %v16893_v20 = vadd.f32 %v16853_v62, %v24838_v15  ;;  %v16851_v5 = vpop.permute.xlu1 %16850 }
0x1047   :  { %21005 = vpow2.f32 %v18625_v60  ;;  %v16892_v38 = vadd.f32 %v16851_v5, %v24840_v53 }
0x1048   :  { %v20996_v4 = vpop.eup %20995  ;;  %v18628_v28 = vmul.f32 -1.442695, %v16893_v20 }
0x1049   :  { %v20998_v24 = vpop.eup %20997  ;;  %v16915_v55 = vadd.f32 1.0, %v20996_v4  ;;  %v18627_v16 = vmul.f32 -1.442695, %v16892_v38  ;;  %v16857_v45 = vpop.permute.xlu0 %16856 }
0x104a   :  { %v16914_v36 = vadd.f32 1.0, %v20998_v24  ;;  %21007 = vpow2.f32 %v18628_v28  ;;  %v16895_v10 = vadd.f32 %v16857_v45, %v24844_v32  ;;  %v16855_v58 = vpop.permute.xlu1 %16854 }
0x104b   :  { %21009 = vrcp.f32 %v16915_v55  ;;  %v16894_v17 = vadd.f32 %v16855_v58, %v24848_v34 }
0x104c   :  { %v21000_v29 = vpop.eup %20999  ;;  %21011 = vrcp.f32 %v16914_v36 }
0x104d   :  { %v21002_v11 = vpop.eup %21001  ;;  %v16917_v14 = vadd.f32 1.0, %v21000_v29  ;;  %21013 = vpow2.f32 %v18627_v16  ;;  %v16861_v3 = vpop.permute.xlu0 %16860 }
0x104e   :  { %v16916_v42 = vadd.f32 1.0, %v21002_v11  ;;  %21015 = vtanh.f32 %v16895_v10  ;;  %v16897_v56 = vadd.f32 %v16861_v3, %v24851_v26  ;;  %v16859_v13 = vpop.permute.xlu1 %16858 }
0x104f   :  { %21017 = vrcp.f32 %v16917_v14  ;;  %v16896_v41 = vadd.f32 %v16859_v13, %v24856_v54 }
0x1050   :  { %v21004_v25 = vpop.eup %21003  ;;  %21019 = vrcp.f32 %v16916_v42 }
0x1051   :  { %v21006_v37 = vpop.eup %21005  ;;  %v16939_v22 = vadd.f32 1.0, %v21004_v25  ;;  %21021 = vtanh.f32 %v16894_v17  ;;  %v16865_v23 = vpop.permute.xlu0 %16864 }
0x1052   :  { %v16938_v8 = vadd.f32 1.0, %v21006_v37  ;;  %21023 = vtanh.f32 %v16897_v56  ;;  %v16899_v1 = vadd.f32 %v16865_v23, %v24859_v31  ;;  %v16863_v49 = vpop.permute.xlu1 %16862 }
0x1053   :  { %21025 = vrcp.f32 %v16939_v22  ;;  %v16898_v60 = vadd.f32 %v16863_v49, %v24862_v18 }
0x1054   :  { %v21008_v62 = vpop.eup %21007  ;;  %21027 = vrcp.f32 %v16938_v8  ;;  %v18630_v20 = vmul.f32 -1.442695, %v16899_v1 }
0x1055   :  { %v21010_v5 = vpop.eup %21009  ;;  %v16941_v38 = vadd.f32 1.0, %v21008_v62  ;;  %21029 = vtanh.f32 %v16896_v41  ;;  %v18629_v4 = vmul.f32 -1.442695, %v16898_v60  ;;  %v16869_v28 = vpop.permute.xlu0 %16868 }
0x1056   :  { %v21012_v24 = vpop.eup %21011  ;;  %21031 = vpow2.f32 %v18630_v20  ;;  %v16901_v55 = vadd.f32 %v16869_v28, %v24868_v57  ;;  %v16867_v16 = vpop.permute.xlu1 %16866 }
0x1057   :  { %v21014_v45 = vpop.eup %21013  ;;  %21033 = vrcp.f32 %v16941_v38  ;;  %v16900_v36 = vadd.f32 %v16867_v16, %v24871_v21 }
0x1058   :  { %v21016_v10 = vpop.eup %21015  ;;  %v16940_v58 = vadd.f32 1.0, %v21014_v45  ;;  %21035 = vpow2.f32 %v18629_v4  ;;  %v18632_v29 = vmul.f32 -1.442695, %v16901_v55 }
0x1059   :  { %v21018_v11 = vpop.eup %21017  ;;  %v18631_v14 = vmul.f32 -1.442695, %v16900_v36  ;;  %v16985_v42 = vpop.permute.xlu0 %16984  ;;  %v16999_v37 = vmul.f32 %v21016_v10, %v21010_v5 }
0x105a   :  { %v21020_v17 = vpop.eup %21019  ;;  %21037 = vrcp.f32 %v16940_v58  ;;  %v16983_v41 = vpop.permute.xlu1 %16982 }
0x105b   :  { %v21022_v3 = vpop.eup %21021  ;;  %21039 = vpow2.f32 %v18632_v29 }
0x105c   :  { %v21024_v56 = vpop.eup %21023  ;;  %21041 = vpow2.f32 %v18631_v14  ;;  %v16998_v8 = vmul.f32 %v21022_v3, %v21012_v24 }
0x105d   :  { %v21026_v13 = vpop.eup %21025  ;;  %v16989_v4 = vpop.permute.xlu0 %16988  ;;  %v17001_v55 = vmul.f32 %v21024_v56, %v21018_v11 }
0x105e   :  { %v21028_v25 = vpop.eup %21027  ;;  %v16995_v22 = vmul.f32 %v21026_v13, %v16985_v42  ;;  %v16987_v36 = vpop.permute.xlu1 %16986 }
0x105f   :  { %v21030_v23 = vpop.eup %21029  ;;  %v16994_v1 = vmul.f32 %v21028_v25, %v16983_v41 }
0x1060   :  { %v21032_v49 = vpop.eup %21031  ;;  %v25295_v60 = vadd.f32 %v16999_v37, %v16995_v22  ;;  %v17000_v58 = vmul.f32 %v21030_v23, %v21020_v17 }
0x1061   :  { %v21034_v62 = vpop.eup %21033  ;;  %v16967_v20 = vadd.f32 1.0, %v21032_v49  ;;  %v25297_v38 = vadd.f32 %v16998_v8, %v16994_v1 }
0x1062   :  { %v21036_v28 = vpop.eup %21035  ;;  %21043 = vtanh.f32 %v25295_v60  ;;  %v16997_v16 = vmul.f32 %v21034_v62, %v16989_v4 }
0x1063   :  { %21045 = vrcp.f32 %v16967_v20  ;;  %v16966_v5 = vadd.f32 1.0, %v21036_v28 }
0x1064   :  { %v21038_v45 = vpop.eup %21037  ;;  %21047 = vtanh.f32 %v25297_v38  ;;  %v25301_v24 = vadd.f32 %v17001_v55, %v16997_v16 }
0x1065   :  { %v21040_v10 = vpop.eup %21039  ;;  %21049 = vrcp.f32 %v16966_v5  ;;  %v16996_v29 = vmul.f32 %v21038_v45, %v16987_v36 }
0x1066   :  { %v21042_v14 = vpop.eup %21041  ;;  %v16969_v3 = vadd.f32 1.0, %v21040_v10  ;;  %21051 = vtanh.f32 %v25301_v24 }
0x1067   :  { %v16968_v42 = vadd.f32 1.0, %v21042_v14  ;;  %v25304_v13 = vadd.f32 %v17000_v58, %v16996_v29 }
0x1068   :  { %21053 = vrcp.f32 %v16969_v3 }
0x1069   :  { %21055 = vrcp.f32 %v16968_v42 }
0x106a   :  { %21057 = vtanh.f32 %v25304_v13 }
0x106c   :  { %v21044_v11 = vpop.eup %21043 }
0x106d   :  { %v21046_v56 = vpop.eup %21045 }
0x106e   :  { %v21048_v25 = vpop.eup %21047  ;;  %v17011_v37 = vmul.f32 %v21046_v56, %v21044_v11 }
0x106f   :  { %v21050_v22 = vpop.eup %21049 }
0x1070   :  { %v21052_v41 = vpop.eup %21051  ;;  %v17010_v8 = vmul.f32 %v21050_v22, %v21048_v25 }
0x1072   :  { %v21054_v17 = vpop.eup %21053  ;;  %v20699_v23 = vpack.i.bf16 %v17011_v37, %v17010_v8 }
0x1073   :  { %v21056_v1 = vpop.eup %21055  ;;  %v17013_v49 = vmul.f32 %v21054_v17, %v21052_v41 }
0x1074   :  { %v21058_v62 = vpop.eup %21057  ;;  %20700 = vrot.lane.b32.xlu1 %v20699_v23, %s21312_s1 }
0x1075   :  { %v17012_v20 = vmul.f32 %v21058_v62, %v21056_v1 }
0x1077   :  { %v20704_v4 = vpack.i.bf16 %v17013_v49, %v17012_v20 }
0x1079   :  { %20705 = vrot.lane.b32.xlu0 %v20704_v4, %s21312_s1 }
0x10e6   :  { %v20701_v28 = vpop.permute.xlu1 %20700 }
0x10e7   :  { %v20703_v55 = vunpack.i.h.bf16 %v20701_v28  ;;  %v20702_v16 = vunpack.i.l.bf16 %v20701_v28 }
0x10e9   :  { %v20080_v5 = vpack.c.bf16 %v20703_v55, %v20702_v16 }
0x10eb   :  { %v20706_v45 = vpop.permute.xlu0 %20705  ;;  %20081 = vmatprep.subr.bf16.mxu0 %v20080_v5 }
0x10ec   :  { %v20708_v36 = vunpack.i.h.bf16 %v20706_v45  ;;  %v20707_v10 = vunpack.i.l.bf16 %v20706_v45  ;;  %20083 = vmatpush3.bf16.msra.mxu0 %v20080_v5 }
0x10ee   :  { %v20084_v58 = vpack.c.bf16 %v20708_v36, %v20707_v10 }
0x10f0   :  { %20085 = vmatprep.subr.bf16.mxu0 %v20084_v58 }
0x10f1   :  { %20087 = vmatpush3.bf16.msra.mxu0 %v20084_v58 }
0x10f4   :  { %19617 = vmatmul.mubr.msk.f32.vlgmr.msra.gmra.mrb[60].mxu0 %vm15103_vm14, %v25062_v61 }
0x10f5   :  { %19619 = vmatprep.mubr.msk.f32.mxu0 %vm15103_vm14, %v25069_v33 }
0x10f8   :  { %19620 = vmatmul.mubr.msk.f32.gmra.mrb[62].mxu0 %vm15103_vm14, %v25076_v52 }
0x10f9   :  { %19622 = vmatprep.mubr.msk.f32.mxu0 %vm15103_vm14, %v25083_v46 }
0x10fc   :  { %19623 = vmatmul.mubr.msk.f32.gmra.mrb[64].mxu0 %vm15103_vm14, %v25090_v50 }
0x10fd   :  { %19625 = vmatprep.mubr.msk.f32.mxu0 %vm15103_vm14, %v25097_v39 }
0x1100   :  { %19626 = vmatmul.mubr.msk.f32.gmra.mrb[66].mxu0 %vm15103_vm14, %v25104_v63 }
0x1101   :  { %19628 = vmatprep.mubr.msk.f32.mxu0 %vm15103_vm14, %v25111_v35 }
0x1104   :  { %19629 = vmatmul.mubr.msk.f32.gmra.mrb[68].mxu0 %vm15103_vm14, %v25118_v40 }
0x1105   :  { %19631 = vmatprep.mubr.msk.f32.mxu0 %vm15103_vm14, %v25125_v6 }
0x1108   :  { %19632 = vmatmul.mubr.msk.f32.gmra.mrb[70].mxu0 %vm15103_vm14, %v25132_v7 }
0x1109   :  { %19634 = vmatprep.mubr.msk.f32.mxu0 %vm15103_vm14, %v25139_v48 }
0x110c   :  { %19635 = vmatmul.mubr.msk.f32.gmra.mrb[72].mxu0 %vm15103_vm14, %v25146_v51 }
0x110d   :  { %19637 = vmatprep.mubr.msk.f32.mxu0 %vm15103_vm14, %v25153_v30 }
0x1110   :  { %19638 = vmatmul.mubr.msk.f32.gmra.mrb[74].mxu0 %vm15103_vm14, %v25160_v12 }
0x1111   :  { %19680 = vmatprep.mubr.msk.f32.mxu0 %vm15103_vm14, %v25167_v9 }
0x11c7   :  { %v19618_v61 = vpop.f32.mrb[60].mxu0 }
0x11c8   :  { %17193 = vrot.lane.b32.xlu0 %v19618_v61, %s21313_s5  ;;  %v17096_v33 = vpop.f32.mrb[61].mxu0 }
0x11c9   :  { %17191 = vrot.lane.b32.xlu1 %v17096_v33, %s21313_s5 }
0x11cb   :  { %v19621_v52 = vpop.f32.mrb[62].mxu0 }
0x11cc   :  { %17197 = vrot.lane.b32.xlu0 %v19621_v52, %s21313_s5  ;;  %v17106_v46 = vpop.f32.mrb[63].mxu0 }
0x11cd   :  { %17195 = vrot.lane.b32.xlu1 %v17106_v46, %s21313_s5 }
0x11cf   :  { %v19624_v50 = vpop.f32.mrb[64].mxu0 }
0x11d0   :  { %17201 = vrot.lane.b32.xlu0 %v19624_v50, %s21313_s5  ;;  %v17116_v39 = vpop.f32.mrb[65].mxu0 }
0x11d1   :  { %17199 = vrot.lane.b32.xlu1 %v17116_v39, %s21313_s5 }
0x11d3   :  { %v19627_v63 = vpop.f32.mrb[66].mxu0 }
0x11d4   :  { %17205 = vrot.lane.b32.xlu0 %v19627_v63, %s21313_s5  ;;  %v17126_v35 = vpop.f32.mrb[67].mxu0 }
0x11d5   :  { %17203 = vrot.lane.b32.xlu1 %v17126_v35, %s21313_s5 }
0x11d7   :  { %v19630_v40 = vpop.f32.mrb[68].mxu0 }
0x11d8   :  { %17209 = vrot.lane.b32.xlu0 %v19630_v40, %s21313_s5  ;;  %v17136_v6 = vpop.f32.mrb[69].mxu0 }
0x11d9   :  { %17207 = vrot.lane.b32.xlu1 %v17136_v6, %s21313_s5 }
0x11db   :  { %v19633_v7 = vpop.f32.mrb[70].mxu0 }
0x11dc   :  { %17213 = vrot.lane.b32.xlu0 %v19633_v7, %s21313_s5  ;;  %v17146_v48 = vpop.f32.mrb[71].mxu0 }
0x11dd   :  { %17211 = vrot.lane.b32.xlu1 %v17146_v48, %s21313_s5 }
0x11df   :  { %v19636_v51 = vpop.f32.mrb[72].mxu0 }
0x11e0   :  { %17217 = vrot.lane.b32.xlu0 %v19636_v51, %s21313_s5  ;;  %v17156_v30 = vpop.f32.mrb[73].mxu0 }
0x11e1   :  { %17215 = vrot.lane.b32.xlu1 %v17156_v30, %s21313_s5 }
0x11e3   :  { %v19639_v12 = vpop.f32.mrb[74].mxu0 }
0x11e4   :  { %17221 = vrot.lane.b32.xlu0 %v19639_v12, %s21313_s5  ;;  %v17166_v9 = vpop.f32.mrb[75].mxu0 }
0x11e5   :  { %17219 = vrot.lane.b32.xlu1 %v17166_v9, %s21313_s5 }
0x11e8   :  { %17337 = vrot.lane.b32.xlu0 %v25295_v60, %s21307_s30 }
0x11e9   :  { %17335 = vrot.lane.b32.xlu1 %v25297_v38, %s21307_s30 }
0x11ec   :  { %17341 = vrot.lane.b32.xlu0 %v25301_v24, %s21307_s30 }
0x11ed   :  { %17339 = vrot.lane.b32.xlu1 %v25304_v13, %s21307_s30 }
0x123a   :  { %v17194_v29 = vpop.permute.xlu0 %17193 }
0x123b   :  { %v17240_v14 = vadd.f32 %v17194_v29, %v24820_v43  ;;  %v17192_v3 = vpop.permute.xlu1 %17191 }
0x123c   :  { %v17239_v42 = vadd.f32 %v17192_v3, %v24822_v19 }
0x123d   :  { %v18650_v11 = vmul.f32 -1.442695, %v17240_v14 }
0x123e   :  { %v18649_v56 = vmul.f32 -1.442695, %v17239_v42  ;;  %v17198_v25 = vpop.permute.xlu0 %17197 }
0x123f   :  { %21059 = vpow2.f32 %v18650_v11  ;;  %v17242_v60 = vadd.f32 %v17198_v25, %v24826_v47  ;;  %v17196_v37 = vpop.permute.xlu1 %17195 }
0x1240   :  { %21061 = vpow2.f32 %v18649_v56  ;;  %v17241_v38 = vadd.f32 %v17196_v37, %v24828_v27 }
0x1241   :  { %v18652_v24 = vmul.f32 -1.442695, %v17242_v60 }
0x1242   :  { %v18651_v22 = vmul.f32 -1.442695, %v17241_v38  ;;  %v17202_v41 = vpop.permute.xlu0 %17201 }
0x1243   :  { %21063 = vpow2.f32 %v18652_v24  ;;  %v17244_v13 = vadd.f32 %v17202_v41, %v24832_v0  ;;  %v17200_v8 = vpop.permute.xlu1 %17199 }
0x1244   :  { %21065 = vpow2.f32 %v18651_v22  ;;  %v17243_v17 = vadd.f32 %v17200_v8, %v24834_v44 }
0x1245   :  { %v18654_v23 = vmul.f32 -1.442695, %v17244_v13 }
0x1246   :  { %v18653_v1 = vmul.f32 -1.442695, %v17243_v17  ;;  %v17206_v49 = vpop.permute.xlu0 %17205 }
0x1247   :  { %21067 = vpow2.f32 %v18654_v23  ;;  %v17246_v62 = vadd.f32 %v17206_v49, %v24838_v15  ;;  %v17204_v20 = vpop.permute.xlu1 %17203 }
0x1248   :  { %21069 = vpow2.f32 %v18653_v1  ;;  %v17245_v4 = vadd.f32 %v17204_v20, %v24840_v53 }
0x1249   :  { %v21060_v28 = vpop.eup %21059  ;;  %v18656_v55 = vmul.f32 -1.442695, %v17246_v62 }
0x124a   :  { %v21062_v16 = vpop.eup %21061  ;;  %v17268_v5 = vadd.f32 1.0, %v21060_v28  ;;  %v18655_v45 = vmul.f32 -1.442695, %v17245_v4  ;;  %v17210_v36 = vpop.permute.xlu0 %17209 }
0x124b   :  { %v17267_v10 = vadd.f32 1.0, %v21062_v16  ;;  %21071 = vpow2.f32 %v18656_v55  ;;  %v17248_v58 = vadd.f32 %v17210_v36, %v24844_v32  ;;  %v17208_v61 = vpop.permute.xlu1 %17207 }
0x124c   :  { %21073 = vrcp.f32 %v17268_v5  ;;  %v17247_v50 = vadd.f32 %v17208_v61, %v24848_v34 }
0x124d   :  { %v21064_v33 = vpop.eup %21063  ;;  %21075 = vrcp.f32 %v17267_v10 }
0x124e   :  { %v21066_v52 = vpop.eup %21065  ;;  %v17270_v46 = vadd.f32 1.0, %v21064_v33  ;;  %21077 = vpow2.f32 %v18655_v45  ;;  %v17214_v39 = vpop.permute.xlu0 %17213 }
0x124f   :  { %v17269_v63 = vadd.f32 1.0, %v21066_v52  ;;  %21079 = vtanh.f32 %v17248_v58  ;;  %v17250_v35 = vadd.f32 %v17214_v39, %v24851_v26  ;;  %v17212_v40 = vpop.permute.xlu1 %17211 }
0x1250   :  { %21081 = vrcp.f32 %v17270_v46  ;;  %v17249_v51 = vadd.f32 %v17212_v40, %v24856_v54 }
0x1251   :  { %v21068_v6 = vpop.eup %21067  ;;  %21083 = vrcp.f32 %v17269_v63 }
0x1252   :  { %v21070_v7 = vpop.eup %21069  ;;  %v17292_v48 = vadd.f32 1.0, %v21068_v6  ;;  %21085 = vtanh.f32 %v17247_v50  ;;  %v17218_v30 = vpop.permute.xlu0 %17217 }
0x1253   :  { %v17291_v12 = vadd.f32 1.0, %v21070_v7  ;;  %21087 = vtanh.f32 %v17250_v35  ;;  %v17252_v9 = vadd.f32 %v17218_v30, %v24859_v31  ;;  %v17216_v29 = vpop.permute.xlu1 %17215 }
0x1254   :  { %21089 = vrcp.f32 %v17292_v48  ;;  %v17251_v14 = vadd.f32 %v17216_v29, %v24862_v18 }
0x1255   :  { %v21072_v3 = vpop.eup %21071  ;;  %21091 = vrcp.f32 %v17291_v12  ;;  %v18658_v42 = vmul.f32 -1.442695, %v17252_v9 }
0x1256   :  { %v21074_v11 = vpop.eup %21073  ;;  %v17294_v56 = vadd.f32 1.0, %v21072_v3  ;;  %21093 = vtanh.f32 %v17249_v51  ;;  %v18657_v25 = vmul.f32 -1.442695, %v17251_v14  ;;  %v17222_v60 = vpop.permute.xlu0 %17221 }
0x1257   :  { %v21076_v37 = vpop.eup %21075  ;;  %21095 = vpow2.f32 %v18658_v42  ;;  %v17254_v38 = vadd.f32 %v17222_v60, %v24868_v57  ;;  %v17220_v24 = vpop.permute.xlu1 %17219 }
0x1258   :  { %v21078_v22 = vpop.eup %21077  ;;  %21097 = vrcp.f32 %v17294_v56  ;;  %v17253_v41 = vadd.f32 %v17220_v24, %v24871_v21 }
0x1259   :  { %v21080_v13 = vpop.eup %21079  ;;  %v17293_v8 = vadd.f32 1.0, %v21078_v22  ;;  %21099 = vpow2.f32 %v18657_v25  ;;  %v18660_v17 = vmul.f32 -1.442695, %v17254_v38 }
0x125a   :  { %v21082_v23 = vpop.eup %21081  ;;  %v18659_v1 = vmul.f32 -1.442695, %v17253_v41  ;;  %v17338_v20 = vpop.permute.xlu0 %17337  ;;  %v17352_v16 = vmul.f32 %v21080_v13, %v21074_v11 }
0x125b   :  { %v21084_v49 = vpop.eup %21083  ;;  %21101 = vrcp.f32 %v17293_v8  ;;  %v17336_v45 = vpop.permute.xlu1 %17335 }
0x125c   :  { %v21086_v62 = vpop.eup %21085  ;;  %21103 = vpow2.f32 %v18660_v17 }
0x125d   :  { %v21088_v4 = vpop.eup %21087  ;;  %21105 = vpow2.f32 %v18659_v1  ;;  %v17351_v10 = vmul.f32 %v21086_v62, %v21076_v37 }
0x125e   :  { %v21090_v28 = vpop.eup %21089  ;;  %v17342_v39 = vpop.permute.xlu0 %17341  ;;  %v17354_v35 = vmul.f32 %v21088_v4, %v21082_v23 }
0x125f   :  { %v21092_v55 = vpop.eup %21091  ;;  %v17348_v5 = vmul.f32 %v21090_v28, %v17338_v20  ;;  %v17340_v51 = vpop.permute.xlu1 %17339 }
0x1260   :  { %v21094_v36 = vpop.eup %21093  ;;  %v17347_v58 = vmul.f32 %v21092_v55, %v17336_v45  ;;  %v25395_v45 = vld [vmem:[%s25641_s9 + $0x8] sm:$0xff] }
0x1261   :  { %v21096_v61 = vpop.eup %21095  ;;  %v25379_v33 = vadd.f32 %v17352_v16, %v17348_v5  ;;  %v17353_v12 = vmul.f32 %v21094_v36, %v21084_v49  ;;  %v25402_v36 = vld [vmem:[%s25641_s9 + $0x10] sm:$0xff] }
0x1262   :  { %v21098_v52 = vpop.eup %21097  ;;  %v17320_v46 = vadd.f32 1.0, %v21096_v61  ;;  %v25381_v50 = vadd.f32 %v17351_v10, %v17347_v58  ;;  %v25409_v10 = vld [vmem:[%s25641_s9 + $0x18] sm:$0xff]  ;;  %v25416_v58 = vld [vmem:[%s25641_s9 + $0x20] sm:$0xff]  ;;  %v25423_v61 = vld [vmem:[%s25641_s9 + $0x28] sm:$0xff] }
0x1263   :  { %v21100_v63 = vpop.eup %21099  ;;  %21107 = vtanh.f32 %v25379_v33  ;;  %v17350_v40 = vmul.f32 %v21098_v52, %v17342_v39  ;;  %v25430_v52 = vld [vmem:[%s25641_s9 + $0x30] sm:$0xff]  ;;  %v25444_v39 = vld [vmem:[%s25641_s9 + $0x40] sm:$0xff] }
0x1264   :  { %21109 = vrcp.f32 %v17320_v46  ;;  %v17319_v6 = vadd.f32 1.0, %v21100_v63  ;;  %v25437_v46 = vld [vmem:[%s25641_s9 + $0x38] sm:$0xff]  ;;  %v25451_v63 = vld [vmem:[%s25641_s9 + $0x48] sm:$0xff] }
0x1265   :  { %v21102_v7 = vpop.eup %21101  ;;  %21111 = vtanh.f32 %v25381_v50  ;;  %v25385_v48 = vadd.f32 %v17354_v35, %v17350_v40  ;;  %v25458_v35 = vld [vmem:[%s25641_s9 + $0x50] sm:$0xff]  ;;  %v25465_v40 = vld [vmem:[%s25641_s9 + $0x58] sm:$0xff] }
0x1266   :  { %v21104_v30 = vpop.eup %21103  ;;  %21113 = vrcp.f32 %v17319_v6  ;;  %v17349_v9 = vmul.f32 %v21102_v7, %v17340_v51  ;;  %v25472_v6 = vld [vmem:[%s25641_s9 + $0x60] sm:$0xff]  ;;  %v25479_v7 = vld [vmem:[%s25641_s9 + $0x68] sm:$0xff]  ;;  %v25486_v51 = vld [vmem:[%s25641_s9 + $0x70] sm:$0xff] }
0x1267   :  { %v21106_v29 = vpop.eup %21105  ;;  %v17322_v14 = vadd.f32 1.0, %v21104_v30  ;;  %21115 = vtanh.f32 %v25385_v48  ;;  %v25493_v30 = vld [vmem:[%s25641_s9 + $0x78] sm:$0xff]  ;;  %s21316_s9 = smov 122  }
0x1268   :  { %v17321_v3 = vadd.f32 1.0, %v21106_v29  ;;  %v25388_v42 = vadd.f32 %v17353_v12, %v17349_v9 }
0x1269   :  { %21117 = vrcp.f32 %v17322_v14 }
0x126a   :  { %21119 = vrcp.f32 %v17321_v3 }
0x126b   :  { %21121 = vtanh.f32 %v25388_v42 }
0x126d   :  { %v21108_v11 = vpop.eup %21107 }
0x126e   :  { %v21110_v56 = vpop.eup %21109 }
0x126f   :  { %v21112_v25 = vpop.eup %21111  ;;  %v17364_v60 = vmul.f32 %v21110_v56, %v21108_v11 }
0x1270   :  { %v21114_v37 = vpop.eup %21113 }
0x1271   :  { %v21116_v38 = vpop.eup %21115  ;;  %v17363_v24 = vmul.f32 %v21114_v37, %v21112_v25 }
0x1273   :  { %v21118_v22 = vpop.eup %21117  ;;  %v20709_v41 = vpack.i.bf16 %v17364_v60, %v17363_v24 }
0x1274   :  { %v21120_v13 = vpop.eup %21119  ;;  %v17366_v8 = vmul.f32 %v21118_v22, %v21116_v38 }
0x1275   :  { %v21122_v17 = vpop.eup %21121  ;;  %20710 = vrot.lane.b32.xlu1 %v20709_v41, %s21314_s23 }
0x1276   :  { %v17365_v23 = vmul.f32 %v21122_v17, %v21120_v13 }
0x1278   :  { %v20714_v1 = vpack.i.bf16 %v17366_v8, %v17365_v23 }
0x127a   :  { %20715 = vrot.lane.b32.xlu0 %v20714_v1, %s21314_s23 }
0x12e7   :  { %v20711_v49 = vpop.permute.xlu1 %20710 }
0x12e8   :  { %v20713_v62 = vunpack.i.h.bf16 %v20711_v49  ;;  %v20712_v20 = vunpack.i.l.bf16 %v20711_v49 }
0x12ea   :  { %v20088_v4 = vpack.c.bf16 %v20713_v62, %v20712_v20 }
0x12ec   :  { %v20716_v28 = vpop.permute.xlu0 %20715  ;;  %20089 = vmatprep.subr.bf16.mxu1 %v20088_v4 }
0x12ed   :  { %v20718_v55 = vunpack.i.h.bf16 %v20716_v28  ;;  %v20717_v16 = vunpack.i.l.bf16 %v20716_v28  ;;  %20091 = vmatpush3.bf16.msra.mxu1 %v20088_v4 }
0x12ef   :  { %v20092_v5 = vpack.c.bf16 %v20718_v55, %v20717_v16 }
0x12f1   :  { %20093 = vmatprep.subr.bf16.mxu1 %v20092_v5 }
0x12f2   :  { %20095 = vmatpush3.bf16.msra.mxu1 %v20092_v5 }
0x12f3   :  { %20104 = vmatprep.subr.bf16.mxu1 %v21292_v59 }
0x12f5   :  { %19649 = vmatmul.mubr.msk.f32.vlgmr.msra.gmra.mrb[122].mxu1 %vm15103_vm14, %v25395_v45 }
0x12f6   :  { %19651 = vmatprep.mubr.msk.f32.mxu1 %vm15103_vm14, %v25402_v36 }
0x12f9   :  { %19652 = vmatmul.mubr.msk.f32.gmra.mrb[124].mxu1 %vm15103_vm14, %v25409_v10 }
0x12fa   :  { %19654 = vmatprep.mubr.msk.f32.mxu1 %vm15103_vm14, %v25416_v58 }
0x12fd   :  { %19655 = vmatmul.mubr.msk.f32.gmra.mrb[126].mxu1 %vm15103_vm14, %v25423_v61 }
0x12fe   :  { %19657 = vmatprep.mubr.msk.f32.mxu1 %vm15103_vm14, %v25430_v52 }
0x1301   :  { %19658 = vmatmul.mubr.msk.f32.gmra.mrb[128].mxu1 %vm15103_vm14, %v25437_v46 }
0x1302   :  { %19660 = vmatprep.mubr.msk.f32.mxu1 %vm15103_vm14, %v25444_v39 }
0x1305   :  { %19661 = vmatmul.mubr.msk.f32.gmra.mrb[130].mxu1 %vm15103_vm14, %v25451_v63 }
0x1306   :  { %19663 = vmatprep.mubr.msk.f32.mxu1 %vm15103_vm14, %v25458_v35 }
0x1309   :  { %19664 = vmatmul.mubr.msk.f32.gmra.mrb[132].mxu1 %vm15103_vm14, %v25465_v40 }
0x130a   :  { %19666 = vmatprep.mubr.msk.f32.mxu1 %vm15103_vm14, %v25472_v6 }
0x130d   :  { %19667 = vmatmul.mubr.msk.f32.gmra.mrb[134].mxu1 %vm15103_vm14, %v25479_v7 }
0x130e   :  { %19669 = vmatprep.mubr.msk.f32.mxu1 %vm15103_vm14, %v25486_v51 }
0x1311   :  { %19670 = vmatmul.mubr.msk.f32.gmra.mrb[136].mxu1 %vm15103_vm14, %v25493_v30 }
0x1312   :  { %19712 = vmatprep.mubr.msk.f32.mxu1 %vm21318_vm15, %v21282_v2 }
0x13c8   :  { %v19650_v12 = vpop.f32.mrb[122].mxu1 }
0x13c9   :  { %17546 = vrot.lane.b32.xlu0 %v19650_v12, %s21315_s26  ;;  %v17449_v9 = vpop.f32.mrb[123].mxu1 }
0x13ca   :  { %17544 = vrot.lane.b32.xlu1 %v17449_v9, %s21315_s26 }
0x13cc   :  { %v19653_v29 = vpop.f32.mrb[124].mxu1 }
0x13cd   :  { %17550 = vrot.lane.b32.xlu0 %v19653_v29, %s21315_s26  ;;  %v17459_v14 = vpop.f32.mrb[125].mxu1 }
0x13ce   :  { %17548 = vrot.lane.b32.xlu1 %v17459_v14, %s21315_s26 }
0x13d0   :  { %v19656_v3 = vpop.f32.mrb[126].mxu1 }
0x13d1   :  { %17554 = vrot.lane.b32.xlu0 %v19656_v3, %s21315_s26  ;;  %v17469_v11 = vpop.f32.mrb[127].mxu1 }
0x13d2   :  { %17552 = vrot.lane.b32.xlu1 %v17469_v11, %s21315_s26 }
0x13d4   :  { %v19659_v56 = vpop.f32.mrb[128].mxu1 }
0x13d5   :  { %17558 = vrot.lane.b32.xlu0 %v19659_v56, %s21315_s26  ;;  %v17479_v25 = vpop.f32.mrb[129].mxu1 }
0x13d6   :  { %17556 = vrot.lane.b32.xlu1 %v17479_v25, %s21315_s26 }
0x13d8   :  { %v19662_v60 = vpop.f32.mrb[130].mxu1 }
0x13d9   :  { %17562 = vrot.lane.b32.xlu0 %v19662_v60, %s21315_s26  ;;  %v17489_v37 = vpop.f32.mrb[131].mxu1 }
0x13da   :  { %17560 = vrot.lane.b32.xlu1 %v17489_v37, %s21315_s26 }
0x13dc   :  { %v19665_v38 = vpop.f32.mrb[132].mxu1 }
0x13dd   :  { %17566 = vrot.lane.b32.xlu0 %v19665_v38, %s21315_s26  ;;  %v17499_v24 = vpop.f32.mrb[133].mxu1 }
0x13de   :  { %17564 = vrot.lane.b32.xlu1 %v17499_v24, %s21315_s26 }
0x13e0   :  { %v19668_v22 = vpop.f32.mrb[134].mxu1 }
0x13e1   :  { %17570 = vrot.lane.b32.xlu0 %v19668_v22, %s21315_s26  ;;  %v17509_v41 = vpop.f32.mrb[135].mxu1 }
0x13e2   :  { %17568 = vrot.lane.b32.xlu1 %v17509_v41, %s21315_s26 }
0x13e4   :  { %v19671_v13 = vpop.f32.mrb[136].mxu1 }
0x13e5   :  { %17574 = vrot.lane.b32.xlu0 %v19671_v13, %s21315_s26  ;;  %v17519_v8 = vpop.f32.mrb[137].mxu1 }
0x13e6   :  { %17572 = vrot.lane.b32.xlu1 %v17519_v8, %s21315_s26 }
0x13e9   :  { %17690 = vrot.lane.b32.xlu0 %v25379_v33, %s21307_s30 }
0x13ea   :  { %17688 = vrot.lane.b32.xlu1 %v25381_v50, %s21307_s30 }
0x13ed   :  { %17694 = vrot.lane.b32.xlu0 %v25385_v48, %s21307_s30 }
0x13ee   :  { %17692 = vrot.lane.b32.xlu1 %v25388_v42, %s21307_s30 }
0x143b   :  { %v17547_v17 = vpop.permute.xlu0 %17546 }
0x143c   :  { %v17593_v23 = vadd.f32 %v17547_v17, %v24820_v43  ;;  %v17545_v1 = vpop.permute.xlu1 %17544 }
0x143d   :  { %v17592_v49 = vadd.f32 %v17545_v1, %v24822_v19 }
0x143e   :  { %v18678_v62 = vmul.f32 -1.442695, %v17593_v23 }
0x143f   :  { %v18677_v20 = vmul.f32 -1.442695, %v17592_v49  ;;  %v17551_v4 = vpop.permute.xlu0 %17550 }
0x1440   :  { %21123 = vpow2.f32 %v18678_v62  ;;  %v17595_v33 = vadd.f32 %v17551_v4, %v24826_v47  ;;  %v17549_v28 = vpop.permute.xlu1 %17548 }
0x1441   :  { %21125 = vpow2.f32 %v18677_v20  ;;  %v17594_v50 = vadd.f32 %v17549_v28, %v24828_v27 }
0x1442   :  { %v18680_v48 = vmul.f32 -1.442695, %v17595_v33 }
0x1443   :  { %v18679_v55 = vmul.f32 -1.442695, %v17594_v50  ;;  %v17555_v16 = vpop.permute.xlu0 %17554 }
0x1444   :  { %21127 = vpow2.f32 %v18680_v48  ;;  %v17597_v42 = vadd.f32 %v17555_v16, %v24832_v0  ;;  %v17553_v5 = vpop.permute.xlu1 %17552 }
0x1445   :  { %21129 = vpow2.f32 %v18679_v55  ;;  %v17596_v12 = vadd.f32 %v17553_v5, %v24834_v44 }
0x1446   :  { %v18682_v9 = vmul.f32 -1.442695, %v17597_v42 }
0x1447   :  { %v18681_v29 = vmul.f32 -1.442695, %v17596_v12  ;;  %v17559_v14 = vpop.permute.xlu0 %17558 }
0x1448   :  { %21131 = vpow2.f32 %v18682_v9  ;;  %v17599_v3 = vadd.f32 %v17559_v14, %v24838_v15  ;;  %v17557_v11 = vpop.permute.xlu1 %17556 }
0x1449   :  { %21133 = vpow2.f32 %v18681_v29  ;;  %v17598_v56 = vadd.f32 %v17557_v11, %v24840_v53 }
0x144a   :  { %v21124_v25 = vpop.eup %21123  ;;  %v18684_v60 = vmul.f32 -1.442695, %v17599_v3 }
0x144b   :  { %v21126_v37 = vpop.eup %21125  ;;  %v17621_v38 = vadd.f32 1.0, %v21124_v25  ;;  %v18683_v24 = vmul.f32 -1.442695, %v17598_v56  ;;  %v17563_v22 = vpop.permute.xlu0 %17562 }
0x144c   :  { %v17620_v41 = vadd.f32 1.0, %v21126_v37  ;;  %21135 = vpow2.f32 %v18684_v60  ;;  %v17601_v13 = vadd.f32 %v17563_v22, %v24844_v32  ;;  %v17561_v8 = vpop.permute.xlu1 %17560 }
0x144d   :  { %21137 = vrcp.f32 %v17621_v38  ;;  %v17600_v49 = vadd.f32 %v17561_v8, %v24848_v34 }
0x144e   :  { %v21128_v17 = vpop.eup %21127  ;;  %21139 = vrcp.f32 %v17620_v41 }
0x144f   :  { %v21130_v23 = vpop.eup %21129  ;;  %v17623_v1 = vadd.f32 1.0, %v21128_v17  ;;  %21141 = vpow2.f32 %v18683_v24  ;;  %v17567_v62 = vpop.permute.xlu0 %17566 }
0x1450   :  { %v17622_v20 = vadd.f32 1.0, %v21130_v23  ;;  %21143 = vtanh.f32 %v17601_v13  ;;  %v17603_v4 = vadd.f32 %v17567_v62, %v24851_v26  ;;  %v17565_v33 = vpop.permute.xlu1 %17564 }
0x1451   :  { %21145 = vrcp.f32 %v17623_v1  ;;  %v17602_v55 = vadd.f32 %v17565_v33, %v24856_v54 }
0x1452   :  { %v21132_v28 = vpop.eup %21131  ;;  %21147 = vrcp.f32 %v17622_v20 }
0x1453   :  { %v21134_v50 = vpop.eup %21133  ;;  %v17645_v48 = vadd.f32 1.0, %v21132_v28  ;;  %21149 = vtanh.f32 %v17600_v49  ;;  %v17571_v16 = vpop.permute.xlu0 %17570 }
0x1454   :  { %v17644_v42 = vadd.f32 1.0, %v21134_v50  ;;  %21151 = vtanh.f32 %v17603_v4  ;;  %v17605_v5 = vadd.f32 %v17571_v16, %v24859_v31  ;;  %v17569_v12 = vpop.permute.xlu1 %17568 }
0x1455   :  { %21153 = vrcp.f32 %v17645_v48  ;;  %v17604_v9 = vadd.f32 %v17569_v12, %v24862_v18 }
0x1456   :  { %v21136_v29 = vpop.eup %21135  ;;  %21155 = vrcp.f32 %v17644_v42  ;;  %v18686_v14 = vmul.f32 -1.442695, %v17605_v5 }
0x1457   :  { %v21138_v3 = vpop.eup %21137  ;;  %v17647_v11 = vadd.f32 1.0, %v21136_v29  ;;  %21157 = vtanh.f32 %v17602_v55  ;;  %v18685_v56 = vmul.f32 -1.442695, %v17604_v9  ;;  %v17575_v25 = vpop.permute.xlu0 %17574 }
0x1458   :  { %v21140_v60 = vpop.eup %21139  ;;  %21159 = vpow2.f32 %v18686_v14  ;;  %v17607_v37 = vadd.f32 %v17575_v25, %v24868_v57  ;;  %v17573_v38 = vpop.permute.xlu1 %17572 }
0x1459   :  { %v21142_v24 = vpop.eup %21141  ;;  %21161 = vrcp.f32 %v17647_v11  ;;  %v17606_v22 = vadd.f32 %v17573_v38, %v24871_v21 }
0x145a   :  { %v21144_v41 = vpop.eup %21143  ;;  %v17646_v13 = vadd.f32 1.0, %v21142_v24  ;;  %21163 = vpow2.f32 %v18685_v56  ;;  %v18688_v8 = vmul.f32 -1.442695, %v17607_v37 }
0x145b   :  { %v21146_v17 = vpop.eup %21145  ;;  %v18687_v23 = vmul.f32 -1.442695, %v17606_v22  ;;  %v17691_v62 = vpop.permute.xlu0 %17690  ;;  %v17705_v28 = vmul.f32 %v21144_v41, %v21138_v3 }
0x145c   :  { %v21148_v1 = vpop.eup %21147  ;;  %21165 = vrcp.f32 %v17646_v13  ;;  %v17689_v48 = vpop.permute.xlu1 %17688 }
0x145d   :  { %v21150_v49 = vpop.eup %21149  ;;  %21167 = vpow2.f32 %v18688_v8 }
0x145e   :  { %v21152_v20 = vpop.eup %21151  ;;  %21169 = vpow2.f32 %v18687_v23  ;;  %v17704_v16 = vmul.f32 %v21150_v49, %v21140_v60 }
0x145f   :  { %v21154_v4 = vpop.eup %21153  ;;  %v17695_v11 = vpop.permute.xlu0 %17694  ;;  %v17707_v25 = vmul.f32 %v21152_v20, %v21146_v17 }
0x1460   :  { %v21156_v33 = vpop.eup %21155  ;;  %v17701_v50 = vmul.f32 %v21154_v4, %v17691_v62  ;;  %v17693_v24 = vpop.permute.xlu1 %17692 }
0x1461   :  { %v21158_v55 = vpop.eup %21157  ;;  %v17700_v42 = vmul.f32 %v21156_v33, %v17689_v48 }
0x1462   :  { %v21160_v5 = vpop.eup %21159  ;;  %v25537_v12 = vadd.f32 %v17705_v28, %v17701_v50  ;;  %v17706_v41 = vmul.f32 %v21158_v55, %v21148_v1 }
0x1463   :  { %v21162_v9 = vpop.eup %21161  ;;  %v17673_v29 = vadd.f32 1.0, %v21160_v5  ;;  %v25539_v14 = vadd.f32 %v17704_v16, %v17700_v42 }
0x1464   :  { %v21164_v56 = vpop.eup %21163  ;;  %21171 = vtanh.f32 %v25537_v12  ;;  %v17703_v37 = vmul.f32 %v21162_v9, %v17695_v11 }
0x1465   :  { %21173 = vrcp.f32 %v17673_v29  ;;  %v17672_v3 = vadd.f32 1.0, %v21164_v56 }
0x1466   :  { %v21166_v38 = vpop.eup %21165  ;;  %21175 = vtanh.f32 %v25539_v14  ;;  %v25543_v60 = vadd.f32 %v17707_v25, %v17703_v37 }
0x1467   :  { %v21168_v22 = vpop.eup %21167  ;;  %21177 = vrcp.f32 %v17672_v3  ;;  %v17702_v13 = vmul.f32 %v21166_v38, %v17693_v24 }
0x1468   :  { %v21170_v8 = vpop.eup %21169  ;;  %v17675_v23 = vadd.f32 1.0, %v21168_v22  ;;  %21179 = vtanh.f32 %v25543_v60 }
0x1469   :  { %v17674_v49 = vadd.f32 1.0, %v21170_v8  ;;  %v25546_v62 = vadd.f32 %v17706_v41, %v17702_v13 }
0x146a   :  { %21181 = vrcp.f32 %v17675_v23 }
0x146b   :  { %21183 = vrcp.f32 %v17674_v49 }
0x146c   :  { %21185 = vtanh.f32 %v25546_v62 }
0x146e   :  { %v21172_v17 = vpop.eup %21171 }
0x146f   :  { %v21174_v20 = vpop.eup %21173 }
0x1470   :  { %v21176_v4 = vpop.eup %21175  ;;  %v17717_v33 = vmul.f32 %v21174_v20, %v21172_v17 }
0x1471   :  { %v21178_v28 = vpop.eup %21177 }
0x1472   :  { %v21180_v50 = vpop.eup %21179  ;;  %v17716_v48 = vmul.f32 %v21178_v28, %v21176_v4 }
0x1474   :  { %v21182_v1 = vpop.eup %21181  ;;  %v20719_v55 = vpack.i.bf16 %v17717_v33, %v17716_v48 }
0x1475   :  { %v21184_v16 = vpop.eup %21183  ;;  %v17719_v42 = vmul.f32 %v21182_v1, %v21180_v50 }
0x1476   :  { %v21186_v5 = vpop.eup %21185  ;;  %20720 = vrot.lane.b32.xlu1 %v20719_v55, %s21316_s9 }
0x1477   :  { %v17718_v9 = vmul.f32 %v21186_v5, %v21184_v16 }
0x1479   :  { %v20724_v29 = vpack.i.bf16 %v17719_v42, %v17718_v9 }
0x147b   :  { %20725 = vrot.lane.b32.xlu0 %v20724_v29, %s21316_s9 }
0x14e8   :  { %v20721_v11 = vpop.permute.xlu1 %20720 }
0x14e9   :  { %v20723_v56 = vunpack.i.h.bf16 %v20721_v11  ;;  %v20722_v25 = vunpack.i.l.bf16 %v20721_v11 }
0x14eb   :  { %v20096_v37 = vpack.c.bf16 %v20723_v56, %v20722_v25 }
0x14ed   :  { %v20726_v3 = vpop.permute.xlu0 %20725  ;;  %20097 = vmatprep.subr.bf16.mxu0 %v20096_v37 }
0x14ee   :  { %v20728_v38 = vunpack.i.h.bf16 %v20726_v3  ;;  %v20727_v24 = vunpack.i.l.bf16 %v20726_v3  ;;  %20099 = vmatpush3.bf16.msra.mxu0 %v20096_v37 }
0x14f0   :  { %v20100_v22 = vpack.c.bf16 %v20728_v38, %v20727_v24 }
0x14f2   :  { %20101 = vmatprep.subr.bf16.mxu0 %v20100_v22 }
0x14f3   :  { %20103 = vmatpush3.bf16.msra.mxu0 %v20100_v22 }
0x14f6   :  { %19681 = vmatmul.mubr.msk.f32.vlgmr.msra.gmra.mrb[76].mxu0 %vm15103_vm14, %v25395_v45 }
0x14f7   :  { %19683 = vmatprep.mubr.msk.f32.mxu0 %vm15103_vm14, %v25402_v36 }
0x14fa   :  { %19684 = vmatmul.mubr.msk.f32.gmra.mrb[78].mxu0 %vm15103_vm14, %v25409_v10 }
0x14fb   :  { %19686 = vmatprep.mubr.msk.f32.mxu0 %vm15103_vm14, %v25416_v58 }
0x14fe   :  { %19687 = vmatmul.mubr.msk.f32.gmra.mrb[80].mxu0 %vm15103_vm14, %v25423_v61 }
0x14ff   :  { %19689 = vmatprep.mubr.msk.f32.mxu0 %vm15103_vm14, %v25430_v52 }
0x1502   :  { %19690 = vmatmul.mubr.msk.f32.gmra.mrb[82].mxu0 %vm15103_vm14, %v25437_v46 }
0x1503   :  { %19692 = vmatprep.mubr.msk.f32.mxu0 %vm15103_vm14, %v25444_v39 }
0x1506   :  { %19693 = vmatmul.mubr.msk.f32.gmra.mrb[84].mxu0 %vm15103_vm14, %v25451_v63 }
0x1507   :  { %19695 = vmatprep.mubr.msk.f32.mxu0 %vm15103_vm14, %v25458_v35 }
0x150a   :  { %19696 = vmatmul.mubr.msk.f32.gmra.mrb[86].mxu0 %vm15103_vm14, %v25465_v40 }
0x150b   :  { %19698 = vmatprep.mubr.msk.f32.mxu0 %vm15103_vm14, %v25472_v6 }
0x150e   :  { %19699 = vmatmul.mubr.msk.f32.gmra.mrb[88].mxu0 %vm15103_vm14, %v25479_v7 }
0x150f   :  { %19701 = vmatprep.mubr.msk.f32.mxu0 %vm15103_vm14, %v25486_v51 }
0x1512   :  { %19702 = vmatmul.mubr.msk.f32.gmra.mrb[90].mxu0 %vm15103_vm14, %v25493_v30 }
0x15c9   :  { %v19682_v45 = vpop.f32.mrb[76].mxu0 }
0x15ca   :  { %17899 = vrot.lane.b32.xlu0 %v19682_v45, %s21317_s14  ;;  %v17802_v36 = vpop.f32.mrb[77].mxu0 }
0x15cb   :  { %17897 = vrot.lane.b32.xlu1 %v17802_v36, %s21317_s14 }
0x15cd   :  { %v19685_v10 = vpop.f32.mrb[78].mxu0 }
0x15ce   :  { %17903 = vrot.lane.b32.xlu0 %v19685_v10, %s21317_s14  ;;  %v17812_v58 = vpop.f32.mrb[79].mxu0 }
0x15cf   :  { %17901 = vrot.lane.b32.xlu1 %v17812_v58, %s21317_s14 }
0x15d1   :  { %v19688_v61 = vpop.f32.mrb[80].mxu0 }
0x15d2   :  { %17907 = vrot.lane.b32.xlu0 %v19688_v61, %s21317_s14  ;;  %v17822_v52 = vpop.f32.mrb[81].mxu0 }
0x15d3   :  { %17905 = vrot.lane.b32.xlu1 %v17822_v52, %s21317_s14 }
0x15d5   :  { %v19691_v46 = vpop.f32.mrb[82].mxu0 }
0x15d6   :  { %17911 = vrot.lane.b32.xlu0 %v19691_v46, %s21317_s14  ;;  %v17832_v39 = vpop.f32.mrb[83].mxu0 }
0x15d7   :  { %17909 = vrot.lane.b32.xlu1 %v17832_v39, %s21317_s14 }
0x15d9   :  { %v19694_v63 = vpop.f32.mrb[84].mxu0 }
0x15da   :  { %17915 = vrot.lane.b32.xlu0 %v19694_v63, %s21317_s14  ;;  %v17842_v35 = vpop.f32.mrb[85].mxu0 }
0x15db   :  { %17913 = vrot.lane.b32.xlu1 %v17842_v35, %s21317_s14 }
0x15dd   :  { %v19697_v40 = vpop.f32.mrb[86].mxu0 }
0x15de   :  { %17919 = vrot.lane.b32.xlu0 %v19697_v40, %s21317_s14  ;;  %v17852_v6 = vpop.f32.mrb[87].mxu0 }
0x15df   :  { %17917 = vrot.lane.b32.xlu1 %v17852_v6, %s21317_s14 }
0x15e1   :  { %v19700_v7 = vpop.f32.mrb[88].mxu0 }
0x15e2   :  { %17923 = vrot.lane.b32.xlu0 %v19700_v7, %s21317_s14  ;;  %v17862_v51 = vpop.f32.mrb[89].mxu0 }
0x15e3   :  { %17921 = vrot.lane.b32.xlu1 %v17862_v51, %s21317_s14 }
0x15e5   :  { %v19703_v30 = vpop.f32.mrb[90].mxu0 }
0x15e6   :  { %17927 = vrot.lane.b32.xlu0 %v19703_v30, %s21317_s14  ;;  %v17872_v41 = vpop.f32.mrb[91].mxu0 }
0x15e7   :  { %17925 = vrot.lane.b32.xlu1 %v17872_v41, %s21317_s14 }
0x15ea   :  { %18043 = vrot.lane.b32.xlu0 %v25537_v12, %s21307_s30 }
0x15eb   :  { %18041 = vrot.lane.b32.xlu1 %v25539_v14, %s21307_s30 }
0x15ee   :  { %18047 = vrot.lane.b32.xlu0 %v25543_v60, %s21307_s30 }
0x15ef   :  { %18045 = vrot.lane.b32.xlu1 %v25546_v62, %s21307_s30  ;;  %s21319_s30 = smov 121  }
0x163c   :  { %v17900_v13 = vpop.permute.xlu0 %17899 }
0x163d   :  { %v17946_v8 = vadd.f32 %v17900_v13, %v24820_v43  ;;  %v17898_v23 = vpop.permute.xlu1 %17897 }
0x163e   :  { %v17945_v49 = vadd.f32 %v17898_v23, %v24822_v19 }
0x163f   :  { %v18706_v17 = vmul.f32 -1.442695, %v17946_v8 }
0x1640   :  { %v18705_v20 = vmul.f32 -1.442695, %v17945_v49  ;;  %v17904_v4 = vpop.permute.xlu0 %17903 }
0x1641   :  { %21187 = vpow2.f32 %v18706_v17  ;;  %v17948_v12 = vadd.f32 %v17904_v4, %v24826_v47  ;;  %v17902_v33 = vpop.permute.xlu1 %17901 }
0x1642   :  { %21189 = vpow2.f32 %v18705_v20  ;;  %v17947_v14 = vadd.f32 %v17902_v33, %v24828_v27 }
0x1643   :  { %v18708_v60 = vmul.f32 -1.442695, %v17948_v12 }
0x1644   :  { %v18707_v28 = vmul.f32 -1.442695, %v17947_v14  ;;  %v17908_v50 = vpop.permute.xlu0 %17907 }
0x1645   :  { %21191 = vpow2.f32 %v18708_v60  ;;  %v17950_v62 = vadd.f32 %v17908_v50, %v24832_v0  ;;  %v17906_v43 = vpop.permute.xlu1 %17905 }
0x1646   :  { %21193 = vpow2.f32 %v18707_v28  ;;  %v17949_v19 = vadd.f32 %v17906_v43, %v24834_v44 }
0x1647   :  { %v18710_v48 = vmul.f32 -1.442695, %v17950_v62 }
0x1648   :  { %v18709_v1 = vmul.f32 -1.442695, %v17949_v19  ;;  %v17912_v55 = vpop.permute.xlu0 %17911 }
0x1649   :  { %21195 = vpow2.f32 %v18710_v48  ;;  %v17952_v47 = vadd.f32 %v17912_v55, %v24838_v15  ;;  %v17910_v16 = vpop.permute.xlu1 %17909 }
0x164a   :  { %21197 = vpow2.f32 %v18709_v1  ;;  %v17951_v27 = vadd.f32 %v17910_v16, %v24840_v53 }
0x164b   :  { %v21188_v42 = vpop.eup %21187  ;;  %v18712_v5 = vmul.f32 -1.442695, %v17952_v47 }
0x164c   :  { %v21190_v9 = vpop.eup %21189  ;;  %v17974_v29 = vadd.f32 1.0, %v21188_v42  ;;  %v18711_v11 = vmul.f32 -1.442695, %v17951_v27  ;;  %v17916_v0 = vpop.permute.xlu0 %17915 }
0x164d   :  { %v17973_v56 = vadd.f32 1.0, %v21190_v9  ;;  %21199 = vpow2.f32 %v18712_v5  ;;  %v17954_v44 = vadd.f32 %v17916_v0, %v24844_v32  ;;  %v17914_v25 = vpop.permute.xlu1 %17913 }
0x164e   :  { %21201 = vrcp.f32 %v17974_v29  ;;  %v17953_v38 = vadd.f32 %v17914_v25, %v24848_v34 }
0x164f   :  { %v21192_v37 = vpop.eup %21191  ;;  %21203 = vrcp.f32 %v17973_v56 }
0x1650   :  { %v21194_v3 = vpop.eup %21193  ;;  %v17976_v15 = vadd.f32 1.0, %v21192_v37  ;;  %21205 = vpow2.f32 %v18711_v11  ;;  %v17920_v53 = vpop.permute.xlu0 %17919 }
0x1651   :  { %v17975_v24 = vadd.f32 1.0, %v21194_v3  ;;  %21207 = vtanh.f32 %v17954_v44  ;;  %v17956_v22 = vadd.f32 %v17920_v53, %v24851_v26  ;;  %v17918_v45 = vpop.permute.xlu1 %17917 }
0x1652   :  { %21209 = vrcp.f32 %v17976_v15  ;;  %v17955_v58 = vadd.f32 %v17918_v45, %v24856_v54 }
0x1653   :  { %v21196_v36 = vpop.eup %21195  ;;  %21211 = vrcp.f32 %v17975_v24 }
0x1654   :  { %v21198_v10 = vpop.eup %21197  ;;  %v17998_v32 = vadd.f32 1.0, %v21196_v36  ;;  %21213 = vtanh.f32 %v17953_v38  ;;  %v17924_v61 = vpop.permute.xlu0 %17923 }
0x1655   :  { %v17997_v52 = vadd.f32 1.0, %v21198_v10  ;;  %21215 = vtanh.f32 %v17956_v22  ;;  %v17958_v46 = vadd.f32 %v17924_v61, %v24859_v31  ;;  %v17922_v34 = vpop.permute.xlu1 %17921 }
0x1656   :  { %21217 = vrcp.f32 %v17998_v32  ;;  %v17957_v39 = vadd.f32 %v17922_v34, %v24862_v18 }
0x1657   :  { %v21200_v63 = vpop.eup %21199  ;;  %21219 = vrcp.f32 %v17997_v52  ;;  %v18714_v26 = vmul.f32 -1.442695, %v17958_v46 }
0x1658   :  { %v21202_v35 = vpop.eup %21201  ;;  %v18000_v40 = vadd.f32 1.0, %v21200_v63  ;;  %21221 = vtanh.f32 %v17955_v58  ;;  %v18713_v6 = vmul.f32 -1.442695, %v17957_v39  ;;  %v17928_v7 = vpop.permute.xlu0 %17927 }
0x1659   :  { %v21204_v51 = vpop.eup %21203  ;;  %21223 = vpow2.f32 %v18714_v26  ;;  %v17960_v54 = vadd.f32 %v17928_v7, %v24868_v57  ;;  %v17926_v30 = vpop.permute.xlu1 %17925 }
0x165a   :  { %v21206_v41 = vpop.eup %21205  ;;  %21225 = vrcp.f32 %v18000_v40  ;;  %v17959_v31 = vadd.f32 %v17926_v30, %v24871_v21  ;;  %v18074_v30 = vld [vmem:[%s25643_s12] sm:$0xff] }
0x165b   :  { %v21208_v13 = vpop.eup %21207  ;;  %v17999_v8 = vadd.f32 1.0, %v21206_v41  ;;  %21227 = vpow2.f32 %v18713_v6  ;;  %v18716_v18 = vmul.f32 -1.442695, %v17960_v54  ;;  %v18073_v54 = vld [vmem:[%s25642_s11] sm:$0xff] }
0x165c   :  { %v21210_v23 = vpop.eup %21209  ;;  %v18715_v49 = vmul.f32 -1.442695, %v17959_v31  ;;  %v18044_v4 = vpop.permute.xlu0 %18043  ;;  %v18058_v14 = vmul.f32 %v21208_v13, %v21202_v35 }
0x165d   :  { %v21212_v17 = vpop.eup %21211  ;;  %21229 = vrcp.f32 %v17999_v8  ;;  %v18042_v28 = vpop.permute.xlu1 %18041 }
0x165e   :  { %v21214_v20 = vpop.eup %21213  ;;  %21231 = vpow2.f32 %v18716_v18 }
0x165f   :  { %v21216_v12 = vpop.eup %21215  ;;  %21233 = vpow2.f32 %v18715_v49  ;;  %v18057_v21 = vmul.f32 %v21214_v20, %v21204_v51 }
0x1660   :  { %v21218_v33 = vpop.eup %21217  ;;  %v18048_v47 = vpop.permute.xlu0 %18047  ;;  %v18060_v27 = vmul.f32 %v21216_v12, %v21210_v23 }
0x1661   :  { %v21220_v57 = vpop.eup %21219  ;;  %v18054_v60 = vmul.f32 %v21218_v33, %v18044_v4  ;;  %v18046_v11 = vpop.permute.xlu1 %18045 }
0x1662   :  { %v21222_v50 = vpop.eup %21221  ;;  %v18053_v62 = vmul.f32 %v21220_v57, %v18042_v28 }
0x1663   :  { %v21224_v43 = vpop.eup %21223  ;;  %v18062_v19 = vadd.f32 %v18058_v14, %v18054_v60  ;;  %v18059_v56 = vmul.f32 %v21222_v50, %v21212_v17 }
0x1664   :  { %v21226_v48 = vpop.eup %21225  ;;  %v18026_v1 = vadd.f32 1.0, %v21224_v43  ;;  %v18061_v55 = vadd.f32 %v18057_v21, %v18053_v62 }
0x1665   :  { %v21228_v16 = vpop.eup %21227  ;;  %21235 = vtanh.f32 %v18062_v19  ;;  %v18056_v42 = vmul.f32 %v21226_v48, %v18048_v47 }
0x1666   :  { %21237 = vrcp.f32 %v18026_v1  ;;  %v18025_v5 = vadd.f32 1.0, %v21228_v16 }
0x1667   :  { %v21230_v9 = vpop.eup %21229  ;;  %21239 = vtanh.f32 %v18061_v55  ;;  %v18064_v29 = vadd.f32 %v18060_v27, %v18056_v42 }
0x1668   :  { %v21232_v0 = vpop.eup %21231  ;;  %21241 = vrcp.f32 %v18025_v5  ;;  %v18055_v44 = vmul.f32 %v21230_v9, %v18046_v11 }
0x1669   :  { %v21234_v25 = vpop.eup %21233  ;;  %v18028_v37 = vadd.f32 1.0, %v21232_v0  ;;  %21243 = vtanh.f32 %v18064_v29 }
0x166a   :  { %v18027_v3 = vadd.f32 1.0, %v21234_v25  ;;  %v18063_v15 = vadd.f32 %v18059_v56, %v18055_v44 }
0x166b   :  { %21245 = vrcp.f32 %v18028_v37 }
0x166c   :  { %21247 = vrcp.f32 %v18027_v3 }
0x166d   :  { %21249 = vtanh.f32 %v18063_v15 }
0x166f   :  { %v21236_v38 = vpop.eup %21235 }
0x1670   :  { %v21238_v53 = vpop.eup %21237 }
0x1671   :  { %v21240_v24 = vpop.eup %21239  ;;  %v18070_v22 = vmul.f32 %v21238_v53, %v21236_v38 }
0x1672   :  { %v21242_v45 = vpop.eup %21241 }
0x1673   :  { %v21244_v36 = vpop.eup %21243  ;;  %v18069_v10 = vmul.f32 %v21242_v45, %v21240_v24 }
0x1675   :  { %v21246_v32 = vpop.eup %21245  ;;  %v20729_v58 = vpack.i.bf16 %v18070_v22, %v18069_v10 }
0x1676   :  { %v21248_v61 = vpop.eup %21247  ;;  %v18072_v52 = vmul.f32 %v21246_v32, %v21244_v36 }
0x1677   :  { %v21250_v46 = vpop.eup %21249  ;;  %20730 = vrot.lane.b32.xlu1 %v20729_v58, %s21319_s30 }
0x1678   :  { %v18071_v34 = vmul.f32 %v21250_v46, %v21248_v61 }
0x167a   :  { %v20734_v39 = vpack.i.bf16 %v18072_v52, %v18071_v34 }
0x167c   :  { %20735 = vrot.lane.b32.xlu0 %v20734_v39, %s21319_s30 }
0x16e9   :  { %v20731_v63 = vpop.permute.xlu1 %20730 }
0x16ea   :  { %v20733_v26 = vunpack.i.h.bf16 %v20731_v63  ;;  %v20732_v35 = vunpack.i.l.bf16 %v20731_v63 }
0x16ec   :  { %v20105_v40 = vpack.c.bf16 %v20733_v26, %v20732_v35 }
0x16ee   :  { %v20736_v6 = vpop.permute.xlu0 %20735  ;;  %20106 = vmatpush3.bf16.msra.mxu1 %v20105_v40 }
0x16ef   :  { %v20738_v7 = vunpack.i.h.bf16 %v20736_v6  ;;  %v20737_v51 = vunpack.i.l.bf16 %v20736_v6  ;;  %20107 = vmatprep.subr.bf16.mxu1 %v21292_v59 }
0x16f1   :  { %v20108_v2 = vpack.c.bf16 %v20738_v7, %v20737_v51 }
0x16f3   :  { %20109 = vmatpush3.bf16.msra.mxu1 %v20108_v2 }
0x16f6   :  { %19713 = vmatmul.mubr.msk.f32.vlgmr.msra.gmra.mrb[138].mxu1 %vm15103_vm14, %v18073_v54 }
0x17c9   :  { %v18160_v41 = vpop.f32.mrb[138].mxu1 }
0x17ca   :  { %v18161_v31 = vadd.f32 %v18160_v41, %v18074_v30  ;;  %v19714_v13 = vpop.f32.mrb[139].mxu1 }
0x17cc   :  { %18165 = vst.msk [vmem:[%s25644_s13] sm:$0xff] %vm18164_vm0, %v18161_v31 }

</bundles_post_ra>
